<compile_context>
chip_gen: v6e
topology: v6e:2x2x1
jax: 0.10.0
libtpu: 0.0.40
codegen_flags: <defaults>
</compile_context>

<pallas_src>
from math import sqrt

import jax
import jax.numpy as jnp
from jax.experimental import pallas as pl
from jax.experimental.pallas import tpu as pltpu


def _lambeq_mean(size: int) -> float:
    """Normalisation factor from PytorchModel.initialise_weights()."""
    if size < 6:
        correction_factor = [float('nan'), 3, 2.6, 2, 1.6, 1.3][size]
    else:
        correction_factor = 1 / (0.16 * size - 0.04)
    return sqrt(size / 3 - 1 / (15 - correction_factor))


def _init_weight(key, shape, directed_cod: int):
    """(2 * rand(shape) - 1) / mean(directed_cod), deterministic via PRNGKey."""
    u = jax.random.uniform(key, shape, dtype=jnp.float32)
    return (2.0 * u - 1.0) / _lambeq_mean(directed_cod)


def _contract_kernel(v_ref, mats_ref, head_ref, o_ref):
    """Contract a group of G diagrams: out_g = v_g @ M_g0 @ ... @ M_g(K-1) @ H_g.

    v_ref   : (G, 1, D)    VMEM
    mats_ref: (G, K, D, D) VMEM
    head_ref: (G, D, C)    VMEM
    o_ref   : (G, 1, C)    VMEM
    """
    K = mats_ref.shape[1]
    in_dtype = mats_ref.dtype            # bf16 or f32 MXU operands

    acc = v_ref[...].astype(jnp.float32)                       # (G, 1, D)

    # Static (fully unrolled) chain over K; each step is a *batched* einsum
    # over the G independent diagrams so many small MXU matmuls can be in
    # flight simultaneously instead of one latency-bound serialized chain.
    for k in range(K):                                         # K is static
        m = mats_ref[:, k, :, :]                               # (G, D, D)
        acc = jnp.einsum('gid,gde->gie',
                         acc.astype(in_dtype), m,
                         preferred_element_type=jnp.float32)   # (G, 1, D)

    out = jnp.einsum('gid,gdc->gic',
                     acc.astype(in_dtype), head_ref[...],
                     preferred_element_type=jnp.float32)       # (G, 1, C)
    o_ref[...] = out.astype(o_ref.dtype)


def diagram_batch_contract(v, mats, head, *, group=64, use_bf16=False):
    """Pallas wrapper: contract B diagrams (G diagrams per grid step) and stack.

    v    : (B, 1, D) float32
    mats : (B, K, D, D) float32
    head : (B, D, C) float32
    returns (B, C) float32   (the torch.stack([...]) of per-diagram results)
    """
    B, _, D = v.shape
    K = mats.shape[1]
    C = head.shape[2]

    # Group size: amortise per-grid-step overhead; pad batch to a multiple.
    G = min(group, ((B + 7) // 8) * 8)
    Bp = ((B + G - 1) // G) * G
    if Bp != B:
        pad = Bp - B
        v = jnp.pad(v, ((0, pad), (0, 0), (0, 0)))
        mats = jnp.pad(mats, ((0, pad), (0, 0), (0, 0), (0, 0)))
        head = jnp.pad(head, ((0, pad), (0, 0), (0, 0)))

    if use_bf16:
        # Native bf16 MXU operands (v6e/v7x); accumulation stays f32 in-kernel.
        v = v.astype(jnp.bfloat16)
        mats = mats.astype(jnp.bfloat16)
        head = head.astype(jnp.bfloat16)

    itemsize = jnp.dtype(v.dtype).itemsize
    cost = pl.CostEstimate(
        flops=int(2 * Bp * (K * D * D + D * C)),
        transcendentals=0,
        bytes_accessed=int((v.size + mats.size + head.size) * itemsize
                           + Bp * C * 4),
    )

    out = pl.pallas_call(
        _contract_kernel,
        out_shape=jax.ShapeDtypeStruct((Bp, 1, C), jnp.float32),
        grid_spec=pltpu.PrefetchScalarGridSpec(
            num_scalar_prefetch=0,
            grid=(Bp // G,),
            in_specs=[
                pl.BlockSpec((G, 1, D), lambda b: (b, 0, 0)),
                pl.BlockSpec((G, K, D, D), lambda b: (b, 0, 0, 0)),
                pl.BlockSpec((G, D, C), lambda b: (b, 0, 0)),
            ],
            out_specs=pl.BlockSpec((G, 1, C), lambda b: (b, 0, 0)),
        ),
        compiler_params=pltpu.CompilerParams(
            dimension_semantics=("parallel",)),
        cost_estimate=cost,
    )(v, mats, head)

    return out.reshape(Bp, C)[:B]


if __name__ == "__main__":
    # Shapes consistent with a lambeq sentence-classification pipeline:
    # B diagrams, word-wire dimension D, chain length K, sentence dim C.
    B, K, D, C = 100, 3, 32, 2

    key = jax.random.PRNGKey(0)
    kv, km, kh = jax.random.split(key, 3)

    # Deterministic weight init mirroring PytorchModel.initialise_weights():
    # directed_cod of each word box is its output wire dim.
    v = _init_weight(kv, (B, 1, D), directed_cod=D)
    mats = _init_weight(km, (B, K, D, D), directed_cod=D)
    head = _init_weight(kh, (B, D, C), directed_cod=C)

    # Pure-JAX reference for the same contraction (correctness check).
    ref = v.astype(jnp.float32)
    for k in range(K):
        ref = jnp.einsum('bij,bjk->bik', ref, mats[:, k])
    ref = jnp.einsum('bij,bjk->bik', ref, head).reshape(B, C)

    # f32 path (bit-accurate against the f32 reference).
    result = diagram_batch_contract(v, mats, head)
    result = jax.block_until_ready(result)
    assert result.shape == (B, C)
    assert jnp.allclose(result, ref, atol=1e-4, rtol=1e-4)

    # bf16 MXU-operand path (v6e/v7x native) — looser tolerance.
    result_bf16 = diagram_batch_contract(v, mats, head, use_bf16=True)
    result_bf16 = jax.block_until_ready(result_bf16)
    assert jnp.allclose(result_bf16, ref, atol=5e-2, rtol=5e-2)

    print("KERNEL_OK")
</pallas_src>

<mosaic_0001>
module attributes {stable_mosaic.version = 11 : i64} {
  func.func @_contract_kernel(%arg0: i32, %arg1: memref<64x1x32xf32, #tpu.memory_space<vmem>>, %arg2: memref<64x3x32x32xf32, #tpu.memory_space<vmem>>, %arg3: memref<64x32x2xf32, #tpu.memory_space<vmem>>, %arg4: memref<64x1x2xf32, #tpu.memory_space<vmem>>) attributes {dimension_semantics = [#tpu.dimension_semantics<parallel>], iteration_bounds = array<i64: 2>, scalar_prefetch = 0 : i64, scratch_operands = 0 : i64, tpu.core_type = #tpu.core_type<tc>, window_params = [{transform_indices = @transform_0, window_bounds = array<i64: 64, 1, 32>}, {transform_indices = @transform_1, window_bounds = array<i64: 64, 3, 32, 32>}, {transform_indices = @transform_2, window_bounds = array<i64: 64, 32, 2>}, {transform_indices = @transform_3, window_bounds = array<i64: 64, 1, 2>}]} {
    %c0 = arith.constant 0 : index
    %c0_0 = arith.constant 0 : index
    %c0_1 = arith.constant 0 : index
    %0 = vector.load %arg1[%c0, %c0_0, %c0_1] : memref<64x1x32xf32, #tpu.memory_space<vmem>>, vector<64x1x32xf32>
    %c0_2 = arith.constant 0 : index
    %c0_3 = arith.constant 0 : index
    %c0_4 = arith.constant 0 : index
    %c0_5 = arith.constant 0 : index
    %1 = vector.load %arg2[%c0_2, %c0_3, %c0_4, %c0_5] : memref<64x3x32x32xf32, #tpu.memory_space<vmem>>, vector<64x1x32x32xf32>
    %2 = vector.shape_cast %1 : vector<64x1x32x32xf32> to vector<64x32x32xf32>
    "tpu.trace_start"() <{level = 10 : i32, message = "gid,gde->gie"}> : () -> ()
    %cst = arith.constant dense<0.000000e+00> : vector<64x1x32xf32>
    %3 = tpu.matmul %0, %2, %cst {dimension_numbers = #tpu.dot_dimension_numbers<[2], [1], [1], [2], [0, 0, 0, 1, 1, 2], [0], [0]>} : vector<64x1x32xf32>, vector<64x32x32xf32>, vector<64x1x32xf32> -> vector<64x1x32xf32>
    "tpu.trace_stop"() : () -> ()
    %c0_6 = arith.constant 0 : index
    %c1 = arith.constant 1 : index
    %c0_7 = arith.constant 0 : index
    %c0_8 = arith.constant 0 : index
    %4 = vector.load %arg2[%c0_6, %c1, %c0_7, %c0_8] : memref<64x3x32x32xf32, #tpu.memory_space<vmem>>, vector<64x1x32x32xf32>
    %5 = vector.shape_cast %4 : vector<64x1x32x32xf32> to vector<64x32x32xf32>
    "tpu.trace_start"() <{level = 10 : i32, message = "gid,gde->gie"}> : () -> ()
    %cst_9 = arith.constant dense<0.000000e+00> : vector<64x1x32xf32>
    %6 = tpu.matmul %3, %5, %cst_9 {dimension_numbers = #tpu.dot_dimension_numbers<[2], [1], [1], [2], [0, 0, 0, 1, 1, 2], [0], [0]>} : vector<64x1x32xf32>, vector<64x32x32xf32>, vector<64x1x32xf32> -> vector<64x1x32xf32>
    "tpu.trace_stop"() : () -> ()
    %c0_10 = arith.constant 0 : index
    %c2 = arith.constant 2 : index
    %c0_11 = arith.constant 0 : index
    %c0_12 = arith.constant 0 : index
    %7 = vector.load %arg2[%c0_10, %c2, %c0_11, %c0_12] : memref<64x3x32x32xf32, #tpu.memory_space<vmem>>, vector<64x1x32x32xf32>
    %8 = vector.shape_cast %7 : vector<64x1x32x32xf32> to vector<64x32x32xf32>
    "tpu.trace_start"() <{level = 10 : i32, message = "gid,gde->gie"}> : () -> ()
    %cst_13 = arith.constant dense<0.000000e+00> : vector<64x1x32xf32>
    %9 = tpu.matmul %6, %8, %cst_13 {dimension_numbers = #tpu.dot_dimension_numbers<[2], [1], [1], [2], [0, 0, 0, 1, 1, 2], [0], [0]>} : vector<64x1x32xf32>, vector<64x32x32xf32>, vector<64x1x32xf32> -> vector<64x1x32xf32>
    "tpu.trace_stop"() : () -> ()
    %c0_14 = arith.constant 0 : index
    %c0_15 = arith.constant 0 : index
    %c0_16 = arith.constant 0 : index
    %10 = vector.load %arg3[%c0_14, %c0_15, %c0_16] : memref<64x32x2xf32, #tpu.memory_space<vmem>>, vector<64x32x2xf32>
    "tpu.trace_start"() <{level = 10 : i32, message = "gid,gdc->gic"}> : () -> ()
    %cst_17 = arith.constant dense<0.000000e+00> : vector<64x1x2xf32>
    %11 = tpu.matmul %9, %10, %cst_17 {dimension_numbers = #tpu.dot_dimension_numbers<[2], [1], [1], [2], [0, 0, 0, 1, 1, 2], [0], [0]>} : vector<64x1x32xf32>, vector<64x32x2xf32>, vector<64x1x2xf32> -> vector<64x1x2xf32>
    "tpu.trace_stop"() : () -> ()
    %c0_18 = arith.constant 0 : index
    %c0_19 = arith.constant 0 : index
    %c0_20 = arith.constant 0 : index
    %12 = vector.load %arg4[%c0_18, %c0_19, %c0_20] : memref<64x1x2xf32, #tpu.memory_space<vmem>>, vector<64x1x2xf32>
    tpu.vector_store %arg4[%c0_18, %c0_19, %c0_20], %11 {strides = array<i32>} : memref<64x1x2xf32, #tpu.memory_space<vmem>>, vector<64x1x2xf32>,
    return
  }
  func.func @transform_0(%arg0: i32) -> (i32, i32, i32) {
    %c0_i32 = arith.constant 0 : i32
    %c0_i32_0 = arith.constant 0 : i32
    %c0_i32_1 = arith.constant 0 : i32
    return %arg0, %c0_i32, %c0_i32_0 : i32, i32, i32
  }
  func.func @transform_1(%arg0: i32) -> (i32, i32, i32, i32) {
    %c0_i32 = arith.constant 0 : i32
    %c0_i32_0 = arith.constant 0 : i32
    %c0_i32_1 = arith.constant 0 : i32
    %c0_i32_2 = arith.constant 0 : i32
    return %arg0, %c0_i32, %c0_i32_0, %c0_i32_1 : i32, i32, i32, i32
  }
  func.func @transform_2(%arg0: i32) -> (i32, i32, i32) {
    %c0_i32 = arith.constant 0 : i32
    %c0_i32_0 = arith.constant 0 : i32
    %c0_i32_1 = arith.constant 0 : i32
    return %arg0, %c0_i32, %c0_i32_0 : i32, i32, i32
  }
  func.func @transform_3(%arg0: i32) -> (i32, i32, i32) {
    %c0_i32 = arith.constant 0 : i32
    %c0_i32_0 = arith.constant 0 : i32
    %c0_i32_1 = arith.constant 0 : i32
    return %arg0, %c0_i32, %c0_i32_0 : i32, i32, i32
  }
}

</mosaic_0001>

<bundles_post_ra>
// kernel: tpu_custom_call.1
= control target key start
LH: loop header
LB: loop body
LE: loop exit
PB: predicated region body
PF: predicated region fallthrough
CT: control target
= control target key end

     0   :  { %s25054_s12 = smov 0   ;;  %s28675_s0 = inlined_call_operand.vmem [shape: f32[128,1,32], index: 0, kind: input, shape index: {}]   ;;  %s28676_s1 = inlined_call_operand.vmem [shape: f32[128,3,32,32], index: 1, kind: input, shape index: {}]   ;;  %s28677_s2 = inlined_call_operand.vmem [shape: f32[128,32,2], index: 2, kind: input, shape index: {}]   ;;  %s28678_s3 = inlined_call_operand.vmem [shape: f32[128,1,2], index: 3, kind: output, shape index: {}]  }
   0x1 LB: > { %s20134_s13 = sadd.s32 4294967295, %s25030_s12   ;;  %p20138_p0 = scmp.ge.s32.totalorder %s25030_s12, 1  ;;  %s25030_s12 = sphi %s25054_s12, %s13_s12  }
   0x2   : > { %p161_p1 = scmp.lt.s32.totalorder %s25030_s12, 3 }
   0x4   : > { %p162_p2 = pnand %p20138_p0, %p161_p1 }
   0x5   : > { %s20139_s14 = sshll.u32 (!%p162_p2), %s20134_s13, 6 }
   0x6   : > { %165 = sbr.rel (%p162_p2) target bundleno = 1489 (0x5d1), region = 32  ;;  %p196_p3 = scmp.lt.s32.totalorder (!%p162_p2), %s20139_s14, 127 }
   0xb   : > { %v25032_v0 = vmov 0.0   ;;  %vm25033_vm0 = vmmov 0   ;;  %s28680_s14 = smov (!%p196_p3, %s20139_s14), 127  ;;  %vm539_vm1 = vcmask 261120   ;;  %vm19998_vm2 = vcmask 8192  }
   0xc   : > { %22197 = vmatprep.subr.mxu0 %v25032_v0  ;;  %22208 = vmatprep.subr.mxu1 %v25032_v0  ;;  %s25013_s15 = smul.u32 96, %s28680_s14  ;;  %s25088_s21 = scalar_lea.vmem %s28675_s0, %s28680_s14 }
   0xd   : > { %22205 = vmatprep.mubr.msk.f32.mxu0 %vm25033_vm0, %v25032_v0  ;;  %22216 = vmatprep.mubr.msk.f32.mxu1 %vm25033_vm0, %v25032_v0  ;;  %v219_v9 = vld [vmem:[%s25088_s21] sm:$0x1]  ;;  %v220_v10 = vld [vmem:[%s25088_s21 + $0x1] sm:$0x1]  ;;  %v221_v19 = vld [vmem:[%s25088_s21 + $0x2] sm:$0x1]  ;;  %s28256_s28 = scalar_lea.vmem %s28678_s3, %s28680_s14 }
   0xe   : > { %s25074_s18 = scalar_lea.vmem %s28676_s1, %s25013_s15  ;;  %v222_v20 = vld [vmem:[%s25088_s21 + $0x3] sm:$0x1]  ;;  %v223_v29 = vld [vmem:[%s25088_s21 + $0x4] sm:$0x1]  ;;  %v224_v30 = vld [vmem:[%s25088_s21 + $0x5] sm:$0x1] }
   0xf   : > { %v286_v1 = vld [vmem:[%s25074_s18 + $0x18] sm:$0xff]  ;;  %v285_v3 = vld [vmem:[%s25074_s18 + $0x10] sm:$0xff]  ;;  %v284_v5 = vld [vmem:[%s25074_s18 + $0x8] sm:$0xff]  ;;  %s20916_s22 = sshll.u32 %s28680_s14, 5 }
  0x10   : > { %v290_v2 = vld [vmem:[%s25074_s18 + $0x78] sm:$0xff]  ;;  %22198 = vmatpush3.msra.mxu0 %v286_v1  ;;  %v289_v4 = vld [vmem:[%s25074_s18 + $0x70] sm:$0xff]  ;;  %v288_v6 = vld [vmem:[%s25074_s18 + $0x68] sm:$0xff]  ;;  %s27678_s25 = scalar_lea.vmem %s28677_s2, %s20916_s22 }
  0x11   : > { %22209 = vmatpush3.msra.mxu1 %v290_v2  ;;  %22199 = vmatprep.subr.mxu0 %v25032_v0  ;;  %v283_v7 = vld [vmem:[%s25074_s18] sm:$0xff]  ;;  %v294_v11 = vld [vmem:[%s25074_s18 + $0xd8] sm:$0xff]  ;;  %v293_v13 = vld [vmem:[%s25074_s18 + $0xd0] sm:$0xff] }
  0x12   : > { %22210 = vmatprep.subr.mxu1 %v25032_v0  ;;  %22200 = vmatpush3.msra.mxu0 %v285_v3  ;;  %v287_v8 = vld [vmem:[%s25074_s18 + $0x60] sm:$0xff]  ;;  %v298_v12 = vld [vmem:[%s25074_s18 + $0x138] sm:$0xff]  ;;  %v297_v14 = vld [vmem:[%s25074_s18 + $0x130] sm:$0xff] }
  0x13   : > { %22211 = vmatpush3.msra.mxu1 %v289_v4  ;;  %22201 = vmatprep.subr.mxu0 %v25032_v0  ;;  %v292_v15 = vld [vmem:[%s25074_s18 + $0xc8] sm:$0xff]  ;;  %v291_v17 = vld [vmem:[%s25074_s18 + $0xc0] sm:$0xff]  ;;  %v302_v21 = vld [vmem:[%s25074_s18 + $0x198] sm:$0xff] }
  0x14   : > { %22212 = vmatprep.subr.mxu1 %v25032_v0  ;;  %22202 = vmatpush3.msra.mxu0 %v284_v5  ;;  %v296_v16 = vld [vmem:[%s25074_s18 + $0x128] sm:$0xff]  ;;  %v295_v18 = vld [vmem:[%s25074_s18 + $0x120] sm:$0xff]  ;;  %v306_v22 = vld [vmem:[%s25074_s18 + $0x1f8] sm:$0xff] }
  0x15   : > { %22213 = vmatpush3.msra.mxu1 %v288_v6  ;;  %22203 = vmatprep.subr.mxu0 %v25032_v0  ;;  %v301_v23 = vld [vmem:[%s25074_s18 + $0x190] sm:$0xff]  ;;  %v300_v25 = vld [vmem:[%s25074_s18 + $0x188] sm:$0xff]  ;;  %v299_v27 = vld [vmem:[%s25074_s18 + $0x180] sm:$0xff] }
  0x16   : > { %22214 = vmatprep.subr.mxu1 %v25032_v0  ;;  %22204 = vmatpush3.msra.mxu0 %v283_v7  ;;  %v305_v24 = vld [vmem:[%s25074_s18 + $0x1f0] sm:$0xff]  ;;  %v304_v26 = vld [vmem:[%s25074_s18 + $0x1e8] sm:$0xff]  ;;  %v303_v28 = vld [vmem:[%s25074_s18 + $0x1e0] sm:$0xff] }
  0x17   : > { %22215 = vmatpush3.msra.mxu1 %v287_v8  ;;  %22206 = vmatmul.mubr.msk.f32.vlgmr.msra.gmra.mxu0 %vm539_vm1, %v219_v9  ;;  %v310_v31 = vld [vmem:[%s25074_s18 + $0x258] sm:$0xff]  ;;  %v309_v33 = vld [vmem:[%s25074_s18 + $0x250] sm:$0xff]  ;;  %v308_v35 = vld [vmem:[%s25074_s18 + $0x248] sm:$0xff] }
  0x18   : > { %22217 = vmatmul.mubr.msk.f32.vlgmr.msra.gmra.mxu1 %vm539_vm1, %v220_v10  ;;  %22219 = vmatprep.subr.mxu0 %v25032_v0  ;;  %v314_v32 = vld [vmem:[%s25074_s18 + $0x2b8] sm:$0xff]  ;;  %v313_v34 = vld [vmem:[%s25074_s18 + $0x2b0] sm:$0xff]  ;;  %v312_v36 = vld [vmem:[%s25074_s18 + $0x2a8] sm:$0xff] }
  0x19   : > { %22230 = vmatprep.subr.mxu1 %v25032_v0  ;;  %22220 = vmatpush3.msra.mxu0 %v294_v11  ;;  %v307_v37 = vld [vmem:[%s25074_s18 + $0x240] sm:$0xff]  ;;  %v318_v41 = vld [vmem:[%s25074_s18 + $0x318] sm:$0xff]  ;;  %v317_v43 = vld [vmem:[%s25074_s18 + $0x310] sm:$0xff] }
  0x1a   : > { %22231 = vmatpush3.msra.mxu1 %v298_v12  ;;  %22221 = vmatprep.subr.mxu0 %v25032_v0  ;;  %v311_v38 = vld [vmem:[%s25074_s18 + $0x2a0] sm:$0xff]  ;;  %v322_v42 = vld [vmem:[%s25074_s18 + $0x378] sm:$0xff]  ;;  %v321_v44 = vld [vmem:[%s25074_s18 + $0x370] sm:$0xff] }
  0x1b   : > { %22232 = vmatprep.subr.mxu1 %v25032_v0  ;;  %22222 = vmatpush3.msra.mxu0 %v293_v13  ;;  %v225_v39 = vld [vmem:[%s25088_s21 + $0x6] sm:$0x1]  ;;  %v226_v40 = vld [vmem:[%s25088_s21 + $0x7] sm:$0x1]  ;;  %v316_v45 = vld [vmem:[%s25074_s18 + $0x308] sm:$0xff] }
  0x1c   : > { %22233 = vmatpush3.msra.mxu1 %v297_v14  ;;  %22223 = vmatprep.subr.mxu0 %v25032_v0  ;;  %v320_v46 = vld [vmem:[%s25074_s18 + $0x368] sm:$0xff]  ;;  %v315_v47 = vld [vmem:[%s25074_s18 + $0x300] sm:$0xff]  ;;  %v326_v51 = vld [vmem:[%s25074_s18 + $0x3d8] sm:$0xff] }
  0x1d   : > { %22234 = vmatprep.subr.mxu1 %v25032_v0  ;;  %22224 = vmatpush3.msra.mxu0 %v292_v15  ;;  %v319_v48 = vld [vmem:[%s25074_s18 + $0x360] sm:$0xff]  ;;  %v227_v49 = vld [vmem:[%s25088_s21 + $0x8] sm:$0x1]  ;;  %v228_v50 = vld [vmem:[%s25088_s21 + $0x9] sm:$0x1] }
  0x1e   : > { %22235 = vmatpush3.msra.mxu1 %v296_v16  ;;  %22225 = vmatprep.subr.mxu0 %v25032_v0  ;;  %v330_v52 = vld [vmem:[%s25074_s18 + $0x438] sm:$0xff]  ;;  %v325_v53 = vld [vmem:[%s25074_s18 + $0x3d0] sm:$0xff]  ;;  %v324_v55 = vld [vmem:[%s25074_s18 + $0x3c8] sm:$0xff] }
  0x1f   : > { %22236 = vmatprep.subr.mxu1 %v25032_v0  ;;  %22226 = vmatpush3.msra.mxu0 %v291_v17  ;;  %v329_v54 = vld [vmem:[%s25074_s18 + $0x430] sm:$0xff]  ;;  %v328_v56 = vld [vmem:[%s25074_s18 + $0x428] sm:$0xff]  ;;  %v323_v57 = vld [vmem:[%s25074_s18 + $0x3c0] sm:$0xff] }
  0x20   : > { %22227 = vmatprep.mubr.msk.f32.mxu0 %vm25033_vm0, %v25032_v0  ;;  %22237 = vmatpush3.msra.mxu1 %v295_v18  ;;  %v327_v58 = vld [vmem:[%s25074_s18 + $0x420] sm:$0xff]  ;;  %v229_v59 = vld [vmem:[%s25088_s21 + $0xa] sm:$0x1]  ;;  %v230_v60 = vld [vmem:[%s25088_s21 + $0xb] sm:$0x1] }
  0x21   : > { %22238 = vmatprep.mubr.msk.f32.mxu1 %vm25033_vm0, %v25032_v0  ;;  %22228 = vmatmul.mubr.msk.f32.vlgmr.msra.gmra.mxu0 %vm539_vm1, %v221_v19  ;;  %v334_v61 = vld [vmem:[%s25074_s18 + $0x498] sm:$0xff]  ;;  %v333_v63 = vld [vmem:[%s25074_s18 + $0x490] sm:$0xff]  ;;  %v332_v2 = vld [vmem:[%s25074_s18 + $0x488] sm:$0xff] }
  0x22   : > { %22239 = vmatmul.mubr.msk.f32.vlgmr.msra.gmra.mxu1 %vm539_vm1, %v222_v20  ;;  %22241 = vmatprep.subr.mxu0 %v25032_v0  ;;  %v338_v62 = vld [vmem:[%s25074_s18 + $0x4f8] sm:$0xff]  ;;  %v337_v1 = vld [vmem:[%s25074_s18 + $0x4f0] sm:$0xff]  ;;  %v336_v3 = vld [vmem:[%s25074_s18 + $0x4e8] sm:$0xff] }
  0x23   : > { %22252 = vmatprep.subr.mxu1 %v25032_v0  ;;  %22242 = vmatpush3.msra.mxu0 %v302_v21  ;;  %v331_v4 = vld [vmem:[%s25074_s18 + $0x480] sm:$0xff]  ;;  %v231_v6 = vld [vmem:[%s25088_s21 + $0xc] sm:$0x1]  ;;  %v232_v7 = vld [vmem:[%s25088_s21 + $0xd] sm:$0x1] }
  0x24   : > { %22253 = vmatpush3.msra.mxu1 %v306_v22  ;;  %22243 = vmatprep.subr.mxu0 %v25032_v0  ;;  %v335_v5 = vld [vmem:[%s25074_s18 + $0x4e0] sm:$0xff]  ;;  %v342_v8 = vld [vmem:[%s25074_s18 + $0x558] sm:$0xff]  ;;  %v341_v10 = vld [vmem:[%s25074_s18 + $0x550] sm:$0xff] }
  0x25   : > { %22254 = vmatprep.subr.mxu1 %v25032_v0  ;;  %22244 = vmatpush3.msra.mxu0 %v301_v23  ;;  %v346_v9 = vld [vmem:[%s25074_s18 + $0x5b8] sm:$0xff]  ;;  %v345_v11 = vld [vmem:[%s25074_s18 + $0x5b0] sm:$0xff]  ;;  %v340_v12 = vld [vmem:[%s25074_s18 + $0x548] sm:$0xff] }
  0x26   : > { %22255 = vmatpush3.msra.mxu1 %v305_v24  ;;  %22245 = vmatprep.subr.mxu0 %v25032_v0  ;;  %v344_v13 = vld [vmem:[%s25074_s18 + $0x5a8] sm:$0xff]  ;;  %v339_v14 = vld [vmem:[%s25074_s18 + $0x540] sm:$0xff]  ;;  %v350_v18 = vld [vmem:[%s25074_s18 + $0x618] sm:$0xff] }
  0x27   : > { %22256 = vmatprep.subr.mxu1 %v25032_v0  ;;  %22246 = vmatpush3.msra.mxu0 %v300_v25  ;;  %v343_v15 = vld [vmem:[%s25074_s18 + $0x5a0] sm:$0xff]  ;;  %v233_v16 = vld [vmem:[%s25088_s21 + $0xe] sm:$0x1]  ;;  %v234_v17 = vld [vmem:[%s25088_s21 + $0xf] sm:$0x1] }
  0x28   : > { %22257 = vmatpush3.msra.mxu1 %v304_v26  ;;  %22247 = vmatprep.subr.mxu0 %v25032_v0  ;;  %v354_v19 = vld [vmem:[%s25074_s18 + $0x678] sm:$0xff]  ;;  %v349_v20 = vld [vmem:[%s25074_s18 + $0x610] sm:$0xff]  ;;  %v348_v22 = vld [vmem:[%s25074_s18 + $0x608] sm:$0xff] }
  0x29   : > { %22258 = vmatprep.subr.mxu1 %v25032_v0  ;;  %22248 = vmatpush3.msra.mxu0 %v299_v27  ;;  %v353_v21 = vld [vmem:[%s25074_s18 + $0x670] sm:$0xff]  ;;  %v352_v23 = vld [vmem:[%s25074_s18 + $0x668] sm:$0xff]  ;;  %v347_v24 = vld [vmem:[%s25074_s18 + $0x600] sm:$0xff] }
  0x2a   : > { %22249 = vmatprep.mubr.msk.f32.mxu0 %vm25033_vm0, %v25032_v0  ;;  %22259 = vmatpush3.msra.mxu1 %v303_v28  ;;  %v351_v25 = vld [vmem:[%s25074_s18 + $0x660] sm:$0xff]  ;;  %v235_v26 = vld [vmem:[%s25088_s21 + $0x10] sm:$0x1]  ;;  %v236_v27 = vld [vmem:[%s25088_s21 + $0x11] sm:$0x1] }
  0x2b   : > { %22260 = vmatprep.mubr.msk.f32.mxu1 %vm25033_vm0, %v25032_v0  ;;  %22250 = vmatmul.mubr.msk.f32.vlgmr.msra.gmra.mxu0 %vm539_vm1, %v223_v29  ;;  %v358_v28 = vld [vmem:[%s25074_s18 + $0x6d8] sm:$0xff] }
  0x2c   : > { %22261 = vmatmul.mubr.msk.f32.vlgmr.msra.gmra.mxu1 %vm539_vm1, %v224_v30  ;;  %22263 = vmatprep.subr.mxu0 %v25032_v0  ;;  %v362_v29 = vld [vmem:[%s25074_s18 + $0x738] sm:$0xff]  ;;  %v357_v30 = vld [vmem:[%s25074_s18 + $0x6d0] sm:$0xff] }
  0x2d   : > { %22274 = vmatprep.subr.mxu1 %v25032_v0  ;;  %22264 = vmatpush3.msra.mxu0 %v310_v31  ;;  %v361_v31 = vld [vmem:[%s25074_s18 + $0x730] sm:$0xff] }
  0x2e   : > { %22275 = vmatpush3.msra.mxu1 %v314_v32  ;;  %22265 = vmatprep.subr.mxu0 %v25032_v0  ;;  %v356_v32 = vld [vmem:[%s25074_s18 + $0x6c8] sm:$0xff] }
  0x2f   : > { %22276 = vmatprep.subr.mxu1 %v25032_v0  ;;  %22266 = vmatpush3.msra.mxu0 %v309_v33  ;;  %v360_v33 = vld [vmem:[%s25074_s18 + $0x728] sm:$0xff] }
  0x30   : > { %22277 = vmatpush3.msra.mxu1 %v313_v34  ;;  %22267 = vmatprep.subr.mxu0 %v25032_v0  ;;  %v355_v34 = vld [vmem:[%s25074_s18 + $0x6c0] sm:$0xff] }
  0x31   : > { %22278 = vmatprep.subr.mxu1 %v25032_v0  ;;  %22268 = vmatpush3.msra.mxu0 %v308_v35  ;;  %v359_v35 = vld [vmem:[%s25074_s18 + $0x720] sm:$0xff] }
  0x32   : > { %22279 = vmatpush3.msra.mxu1 %v312_v36  ;;  %22269 = vmatprep.subr.mxu0 %v25032_v0  ;;  %v237_v36 = vld [vmem:[%s25088_s21 + $0x12] sm:$0x1] }
  0x33   : > { %22280 = vmatprep.subr.mxu1 %v25032_v0  ;;  %22270 = vmatpush3.msra.mxu0 %v307_v37  ;;  %v238_v37 = vld [vmem:[%s25088_s21 + $0x13] sm:$0x1] }
  0x34   : > { %22271 = vmatprep.mubr.msk.f32.mxu0 %vm25033_vm0, %v25032_v0  ;;  %22281 = vmatpush3.msra.mxu1 %v311_v38  ;;  %v366_v38 = vld [vmem:[%s25074_s18 + $0x798] sm:$0xff] }
  0x35   : > { %22282 = vmatprep.mubr.msk.f32.mxu1 %vm25033_vm0, %v25032_v0  ;;  %22272 = vmatmul.mubr.msk.f32.vlgmr.msra.gmra.mxu0 %vm539_vm1, %v225_v39  ;;  %v370_v39 = vld [vmem:[%s25074_s18 + $0x7f8] sm:$0xff] }
  0x36   : > { %22283 = vmatmul.mubr.msk.f32.vlgmr.msra.gmra.mxu1 %vm539_vm1, %v226_v40  ;;  %22285 = vmatprep.subr.mxu0 %v25032_v0  ;;  %v365_v40 = vld [vmem:[%s25074_s18 + $0x790] sm:$0xff] }
  0x37   : > { %22296 = vmatprep.subr.mxu1 %v25032_v0  ;;  %22286 = vmatpush3.msra.mxu0 %v318_v41  ;;  %v369_v41 = vld [vmem:[%s25074_s18 + $0x7f0] sm:$0xff] }
  0x38   : > { %22297 = vmatpush3.msra.mxu1 %v322_v42  ;;  %22287 = vmatprep.subr.mxu0 %v25032_v0  ;;  %v364_v42 = vld [vmem:[%s25074_s18 + $0x788] sm:$0xff] }
  0x39   : > { %22298 = vmatprep.subr.mxu1 %v25032_v0  ;;  %22288 = vmatpush3.msra.mxu0 %v317_v43  ;;  %v368_v43 = vld [vmem:[%s25074_s18 + $0x7e8] sm:$0xff] }
  0x3a   : > { %22299 = vmatpush3.msra.mxu1 %v321_v44  ;;  %22289 = vmatprep.subr.mxu0 %v25032_v0  ;;  %v363_v44 = vld [vmem:[%s25074_s18 + $0x780] sm:$0xff] }
  0x3b   : > { %22300 = vmatprep.subr.mxu1 %v25032_v0  ;;  %22290 = vmatpush3.msra.mxu0 %v316_v45  ;;  %v367_v45 = vld [vmem:[%s25074_s18 + $0x7e0] sm:$0xff] }
  0x3c   : > { %22301 = vmatpush3.msra.mxu1 %v320_v46  ;;  %22291 = vmatprep.subr.mxu0 %v25032_v0  ;;  %v239_v46 = vld [vmem:[%s25088_s21 + $0x14] sm:$0x1] }
  0x3d   : > { %22302 = vmatprep.subr.mxu1 %v25032_v0  ;;  %22292 = vmatpush3.msra.mxu0 %v315_v47  ;;  %v240_v47 = vld [vmem:[%s25088_s21 + $0x15] sm:$0x1] }
  0x3e   : > { %22293 = vmatprep.mubr.msk.f32.mxu0 %vm25033_vm0, %v25032_v0  ;;  %22303 = vmatpush3.msra.mxu1 %v319_v48  ;;  %v374_v48 = vld [vmem:[%s25074_s18 + $0x858] sm:$0xff] }
  0x3f   : > { %22304 = vmatprep.mubr.msk.f32.mxu1 %vm25033_vm0, %v25032_v0  ;;  %22294 = vmatmul.mubr.msk.f32.vlgmr.msra.gmra.mxu0 %vm539_vm1, %v227_v49  ;;  %v378_v49 = vld [vmem:[%s25074_s18 + $0x8b8] sm:$0xff] }
  0x40   : > { %22305 = vmatmul.mubr.msk.f32.vlgmr.msra.gmra.mxu1 %vm539_vm1, %v228_v50  ;;  %22307 = vmatprep.subr.mxu0 %v25032_v0  ;;  %v373_v50 = vld [vmem:[%s25074_s18 + $0x850] sm:$0xff] }
  0x41   : > { %22318 = vmatprep.subr.mxu1 %v25032_v0  ;;  %22308 = vmatpush3.msra.mxu0 %v326_v51  ;;  %v377_v51 = vld [vmem:[%s25074_s18 + $0x8b0] sm:$0xff] }
  0x42   : > { %22319 = vmatpush3.msra.mxu1 %v330_v52  ;;  %22309 = vmatprep.subr.mxu0 %v25032_v0  ;;  %v372_v52 = vld [vmem:[%s25074_s18 + $0x848] sm:$0xff] }
  0x43   : > { %22320 = vmatprep.subr.mxu1 %v25032_v0  ;;  %22310 = vmatpush3.msra.mxu0 %v325_v53  ;;  %v376_v53 = vld [vmem:[%s25074_s18 + $0x8a8] sm:$0xff] }
  0x44   : > { %22321 = vmatpush3.msra.mxu1 %v329_v54  ;;  %22311 = vmatprep.subr.mxu0 %v25032_v0  ;;  %v371_v54 = vld [vmem:[%s25074_s18 + $0x840] sm:$0xff] }
  0x45   : > { %22322 = vmatprep.subr.mxu1 %v25032_v0  ;;  %22312 = vmatpush3.msra.mxu0 %v324_v55  ;;  %v375_v55 = vld [vmem:[%s25074_s18 + $0x8a0] sm:$0xff] }
  0x46   : > { %22323 = vmatpush3.msra.mxu1 %v328_v56  ;;  %22313 = vmatprep.subr.mxu0 %v25032_v0  ;;  %v241_v56 = vld [vmem:[%s25088_s21 + $0x16] sm:$0x1] }
  0x47   : > { %22324 = vmatprep.subr.mxu1 %v25032_v0  ;;  %22314 = vmatpush3.msra.mxu0 %v323_v57  ;;  %v242_v57 = vld [vmem:[%s25088_s21 + $0x17] sm:$0x1] }
  0x48   : > { %22315 = vmatprep.mubr.msk.f32.mxu0 %vm25033_vm0, %v25032_v0  ;;  %22325 = vmatpush3.msra.mxu1 %v327_v58  ;;  %v382_v58 = vld [vmem:[%s25074_s18 + $0x918] sm:$0xff] }
  0x49   : > { %22326 = vmatprep.mubr.msk.f32.mxu1 %vm25033_vm0, %v25032_v0  ;;  %22316 = vmatmul.mubr.msk.f32.vlgmr.msra.gmra.mxu0 %vm539_vm1, %v229_v59  ;;  %v386_v59 = vld [vmem:[%s25074_s18 + $0x978] sm:$0xff] }
  0x4a   : > { %22327 = vmatmul.mubr.msk.f32.vlgmr.msra.gmra.mxu1 %vm539_vm1, %v230_v60  ;;  %22329 = vmatprep.subr.mxu0 %v25032_v0  ;;  %v381_v60 = vld [vmem:[%s25074_s18 + $0x910] sm:$0xff] }
  0x4b   : > { %22340 = vmatprep.subr.mxu1 %v25032_v0  ;;  %22330 = vmatpush3.msra.mxu0 %v334_v61  ;;  %v385_v61 = vld [vmem:[%s25074_s18 + $0x970] sm:$0xff] }
  0x4c   : > { %22341 = vmatpush3.msra.mxu1 %v338_v62  ;;  %22331 = vmatprep.subr.mxu0 %v25032_v0  ;;  %v380_v62 = vld [vmem:[%s25074_s18 + $0x908] sm:$0xff] }
  0x4d   : > { %22342 = vmatprep.subr.mxu1 %v25032_v0  ;;  %22332 = vmatpush3.msra.mxu0 %v333_v63  ;;  %v384_v63 = vld [vmem:[%s25074_s18 + $0x968] sm:$0xff] }
  0x4e   : > { %22343 = vmatpush3.msra.mxu1 %v337_v1  ;;  %22333 = vmatprep.subr.mxu0 %v25032_v0  ;;  %v379_v1 = vld [vmem:[%s25074_s18 + $0x900] sm:$0xff] }
  0x4f   : > { %22344 = vmatprep.subr.mxu1 %v25032_v0  ;;  %22334 = vmatpush3.msra.mxu0 %v332_v2  ;;  %v383_v2 = vld [vmem:[%s25074_s18 + $0x960] sm:$0xff] }
  0x50   : > { %22345 = vmatpush3.msra.mxu1 %v336_v3  ;;  %22335 = vmatprep.subr.mxu0 %v25032_v0  ;;  %v243_v3 = vld [vmem:[%s25088_s21 + $0x18] sm:$0x1] }
  0x51   : > { %22346 = vmatprep.subr.mxu1 %v25032_v0  ;;  %22336 = vmatpush3.msra.mxu0 %v331_v4  ;;  %v244_v4 = vld [vmem:[%s25088_s21 + $0x19] sm:$0x1] }
  0x52   : > { %22337 = vmatprep.mubr.msk.f32.mxu0 %vm25033_vm0, %v25032_v0  ;;  %22347 = vmatpush3.msra.mxu1 %v335_v5  ;;  %v390_v5 = vld [vmem:[%s25074_s18 + $0x9d8] sm:$0xff] }
  0x53   : > { %22348 = vmatprep.mubr.msk.f32.mxu1 %vm25033_vm0, %v25032_v0  ;;  %22338 = vmatmul.mubr.msk.f32.vlgmr.msra.gmra.mxu0 %vm539_vm1, %v231_v6  ;;  %v394_v6 = vld [vmem:[%s25074_s18 + $0xa38] sm:$0xff] }
  0x54   : > { %22349 = vmatmul.mubr.msk.f32.vlgmr.msra.gmra.mxu1 %vm539_vm1, %v232_v7  ;;  %22351 = vmatprep.subr.mxu0 %v25032_v0  ;;  %v389_v7 = vld [vmem:[%s25074_s18 + $0x9d0] sm:$0xff] }
  0x55   : > { %22362 = vmatprep.subr.mxu1 %v25032_v0  ;;  %22352 = vmatpush3.msra.mxu0 %v342_v8  ;;  %v393_v8 = vld [vmem:[%s25074_s18 + $0xa30] sm:$0xff] }
  0x56   : > { %22363 = vmatpush3.msra.mxu1 %v346_v9  ;;  %22353 = vmatprep.subr.mxu0 %v25032_v0  ;;  %v388_v9 = vld [vmem:[%s25074_s18 + $0x9c8] sm:$0xff] }
  0x57   : > { %22364 = vmatprep.subr.mxu1 %v25032_v0  ;;  %22354 = vmatpush3.msra.mxu0 %v341_v10  ;;  %v392_v10 = vld [vmem:[%s25074_s18 + $0xa28] sm:$0xff] }
  0x58   : > { %22365 = vmatpush3.msra.mxu1 %v345_v11  ;;  %22355 = vmatprep.subr.mxu0 %v25032_v0  ;;  %v387_v11 = vld [vmem:[%s25074_s18 + $0x9c0] sm:$0xff] }
  0x59   : > { %22366 = vmatprep.subr.mxu1 %v25032_v0  ;;  %22356 = vmatpush3.msra.mxu0 %v340_v12  ;;  %v391_v12 = vld [vmem:[%s25074_s18 + $0xa20] sm:$0xff] }
  0x5a   : > { %22367 = vmatpush3.msra.mxu1 %v344_v13  ;;  %22357 = vmatprep.subr.mxu0 %v25032_v0  ;;  %v245_v13 = vld [vmem:[%s25088_s21 + $0x1a] sm:$0x1] }
  0x5b   : > { %22368 = vmatprep.subr.mxu1 %v25032_v0  ;;  %22358 = vmatpush3.msra.mxu0 %v339_v14  ;;  %v246_v14 = vld [vmem:[%s25088_s21 + $0x1b] sm:$0x1] }
  0x5c   : > { %22359 = vmatprep.mubr.msk.f32.mxu0 %vm25033_vm0, %v25032_v0  ;;  %22369 = vmatpush3.msra.mxu1 %v343_v15  ;;  %v398_v15 = vld [vmem:[%s25074_s18 + $0xa98] sm:$0xff] }
  0x5d   : > { %22370 = vmatprep.mubr.msk.f32.mxu1 %vm25033_vm0, %v25032_v0  ;;  %22360 = vmatmul.mubr.msk.f32.vlgmr.msra.gmra.mxu0 %vm539_vm1, %v233_v16  ;;  %v402_v16 = vld [vmem:[%s25074_s18 + $0xaf8] sm:$0xff] }
  0x5e   : > { %22371 = vmatmul.mubr.msk.f32.vlgmr.msra.gmra.mxu1 %vm539_vm1, %v234_v17  ;;  %22373 = vmatprep.subr.mxu0 %v25032_v0  ;;  %v397_v17 = vld [vmem:[%s25074_s18 + $0xa90] sm:$0xff] }
  0x5f   : > { %22384 = vmatprep.subr.mxu1 %v25032_v0  ;;  %22374 = vmatpush3.msra.mxu0 %v350_v18  ;;  %v401_v18 = vld [vmem:[%s25074_s18 + $0xaf0] sm:$0xff] }
  0x60   : > { %22385 = vmatpush3.msra.mxu1 %v354_v19  ;;  %22375 = vmatprep.subr.mxu0 %v25032_v0  ;;  %v396_v19 = vld [vmem:[%s25074_s18 + $0xa88] sm:$0xff] }
  0x61   : > { %22386 = vmatprep.subr.mxu1 %v25032_v0  ;;  %22376 = vmatpush3.msra.mxu0 %v349_v20  ;;  %v400_v20 = vld [vmem:[%s25074_s18 + $0xae8] sm:$0xff] }
  0x62   : > { %22387 = vmatpush3.msra.mxu1 %v353_v21  ;;  %22377 = vmatprep.subr.mxu0 %v25032_v0  ;;  %v395_v21 = vld [vmem:[%s25074_s18 + $0xa80] sm:$0xff] }
  0x63   : > { %22388 = vmatprep.subr.mxu1 %v25032_v0  ;;  %22378 = vmatpush3.msra.mxu0 %v348_v22  ;;  %v399_v22 = vld [vmem:[%s25074_s18 + $0xae0] sm:$0xff] }
  0x64   : > { %22389 = vmatpush3.msra.mxu1 %v352_v23  ;;  %22379 = vmatprep.subr.mxu0 %v25032_v0  ;;  %v247_v23 = vld [vmem:[%s25088_s21 + $0x1c] sm:$0x1] }
  0x65   : > { %22390 = vmatprep.subr.mxu1 %v25032_v0  ;;  %22380 = vmatpush3.msra.mxu0 %v347_v24  ;;  %v248_v24 = vld [vmem:[%s25088_s21 + $0x1d] sm:$0x1] }
  0x66   : > { %22381 = vmatprep.mubr.msk.f32.mxu0 %vm25033_vm0, %v25032_v0  ;;  %22391 = vmatpush3.msra.mxu1 %v351_v25  ;;  %v406_v25 = vld [vmem:[%s25074_s18 + $0xb58] sm:$0xff] }
  0x67   : > { %22392 = vmatprep.mubr.msk.f32.mxu1 %vm25033_vm0, %v25032_v0  ;;  %22382 = vmatmul.mubr.msk.f32.vlgmr.msra.gmra.mxu0 %vm539_vm1, %v235_v26  ;;  %v410_v26 = vld [vmem:[%s25074_s18 + $0xbb8] sm:$0xff] }
  0x68   : > { %22393 = vmatmul.mubr.msk.f32.vlgmr.msra.gmra.mxu1 %vm539_vm1, %v236_v27  ;;  %22395 = vmatprep.subr.mxu0 %v25032_v0  ;;  %v405_v27 = vld [vmem:[%s25074_s18 + $0xb50] sm:$0xff] }
  0x69   : > { %22406 = vmatprep.subr.mxu1 %v25032_v0  ;;  %22396 = vmatpush3.msra.mxu0 %v358_v28  ;;  %v409_v28 = vld [vmem:[%s25074_s18 + $0xbb0] sm:$0xff] }
  0x6a   : > { %22407 = vmatpush3.msra.mxu1 %v362_v29  ;;  %22397 = vmatprep.subr.mxu0 %v25032_v0  ;;  %v404_v29 = vld [vmem:[%s25074_s18 + $0xb48] sm:$0xff] }
  0x6b   : > { %22408 = vmatprep.subr.mxu1 %v25032_v0  ;;  %22398 = vmatpush3.msra.mxu0 %v357_v30  ;;  %v408_v30 = vld [vmem:[%s25074_s18 + $0xba8] sm:$0xff] }
  0x6c   : > { %22409 = vmatpush3.msra.mxu1 %v361_v31  ;;  %22399 = vmatprep.subr.mxu0 %v25032_v0  ;;  %v403_v31 = vld [vmem:[%s25074_s18 + $0xb40] sm:$0xff] }
  0x6d   : > { %22410 = vmatprep.subr.mxu1 %v25032_v0  ;;  %22400 = vmatpush3.msra.mxu0 %v356_v32  ;;  %v407_v32 = vld [vmem:[%s25074_s18 + $0xba0] sm:$0xff] }
  0x6e   : > { %22411 = vmatpush3.msra.mxu1 %v360_v33  ;;  %22401 = vmatprep.subr.mxu0 %v25032_v0  ;;  %v249_v33 = vld [vmem:[%s25088_s21 + $0x1e] sm:$0x1] }
  0x6f   : > { %22412 = vmatprep.subr.mxu1 %v25032_v0  ;;  %22402 = vmatpush3.msra.mxu0 %v355_v34  ;;  %v250_v34 = vld [vmem:[%s25088_s21 + $0x1f] sm:$0x1] }
  0x70   : > { %22403 = vmatprep.mubr.msk.f32.mxu0 %vm25033_vm0, %v25032_v0  ;;  %22413 = vmatpush3.msra.mxu1 %v359_v35  ;;  %v414_v35 = vld [vmem:[%s25074_s18 + $0xc18] sm:$0xff] }
  0x71   : > { %22414 = vmatprep.mubr.msk.f32.mxu1 %vm25033_vm0, %v25032_v0  ;;  %22404 = vmatmul.mubr.msk.f32.vlgmr.msra.gmra.mxu0 %vm539_vm1, %v237_v36  ;;  %v418_v36 = vld [vmem:[%s25074_s18 + $0xc78] sm:$0xff] }
  0x72   : > { %22415 = vmatmul.mubr.msk.f32.vlgmr.msra.gmra.mxu1 %vm539_vm1, %v238_v37  ;;  %22417 = vmatprep.subr.mxu0 %v25032_v0  ;;  %v413_v37 = vld [vmem:[%s25074_s18 + $0xc10] sm:$0xff] }
  0x73   : > { %22428 = vmatprep.subr.mxu1 %v25032_v0  ;;  %22418 = vmatpush3.msra.mxu0 %v366_v38  ;;  %v417_v38 = vld [vmem:[%s25074_s18 + $0xc70] sm:$0xff] }
  0x74   : > { %22429 = vmatpush3.msra.mxu1 %v370_v39  ;;  %22419 = vmatprep.subr.mxu0 %v25032_v0  ;;  %v412_v39 = vld [vmem:[%s25074_s18 + $0xc08] sm:$0xff] }
  0x75   : > { %22430 = vmatprep.subr.mxu1 %v25032_v0  ;;  %22420 = vmatpush3.msra.mxu0 %v365_v40  ;;  %v416_v40 = vld [vmem:[%s25074_s18 + $0xc68] sm:$0xff] }
  0x76   : > { %22431 = vmatpush3.msra.mxu1 %v369_v41  ;;  %22421 = vmatprep.subr.mxu0 %v25032_v0  ;;  %v411_v41 = vld [vmem:[%s25074_s18 + $0xc00] sm:$0xff] }
  0x77   : > { %22432 = vmatprep.subr.mxu1 %v25032_v0  ;;  %22422 = vmatpush3.msra.mxu0 %v364_v42  ;;  %v415_v42 = vld [vmem:[%s25074_s18 + $0xc60] sm:$0xff] }
  0x78   : > { %22433 = vmatpush3.msra.mxu1 %v368_v43  ;;  %22423 = vmatprep.subr.mxu0 %v25032_v0  ;;  %v251_v43 = vld [vmem:[%s25088_s21 + $0x20] sm:$0x1] }
  0x79   : > { %22434 = vmatprep.subr.mxu1 %v25032_v0  ;;  %22424 = vmatpush3.msra.mxu0 %v363_v44  ;;  %v252_v44 = vld [vmem:[%s25088_s21 + $0x21] sm:$0x1] }
  0x7a   : > { %22425 = vmatprep.mubr.msk.f32.mxu0 %vm25033_vm0, %v25032_v0  ;;  %22435 = vmatpush3.msra.mxu1 %v367_v45  ;;  %v422_v45 = vld [vmem:[%s25074_s18 + $0xcd8] sm:$0xff] }
  0x7b   : > { %22436 = vmatprep.mubr.msk.f32.mxu1 %vm25033_vm0, %v25032_v0  ;;  %22426 = vmatmul.mubr.msk.f32.vlgmr.msra.gmra.mxu0 %vm539_vm1, %v239_v46  ;;  %v426_v46 = vld [vmem:[%s25074_s18 + $0xd38] sm:$0xff] }
  0x7c   : > { %22437 = vmatmul.mubr.msk.f32.vlgmr.msra.gmra.mxu1 %vm539_vm1, %v240_v47  ;;  %22439 = vmatprep.subr.mxu0 %v25032_v0  ;;  %v421_v47 = vld [vmem:[%s25074_s18 + $0xcd0] sm:$0xff] }
  0x7d   : > { %22450 = vmatprep.subr.mxu1 %v25032_v0  ;;  %22440 = vmatpush3.msra.mxu0 %v374_v48  ;;  %v425_v48 = vld [vmem:[%s25074_s18 + $0xd30] sm:$0xff] }
  0x7e   : > { %22451 = vmatpush3.msra.mxu1 %v378_v49  ;;  %22441 = vmatprep.subr.mxu0 %v25032_v0  ;;  %v420_v49 = vld [vmem:[%s25074_s18 + $0xcc8] sm:$0xff] }
  0x7f   : > { %22452 = vmatprep.subr.mxu1 %v25032_v0  ;;  %22442 = vmatpush3.msra.mxu0 %v373_v50  ;;  %v424_v50 = vld [vmem:[%s25074_s18 + $0xd28] sm:$0xff] }
  0x80   : > { %22453 = vmatpush3.msra.mxu1 %v377_v51  ;;  %22443 = vmatprep.subr.mxu0 %v25032_v0  ;;  %v419_v51 = vld [vmem:[%s25074_s18 + $0xcc0] sm:$0xff] }
  0x81   : > { %22454 = vmatprep.subr.mxu1 %v25032_v0  ;;  %22444 = vmatpush3.msra.mxu0 %v372_v52  ;;  %v423_v52 = vld [vmem:[%s25074_s18 + $0xd20] sm:$0xff] }
  0x82   : > { %22455 = vmatpush3.msra.mxu1 %v376_v53  ;;  %22445 = vmatprep.subr.mxu0 %v25032_v0  ;;  %v253_v53 = vld [vmem:[%s25088_s21 + $0x22] sm:$0x1] }
  0x83   : > { %22456 = vmatprep.subr.mxu1 %v25032_v0  ;;  %22446 = vmatpush3.msra.mxu0 %v371_v54  ;;  %v254_v54 = vld [vmem:[%s25088_s21 + $0x23] sm:$0x1] }
  0x84   : > { %22447 = vmatprep.mubr.msk.f32.mxu0 %vm25033_vm0, %v25032_v0  ;;  %22457 = vmatpush3.msra.mxu1 %v375_v55  ;;  %v430_v55 = vld [vmem:[%s25074_s18 + $0xd98] sm:$0xff] }
  0x85   : > { %22458 = vmatprep.mubr.msk.f32.mxu1 %vm25033_vm0, %v25032_v0  ;;  %22448 = vmatmul.mubr.msk.f32.vlgmr.msra.gmra.mxu0 %vm539_vm1, %v241_v56  ;;  %v434_v56 = vld [vmem:[%s25074_s18 + $0xdf8] sm:$0xff] }
  0x86   : > { %22459 = vmatmul.mubr.msk.f32.vlgmr.msra.gmra.mxu1 %vm539_vm1, %v242_v57  ;;  %22461 = vmatprep.subr.mxu0 %v25032_v0  ;;  %v429_v57 = vld [vmem:[%s25074_s18 + $0xd90] sm:$0xff] }
  0x87   : > { %22472 = vmatprep.subr.mxu1 %v25032_v0  ;;  %22462 = vmatpush3.msra.mxu0 %v382_v58  ;;  %v433_v58 = vld [vmem:[%s25074_s18 + $0xdf0] sm:$0xff] }
  0x88   : > { %22473 = vmatpush3.msra.mxu1 %v386_v59  ;;  %22463 = vmatprep.subr.mxu0 %v25032_v0  ;;  %v428_v59 = vld [vmem:[%s25074_s18 + $0xd88] sm:$0xff] }
  0x89   : > { %22474 = vmatprep.subr.mxu1 %v25032_v0  ;;  %22464 = vmatpush3.msra.mxu0 %v381_v60  ;;  %v432_v60 = vld [vmem:[%s25074_s18 + $0xde8] sm:$0xff] }
  0x8a   : > { %22475 = vmatpush3.msra.mxu1 %v385_v61  ;;  %22465 = vmatprep.subr.mxu0 %v25032_v0  ;;  %v427_v61 = vld [vmem:[%s25074_s18 + $0xd80] sm:$0xff] }
  0x8b   : > { %22476 = vmatprep.subr.mxu1 %v25032_v0  ;;  %22466 = vmatpush3.msra.mxu0 %v380_v62  ;;  %v431_v62 = vld [vmem:[%s25074_s18 + $0xde0] sm:$0xff] }
  0x8c   : > { %22477 = vmatpush3.msra.mxu1 %v384_v63  ;;  %22467 = vmatprep.subr.mxu0 %v25032_v0  ;;  %v255_v63 = vld [vmem:[%s25088_s21 + $0x24] sm:$0x1] }
  0x8d   : > { %22478 = vmatprep.subr.mxu1 %v25032_v0  ;;  %22468 = vmatpush3.msra.mxu0 %v379_v1  ;;  %v256_v1 = vld [vmem:[%s25088_s21 + $0x25] sm:$0x1] }
  0x8e   : > { %22469 = vmatprep.mubr.msk.f32.mxu0 %vm25033_vm0, %v25032_v0  ;;  %22479 = vmatpush3.msra.mxu1 %v383_v2  ;;  %v438_v2 = vld [vmem:[%s25074_s18 + $0xe58] sm:$0xff] }
  0x8f   : > { %22480 = vmatprep.mubr.msk.f32.mxu1 %vm25033_vm0, %v25032_v0  ;;  %22470 = vmatmul.mubr.msk.f32.vlgmr.msra.gmra.mxu0 %vm539_vm1, %v243_v3  ;;  %v442_v3 = vld [vmem:[%s25074_s18 + $0xeb8] sm:$0xff] }
  0x90   : > { %22481 = vmatmul.mubr.msk.f32.vlgmr.msra.gmra.mxu1 %vm539_vm1, %v244_v4  ;;  %22483 = vmatprep.subr.mxu0 %v25032_v0  ;;  %v437_v4 = vld [vmem:[%s25074_s18 + $0xe50] sm:$0xff] }
  0x91   : > { %22494 = vmatprep.subr.mxu1 %v25032_v0  ;;  %22484 = vmatpush3.msra.mxu0 %v390_v5  ;;  %v441_v5 = vld [vmem:[%s25074_s18 + $0xeb0] sm:$0xff] }
  0x92   : > { %22495 = vmatpush3.msra.mxu1 %v394_v6  ;;  %22485 = vmatprep.subr.mxu0 %v25032_v0  ;;  %v436_v6 = vld [vmem:[%s25074_s18 + $0xe48] sm:$0xff] }
  0x93   : > { %22496 = vmatprep.subr.mxu1 %v25032_v0  ;;  %22486 = vmatpush3.msra.mxu0 %v389_v7  ;;  %v440_v7 = vld [vmem:[%s25074_s18 + $0xea8] sm:$0xff] }
  0x94   : > { %22497 = vmatpush3.msra.mxu1 %v393_v8  ;;  %22487 = vmatprep.subr.mxu0 %v25032_v0  ;;  %v435_v8 = vld [vmem:[%s25074_s18 + $0xe40] sm:$0xff] }
  0x95   : > { %22498 = vmatprep.subr.mxu1 %v25032_v0  ;;  %22488 = vmatpush3.msra.mxu0 %v388_v9  ;;  %v439_v9 = vld [vmem:[%s25074_s18 + $0xea0] sm:$0xff] }
  0x96   : > { %22499 = vmatpush3.msra.mxu1 %v392_v10  ;;  %22489 = vmatprep.subr.mxu0 %v25032_v0  ;;  %v257_v10 = vld [vmem:[%s25088_s21 + $0x26] sm:$0x1] }
  0x97   : > { %22500 = vmatprep.subr.mxu1 %v25032_v0  ;;  %22490 = vmatpush3.msra.mxu0 %v387_v11  ;;  %v258_v11 = vld [vmem:[%s25088_s21 + $0x27] sm:$0x1] }
  0x98   : > { %22491 = vmatprep.mubr.msk.f32.mxu0 %vm25033_vm0, %v25032_v0  ;;  %22501 = vmatpush3.msra.mxu1 %v391_v12  ;;  %v446_v12 = vld [vmem:[%s25074_s18 + $0xf18] sm:$0xff] }
  0x99   : > { %22502 = vmatprep.mubr.msk.f32.mxu1 %vm25033_vm0, %v25032_v0  ;;  %22492 = vmatmul.mubr.msk.f32.vlgmr.msra.gmra.mxu0 %vm539_vm1, %v245_v13  ;;  %v450_v13 = vld [vmem:[%s25074_s18 + $0xf78] sm:$0xff] }
  0x9a   : > { %22503 = vmatmul.mubr.msk.f32.vlgmr.msra.gmra.mxu1 %vm539_vm1, %v246_v14  ;;  %22505 = vmatprep.subr.mxu0 %v25032_v0  ;;  %v445_v14 = vld [vmem:[%s25074_s18 + $0xf10] sm:$0xff] }
  0x9b   : > { %22516 = vmatprep.subr.mxu1 %v25032_v0  ;;  %22506 = vmatpush3.msra.mxu0 %v398_v15  ;;  %v449_v15 = vld [vmem:[%s25074_s18 + $0xf70] sm:$0xff] }
  0x9c   : > { %22517 = vmatpush3.msra.mxu1 %v402_v16  ;;  %22507 = vmatprep.subr.mxu0 %v25032_v0 }
  0x9d   : > { %22518 = vmatprep.subr.mxu1 %v25032_v0  ;;  %22508 = vmatpush3.msra.mxu0 %v397_v17 }
  0x9e   : > { %22519 = vmatpush3.msra.mxu1 %v401_v18  ;;  %22509 = vmatprep.subr.mxu0 %v25032_v0  ;;  %v444_v18 = vld [vmem:[%s25074_s18 + $0xf08] sm:$0xff] }
  0x9f   : > { %22520 = vmatprep.subr.mxu1 %v25032_v0  ;;  %22510 = vmatpush3.msra.mxu0 %v396_v19  ;;  %v448_v19 = vld [vmem:[%s25074_s18 + $0xf68] sm:$0xff] }
  0xa0   : > { %22521 = vmatpush3.msra.mxu1 %v400_v20  ;;  %22511 = vmatprep.subr.mxu0 %v25032_v0 }
  0xa1   : > { %22522 = vmatprep.subr.mxu1 %v25032_v0  ;;  %22512 = vmatpush3.msra.mxu0 %v395_v21 }
  0xa2   : > { %22513 = vmatprep.mubr.msk.f32.mxu0 %vm25033_vm0, %v25032_v0  ;;  %22523 = vmatpush3.msra.mxu1 %v399_v22  ;;  %v443_v22 = vld [vmem:[%s25074_s18 + $0xf00] sm:$0xff] }
  0xa3   : > { %22524 = vmatprep.mubr.msk.f32.mxu1 %vm25033_vm0, %v25032_v0  ;;  %22514 = vmatmul.mubr.msk.f32.vlgmr.msra.gmra.mxu0 %vm539_vm1, %v247_v23  ;;  %v447_v23 = vld [vmem:[%s25074_s18 + $0xf60] sm:$0xff] }
  0xa4   : > { %22525 = vmatmul.mubr.msk.f32.vlgmr.msra.gmra.mxu1 %vm539_vm1, %v248_v24  ;;  %22527 = vmatprep.subr.mxu0 %v25032_v0  ;;  %v259_v24 = vld [vmem:[%s25088_s21 + $0x28] sm:$0x1] }
  0xa5   : > { %22538 = vmatprep.subr.mxu1 %v25032_v0  ;;  %22528 = vmatpush3.msra.mxu0 %v406_v25  ;;  %v260_v25 = vld [vmem:[%s25088_s21 + $0x29] sm:$0x1] }
  0xa6   : > { %22539 = vmatpush3.msra.mxu1 %v410_v26  ;;  %22529 = vmatprep.subr.mxu0 %v25032_v0  ;;  %v454_v26 = vld [vmem:[%s25074_s18 + $0xfd8] sm:$0xff] }
  0xa7   : > { %22540 = vmatprep.subr.mxu1 %v25032_v0  ;;  %22530 = vmatpush3.msra.mxu0 %v405_v27  ;;  %v458_v27 = vld [vmem:[%s25074_s18 + $0x1038] sm:$0xff] }
  0xa8   : > { %22541 = vmatpush3.msra.mxu1 %v409_v28  ;;  %22531 = vmatprep.subr.mxu0 %v25032_v0  ;;  %v453_v28 = vld [vmem:[%s25074_s18 + $0xfd0] sm:$0xff] }
  0xa9   : > { %22542 = vmatprep.subr.mxu1 %v25032_v0  ;;  %22532 = vmatpush3.msra.mxu0 %v404_v29  ;;  %v457_v29 = vld [vmem:[%s25074_s18 + $0x1030] sm:$0xff] }
  0xaa   : > { %22543 = vmatpush3.msra.mxu1 %v408_v30  ;;  %22533 = vmatprep.subr.mxu0 %v25032_v0 }
  0xab   : > { %22544 = vmatprep.subr.mxu1 %v25032_v0  ;;  %22534 = vmatpush3.msra.mxu0 %v403_v31 }
  0xac   : > { %22535 = vmatprep.mubr.msk.f32.mxu0 %vm25033_vm0, %v25032_v0  ;;  %22545 = vmatpush3.msra.mxu1 %v407_v32  ;;  %v452_v32 = vld [vmem:[%s25074_s18 + $0xfc8] sm:$0xff] }
  0xad   : > { %22546 = vmatprep.mubr.msk.f32.mxu1 %vm25033_vm0, %v25032_v0  ;;  %22536 = vmatmul.mubr.msk.f32.vlgmr.msra.gmra.mxu0 %vm539_vm1, %v249_v33  ;;  %v456_v33 = vld [vmem:[%s25074_s18 + $0x1028] sm:$0xff] }
  0xae   : > { %22547 = vmatmul.mubr.msk.f32.vlgmr.msra.gmra.mxu1 %vm539_vm1, %v250_v34  ;;  %22549 = vmatprep.subr.mxu0 %v25032_v0 }
  0xaf   : > { %22560 = vmatprep.subr.mxu1 %v25032_v0  ;;  %22550 = vmatpush3.msra.mxu0 %v414_v35 }
  0xb0   : > { %22561 = vmatpush3.msra.mxu1 %v418_v36  ;;  %22551 = vmatprep.subr.mxu0 %v25032_v0  ;;  %v451_v36 = vld [vmem:[%s25074_s18 + $0xfc0] sm:$0xff] }
  0xb1   : > { %22562 = vmatprep.subr.mxu1 %v25032_v0  ;;  %22552 = vmatpush3.msra.mxu0 %v413_v37  ;;  %v455_v37 = vld [vmem:[%s25074_s18 + $0x1020] sm:$0xff] }
  0xb2   : > { %22563 = vmatpush3.msra.mxu1 %v417_v38  ;;  %22553 = vmatprep.subr.mxu0 %v25032_v0  ;;  %v261_v38 = vld [vmem:[%s25088_s21 + $0x2a] sm:$0x1] }
  0xb3   : > { %22564 = vmatprep.subr.mxu1 %v25032_v0  ;;  %22554 = vmatpush3.msra.mxu0 %v412_v39  ;;  %v262_v39 = vld [vmem:[%s25088_s21 + $0x2b] sm:$0x1] }
  0xb4   : > { %22565 = vmatpush3.msra.mxu1 %v416_v40  ;;  %22555 = vmatprep.subr.mxu0 %v25032_v0  ;;  %v462_v40 = vld [vmem:[%s25074_s18 + $0x1098] sm:$0xff] }
  0xb5   : > { %22566 = vmatprep.subr.mxu1 %v25032_v0  ;;  %22556 = vmatpush3.msra.mxu0 %v411_v41  ;;  %v466_v41 = vld [vmem:[%s25074_s18 + $0x10f8] sm:$0xff] }
  0xb6   : > { %22557 = vmatprep.mubr.msk.f32.mxu0 %vm25033_vm0, %v25032_v0  ;;  %22567 = vmatpush3.msra.mxu1 %v415_v42  ;;  %v461_v42 = vld [vmem:[%s25074_s18 + $0x1090] sm:$0xff] }
  0xb7   : > { %22568 = vmatprep.mubr.msk.f32.mxu1 %vm25033_vm0, %v25032_v0  ;;  %22558 = vmatmul.mubr.msk.f32.vlgmr.msra.gmra.mxu0 %vm539_vm1, %v251_v43  ;;  %v465_v43 = vld [vmem:[%s25074_s18 + $0x10f0] sm:$0xff] }
  0xb8   : > { %22569 = vmatmul.mubr.msk.f32.vlgmr.msra.gmra.mxu1 %vm539_vm1, %v252_v44  ;;  %22571 = vmatprep.subr.mxu0 %v25032_v0 }
  0xb9   : > { %22582 = vmatprep.subr.mxu1 %v25032_v0  ;;  %22572 = vmatpush3.msra.mxu0 %v422_v45 }
  0xba   : > { %22583 = vmatpush3.msra.mxu1 %v426_v46  ;;  %22573 = vmatprep.subr.mxu0 %v25032_v0  ;;  %v460_v46 = vld [vmem:[%s25074_s18 + $0x1088] sm:$0xff] }
  0xbb   : > { %22584 = vmatprep.subr.mxu1 %v25032_v0  ;;  %22574 = vmatpush3.msra.mxu0 %v421_v47  ;;  %v464_v47 = vld [vmem:[%s25074_s18 + $0x10e8] sm:$0xff] }
  0xbc   : > { %22585 = vmatpush3.msra.mxu1 %v425_v48  ;;  %22575 = vmatprep.subr.mxu0 %v25032_v0 }
  0xbd   : > { %22586 = vmatprep.subr.mxu1 %v25032_v0  ;;  %22576 = vmatpush3.msra.mxu0 %v420_v49 }
  0xbe   : > { %22587 = vmatpush3.msra.mxu1 %v424_v50  ;;  %22577 = vmatprep.subr.mxu0 %v25032_v0  ;;  %v459_v50 = vld [vmem:[%s25074_s18 + $0x1080] sm:$0xff] }
  0xbf   : > { %22588 = vmatprep.subr.mxu1 %v25032_v0  ;;  %22578 = vmatpush3.msra.mxu0 %v419_v51  ;;  %v463_v51 = vld [vmem:[%s25074_s18 + $0x10e0] sm:$0xff] }
  0xc0   : > { %22579 = vmatprep.mubr.msk.f32.mxu0 %vm25033_vm0, %v25032_v0  ;;  %22589 = vmatpush3.msra.mxu1 %v423_v52  ;;  %v263_v52 = vld [vmem:[%s25088_s21 + $0x2c] sm:$0x1] }
  0xc1   : > { %22590 = vmatprep.mubr.msk.f32.mxu1 %vm25033_vm0, %v25032_v0  ;;  %22580 = vmatmul.mubr.msk.f32.vlgmr.msra.gmra.mxu0 %vm539_vm1, %v253_v53  ;;  %v264_v53 = vld [vmem:[%s25088_s21 + $0x2d] sm:$0x1] }
  0xc2   : > { %22591 = vmatmul.mubr.msk.f32.vlgmr.msra.gmra.mxu1 %vm539_vm1, %v254_v54  ;;  %22593 = vmatprep.subr.mxu0 %v25032_v0  ;;  %v470_v54 = vld [vmem:[%s25074_s18 + $0x1158] sm:$0xff] }
  0xc3   : > { %22604 = vmatprep.subr.mxu1 %v25032_v0  ;;  %22594 = vmatpush3.msra.mxu0 %v430_v55  ;;  %v474_v55 = vld [vmem:[%s25074_s18 + $0x11b8] sm:$0xff] }
  0xc4   : > { %22605 = vmatpush3.msra.mxu1 %v434_v56  ;;  %22595 = vmatprep.subr.mxu0 %v25032_v0  ;;  %v469_v56 = vld [vmem:[%s25074_s18 + $0x1150] sm:$0xff] }
  0xc5   : > { %22606 = vmatprep.subr.mxu1 %v25032_v0  ;;  %22596 = vmatpush3.msra.mxu0 %v429_v57  ;;  %v473_v57 = vld [vmem:[%s25074_s18 + $0x11b0] sm:$0xff] }
  0xc6   : > { %22607 = vmatpush3.msra.mxu1 %v433_v58  ;;  %22597 = vmatprep.subr.mxu0 %v25032_v0 }
  0xc7   : > { %22608 = vmatprep.subr.mxu1 %v25032_v0  ;;  %22598 = vmatpush3.msra.mxu0 %v428_v59 }
  0xc8   : > { %22609 = vmatpush3.msra.mxu1 %v432_v60  ;;  %22599 = vmatprep.subr.mxu0 %v25032_v0  ;;  %v468_v60 = vld [vmem:[%s25074_s18 + $0x1148] sm:$0xff] }
  0xc9   : > { %22610 = vmatprep.subr.mxu1 %v25032_v0  ;;  %22600 = vmatpush3.msra.mxu0 %v427_v61  ;;  %v472_v61 = vld [vmem:[%s25074_s18 + $0x11a8] sm:$0xff] }
  0xca   : > { %22601 = vmatprep.mubr.msk.f32.mxu0 %vm25033_vm0, %v25032_v0  ;;  %22611 = vmatpush3.msra.mxu1 %v431_v62 }
  0xcb   : > { %22612 = vmatprep.mubr.msk.f32.mxu1 %vm25033_vm0, %v25032_v0  ;;  %22602 = vmatmul.mubr.msk.f32.vlgmr.msra.gmra.mxu0 %vm539_vm1, %v255_v63 }
  0xcc   : > { %22613 = vmatmul.mubr.msk.f32.vlgmr.msra.gmra.mxu1 %vm539_vm1, %v256_v1  ;;  %22615 = vmatprep.subr.mxu0 %v25032_v0  ;;  %v467_v1 = vld [vmem:[%s25074_s18 + $0x1140] sm:$0xff] }
  0xcd   : > { %22626 = vmatprep.subr.mxu1 %v25032_v0  ;;  %22616 = vmatpush3.msra.mxu0 %v438_v2  ;;  %v471_v2 = vld [vmem:[%s25074_s18 + $0x11a0] sm:$0xff] }
  0xce   : > { %22627 = vmatpush3.msra.mxu1 %v442_v3  ;;  %22617 = vmatprep.subr.mxu0 %v25032_v0  ;;  %v265_v3 = vld [vmem:[%s25088_s21 + $0x2e] sm:$0x1] }
  0xcf   : > { %22628 = vmatprep.subr.mxu1 %v25032_v0  ;;  %22618 = vmatpush3.msra.mxu0 %v437_v4  ;;  %v266_v4 = vld [vmem:[%s25088_s21 + $0x2f] sm:$0x1] }
  0xd0   : > { %22629 = vmatpush3.msra.mxu1 %v441_v5  ;;  %22619 = vmatprep.subr.mxu0 %v25032_v0  ;;  %v478_v5 = vld [vmem:[%s25074_s18 + $0x1218] sm:$0xff] }
  0xd1   : > { %22630 = vmatprep.subr.mxu1 %v25032_v0  ;;  %22620 = vmatpush3.msra.mxu0 %v436_v6  ;;  %v482_v6 = vld [vmem:[%s25074_s18 + $0x1278] sm:$0xff] }
  0xd2   : > { %22631 = vmatpush3.msra.mxu1 %v440_v7  ;;  %22621 = vmatprep.subr.mxu0 %v25032_v0  ;;  %v477_v7 = vld [vmem:[%s25074_s18 + $0x1210] sm:$0xff] }
  0xd3   : > { %22632 = vmatprep.subr.mxu1 %v25032_v0  ;;  %22622 = vmatpush3.msra.mxu0 %v435_v8  ;;  %v481_v8 = vld [vmem:[%s25074_s18 + $0x1270] sm:$0xff] }
  0xd4   : > { %22623 = vmatprep.mubr.msk.f32.mxu0 %vm25033_vm0, %v25032_v0  ;;  %22633 = vmatpush3.msra.mxu1 %v439_v9 }
  0xd5   : > { %22634 = vmatprep.mubr.msk.f32.mxu1 %vm25033_vm0, %v25032_v0  ;;  %22624 = vmatmul.mubr.msk.f32.vlgmr.msra.gmra.mxu0 %vm539_vm1, %v257_v10 }
  0xd6   : > { %22635 = vmatmul.mubr.msk.f32.vlgmr.msra.gmra.mxu1 %vm539_vm1, %v258_v11  ;;  %22637 = vmatprep.subr.mxu0 %v25032_v0  ;;  %v476_v11 = vld [vmem:[%s25074_s18 + $0x1208] sm:$0xff] }
  0xd7   : > { %22648 = vmatprep.subr.mxu1 %v25032_v0  ;;  %22638 = vmatpush3.msra.mxu0 %v446_v12  ;;  %v25562_v16 = vpop.f32.mrf.mxu0  ;;  %v480_v12 = vld [vmem:[%s25074_s18 + $0x1268] sm:$0xff] }
  0xd8   : > { %22649 = vmatpush3.msra.mxu1 %v450_v13  ;;  %v25564_v17 = vpop.f32.mrf.mxu1  ;;  %22639 = vmatprep.subr.mxu0 %v25032_v0 }
  0xd9   : > { %22650 = vmatprep.subr.mxu1 %v25032_v0  ;;  %22640 = vmatpush3.msra.mxu0 %v445_v14  ;;  %v22207_v20 = vpop.f32.mrf.mxu0 }
  0xda   : > { %22651 = vmatpush3.msra.mxu1 %v449_v15  ;;  %v22218_v21 = vpop.f32.mrf.mxu1  ;;  %22641 = vmatprep.subr.mxu0 %v25032_v0  ;;  %v475_v15 = vld [vmem:[%s25074_s18 + $0x1200] sm:$0xff]  ;;  %v268_v20 = vld [vmem:[%s25088_s21 + $0x31] sm:$0x1] }
  0xdb   : > { %22652 = vmatprep.subr.mxu1 %v25032_v0  ;;  %22642 = vmatpush3.msra.mxu0 %v444_v18  ;;  %v479_v18 = vld [vmem:[%s25074_s18 + $0x1260] sm:$0xff]  ;;  %v486_v21 = vld [vmem:[%s25074_s18 + $0x12d8] sm:$0xff] }
  0xdc   : > { %22653 = vmatpush3.msra.mxu1 %v448_v19  ;;  %22643 = vmatprep.subr.mxu0 %v25032_v0  ;;  %v267_v19 = vld [vmem:[%s25088_s21 + $0x30] sm:$0x1] }
  0xdd   : > { %22654 = vmatprep.subr.mxu1 %v25032_v0  ;;  %22644 = vmatpush3.msra.mxu0 %v443_v22  ;;  %v490_v22 = vld [vmem:[%s25074_s18 + $0x1338] sm:$0xff] }
  0xde   : > { %22645 = vmatprep.mubr.msk.f32.mxu0 %vm25033_vm0, %v25032_v0  ;;  %22655 = vmatpush3.msra.mxu1 %v447_v23  ;;  %v485_v23 = vld [vmem:[%s25074_s18 + $0x12d0] sm:$0xff] }
  0xdf   : > { %22656 = vmatprep.mubr.msk.f32.mxu1 %vm25033_vm0, %v25032_v0  ;;  %22646 = vmatmul.mubr.msk.f32.vlgmr.msra.gmra.mxu0 %vm539_vm1, %v259_v24  ;;  %v489_v24 = vld [vmem:[%s25074_s18 + $0x1330] sm:$0xff] }
  0xe0   : > { %22657 = vmatmul.mubr.msk.f32.vlgmr.msra.gmra.mxu1 %vm539_vm1, %v260_v25  ;;  %22659 = vmatprep.subr.mxu0 %v25032_v0 }
  0xe1   : > { %22670 = vmatprep.subr.mxu1 %v25032_v0  ;;  %22660 = vmatpush3.msra.mxu0 %v454_v26  ;;  %v25590_v30 = vpop.f32.mrf.mxu0 }
  0xe2   : > { %22671 = vmatpush3.msra.mxu1 %v458_v27  ;;  %v25592_v31 = vpop.f32.mrf.mxu1  ;;  %22661 = vmatprep.subr.mxu0 %v25032_v0  ;;  %v484_v27 = vld [vmem:[%s25074_s18 + $0x12c8] sm:$0xff] }
  0xe3   : > { %22672 = vmatprep.subr.mxu1 %v25032_v0  ;;  %22662 = vmatpush3.msra.mxu0 %v453_v28  ;;  %v22229_v34 = vpop.f32.mrf.mxu0  ;;  %v488_v28 = vld [vmem:[%s25074_s18 + $0x1328] sm:$0xff] }
  0xe4   : > { %22673 = vmatpush3.msra.mxu1 %v457_v29  ;;  %v22240_v35 = vpop.f32.mrf.mxu1  ;;  %22663 = vmatprep.subr.mxu0 %v25032_v0  ;;  %v487_v34 = vld [vmem:[%s25074_s18 + $0x1320] sm:$0xff] }
  0xe5   : > { %22674 = vmatprep.subr.mxu1 %v25032_v0  ;;  %22664 = vmatpush3.msra.mxu0 %v452_v32  ;;  %v269_v35 = vld [vmem:[%s25088_s21 + $0x32] sm:$0x1] }
  0xe6   : > { %22675 = vmatpush3.msra.mxu1 %v456_v33  ;;  %22665 = vmatprep.subr.mxu0 %v25032_v0  ;;  %v483_v33 = vld [vmem:[%s25074_s18 + $0x12c0] sm:$0xff] }
  0xe7   : > { %22676 = vmatprep.subr.mxu1 %v25032_v0  ;;  %22666 = vmatpush3.msra.mxu0 %v451_v36  ;;  %v270_v36 = vld [vmem:[%s25088_s21 + $0x33] sm:$0x1] }
  0xe8   : > { %22667 = vmatprep.mubr.msk.f32.mxu0 %vm25033_vm0, %v25032_v0  ;;  %22677 = vmatpush3.msra.mxu1 %v455_v37  ;;  %v494_v37 = vld [vmem:[%s25074_s18 + $0x1398] sm:$0xff] }
  0xe9   : > { %22678 = vmatprep.mubr.msk.f32.mxu1 %vm25033_vm0, %v25032_v0  ;;  %22668 = vmatmul.mubr.msk.f32.vlgmr.msra.gmra.mxu0 %vm539_vm1, %v261_v38  ;;  %v498_v38 = vld [vmem:[%s25074_s18 + $0x13f8] sm:$0xff] }
  0xea   : > { %22679 = vmatmul.mubr.msk.f32.vlgmr.msra.gmra.mxu1 %vm539_vm1, %v262_v39  ;;  %22681 = vmatprep.subr.mxu0 %v25032_v0  ;;  %v493_v39 = vld [vmem:[%s25074_s18 + $0x1390] sm:$0xff] }
  0xeb   : > { %22692 = vmatprep.subr.mxu1 %v25032_v0  ;;  %22682 = vmatpush3.msra.mxu0 %v462_v40  ;;  %v25618_v44 = vpop.f32.mrf.mxu0  ;;  %v497_v40 = vld [vmem:[%s25074_s18 + $0x13f0] sm:$0xff] }
  0xec   : > { %22693 = vmatpush3.msra.mxu1 %v466_v41  ;;  %v25620_v45 = vpop.f32.mrf.mxu1  ;;  %22683 = vmatprep.subr.mxu0 %v25032_v0 }
  0xed   : > { %22694 = vmatprep.subr.mxu1 %v25032_v0  ;;  %22684 = vmatpush3.msra.mxu0 %v461_v42  ;;  %v22251_v48 = vpop.f32.mrf.mxu0 }
  0xee   : > { %22695 = vmatpush3.msra.mxu1 %v465_v43  ;;  %v22262_v49 = vpop.f32.mrf.mxu1  ;;  %22685 = vmatprep.subr.mxu0 %v25032_v0  ;;  %v492_v43 = vld [vmem:[%s25074_s18 + $0x1388] sm:$0xff] }
  0xef   : > { %22696 = vmatprep.subr.mxu1 %v25032_v0  ;;  %22686 = vmatpush3.msra.mxu0 %v460_v46  ;;  %v496_v46 = vld [vmem:[%s25074_s18 + $0x13e8] sm:$0xff]  ;;  %v491_v49 = vld [vmem:[%s25074_s18 + $0x1380] sm:$0xff] }
  0xf0   : > { %22697 = vmatpush3.msra.mxu1 %v464_v47  ;;  %22687 = vmatprep.subr.mxu0 %v25032_v0 }
  0xf1   : > { %22698 = vmatprep.subr.mxu1 %v25032_v0  ;;  %22688 = vmatpush3.msra.mxu0 %v459_v50  ;;  %v495_v50 = vld [vmem:[%s25074_s18 + $0x13e0] sm:$0xff] }
  0xf2   : > { %22689 = vmatprep.mubr.msk.f32.mxu0 %vm25033_vm0, %v25032_v0  ;;  %22699 = vmatpush3.msra.mxu1 %v463_v51  ;;  %v271_v51 = vld [vmem:[%s25088_s21 + $0x34] sm:$0x1] }
  0xf3   : > { %22700 = vmatprep.mubr.msk.f32.mxu1 %vm25033_vm0, %v25032_v0  ;;  %22690 = vmatmul.mubr.msk.f32.vlgmr.msra.gmra.mxu0 %vm539_vm1, %v263_v52  ;;  %v272_v52 = vld [vmem:[%s25088_s21 + $0x35] sm:$0x1] }
  0xf4   : > { %22701 = vmatmul.mubr.msk.f32.vlgmr.msra.gmra.mxu1 %vm539_vm1, %v264_v53  ;;  %22703 = vmatprep.subr.mxu0 %v25032_v0  ;;  %v502_v53 = vld [vmem:[%s25074_s18 + $0x1458] sm:$0xff] }
  0xf5   : > { %22714 = vmatprep.subr.mxu1 %v25032_v0  ;;  %22704 = vmatpush3.msra.mxu0 %v470_v54  ;;  %v25646_v58 = vpop.f32.mrf.mxu0  ;;  %v506_v54 = vld [vmem:[%s25074_s18 + $0x14b8] sm:$0xff] }
  0xf6   : > { %22715 = vmatpush3.msra.mxu1 %v474_v55  ;;  %v25648_v59 = vpop.f32.mrf.mxu1  ;;  %22705 = vmatprep.subr.mxu0 %v25032_v0  ;;  %v501_v55 = vld [vmem:[%s25074_s18 + $0x1450] sm:$0xff] }
  0xf7   : > { %22716 = vmatprep.subr.mxu1 %v25032_v0  ;;  %22706 = vmatpush3.msra.mxu0 %v469_v56  ;;  %v22273_v62 = vpop.f32.mrf.mxu0  ;;  %v505_v56 = vld [vmem:[%s25074_s18 + $0x14b0] sm:$0xff] }
  0xf8   : > { %22717 = vmatpush3.msra.mxu1 %v473_v57  ;;  %v22284_v63 = vpop.f32.mrf.mxu1  ;;  %22707 = vmatprep.subr.mxu0 %v25032_v0  ;;  %v504_v62 = vld [vmem:[%s25074_s18 + $0x14a8] sm:$0xff] }
  0xf9   : > { %22718 = vmatprep.subr.mxu1 %v25032_v0  ;;  %22708 = vmatpush3.msra.mxu0 %v468_v60 }
  0xfa   : > { %22719 = vmatpush3.msra.mxu1 %v472_v61  ;;  %22709 = vmatprep.subr.mxu0 %v25032_v0  ;;  %v500_v61 = vld [vmem:[%s25074_s18 + $0x1448] sm:$0xff] }
  0xfb   : > { %22720 = vmatprep.subr.mxu1 %v25032_v0  ;;  %22710 = vmatpush3.msra.mxu0 %v467_v1 }
  0xfc   : > { %22711 = vmatprep.mubr.msk.f32.mxu0 %vm25033_vm0, %v25032_v0  ;;  %22721 = vmatpush3.msra.mxu1 %v471_v2  ;;  %v499_v2 = vld [vmem:[%s25074_s18 + $0x1440] sm:$0xff] }
  0xfd   : > { %22722 = vmatprep.mubr.msk.f32.mxu1 %vm25033_vm0, %v25032_v0  ;;  %22712 = vmatmul.mubr.msk.f32.vlgmr.msra.gmra.mxu0 %vm539_vm1, %v265_v3  ;;  %v503_v3 = vld [vmem:[%s25074_s18 + $0x14a0] sm:$0xff] }
  0xfe   : > { %22723 = vmatmul.mubr.msk.f32.vlgmr.msra.gmra.mxu1 %vm539_vm1, %v266_v4  ;;  %22725 = vmatprep.subr.mxu0 %v25032_v0  ;;  %v273_v4 = vld [vmem:[%s25088_s21 + $0x36] sm:$0x1] }
  0xff   : > { %22736 = vmatprep.subr.mxu1 %v25032_v0  ;;  %22726 = vmatpush3.msra.mxu0 %v478_v5  ;;  %v25674_v9 = vpop.f32.mrf.mxu0  ;;  %v274_v5 = vld [vmem:[%s25088_s21 + $0x37] sm:$0x1] }
 0x100   : > { %22737 = vmatpush3.msra.mxu1 %v482_v6  ;;  %v25676_v10 = vpop.f32.mrf.mxu1  ;;  %22727 = vmatprep.subr.mxu0 %v25032_v0  ;;  %v510_v6 = vld [vmem:[%s25074_s18 + $0x1518] sm:$0xff] }
 0x101   : > { %22738 = vmatprep.subr.mxu1 %v25032_v0  ;;  %22728 = vmatpush3.msra.mxu0 %v477_v7  ;;  %v22295_v13 = vpop.f32.mrf.mxu0  ;;  %v514_v7 = vld [vmem:[%s25074_s18 + $0x1578] sm:$0xff] }
 0x102   : > { %22739 = vmatpush3.msra.mxu1 %v481_v8  ;;  %v22306_v14 = vpop.f32.mrf.mxu1  ;;  %22729 = vmatprep.subr.mxu0 %v25032_v0  ;;  %v509_v8 = vld [vmem:[%s25074_s18 + $0x1510] sm:$0xff] }
 0x103   : > { %22740 = vmatprep.subr.mxu1 %v25032_v0  ;;  %22730 = vmatpush3.msra.mxu0 %v476_v11  ;;  %v513_v11 = vld [vmem:[%s25074_s18 + $0x1570] sm:$0xff]  ;;  %v508_v14 = vld [vmem:[%s25074_s18 + $0x1508] sm:$0xff] }
 0x104   : > { %22741 = vmatpush3.msra.mxu1 %v480_v12  ;;  %22731 = vmatprep.subr.mxu0 %v25032_v0 }
 0x105   : > { %22742 = vmatprep.subr.mxu1 %v25032_v0  ;;  %22732 = vmatpush3.msra.mxu0 %v475_v15  ;;  %v512_v15 = vld [vmem:[%s25074_s18 + $0x1568] sm:$0xff] }
 0x106   : > { %22733 = vmatprep.mubr.msk.f32.mxu0 %vm25033_vm0, %v25032_v0  ;;  %22743 = vmatpush3.msra.mxu1 %v479_v18 }
 0x107   : > { %22744 = vmatprep.mubr.msk.f32.mxu1 %vm25033_vm0, %v25032_v0  ;;  %22734 = vmatmul.mubr.msk.f32.vlgmr.msra.gmra.mxu0 %vm539_vm1, %v267_v19 }
 0x108   : > { %22745 = vmatmul.mubr.msk.f32.vlgmr.msra.gmra.mxu1 %vm539_vm1, %v268_v20  ;;  %22747 = vmatprep.subr.mxu0 %v25032_v0  ;;  %v507_v20 = vld [vmem:[%s25074_s18 + $0x1500] sm:$0xff] }
 0x109   : > { %22758 = vmatprep.subr.mxu1 %v25032_v0  ;;  %22748 = vmatpush3.msra.mxu0 %v486_v21  ;;  %v25702_v25 = vpop.f32.mrf.mxu0  ;;  %v511_v21 = vld [vmem:[%s25074_s18 + $0x1560] sm:$0xff] }
 0x10a   : > { %22759 = vmatpush3.msra.mxu1 %v490_v22  ;;  %v25704_v26 = vpop.f32.mrf.mxu1  ;;  %22749 = vmatprep.subr.mxu0 %v25032_v0  ;;  %v275_v22 = vld [vmem:[%s25088_s21 + $0x38] sm:$0x1] }
 0x10b   : > { %22760 = vmatprep.subr.mxu1 %v25032_v0  ;;  %22750 = vmatpush3.msra.mxu0 %v485_v23  ;;  %v22317_v29 = vpop.f32.mrf.mxu0  ;;  %v276_v23 = vld [vmem:[%s25088_s21 + $0x39] sm:$0x1] }
 0x10c   : > { %22761 = vmatpush3.msra.mxu1 %v489_v24  ;;  %v22328_v32 = vpop.f32.mrf.mxu1  ;;  %22751 = vmatprep.subr.mxu0 %v25032_v0  ;;  %v518_v24 = vld [vmem:[%s25074_s18 + $0x15d8] sm:$0xff]  ;;  %v521_v29 = vld [vmem:[%s25074_s18 + $0x1630] sm:$0xff] }
 0x10d   : > { %22762 = vmatprep.subr.mxu1 %v25032_v0  ;;  %22752 = vmatpush3.msra.mxu0 %v484_v27  ;;  %v522_v27 = vld [vmem:[%s25074_s18 + $0x1638] sm:$0xff] }
 0x10e   : > { %22763 = vmatpush3.msra.mxu1 %v488_v28  ;;  %22753 = vmatprep.subr.mxu0 %v25032_v0  ;;  %v517_v28 = vld [vmem:[%s25074_s18 + $0x15d0] sm:$0xff] }
 0x10f   : > { %22764 = vmatprep.subr.mxu1 %v25032_v0  ;;  %22754 = vmatpush3.msra.mxu0 %v483_v33 }
 0x110   : > { %22755 = vmatprep.mubr.msk.f32.mxu0 %vm25033_vm0, %v25032_v0  ;;  %22765 = vmatpush3.msra.mxu1 %v487_v34  ;;  %v516_v34 = vld [vmem:[%s25074_s18 + $0x15c8] sm:$0xff] }
 0x111   : > { %22766 = vmatprep.mubr.msk.f32.mxu1 %vm25033_vm0, %v25032_v0  ;;  %22756 = vmatmul.mubr.msk.f32.vlgmr.msra.gmra.mxu0 %vm539_vm1, %v269_v35  ;;  %v520_v35 = vld [vmem:[%s25074_s18 + $0x1628] sm:$0xff] }
 0x112   : > { %22767 = vmatmul.mubr.msk.f32.vlgmr.msra.gmra.mxu1 %vm539_vm1, %v270_v36  ;;  %22769 = vmatprep.subr.mxu0 %v25032_v0 }
 0x113   : > { %22780 = vmatprep.subr.mxu1 %v25032_v0  ;;  %22770 = vmatpush3.msra.mxu0 %v494_v37  ;;  %v25730_v41 = vpop.f32.mrf.mxu0 }
 0x114   : > { %22781 = vmatpush3.msra.mxu1 %v498_v38  ;;  %v25732_v42 = vpop.f32.mrf.mxu1  ;;  %22771 = vmatprep.subr.mxu0 %v25032_v0  ;;  %v515_v38 = vld [vmem:[%s25074_s18 + $0x15c0] sm:$0xff] }
 0x115   : > { %22782 = vmatprep.subr.mxu1 %v25032_v0  ;;  %22772 = vmatpush3.msra.mxu0 %v493_v39  ;;  %v22339_v47 = vpop.f32.mrf.mxu0  ;;  %v519_v39 = vld [vmem:[%s25074_s18 + $0x1620] sm:$0xff] }
 0x116   : > { %22783 = vmatpush3.msra.mxu1 %v497_v40  ;;  %v22350_v48 = vpop.f32.mrf.mxu1  ;;  %22773 = vmatprep.subr.mxu0 %v25032_v0  ;;  %v277_v40 = vld [vmem:[%s25088_s21 + $0x3a] sm:$0x1] }
 0x117   : > { %22784 = vmatprep.subr.mxu1 %v25032_v0  ;;  %22774 = vmatpush3.msra.mxu0 %v492_v43  ;;  %v278_v43 = vld [vmem:[%s25088_s21 + $0x3b] sm:$0x1]  ;;  %v525_v48 = vld [vmem:[%s25074_s18 + $0x1690] sm:$0xff] }
 0x118   : > { %22785 = vmatpush3.msra.mxu1 %v496_v46  ;;  %22775 = vmatprep.subr.mxu0 %v25032_v0  ;;  %v526_v46 = vld [vmem:[%s25074_s18 + $0x1698] sm:$0xff] }
 0x119   : > { %22786 = vmatprep.subr.mxu1 %v25032_v0  ;;  %22776 = vmatpush3.msra.mxu0 %v491_v49  ;;  %v530_v47 = vld [vmem:[%s25074_s18 + $0x16f8] sm:$0xff]  ;;  %v529_v49 = vld [vmem:[%s25074_s18 + $0x16f0] sm:$0xff] }
 0x11a   : > { %22777 = vmatprep.mubr.msk.f32.mxu0 %vm25033_vm0, %v25032_v0  ;;  %22787 = vmatpush3.msra.mxu1 %v495_v50 }
 0x11b   : > { %22788 = vmatprep.mubr.msk.f32.mxu1 %vm25033_vm0, %v25032_v0  ;;  %22778 = vmatmul.mubr.msk.f32.vlgmr.msra.gmra.mxu0 %vm539_vm1, %v271_v51 }
 0x11c   : > { %22789 = vmatmul.mubr.msk.f32.vlgmr.msra.gmra.mxu1 %vm539_vm1, %v272_v52  ;;  %22791 = vmatprep.subr.mxu0 %v25032_v0  ;;  %v524_v52 = vld [vmem:[%s25074_s18 + $0x1688] sm:$0xff] }
 0x11d   : > { %22802 = vmatprep.subr.mxu1 %v25032_v0  ;;  %22792 = vmatpush3.msra.mxu0 %v502_v53  ;;  %v25758_v57 = vpop.f32.mrf.mxu0  ;;  %v528_v53 = vld [vmem:[%s25074_s18 + $0x16e8] sm:$0xff] }
 0x11e   : > { %22803 = vmatpush3.msra.mxu1 %v506_v54  ;;  %v25760_v60 = vpop.f32.mrf.mxu1  ;;  %22793 = vmatprep.subr.mxu0 %v25032_v0 }
 0x11f   : > { %22804 = vmatprep.subr.mxu1 %v25032_v0  ;;  %22794 = vmatpush3.msra.mxu0 %v501_v55  ;;  %v22361_v63 = vpop.f32.mrf.mxu0 }
 0x120   : > { %22805 = vmatpush3.msra.mxu1 %v505_v56  ;;  %v22372_v1 = vpop.f32.mrf.mxu1  ;;  %22795 = vmatprep.subr.mxu0 %v25032_v0  ;;  %v523_v56 = vld [vmem:[%s25074_s18 + $0x1680] sm:$0xff]  ;;  %v280_v63 = vld [vmem:[%s25088_s21 + $0x3d] sm:$0x1] }
 0x121   : > { %22806 = vmatprep.subr.mxu1 %v25032_v0  ;;  %22796 = vmatpush3.msra.mxu0 %v500_v61  ;;  %v527_v61 = vld [vmem:[%s25074_s18 + $0x16e0] sm:$0xff]  ;;  %v534_v1 = vld [vmem:[%s25074_s18 + $0x1758] sm:$0xff] }
 0x122   : > { %22807 = vmatpush3.msra.mxu1 %v504_v62  ;;  %22797 = vmatprep.subr.mxu0 %v25032_v0  ;;  %v279_v62 = vld [vmem:[%s25088_s21 + $0x3c] sm:$0x1] }
 0x123   : > { %22808 = vmatprep.subr.mxu1 %v25032_v0  ;;  %22798 = vmatpush3.msra.mxu0 %v499_v2  ;;  %v538_v2 = vld [vmem:[%s25074_s18 + $0x17b8] sm:$0xff] }
 0x124   : > { %22799 = vmatprep.mubr.msk.f32.mxu0 %vm25033_vm0, %v25032_v0  ;;  %22809 = vmatpush3.msra.mxu1 %v503_v3  ;;  %v533_v3 = vld [vmem:[%s25074_s18 + $0x1750] sm:$0xff] }
 0x125   : > { %22810 = vmatprep.mubr.msk.f32.mxu1 %vm25033_vm0, %v25032_v0  ;;  %22800 = vmatmul.mubr.msk.f32.vlgmr.msra.gmra.mxu0 %vm539_vm1, %v273_v4  ;;  %v537_v4 = vld [vmem:[%s25074_s18 + $0x17b0] sm:$0xff] }
 0x126   : > { %22811 = vmatmul.mubr.msk.f32.vlgmr.msra.gmra.mxu1 %vm539_vm1, %v274_v5  ;;  %22813 = vmatprep.subr.mxu0 %v25032_v0 }
 0x127   : > { %22824 = vmatprep.subr.mxu1 %v25032_v0  ;;  %22814 = vmatpush3.msra.mxu0 %v510_v6  ;;  %v25786_v12 = vpop.f32.mrf.mxu0 }
 0x128   : > { %22825 = vmatpush3.msra.mxu1 %v514_v7  ;;  %v25788_v13 = vpop.f32.mrf.mxu1  ;;  %22815 = vmatprep.subr.mxu0 %v25032_v0  ;;  %v532_v7 = vld [vmem:[%s25074_s18 + $0x1748] sm:$0xff] }
 0x129   : > { %22826 = vmatprep.subr.mxu1 %v25032_v0  ;;  %22816 = vmatpush3.msra.mxu0 %v509_v8  ;;  %v22383_v18 = vpop.f32.mrf.mxu0  ;;  %v536_v8 = vld [vmem:[%s25074_s18 + $0x17a8] sm:$0xff] }
 0x12a   : > { %22827 = vmatpush3.msra.mxu1 %v513_v11  ;;  %v22394_v19 = vpop.f32.mrf.mxu1  ;;  %22817 = vmatprep.subr.mxu0 %v25032_v0  ;;  %v535_v18 = vld [vmem:[%s25074_s18 + $0x17a0] sm:$0xff] }
 0x12b   : > { %22828 = vmatprep.subr.mxu1 %v25032_v0  ;;  %22818 = vmatpush3.msra.mxu0 %v508_v14  ;;  %v281_v19 = vld [vmem:[%s25088_s21 + $0x3e] sm:$0x1] }
 0x12c   : > { %22829 = vmatpush3.msra.mxu1 %v512_v15  ;;  %22819 = vmatprep.subr.mxu0 %v25032_v0  ;;  %v531_v15 = vld [vmem:[%s25074_s18 + $0x1740] sm:$0xff] }
 0x12d   : > { %22830 = vmatprep.subr.mxu1 %v25032_v0  ;;  %22820 = vmatpush3.msra.mxu0 %v507_v20  ;;  %v282_v20 = vld [vmem:[%s25088_s21 + $0x3f] sm:$0x1] }
 0x12e   : > { %22821 = vmatprep.mubr.msk.f32.mxu0 %vm25033_vm0, %v25032_v0  ;;  %22831 = vmatpush3.msra.mxu1 %v511_v21  ;;  %v20213_v21 = vld [vmem:[%s25074_s18 + $0x38] sm:$0xff] }
 0x12f   : > { %22832 = vmatprep.mubr.msk.f32.mxu1 %vm25033_vm0, %v25032_v0  ;;  %22822 = vmatmul.mubr.msk.f32.vlgmr.msra.gmra.mxu0 %vm539_vm1, %v275_v22  ;;  %v20217_v22 = vld [vmem:[%s25074_s18 + $0x98] sm:$0xff] }
 0x130   : > { %22833 = vmatmul.mubr.msk.f32.vlgmr.msra.gmra.mxu1 %vm539_vm1, %v276_v23  ;;  %22835 = vmatprep.subr.mxu0 %v25032_v0  ;;  %v20212_v23 = vld [vmem:[%s25074_s18 + $0x30] sm:$0xff] }
 0x131   : > { %22846 = vmatprep.subr.mxu1 %v25032_v0  ;;  %22836 = vmatpush3.msra.mxu0 %v518_v24  ;;  %v25814_v32 = vpop.f32.mrf.mxu0  ;;  %v20216_v24 = vld [vmem:[%s25074_s18 + $0x90] sm:$0xff] }
 0x132   : > { %22847 = vmatpush3.msra.mxu1 %v522_v27  ;;  %v25816_v33 = vpop.f32.mrf.mxu1  ;;  %22837 = vmatprep.subr.mxu0 %v25032_v0 }
 0x133   : > { %22848 = vmatprep.subr.mxu1 %v25032_v0  ;;  %22838 = vmatpush3.msra.mxu0 %v517_v28  ;;  %v22405_v36 = vpop.f32.mrf.mxu0 }
 0x134   : > { %22849 = vmatpush3.msra.mxu1 %v521_v29  ;;  %v22416_v37 = vpop.f32.mrf.mxu1  ;;  %22839 = vmatprep.subr.mxu0 %v25032_v0  ;;  %v20211_v29 = vld [vmem:[%s25074_s18 + $0x28] sm:$0xff] }
 0x135   : > { %22850 = vmatprep.subr.mxu1 %v25032_v0  ;;  %22840 = vmatpush3.msra.mxu0 %v516_v34  ;;  %v20215_v34 = vld [vmem:[%s25074_s18 + $0x88] sm:$0xff]  ;;  %v20210_v37 = vld [vmem:[%s25074_s18 + $0x20] sm:$0xff] }
 0x136   : > { %22851 = vmatpush3.msra.mxu1 %v520_v35  ;;  %22841 = vmatprep.subr.mxu0 %v25032_v0 }
 0x137   : > { %22852 = vmatprep.subr.mxu1 %v25032_v0  ;;  %22842 = vmatpush3.msra.mxu0 %v515_v38  ;;  %v20214_v38 = vld [vmem:[%s25074_s18 + $0x80] sm:$0xff] }
 0x138   : > { %22843 = vmatprep.mubr.msk.f32.mxu0 %vm25033_vm0, %v25032_v0  ;;  %22853 = vmatpush3.msra.mxu1 %v519_v39  ;;  %v20221_v39 = vld [vmem:[%s25074_s18 + $0xf8] sm:$0xff] }
 0x139   : > { %22854 = vmatprep.mubr.msk.f32.mxu1 %vm25033_vm0, %v25032_v0  ;;  %22844 = vmatmul.mubr.msk.f32.vlgmr.msra.gmra.mxu0 %vm539_vm1, %v277_v40  ;;  %v20225_v40 = vld [vmem:[%s25074_s18 + $0x158] sm:$0xff] }
 0x13a   : > { %22855 = vmatmul.mubr.msk.f32.vlgmr.msra.gmra.mxu1 %vm539_vm1, %v278_v43  ;;  %22857 = vmatprep.subr.mxu0 %v25032_v0  ;;  %v20220_v43 = vld [vmem:[%s25074_s18 + $0xf0] sm:$0xff] }
 0x13b   : > { %22868 = vmatprep.subr.mxu1 %v25032_v0  ;;  %22858 = vmatpush3.msra.mxu0 %v526_v46  ;;  %v25842_v50 = vpop.f32.mrf.mxu0  ;;  %v20224_v46 = vld [vmem:[%s25074_s18 + $0x150] sm:$0xff] }
 0x13c   : > { %22869 = vmatpush3.msra.mxu1 %v530_v47  ;;  %v25844_v51 = vpop.f32.mrf.mxu1  ;;  %22859 = vmatprep.subr.mxu0 %v25032_v0 }
 0x13d   : > { %22870 = vmatprep.subr.mxu1 %v25032_v0  ;;  %22860 = vmatpush3.msra.mxu0 %v525_v48  ;;  %v22427_v54 = vpop.f32.mrf.mxu0 }
 0x13e   : > { %22871 = vmatpush3.msra.mxu1 %v529_v49  ;;  %v22438_v55 = vpop.f32.mrf.mxu1  ;;  %22861 = vmatprep.subr.mxu0 %v25032_v0  ;;  %v20222_v54 = vld [vmem:[%s25074_s18 + $0x140] sm:$0xff] }
 0x13f   : > { %22872 = vmatprep.subr.mxu1 %v25032_v0  ;;  %22862 = vmatpush3.msra.mxu0 %v524_v52  ;;  %v20229_v55 = vld [vmem:[%s25074_s18 + $0x1b8] sm:$0xff] }
 0x140   : > { %22873 = vmatpush3.msra.mxu1 %v528_v53  ;;  %22863 = vmatprep.subr.mxu0 %v25032_v0  ;;  %v20218_v53 = vld [vmem:[%s25074_s18 + $0xe0] sm:$0xff] }
 0x141   : > { %22874 = vmatprep.subr.mxu1 %v25032_v0  ;;  %22864 = vmatpush3.msra.mxu0 %v523_v56  ;;  %v20233_v56 = vld [vmem:[%s25074_s18 + $0x218] sm:$0xff] }
 0x142   : > { %22865 = vmatprep.mubr.msk.f32.mxu0 %vm25033_vm0, %v25032_v0  ;;  %22875 = vmatpush3.msra.mxu1 %v527_v61  ;;  %v20228_v61 = vld [vmem:[%s25074_s18 + $0x1b0] sm:$0xff] }
 0x143   : > { %22876 = vmatprep.mubr.msk.f32.mxu1 %vm25033_vm0, %v25032_v0  ;;  %22866 = vmatmul.mubr.msk.f32.vlgmr.msra.gmra.mxu0 %vm539_vm1, %v279_v62  ;;  %v20232_v62 = vld [vmem:[%s25074_s18 + $0x210] sm:$0xff] }
 0x144   : > { %22877 = vmatmul.mubr.msk.f32.vlgmr.msra.gmra.mxu1 %vm539_vm1, %v280_v63  ;;  %22879 = vmatprep.subr.mxu0 %v25032_v0 }
 0x145   : > { %22890 = vmatprep.subr.mxu1 %v25032_v0  ;;  %22880 = vmatpush3.msra.mxu0 %v534_v1  ;;  %v25870_v5 = vpop.f32.mrf.mxu0 }
 0x146   : > { %22891 = vmatpush3.msra.mxu1 %v538_v2  ;;  %v25872_v6 = vpop.f32.mrf.mxu1  ;;  %22881 = vmatprep.subr.mxu0 %v25032_v0 }
 0x147   : > { %22892 = vmatprep.subr.mxu1 %v25032_v0  ;;  %22882 = vmatpush3.msra.mxu0 %v533_v3  ;;  %v22449_v11 = vpop.f32.mrf.mxu0 }
 0x148   : > { %22893 = vmatpush3.msra.mxu1 %v537_v4  ;;  %v22460_v14 = vpop.f32.mrf.mxu1  ;;  %22883 = vmatprep.subr.mxu0 %v25032_v0  ;;  %v20226_v4 = vld [vmem:[%s25074_s18 + $0x1a0] sm:$0xff]  ;;  %v20241_v11 = vld [vmem:[%s25074_s18 + $0x2d8] sm:$0xff] }
 0x149   : > { %22894 = vmatprep.subr.mxu1 %v25032_v0  ;;  %22884 = vmatpush3.msra.mxu0 %v532_v7  ;;  %v20230_v7 = vld [vmem:[%s25074_s18 + $0x200] sm:$0xff]  ;;  %v20236_v14 = vld [vmem:[%s25074_s18 + $0x270] sm:$0xff] }
 0x14a   : > { %22895 = vmatpush3.msra.mxu1 %v536_v8  ;;  %22885 = vmatprep.subr.mxu0 %v25032_v0  ;;  %v20237_v8 = vld [vmem:[%s25074_s18 + $0x278] sm:$0xff] }
 0x14b   : > { %22896 = vmatprep.subr.mxu1 %v25032_v0  ;;  %22886 = vmatpush3.msra.mxu0 %v531_v15  ;;  %v20240_v15 = vld [vmem:[%s25074_s18 + $0x2d0] sm:$0xff] }
 0x14c   : > { %22887 = vmatprep.mubr.msk.f32.mxu0 %vm25033_vm0, %v25032_v0  ;;  %22897 = vmatpush3.msra.mxu1 %v535_v18 }
 0x14d   : > { %22898 = vmatprep.mubr.msk.f32.mxu1 %vm25033_vm0, %v25032_v0  ;;  %22888 = vmatmul.mubr.msk.f32.vlgmr.msra.gmra.mxu0 %vm539_vm1, %v281_v19 }
 0x14e   : > { %22899 = vmatmul.mubr.msk.f32.vlgmr.msra.gmra.mxu1 %vm539_vm1, %v282_v20  ;;  %22901 = vmatprep.subr.mxu0 %v25032_v0 }
 0x14f   : > { %22912 = vmatprep.subr.mxu1 %v25032_v0  ;;  %22902 = vmatpush3.msra.mxu0 %v20213_v21  ;;  %v25898_v27 = vpop.f32.mrf.mxu0 }
 0x150   : > { %22913 = vmatpush3.msra.mxu1 %v20217_v22  ;;  %v25900_v28 = vpop.f32.mrf.mxu1  ;;  %22903 = vmatprep.subr.mxu0 %v25032_v0  ;;  %v20234_v22 = vld [vmem:[%s25074_s18 + $0x260] sm:$0xff] }
 0x151   : > { %22914 = vmatprep.subr.mxu1 %v25032_v0  ;;  %22904 = vmatpush3.msra.mxu0 %v20212_v23  ;;  %v22471_v35 = vpop.f32.mrf.mxu0  ;;  %v20238_v23 = vld [vmem:[%s25074_s18 + $0x2c0] sm:$0xff] }
 0x152   : > { %22915 = vmatpush3.msra.mxu1 %v20216_v24  ;;  %v22482_v36 = vpop.f32.mrf.mxu1  ;;  %22905 = vmatprep.subr.mxu0 %v25032_v0  ;;  %v20245_v24 = vld [vmem:[%s25074_s18 + $0x338] sm:$0xff]  ;;  %v20248_v35 = vld [vmem:[%s25074_s18 + $0x390] sm:$0xff] }
 0x153   : > { %22916 = vmatprep.subr.mxu1 %v25032_v0  ;;  %22906 = vmatpush3.msra.mxu0 %v20211_v29  ;;  %v20249_v29 = vld [vmem:[%s25074_s18 + $0x398] sm:$0xff] }
 0x154   : > { %22917 = vmatpush3.msra.mxu1 %v20215_v34  ;;  %22907 = vmatprep.subr.mxu0 %v25032_v0  ;;  %v20244_v34 = vld [vmem:[%s25074_s18 + $0x330] sm:$0xff] }
 0x155   : > { %22918 = vmatprep.subr.mxu1 %v25032_v0  ;;  %22908 = vmatpush3.msra.mxu0 %v20210_v37 }
 0x156   : > { %22909 = vmatprep.mubr.msk.f32.mxu0 %vm25033_vm0, %v25032_v0  ;;  %22919 = vmatpush3.msra.mxu1 %v20214_v38 }
 0x157   : > { %22920 = vmatprep.mubr.msk.f32.mxu1 %vm25033_vm0, %v25032_v0  ;;  %22910 = vmatmul.mubr.msk.f32.vlgmr.msra.gmra.mxu0 %vm539_vm1, %v25562_v16  ;;  %v20219_v16 = vld [vmem:[%s25074_s18 + $0xe8] sm:$0xff] }
 0x158   : > { %22921 = vmatmul.mubr.msk.f32.vlgmr.msra.gmra.mxu1 %vm539_vm1, %v25564_v17  ;;  %22923 = vmatprep.subr.mxu0 %v25032_v0  ;;  %v20223_v17 = vld [vmem:[%s25074_s18 + $0x148] sm:$0xff] }
 0x159   : > { %22934 = vmatprep.subr.mxu1 %v25032_v0  ;;  %22924 = vmatpush3.msra.mxu0 %v20221_v39  ;;  %v25926_v47 = vpop.f32.mrf.mxu0 }
 0x15a   : > { %22935 = vmatpush3.msra.mxu1 %v20225_v40  ;;  %v25928_v48 = vpop.f32.mrf.mxu1  ;;  %22925 = vmatprep.subr.mxu0 %v25032_v0  ;;  %v20242_v40 = vld [vmem:[%s25074_s18 + $0x320] sm:$0xff] }
 0x15b   : > { %22936 = vmatprep.subr.mxu1 %v25032_v0  ;;  %22926 = vmatpush3.msra.mxu0 %v20220_v43  ;;  %v22493_v49 = vpop.f32.mrf.mxu0  ;;  %v20246_v43 = vld [vmem:[%s25074_s18 + $0x380] sm:$0xff] }
 0x15c   : > { %22937 = vmatpush3.msra.mxu1 %v20224_v46  ;;  %v22504_v52 = vpop.f32.mrf.mxu1  ;;  %22927 = vmatprep.subr.mxu0 %v25032_v0  ;;  %v20253_v46 = vld [vmem:[%s25074_s18 + $0x3f8] sm:$0xff]  ;;  %v20256_v49 = vld [vmem:[%s25074_s18 + $0x450] sm:$0xff] }
 0x15d   : > { %22938 = vmatprep.subr.mxu1 %v25032_v0  ;;  %22928 = vmatpush3.msra.mxu0 %v20219_v16  ;;  %v20257_v16 = vld [vmem:[%s25074_s18 + $0x458] sm:$0xff] }
 0x15e   : > { %22939 = vmatpush3.msra.mxu1 %v20223_v17  ;;  %22929 = vmatprep.subr.mxu0 %v25032_v0  ;;  %v20252_v17 = vld [vmem:[%s25074_s18 + $0x3f0] sm:$0xff] }
 0x15f   : > { %22940 = vmatprep.subr.mxu1 %v25032_v0  ;;  %22930 = vmatpush3.msra.mxu0 %v20218_v53 }
 0x160   : > { %22931 = vmatprep.mubr.msk.f32.mxu0 %vm25033_vm0, %v25032_v0  ;;  %22941 = vmatpush3.msra.mxu1 %v20222_v54 }
 0x161   : > { %22942 = vmatprep.mubr.msk.f32.mxu1 %vm25033_vm0, %v25032_v0  ;;  %22932 = vmatmul.mubr.msk.f32.vlgmr.msra.gmra.mxu0 %vm539_vm1, %v25590_v30  ;;  %v20227_v30 = vld [vmem:[%s25074_s18 + $0x1a8] sm:$0xff] }
 0x162   : > { %22943 = vmatmul.mubr.msk.f32.vlgmr.msra.gmra.mxu1 %vm539_vm1, %v25592_v31  ;;  %22945 = vmatprep.subr.mxu0 %v25032_v0  ;;  %v20231_v31 = vld [vmem:[%s25074_s18 + $0x208] sm:$0xff] }
 0x163   : > { %22956 = vmatprep.subr.mxu1 %v25032_v0  ;;  %22946 = vmatpush3.msra.mxu0 %v20229_v55  ;;  %v25954_v63 = vpop.f32.mrf.mxu0 }
 0x164   : > { %22957 = vmatpush3.msra.mxu1 %v20233_v56  ;;  %v25956_v1 = vpop.f32.mrf.mxu1  ;;  %22947 = vmatprep.subr.mxu0 %v25032_v0  ;;  %v20250_v56 = vld [vmem:[%s25074_s18 + $0x3e0] sm:$0xff] }
 0x165   : > { %22958 = vmatprep.subr.mxu1 %v25032_v0  ;;  %22948 = vmatpush3.msra.mxu0 %v20228_v61  ;;  %v22515_v2 = vpop.f32.mrf.mxu0  ;;  %v20254_v61 = vld [vmem:[%s25074_s18 + $0x440] sm:$0xff] }
 0x166   : > { %22959 = vmatpush3.msra.mxu1 %v20232_v62  ;;  %v22526_v3 = vpop.f32.mrf.mxu1  ;;  %22949 = vmatprep.subr.mxu0 %v25032_v0  ;;  %v20261_v62 = vld [vmem:[%s25074_s18 + $0x4b8] sm:$0xff]  ;;  %v20264_v2 = vld [vmem:[%s25074_s18 + $0x510] sm:$0xff] }
 0x167   : > { %22960 = vmatprep.subr.mxu1 %v25032_v0  ;;  %22950 = vmatpush3.msra.mxu0 %v20227_v30  ;;  %v20265_v30 = vld [vmem:[%s25074_s18 + $0x518] sm:$0xff] }
 0x168   : > { %22961 = vmatpush3.msra.mxu1 %v20231_v31  ;;  %22951 = vmatprep.subr.mxu0 %v25032_v0  ;;  %v20260_v31 = vld [vmem:[%s25074_s18 + $0x4b0] sm:$0xff] }
 0x169   : > { %22962 = vmatprep.subr.mxu1 %v25032_v0  ;;  %22952 = vmatpush3.msra.mxu0 %v20226_v4 }
 0x16a   : > { %22953 = vmatprep.mubr.msk.f32.mxu0 %vm25033_vm0, %v25032_v0  ;;  %22963 = vmatpush3.msra.mxu1 %v20230_v7 }
 0x16b   : > { %22964 = vmatprep.mubr.msk.f32.mxu1 %vm25033_vm0, %v25032_v0  ;;  %22954 = vmatmul.mubr.msk.f32.vlgmr.msra.gmra.mxu0 %vm539_vm1, %v25618_v44  ;;  %v20235_v44 = vld [vmem:[%s25074_s18 + $0x268] sm:$0xff] }
 0x16c   : > { %22965 = vmatmul.mubr.msk.f32.vlgmr.msra.gmra.mxu1 %vm539_vm1, %v25620_v45  ;;  %22967 = vmatprep.subr.mxu0 %v25032_v0  ;;  %v20239_v45 = vld [vmem:[%s25074_s18 + $0x2c8] sm:$0xff] }
 0x16d   : > { %22978 = vmatprep.subr.mxu1 %v25032_v0  ;;  %22968 = vmatpush3.msra.mxu0 %v20237_v8  ;;  %v25982_v18 = vpop.f32.mrf.mxu0 }
 0x16e   : > { %22979 = vmatpush3.msra.mxu1 %v20241_v11  ;;  %v25984_v19 = vpop.f32.mrf.mxu1  ;;  %22969 = vmatprep.subr.mxu0 %v25032_v0  ;;  %v20258_v11 = vld [vmem:[%s25074_s18 + $0x4a0] sm:$0xff] }
 0x16f   : > { %22980 = vmatprep.subr.mxu1 %v25032_v0  ;;  %22970 = vmatpush3.msra.mxu0 %v20236_v14  ;;  %v22537_v20 = vpop.f32.mrf.mxu0  ;;  %v20262_v14 = vld [vmem:[%s25074_s18 + $0x500] sm:$0xff] }
 0x170   : > { %22981 = vmatpush3.msra.mxu1 %v20240_v15  ;;  %v22548_v21 = vpop.f32.mrf.mxu1  ;;  %22971 = vmatprep.subr.mxu0 %v25032_v0  ;;  %v20269_v15 = vld [vmem:[%s25074_s18 + $0x578] sm:$0xff]  ;;  %v20272_v20 = vld [vmem:[%s25074_s18 + $0x5d0] sm:$0xff] }
 0x171   : > { %22982 = vmatprep.subr.mxu1 %v25032_v0  ;;  %22972 = vmatpush3.msra.mxu0 %v20235_v44  ;;  %v20273_v44 = vld [vmem:[%s25074_s18 + $0x5d8] sm:$0xff] }
 0x172   : > { %22983 = vmatpush3.msra.mxu1 %v20239_v45  ;;  %22973 = vmatprep.subr.mxu0 %v25032_v0  ;;  %v20268_v45 = vld [vmem:[%s25074_s18 + $0x570] sm:$0xff] }
 0x173   : > { %22984 = vmatprep.subr.mxu1 %v25032_v0  ;;  %22974 = vmatpush3.msra.mxu0 %v20234_v22 }
 0x174   : > { %22975 = vmatprep.mubr.msk.f32.mxu0 %vm25033_vm0, %v25032_v0  ;;  %22985 = vmatpush3.msra.mxu1 %v20238_v23 }
 0x175   : > { %22986 = vmatprep.mubr.msk.f32.mxu1 %vm25033_vm0, %v25032_v0  ;;  %22976 = vmatmul.mubr.msk.f32.vlgmr.msra.gmra.mxu0 %vm539_vm1, %v25646_v58  ;;  %v20243_v58 = vld [vmem:[%s25074_s18 + $0x328] sm:$0xff] }
 0x176   : > { %22987 = vmatmul.mubr.msk.f32.vlgmr.msra.gmra.mxu1 %vm539_vm1, %v25648_v59  ;;  %22989 = vmatprep.subr.mxu0 %v25032_v0  ;;  %v20247_v59 = vld [vmem:[%s25074_s18 + $0x388] sm:$0xff] }
 0x177   : > { %23000 = vmatprep.subr.mxu1 %v25032_v0  ;;  %22990 = vmatpush3.msra.mxu0 %v20245_v24  ;;  %v26010_v36 = vpop.f32.mrf.mxu0 }
 0x178   : > { %23001 = vmatpush3.msra.mxu1 %v20249_v29  ;;  %v26012_v37 = vpop.f32.mrf.mxu1  ;;  %22991 = vmatprep.subr.mxu0 %v25032_v0  ;;  %v20266_v29 = vld [vmem:[%s25074_s18 + $0x560] sm:$0xff] }
 0x179   : > { %23002 = vmatprep.subr.mxu1 %v25032_v0  ;;  %22992 = vmatpush3.msra.mxu0 %v20244_v34  ;;  %v22559_v38 = vpop.f32.mrf.mxu0  ;;  %v20270_v34 = vld [vmem:[%s25074_s18 + $0x5c0] sm:$0xff] }
 0x17a   : > { %23003 = vmatpush3.msra.mxu1 %v20248_v35  ;;  %v22570_v39 = vpop.f32.mrf.mxu1  ;;  %22993 = vmatprep.subr.mxu0 %v25032_v0  ;;  %v20277_v35 = vld [vmem:[%s25074_s18 + $0x638] sm:$0xff]  ;;  %v20280_v38 = vld [vmem:[%s25074_s18 + $0x690] sm:$0xff] }
 0x17b   : > { %23004 = vmatprep.subr.mxu1 %v25032_v0  ;;  %22994 = vmatpush3.msra.mxu0 %v20243_v58  ;;  %v20281_v58 = vld [vmem:[%s25074_s18 + $0x698] sm:$0xff] }
 0x17c   : > { %23005 = vmatpush3.msra.mxu1 %v20247_v59  ;;  %22995 = vmatprep.subr.mxu0 %v25032_v0  ;;  %v20276_v59 = vld [vmem:[%s25074_s18 + $0x630] sm:$0xff] }
 0x17d   : > { %23006 = vmatprep.subr.mxu1 %v25032_v0  ;;  %22996 = vmatpush3.msra.mxu0 %v20242_v40 }
 0x17e   : > { %22997 = vmatprep.mubr.msk.f32.mxu0 %vm25033_vm0, %v25032_v0  ;;  %23007 = vmatpush3.msra.mxu1 %v20246_v43 }
 0x17f   : > { %23008 = vmatprep.mubr.msk.f32.mxu1 %vm25033_vm0, %v25032_v0  ;;  %22998 = vmatmul.mubr.msk.f32.vlgmr.msra.gmra.mxu0 %vm539_vm1, %v25674_v9  ;;  %v20251_v9 = vld [vmem:[%s25074_s18 + $0x3e8] sm:$0xff] }
 0x180   : > { %23009 = vmatmul.mubr.msk.f32.vlgmr.msra.gmra.mxu1 %vm539_vm1, %v25676_v10  ;;  %23011 = vmatprep.subr.mxu0 %v25032_v0  ;;  %v20255_v10 = vld [vmem:[%s25074_s18 + $0x448] sm:$0xff] }
 0x181   : > { %23022 = vmatprep.subr.mxu1 %v25032_v0  ;;  %23012 = vmatpush3.msra.mxu0 %v20253_v46  ;;  %v26038_v52 = vpop.f32.mrf.mxu0 }
 0x182   : > { %23023 = vmatpush3.msra.mxu1 %v20257_v16  ;;  %v26040_v53 = vpop.f32.mrf.mxu1  ;;  %23013 = vmatprep.subr.mxu0 %v25032_v0  ;;  %v20274_v16 = vld [vmem:[%s25074_s18 + $0x620] sm:$0xff] }
 0x183   : > { %23024 = vmatprep.subr.mxu1 %v25032_v0  ;;  %23014 = vmatpush3.msra.mxu0 %v20252_v17  ;;  %v22581_v54 = vpop.f32.mrf.mxu0  ;;  %v20278_v17 = vld [vmem:[%s25074_s18 + $0x680] sm:$0xff] }
 0x184   : > { %23025 = vmatpush3.msra.mxu1 %v20256_v49  ;;  %v22592_v55 = vpop.f32.mrf.mxu1  ;;  %23015 = vmatprep.subr.mxu0 %v25032_v0  ;;  %v20285_v49 = vld [vmem:[%s25074_s18 + $0x6f8] sm:$0xff]  ;;  %v20288_v54 = vld [vmem:[%s25074_s18 + $0x750] sm:$0xff] }
 0x185   : > { %23026 = vmatprep.subr.mxu1 %v25032_v0  ;;  %23016 = vmatpush3.msra.mxu0 %v20251_v9  ;;  %v20289_v9 = vld [vmem:[%s25074_s18 + $0x758] sm:$0xff] }
 0x186   : > { %23027 = vmatpush3.msra.mxu1 %v20255_v10  ;;  %23017 = vmatprep.subr.mxu0 %v25032_v0  ;;  %v20284_v10 = vld [vmem:[%s25074_s18 + $0x6f0] sm:$0xff] }
 0x187   : > { %23028 = vmatprep.subr.mxu1 %v25032_v0  ;;  %23018 = vmatpush3.msra.mxu0 %v20250_v56 }
 0x188   : > { %23019 = vmatprep.mubr.msk.f32.mxu0 %vm25033_vm0, %v25032_v0  ;;  %23029 = vmatpush3.msra.mxu1 %v20254_v61 }
 0x189   : > { %23030 = vmatprep.mubr.msk.f32.mxu1 %vm25033_vm0, %v25032_v0  ;;  %23020 = vmatmul.mubr.msk.f32.vlgmr.msra.gmra.mxu0 %vm539_vm1, %v25702_v25  ;;  %v20259_v25 = vld [vmem:[%s25074_s18 + $0x4a8] sm:$0xff] }
 0x18a   : > { %23031 = vmatmul.mubr.msk.f32.vlgmr.msra.gmra.mxu1 %vm539_vm1, %v25704_v26  ;;  %23033 = vmatprep.subr.mxu0 %v25032_v0  ;;  %v20263_v26 = vld [vmem:[%s25074_s18 + $0x508] sm:$0xff] }
 0x18b   : > { %23044 = vmatprep.subr.mxu1 %v25032_v0  ;;  %23034 = vmatpush3.msra.mxu0 %v20261_v62  ;;  %v26066_v3 = vpop.f32.mrf.mxu0 }
 0x18c   : > { %23045 = vmatpush3.msra.mxu1 %v20265_v30  ;;  %v26068_v4 = vpop.f32.mrf.mxu1  ;;  %23035 = vmatprep.subr.mxu0 %v25032_v0  ;;  %v20282_v30 = vld [vmem:[%s25074_s18 + $0x6e0] sm:$0xff] }
 0x18d   : > { %23046 = vmatprep.subr.mxu1 %v25032_v0  ;;  %23036 = vmatpush3.msra.mxu0 %v20260_v31  ;;  %v22603_v7 = vpop.f32.mrf.mxu0  ;;  %v20286_v31 = vld [vmem:[%s25074_s18 + $0x740] sm:$0xff] }
 0x18e   : > { %23047 = vmatpush3.msra.mxu1 %v20264_v2  ;;  %v22614_v8 = vpop.f32.mrf.mxu1  ;;  %23037 = vmatprep.subr.mxu0 %v25032_v0  ;;  %v20293_v2 = vld [vmem:[%s25074_s18 + $0x7b8] sm:$0xff]  ;;  %v20296_v7 = vld [vmem:[%s25074_s18 + $0x810] sm:$0xff] }
 0x18f   : > { %23048 = vmatprep.subr.mxu1 %v25032_v0  ;;  %23038 = vmatpush3.msra.mxu0 %v20259_v25  ;;  %v20297_v25 = vld [vmem:[%s25074_s18 + $0x818] sm:$0xff] }
 0x190   : > { %23049 = vmatpush3.msra.mxu1 %v20263_v26  ;;  %23039 = vmatprep.subr.mxu0 %v25032_v0  ;;  %v20292_v26 = vld [vmem:[%s25074_s18 + $0x7b0] sm:$0xff] }
 0x191   : > { %23050 = vmatprep.subr.mxu1 %v25032_v0  ;;  %23040 = vmatpush3.msra.mxu0 %v20258_v11 }
 0x192   : > { %23041 = vmatprep.mubr.msk.f32.mxu0 %vm25033_vm0, %v25032_v0  ;;  %23051 = vmatpush3.msra.mxu1 %v20262_v14 }
 0x193   : > { %23052 = vmatprep.mubr.msk.f32.mxu1 %vm25033_vm0, %v25032_v0  ;;  %23042 = vmatmul.mubr.msk.f32.vlgmr.msra.gmra.mxu0 %vm539_vm1, %v25730_v41  ;;  %v20267_v41 = vld [vmem:[%s25074_s18 + $0x568] sm:$0xff] }
 0x194   : > { %23053 = vmatmul.mubr.msk.f32.vlgmr.msra.gmra.mxu1 %vm539_vm1, %v25732_v42  ;;  %23055 = vmatprep.subr.mxu0 %v25032_v0  ;;  %v20271_v42 = vld [vmem:[%s25074_s18 + $0x5c8] sm:$0xff] }
 0x195   : > { %23066 = vmatprep.subr.mxu1 %v25032_v0  ;;  %23056 = vmatpush3.msra.mxu0 %v20269_v15  ;;  %v26094_v21 = vpop.f32.mrf.mxu0 }
 0x196   : > { %23067 = vmatpush3.msra.mxu1 %v20273_v44  ;;  %v26096_v22 = vpop.f32.mrf.mxu1  ;;  %23057 = vmatprep.subr.mxu0 %v25032_v0  ;;  %v20290_v44 = vld [vmem:[%s25074_s18 + $0x7a0] sm:$0xff] }
 0x197   : > { %23068 = vmatprep.subr.mxu1 %v25032_v0  ;;  %23058 = vmatpush3.msra.mxu0 %v20268_v45  ;;  %v22625_v23 = vpop.f32.mrf.mxu0  ;;  %v20294_v45 = vld [vmem:[%s25074_s18 + $0x800] sm:$0xff] }
 0x198   : > { %23069 = vmatpush3.msra.mxu1 %v20272_v20  ;;  %v22636_v24 = vpop.f32.mrf.mxu1  ;;  %23059 = vmatprep.subr.mxu0 %v25032_v0  ;;  %v20301_v20 = vld [vmem:[%s25074_s18 + $0x878] sm:$0xff]  ;;  %v20304_v23 = vld [vmem:[%s25074_s18 + $0x8d0] sm:$0xff] }
 0x199   : > { %23070 = vmatprep.subr.mxu1 %v25032_v0  ;;  %23060 = vmatpush3.msra.mxu0 %v20267_v41  ;;  %v20305_v41 = vld [vmem:[%s25074_s18 + $0x8d8] sm:$0xff] }
 0x19a   : > { %23071 = vmatpush3.msra.mxu1 %v20271_v42  ;;  %23061 = vmatprep.subr.mxu0 %v25032_v0  ;;  %v20300_v42 = vld [vmem:[%s25074_s18 + $0x870] sm:$0xff] }
 0x19b   : > { %23072 = vmatprep.subr.mxu1 %v25032_v0  ;;  %23062 = vmatpush3.msra.mxu0 %v20266_v29 }
 0x19c   : > { %23063 = vmatprep.mubr.msk.f32.mxu0 %vm25033_vm0, %v25032_v0  ;;  %23073 = vmatpush3.msra.mxu1 %v20270_v34 }
 0x19d   : > { %23074 = vmatprep.mubr.msk.f32.mxu1 %vm25033_vm0, %v25032_v0  ;;  %23064 = vmatmul.mubr.msk.f32.vlgmr.msra.gmra.mxu0 %vm539_vm1, %v25758_v57  ;;  %v20275_v57 = vld [vmem:[%s25074_s18 + $0x628] sm:$0xff] }
 0x19e   : > { %23075 = vmatmul.mubr.msk.f32.vlgmr.msra.gmra.mxu1 %vm539_vm1, %v25760_v60  ;;  %23077 = vmatprep.subr.mxu0 %v25032_v0  ;;  %v20279_v60 = vld [vmem:[%s25074_s18 + $0x688] sm:$0xff] }
 0x19f   : > { %23088 = vmatprep.subr.mxu1 %v25032_v0  ;;  %23078 = vmatpush3.msra.mxu0 %v20277_v35  ;;  %v26122_v39 = vpop.f32.mrf.mxu0 }
 0x1a0   : > { %23089 = vmatpush3.msra.mxu1 %v20281_v58  ;;  %v26124_v40 = vpop.f32.mrf.mxu1  ;;  %23079 = vmatprep.subr.mxu0 %v25032_v0  ;;  %v20298_v58 = vld [vmem:[%s25074_s18 + $0x860] sm:$0xff] }
 0x1a1   : > { %23090 = vmatprep.subr.mxu1 %v25032_v0  ;;  %23080 = vmatpush3.msra.mxu0 %v20276_v59  ;;  %v22647_v43 = vpop.f32.mrf.mxu0  ;;  %v20302_v59 = vld [vmem:[%s25074_s18 + $0x8c0] sm:$0xff] }
 0x1a2   : > { %23091 = vmatpush3.msra.mxu1 %v20280_v38  ;;  %v22658_v46 = vpop.f32.mrf.mxu1  ;;  %23081 = vmatprep.subr.mxu0 %v25032_v0  ;;  %v20309_v38 = vld [vmem:[%s25074_s18 + $0x938] sm:$0xff]  ;;  %v20312_v43 = vld [vmem:[%s25074_s18 + $0x990] sm:$0xff] }
 0x1a3   : > { %23092 = vmatprep.subr.mxu1 %v25032_v0  ;;  %23082 = vmatpush3.msra.mxu0 %v20275_v57  ;;  %v20313_v57 = vld [vmem:[%s25074_s18 + $0x998] sm:$0xff] }
 0x1a4   : > { %23093 = vmatpush3.msra.mxu1 %v20279_v60  ;;  %23083 = vmatprep.subr.mxu0 %v25032_v0  ;;  %v20308_v60 = vld [vmem:[%s25074_s18 + $0x930] sm:$0xff] }
 0x1a5   : > { %23094 = vmatprep.subr.mxu1 %v25032_v0  ;;  %23084 = vmatpush3.msra.mxu0 %v20274_v16 }
 0x1a6   : > { %23085 = vmatprep.mubr.msk.f32.mxu0 %vm25033_vm0, %v25032_v0  ;;  %23095 = vmatpush3.msra.mxu1 %v20278_v17 }
 0x1a7   : > { %23096 = vmatprep.mubr.msk.f32.mxu1 %vm25033_vm0, %v25032_v0  ;;  %23086 = vmatmul.mubr.msk.f32.vlgmr.msra.gmra.mxu0 %vm539_vm1, %v25786_v12  ;;  %v20283_v12 = vld [vmem:[%s25074_s18 + $0x6e8] sm:$0xff] }
 0x1a8   : > { %23097 = vmatmul.mubr.msk.f32.vlgmr.msra.gmra.mxu1 %vm539_vm1, %v25788_v13  ;;  %23099 = vmatprep.subr.mxu0 %v25032_v0  ;;  %v20287_v13 = vld [vmem:[%s25074_s18 + $0x748] sm:$0xff] }
 0x1a9   : > { %23110 = vmatprep.subr.mxu1 %v25032_v0  ;;  %23100 = vmatpush3.msra.mxu0 %v20285_v49  ;;  %v26150_v55 = vpop.f32.mrf.mxu0 }
 0x1aa   : > { %23111 = vmatpush3.msra.mxu1 %v20289_v9  ;;  %v26152_v56 = vpop.f32.mrf.mxu1  ;;  %23101 = vmatprep.subr.mxu0 %v25032_v0  ;;  %v20306_v9 = vld [vmem:[%s25074_s18 + $0x920] sm:$0xff] }
 0x1ab   : > { %23112 = vmatprep.subr.mxu1 %v25032_v0  ;;  %23102 = vmatpush3.msra.mxu0 %v20284_v10  ;;  %v22669_v61 = vpop.f32.mrf.mxu0  ;;  %v20310_v10 = vld [vmem:[%s25074_s18 + $0x980] sm:$0xff] }
 0x1ac   : > { %23113 = vmatpush3.msra.mxu1 %v20288_v54  ;;  %v22680_v62 = vpop.f32.mrf.mxu1  ;;  %23103 = vmatprep.subr.mxu0 %v25032_v0  ;;  %v20317_v54 = vld [vmem:[%s25074_s18 + $0x9f8] sm:$0xff]  ;;  %v20320_v61 = vld [vmem:[%s25074_s18 + $0xa50] sm:$0xff] }
 0x1ad   : > { %23114 = vmatprep.subr.mxu1 %v25032_v0  ;;  %23104 = vmatpush3.msra.mxu0 %v20283_v12  ;;  %v20321_v12 = vld [vmem:[%s25074_s18 + $0xa58] sm:$0xff] }
 0x1ae   : > { %23115 = vmatpush3.msra.mxu1 %v20287_v13  ;;  %23105 = vmatprep.subr.mxu0 %v25032_v0  ;;  %v20316_v13 = vld [vmem:[%s25074_s18 + $0x9f0] sm:$0xff] }
 0x1af   : > { %23116 = vmatprep.subr.mxu1 %v25032_v0  ;;  %23106 = vmatpush3.msra.mxu0 %v20282_v30 }
 0x1b0   : > { %23107 = vmatprep.mubr.msk.f32.mxu0 %vm25033_vm0, %v25032_v0  ;;  %23117 = vmatpush3.msra.mxu1 %v20286_v31 }
 0x1b1   : > { %23118 = vmatprep.mubr.msk.f32.mxu1 %vm25033_vm0, %v25032_v0  ;;  %23108 = vmatmul.mubr.msk.f32.vlgmr.msra.gmra.mxu0 %vm539_vm1, %v25814_v32  ;;  %v20291_v32 = vld [vmem:[%s25074_s18 + $0x7a8] sm:$0xff] }
 0x1b2   : > { %23119 = vmatmul.mubr.msk.f32.vlgmr.msra.gmra.mxu1 %vm539_vm1, %v25816_v33  ;;  %23121 = vmatprep.subr.mxu0 %v25032_v0  ;;  %v20295_v33 = vld [vmem:[%s25074_s18 + $0x808] sm:$0xff] }
 0x1b3   : > { %23132 = vmatprep.subr.mxu1 %v25032_v0  ;;  %23122 = vmatpush3.msra.mxu0 %v20293_v2  ;;  %v26178_v8 = vpop.f32.mrf.mxu0 }
 0x1b4   : > { %23133 = vmatpush3.msra.mxu1 %v20297_v25  ;;  %v26180_v11 = vpop.f32.mrf.mxu1  ;;  %23123 = vmatprep.subr.mxu0 %v25032_v0  ;;  %v20314_v25 = vld [vmem:[%s25074_s18 + $0x9e0] sm:$0xff] }
 0x1b5   : > { %23134 = vmatprep.subr.mxu1 %v25032_v0  ;;  %23124 = vmatpush3.msra.mxu0 %v20292_v26  ;;  %v22691_v14 = vpop.f32.mrf.mxu0  ;;  %v20318_v26 = vld [vmem:[%s25074_s18 + $0xa40] sm:$0xff] }
 0x1b6   : > { %23135 = vmatpush3.msra.mxu1 %v20296_v7  ;;  %v22702_v15 = vpop.f32.mrf.mxu1  ;;  %23125 = vmatprep.subr.mxu0 %v25032_v0  ;;  %v20325_v7 = vld [vmem:[%s25074_s18 + $0xab8] sm:$0xff]  ;;  %v20328_v14 = vld [vmem:[%s25074_s18 + $0xb10] sm:$0xff] }
 0x1b7   : > { %23136 = vmatprep.subr.mxu1 %v25032_v0  ;;  %23126 = vmatpush3.msra.mxu0 %v20291_v32  ;;  %v20329_v32 = vld [vmem:[%s25074_s18 + $0xb18] sm:$0xff] }
 0x1b8   : > { %23137 = vmatpush3.msra.mxu1 %v20295_v33  ;;  %23127 = vmatprep.subr.mxu0 %v25032_v0  ;;  %v20324_v33 = vld [vmem:[%s25074_s18 + $0xab0] sm:$0xff] }
 0x1b9   : > { %23138 = vmatprep.subr.mxu1 %v25032_v0  ;;  %23128 = vmatpush3.msra.mxu0 %v20290_v44 }
 0x1ba   : > { %23129 = vmatprep.mubr.msk.f32.mxu0 %vm25033_vm0, %v25032_v0  ;;  %23139 = vmatpush3.msra.mxu1 %v20294_v45 }
 0x1bb   : > { %23140 = vmatprep.mubr.msk.f32.mxu1 %vm25033_vm0, %v25032_v0  ;;  %23130 = vmatmul.mubr.msk.f32.vlgmr.msra.gmra.mxu0 %vm539_vm1, %v25842_v50  ;;  %v20299_v50 = vld [vmem:[%s25074_s18 + $0x868] sm:$0xff] }
 0x1bc   : > { %23141 = vmatmul.mubr.msk.f32.vlgmr.msra.gmra.mxu1 %vm539_vm1, %v25844_v51  ;;  %23143 = vmatprep.subr.mxu0 %v25032_v0  ;;  %v20303_v51 = vld [vmem:[%s25074_s18 + $0x8c8] sm:$0xff] }
 0x1bd   : > { %23154 = vmatprep.subr.mxu1 %v25032_v0  ;;  %23144 = vmatpush3.msra.mxu0 %v20301_v20  ;;  %v26206_v24 = vpop.f32.mrf.mxu0 }
 0x1be   : > { %23155 = vmatpush3.msra.mxu1 %v20305_v41  ;;  %v26208_v29 = vpop.f32.mrf.mxu1  ;;  %23145 = vmatprep.subr.mxu0 %v25032_v0  ;;  %v20322_v41 = vld [vmem:[%s25074_s18 + $0xaa0] sm:$0xff] }
 0x1bf   : > { %23156 = vmatprep.subr.mxu1 %v25032_v0  ;;  %23146 = vmatpush3.msra.mxu0 %v20300_v42  ;;  %v22713_v34 = vpop.f32.mrf.mxu0  ;;  %v20326_v42 = vld [vmem:[%s25074_s18 + $0xb00] sm:$0xff] }
 0x1c0   : > { %23157 = vmatpush3.msra.mxu1 %v20304_v23  ;;  %v22724_v35 = vpop.f32.mrf.mxu1  ;;  %23147 = vmatprep.subr.mxu0 %v25032_v0  ;;  %v20333_v23 = vld [vmem:[%s25074_s18 + $0xb78] sm:$0xff]  ;;  %v20336_v34 = vld [vmem:[%s25074_s18 + $0xbd0] sm:$0xff] }
 0x1c1   : > { %23158 = vmatprep.subr.mxu1 %v25032_v0  ;;  %23148 = vmatpush3.msra.mxu0 %v20299_v50  ;;  %v20337_v50 = vld [vmem:[%s25074_s18 + $0xbd8] sm:$0xff] }
 0x1c2   : > { %23159 = vmatpush3.msra.mxu1 %v20303_v51  ;;  %23149 = vmatprep.subr.mxu0 %v25032_v0  ;;  %v20332_v51 = vld [vmem:[%s25074_s18 + $0xb70] sm:$0xff] }
 0x1c3   : > { %23160 = vmatprep.subr.mxu1 %v25032_v0  ;;  %23150 = vmatpush3.msra.mxu0 %v20298_v58 }
 0x1c4   : > { %23151 = vmatprep.mubr.msk.f32.mxu0 %vm25033_vm0, %v25032_v0  ;;  %23161 = vmatpush3.msra.mxu1 %v20302_v59 }
 0x1c5   : > { %23162 = vmatprep.mubr.msk.f32.mxu1 %vm25033_vm0, %v25032_v0  ;;  %23152 = vmatmul.mubr.msk.f32.vlgmr.msra.gmra.mxu0 %vm539_vm1, %v25870_v5  ;;  %v20307_v5 = vld [vmem:[%s25074_s18 + $0x928] sm:$0xff] }
 0x1c6   : > { %23163 = vmatmul.mubr.msk.f32.vlgmr.msra.gmra.mxu1 %vm539_vm1, %v25872_v6  ;;  %23165 = vmatprep.subr.mxu0 %v25032_v0  ;;  %v20311_v6 = vld [vmem:[%s25074_s18 + $0x988] sm:$0xff] }
 0x1c7   : > { %23176 = vmatprep.subr.mxu1 %v25032_v0  ;;  %23166 = vmatpush3.msra.mxu0 %v20309_v38  ;;  %v26234_v46 = vpop.f32.mrf.mxu0 }
 0x1c8   : > { %23177 = vmatpush3.msra.mxu1 %v20313_v57  ;;  %v26236_v16 = vpop.f32.mrf.mxu1  ;;  %23167 = vmatprep.subr.mxu0 %v25032_v0  ;;  %v20330_v57 = vld [vmem:[%s25074_s18 + $0xb60] sm:$0xff] }
 0x1c9   : > { %23178 = vmatprep.subr.mxu1 %v25032_v0  ;;  %23168 = vmatpush3.msra.mxu0 %v20308_v60  ;;  %v22735_v17 = vpop.f32.mrf.mxu0  ;;  %v20334_v60 = vld [vmem:[%s25074_s18 + $0xbc0] sm:$0xff] }
 0x1ca   : > { %23179 = vmatpush3.msra.mxu1 %v20312_v43  ;;  %v22746_v49 = vpop.f32.mrf.mxu1  ;;  %23169 = vmatprep.subr.mxu0 %v25032_v0  ;;  %v20341_v43 = vld [vmem:[%s25074_s18 + $0xc38] sm:$0xff]  ;;  %v20344_v17 = vld [vmem:[%s25074_s18 + $0xc90] sm:$0xff] }
 0x1cb   : > { %23180 = vmatprep.subr.mxu1 %v25032_v0  ;;  %23170 = vmatpush3.msra.mxu0 %v20307_v5  ;;  %v20345_v5 = vld [vmem:[%s25074_s18 + $0xc98] sm:$0xff] }
 0x1cc   : > { %23181 = vmatpush3.msra.mxu1 %v20311_v6  ;;  %23171 = vmatprep.subr.mxu0 %v25032_v0  ;;  %v20340_v6 = vld [vmem:[%s25074_s18 + $0xc30] sm:$0xff] }
 0x1cd   : > { %23182 = vmatprep.subr.mxu1 %v25032_v0  ;;  %23172 = vmatpush3.msra.mxu0 %v20306_v9 }
 0x1ce   : > { %23173 = vmatprep.mubr.msk.f32.mxu0 %vm25033_vm0, %v25032_v0  ;;  %23183 = vmatpush3.msra.mxu1 %v20310_v10 }
 0x1cf   : > { %23184 = vmatprep.mubr.msk.f32.mxu1 %vm25033_vm0, %v25032_v0  ;;  %23174 = vmatmul.mubr.msk.f32.vlgmr.msra.gmra.mxu0 %vm539_vm1, %v25898_v27  ;;  %v20315_v27 = vld [vmem:[%s25074_s18 + $0x9e8] sm:$0xff] }
 0x1d0   : > { %23185 = vmatmul.mubr.msk.f32.vlgmr.msra.gmra.mxu1 %vm539_vm1, %v25900_v28  ;;  %23187 = vmatprep.subr.mxu0 %v25032_v0  ;;  %v20319_v28 = vld [vmem:[%s25074_s18 + $0xa48] sm:$0xff] }
 0x1d1   : > { %23198 = vmatprep.subr.mxu1 %v25032_v0  ;;  %23188 = vmatpush3.msra.mxu0 %v20317_v54  ;;  %v26262_v62 = vpop.f32.mrf.mxu0 }
 0x1d2   : > { %23199 = vmatpush3.msra.mxu1 %v20321_v12  ;;  %v26264_v30 = vpop.f32.mrf.mxu1  ;;  %23189 = vmatprep.subr.mxu0 %v25032_v0  ;;  %v20338_v12 = vld [vmem:[%s25074_s18 + $0xc20] sm:$0xff] }
 0x1d3   : > { %23200 = vmatprep.subr.mxu1 %v25032_v0  ;;  %23190 = vmatpush3.msra.mxu0 %v20316_v13  ;;  %v22757_v31 = vpop.f32.mrf.mxu0  ;;  %v20342_v13 = vld [vmem:[%s25074_s18 + $0xc80] sm:$0xff] }
 0x1d4   : > { %23201 = vmatpush3.msra.mxu1 %v20320_v61  ;;  %v22768_v2 = vpop.f32.mrf.mxu1  ;;  %23191 = vmatprep.subr.mxu0 %v25032_v0  ;;  %v20349_v61 = vld [vmem:[%s25074_s18 + $0xcf8] sm:$0xff]  ;;  %v20352_v31 = vld [vmem:[%s25074_s18 + $0xd50] sm:$0xff] }
 0x1d5   : > { %23202 = vmatprep.subr.mxu1 %v25032_v0  ;;  %23192 = vmatpush3.msra.mxu0 %v20315_v27  ;;  %v20353_v27 = vld [vmem:[%s25074_s18 + $0xd58] sm:$0xff] }
 0x1d6   : > { %23203 = vmatpush3.msra.mxu1 %v20319_v28  ;;  %23193 = vmatprep.subr.mxu0 %v25032_v0  ;;  %v20348_v28 = vld [vmem:[%s25074_s18 + $0xcf0] sm:$0xff] }
 0x1d7   : > { %23204 = vmatprep.subr.mxu1 %v25032_v0  ;;  %23194 = vmatpush3.msra.mxu0 %v20314_v25 }
 0x1d8   : > { %23195 = vmatprep.mubr.msk.f32.mxu0 %vm25033_vm0, %v25032_v0  ;;  %23205 = vmatpush3.msra.mxu1 %v20318_v26 }
 0x1d9   : > { %23206 = vmatprep.mubr.msk.f32.mxu1 %vm25033_vm0, %v25032_v0  ;;  %23196 = vmatmul.mubr.msk.f32.vlgmr.msra.gmra.mxu0 %vm539_vm1, %v25926_v47  ;;  %v20323_v47 = vld [vmem:[%s25074_s18 + $0xaa8] sm:$0xff] }
 0x1da   : > { %23207 = vmatmul.mubr.msk.f32.vlgmr.msra.gmra.mxu1 %vm539_vm1, %v25928_v48  ;;  %23209 = vmatprep.subr.mxu0 %v25032_v0  ;;  %v20327_v48 = vld [vmem:[%s25074_s18 + $0xb08] sm:$0xff] }
 0x1db   : > { %23220 = vmatprep.subr.mxu1 %v25032_v0  ;;  %23210 = vmatpush3.msra.mxu0 %v20325_v7  ;;  %v26290_v15 = vpop.f32.mrf.mxu0 }
 0x1dc   : > { %23221 = vmatpush3.msra.mxu1 %v20329_v32  ;;  %v26292_v44 = vpop.f32.mrf.mxu1  ;;  %23211 = vmatprep.subr.mxu0 %v25032_v0  ;;  %v20346_v32 = vld [vmem:[%s25074_s18 + $0xce0] sm:$0xff] }
 0x1dd   : > { %23222 = vmatprep.subr.mxu1 %v25032_v0  ;;  %23212 = vmatpush3.msra.mxu0 %v20324_v33  ;;  %v22779_v45 = vpop.f32.mrf.mxu0  ;;  %v20350_v33 = vld [vmem:[%s25074_s18 + $0xd40] sm:$0xff] }
 0x1de   : > { %23223 = vmatpush3.msra.mxu1 %v20328_v14  ;;  %v22790_v20 = vpop.f32.mrf.mxu1  ;;  %23213 = vmatprep.subr.mxu0 %v25032_v0  ;;  %v20357_v14 = vld [vmem:[%s25074_s18 + $0xdb8] sm:$0xff]  ;;  %v20360_v45 = vld [vmem:[%s25074_s18 + $0xe10] sm:$0xff] }
 0x1df   : > { %23224 = vmatprep.subr.mxu1 %v25032_v0  ;;  %23214 = vmatpush3.msra.mxu0 %v20323_v47  ;;  %v20361_v47 = vld [vmem:[%s25074_s18 + $0xe18] sm:$0xff] }
 0x1e0   : > { %23225 = vmatpush3.msra.mxu1 %v20327_v48  ;;  %23215 = vmatprep.subr.mxu0 %v25032_v0  ;;  %v20356_v48 = vld [vmem:[%s25074_s18 + $0xdb0] sm:$0xff] }
 0x1e1   : > { %23226 = vmatprep.subr.mxu1 %v25032_v0  ;;  %23216 = vmatpush3.msra.mxu0 %v20322_v41 }
 0x1e2   : > { %23217 = vmatprep.mubr.msk.f32.mxu0 %vm25033_vm0, %v25032_v0  ;;  %23227 = vmatpush3.msra.mxu1 %v20326_v42 }
 0x1e3   : > { %23228 = vmatprep.mubr.msk.f32.mxu1 %vm25033_vm0, %v25032_v0  ;;  %23218 = vmatmul.mubr.msk.f32.vlgmr.msra.gmra.mxu0 %vm539_vm1, %v25954_v63  ;;  %v20331_v63 = vld [vmem:[%s25074_s18 + $0xb68] sm:$0xff] }
 0x1e4   : > { %23229 = vmatmul.mubr.msk.f32.vlgmr.msra.gmra.mxu1 %vm539_vm1, %v25956_v1  ;;  %23231 = vmatprep.subr.mxu0 %v25032_v0  ;;  %v20335_v1 = vld [vmem:[%s25074_s18 + $0xbc8] sm:$0xff] }
 0x1e5   : > { %23242 = vmatprep.subr.mxu1 %v25032_v0  ;;  %23232 = vmatpush3.msra.mxu0 %v20333_v23  ;;  %v26318_v35 = vpop.f32.mrf.mxu0 }
 0x1e6   : > { %23243 = vmatpush3.msra.mxu1 %v20337_v50  ;;  %v26320_v58 = vpop.f32.mrf.mxu1  ;;  %23233 = vmatprep.subr.mxu0 %v25032_v0  ;;  %v20354_v50 = vld [vmem:[%s25074_s18 + $0xda0] sm:$0xff] }
 0x1e7   : > { %23244 = vmatprep.subr.mxu1 %v25032_v0  ;;  %23234 = vmatpush3.msra.mxu0 %v20332_v51  ;;  %v22801_v59 = vpop.f32.mrf.mxu0  ;;  %v20358_v51 = vld [vmem:[%s25074_s18 + $0xe00] sm:$0xff] }
 0x1e8   : > { %23245 = vmatpush3.msra.mxu1 %v20336_v34  ;;  %v22812_v38 = vpop.f32.mrf.mxu1  ;;  %23235 = vmatprep.subr.mxu0 %v25032_v0  ;;  %v20365_v34 = vld [vmem:[%s25074_s18 + $0xe78] sm:$0xff]  ;;  %v20368_v59 = vld [vmem:[%s25074_s18 + $0xed0] sm:$0xff] }
 0x1e9   : > { %23246 = vmatprep.subr.mxu1 %v25032_v0  ;;  %23236 = vmatpush3.msra.mxu0 %v20331_v63  ;;  %v20369_v63 = vld [vmem:[%s25074_s18 + $0xed8] sm:$0xff] }
 0x1ea   : > { %23247 = vmatpush3.msra.mxu1 %v20335_v1  ;;  %23237 = vmatprep.subr.mxu0 %v25032_v0  ;;  %v20364_v1 = vld [vmem:[%s25074_s18 + $0xe70] sm:$0xff] }
 0x1eb   : > { %23248 = vmatprep.subr.mxu1 %v25032_v0  ;;  %23238 = vmatpush3.msra.mxu0 %v20330_v57 }
 0x1ec   : > { %23239 = vmatprep.mubr.msk.f32.mxu0 %vm25033_vm0, %v25032_v0  ;;  %23249 = vmatpush3.msra.mxu1 %v20334_v60 }
 0x1ed   : > { %23250 = vmatprep.mubr.msk.f32.mxu1 %vm25033_vm0, %v25032_v0  ;;  %23240 = vmatmul.mubr.msk.f32.vlgmr.msra.gmra.mxu0 %vm539_vm1, %v25982_v18  ;;  %v20339_v18 = vld [vmem:[%s25074_s18 + $0xc28] sm:$0xff] }
 0x1ee   : > { %23251 = vmatmul.mubr.msk.f32.vlgmr.msra.gmra.mxu1 %vm539_vm1, %v25984_v19  ;;  %23253 = vmatprep.subr.mxu0 %v25032_v0  ;;  %v20343_v19 = vld [vmem:[%s25074_s18 + $0xc88] sm:$0xff] }
 0x1ef   : > { %23264 = vmatprep.subr.mxu1 %v25032_v0  ;;  %23254 = vmatpush3.msra.mxu0 %v20341_v43  ;;  %v26346_v49 = vpop.f32.mrf.mxu0 }
 0x1f0   : > { %23265 = vmatpush3.msra.mxu1 %v20345_v5  ;;  %v26348_v9 = vpop.f32.mrf.mxu1  ;;  %23255 = vmatprep.subr.mxu0 %v25032_v0  ;;  %v20362_v5 = vld [vmem:[%s25074_s18 + $0xe60] sm:$0xff] }
 0x1f1   : > { %23266 = vmatprep.subr.mxu1 %v25032_v0  ;;  %23256 = vmatpush3.msra.mxu0 %v20340_v6  ;;  %v22823_v10 = vpop.f32.mrf.mxu0  ;;  %v20366_v6 = vld [vmem:[%s25074_s18 + $0xec0] sm:$0xff] }
 0x1f2   : > { %23267 = vmatpush3.msra.mxu1 %v20344_v17  ;;  %v22834_v54 = vpop.f32.mrf.mxu1  ;;  %23257 = vmatprep.subr.mxu0 %v25032_v0  ;;  %v20373_v17 = vld [vmem:[%s25074_s18 + $0xf38] sm:$0xff]  ;;  %v20376_v10 = vld [vmem:[%s25074_s18 + $0xf90] sm:$0xff] }
 0x1f3   : > { %23268 = vmatprep.subr.mxu1 %v25032_v0  ;;  %23258 = vmatpush3.msra.mxu0 %v20339_v18  ;;  %v20377_v18 = vld [vmem:[%s25074_s18 + $0xf98] sm:$0xff] }
 0x1f4   : > { %23269 = vmatpush3.msra.mxu1 %v20343_v19  ;;  %23259 = vmatprep.subr.mxu0 %v25032_v0  ;;  %v20372_v19 = vld [vmem:[%s25074_s18 + $0xf30] sm:$0xff] }
 0x1f5   : > { %23270 = vmatprep.subr.mxu1 %v25032_v0  ;;  %23260 = vmatpush3.msra.mxu0 %v20338_v12 }
 0x1f6   : > { %23261 = vmatprep.mubr.msk.f32.mxu0 %vm25033_vm0, %v25032_v0  ;;  %23271 = vmatpush3.msra.mxu1 %v20342_v13 }
 0x1f7   : > { %23272 = vmatprep.mubr.msk.f32.mxu1 %vm25033_vm0, %v25032_v0  ;;  %23262 = vmatmul.mubr.msk.f32.vlgmr.msra.gmra.mxu0 %vm539_vm1, %v26010_v36  ;;  %v20347_v36 = vld [vmem:[%s25074_s18 + $0xce8] sm:$0xff] }
 0x1f8   : > { %23273 = vmatmul.mubr.msk.f32.vlgmr.msra.gmra.mxu1 %vm539_vm1, %v26012_v37  ;;  %23275 = vmatprep.subr.mxu0 %v25032_v0  ;;  %v20351_v37 = vld [vmem:[%s25074_s18 + $0xd48] sm:$0xff] }
 0x1f9   : > { %23286 = vmatprep.subr.mxu1 %v25032_v0  ;;  %23276 = vmatpush3.msra.mxu0 %v20349_v61  ;;  %v26374_v2 = vpop.f32.mrf.mxu0 }
 0x1fa   : > { %23287 = vmatpush3.msra.mxu1 %v20353_v27  ;;  %v26376_v25 = vpop.f32.mrf.mxu1  ;;  %23277 = vmatprep.subr.mxu0 %v25032_v0  ;;  %v20370_v27 = vld [vmem:[%s25074_s18 + $0xf20] sm:$0xff] }
 0x1fb   : > { %23288 = vmatprep.subr.mxu1 %v25032_v0  ;;  %23278 = vmatpush3.msra.mxu0 %v20348_v28  ;;  %v22845_v26 = vpop.f32.mrf.mxu0  ;;  %v20374_v28 = vld [vmem:[%s25074_s18 + $0xf80] sm:$0xff] }
 0x1fc   : > { %23289 = vmatpush3.msra.mxu1 %v20352_v31  ;;  %v22856_v7 = vpop.f32.mrf.mxu1  ;;  %23279 = vmatprep.subr.mxu0 %v25032_v0  ;;  %v20381_v31 = vld [vmem:[%s25074_s18 + $0xff8] sm:$0xff]  ;;  %v20384_v26 = vld [vmem:[%s25074_s18 + $0x1050] sm:$0xff] }
 0x1fd   : > { %23290 = vmatprep.subr.mxu1 %v25032_v0  ;;  %23280 = vmatpush3.msra.mxu0 %v20347_v36  ;;  %v20385_v36 = vld [vmem:[%s25074_s18 + $0x1058] sm:$0xff] }
 0x1fe   : > { %23291 = vmatpush3.msra.mxu1 %v20351_v37  ;;  %23281 = vmatprep.subr.mxu0 %v25032_v0  ;;  %v20380_v37 = vld [vmem:[%s25074_s18 + $0xff0] sm:$0xff] }
 0x1ff   : > { %23292 = vmatprep.subr.mxu1 %v25032_v0  ;;  %23282 = vmatpush3.msra.mxu0 %v20346_v32 }
 0x200   : > { %23283 = vmatprep.mubr.msk.f32.mxu0 %vm25033_vm0, %v25032_v0  ;;  %23293 = vmatpush3.msra.mxu1 %v20350_v33 }
 0x201   : > { %23294 = vmatprep.mubr.msk.f32.mxu1 %vm25033_vm0, %v25032_v0  ;;  %23284 = vmatmul.mubr.msk.f32.vlgmr.msra.gmra.mxu0 %vm539_vm1, %v26038_v52  ;;  %v20355_v52 = vld [vmem:[%s25074_s18 + $0xda8] sm:$0xff] }
 0x202   : > { %23295 = vmatmul.mubr.msk.f32.vlgmr.msra.gmra.mxu1 %vm539_vm1, %v26040_v53  ;;  %23297 = vmatprep.subr.mxu0 %v25032_v0  ;;  %v20359_v53 = vld [vmem:[%s25074_s18 + $0xe08] sm:$0xff] }
 0x203   : > { %23308 = vmatprep.subr.mxu1 %v25032_v0  ;;  %23298 = vmatpush3.msra.mxu0 %v20357_v14  ;;  %v26402_v20 = vpop.f32.mrf.mxu0 }
 0x204   : > { %23309 = vmatpush3.msra.mxu1 %v20361_v47  ;;  %v26404_v41 = vpop.f32.mrf.mxu1  ;;  %23299 = vmatprep.subr.mxu0 %v25032_v0  ;;  %v20378_v47 = vld [vmem:[%s25074_s18 + $0xfe0] sm:$0xff] }
 0x205   : > { %23310 = vmatprep.subr.mxu1 %v25032_v0  ;;  %23300 = vmatpush3.msra.mxu0 %v20356_v48  ;;  %v22867_v42 = vpop.f32.mrf.mxu0  ;;  %v20382_v48 = vld [vmem:[%s25074_s18 + $0x1040] sm:$0xff] }
 0x206   : > { %23311 = vmatpush3.msra.mxu1 %v20360_v45  ;;  %v22878_v23 = vpop.f32.mrf.mxu1  ;;  %23301 = vmatprep.subr.mxu0 %v25032_v0  ;;  %v20389_v45 = vld [vmem:[%s25074_s18 + $0x10b8] sm:$0xff]  ;;  %v20392_v42 = vld [vmem:[%s25074_s18 + $0x1110] sm:$0xff] }
 0x207   : > { %23312 = vmatprep.subr.mxu1 %v25032_v0  ;;  %23302 = vmatpush3.msra.mxu0 %v20355_v52  ;;  %v20393_v52 = vld [vmem:[%s25074_s18 + $0x1118] sm:$0xff] }
 0x208   : > { %23313 = vmatpush3.msra.mxu1 %v20359_v53  ;;  %23303 = vmatprep.subr.mxu0 %v25032_v0  ;;  %v20388_v53 = vld [vmem:[%s25074_s18 + $0x10b0] sm:$0xff] }
 0x209   : > { %23314 = vmatprep.subr.mxu1 %v25032_v0  ;;  %23304 = vmatpush3.msra.mxu0 %v20354_v50 }
 0x20a   : > { %23305 = vmatprep.mubr.msk.f32.mxu0 %vm25033_vm0, %v25032_v0  ;;  %23315 = vmatpush3.msra.mxu1 %v20358_v51 }
 0x20b   : > { %23316 = vmatprep.mubr.msk.f32.mxu1 %vm25033_vm0, %v25032_v0  ;;  %23306 = vmatmul.mubr.msk.f32.vlgmr.msra.gmra.mxu0 %vm539_vm1, %v26066_v3  ;;  %v20363_v3 = vld [vmem:[%s25074_s18 + $0xe68] sm:$0xff] }
 0x20c   : > { %23317 = vmatmul.mubr.msk.f32.vlgmr.msra.gmra.mxu1 %vm539_vm1, %v26068_v4  ;;  %23319 = vmatprep.subr.mxu0 %v25032_v0  ;;  %v20367_v4 = vld [vmem:[%s25074_s18 + $0xec8] sm:$0xff] }
 0x20d   : > { %23330 = vmatprep.subr.mxu1 %v25032_v0  ;;  %23320 = vmatpush3.msra.mxu0 %v20365_v34  ;;  %v26430_v38 = vpop.f32.mrf.mxu0 }
 0x20e   : > { %23331 = vmatpush3.msra.mxu1 %v20369_v63  ;;  %v26432_v57 = vpop.f32.mrf.mxu1  ;;  %23321 = vmatprep.subr.mxu0 %v25032_v0  ;;  %v20386_v63 = vld [vmem:[%s25074_s18 + $0x10a0] sm:$0xff] }
 0x20f   : > { %23332 = vmatprep.subr.mxu1 %v25032_v0  ;;  %23322 = vmatpush3.msra.mxu0 %v20364_v1  ;;  %v22889_v60 = vpop.f32.mrf.mxu0  ;;  %v20390_v1 = vld [vmem:[%s25074_s18 + $0x1100] sm:$0xff] }
 0x210   : > { %23333 = vmatpush3.msra.mxu1 %v20368_v59  ;;  %v22900_v43 = vpop.f32.mrf.mxu1  ;;  %23323 = vmatprep.subr.mxu0 %v25032_v0  ;;  %v20397_v59 = vld [vmem:[%s25074_s18 + $0x1178] sm:$0xff]  ;;  %v20400_v60 = vld [vmem:[%s25074_s18 + $0x11d0] sm:$0xff] }
 0x211   : > { %23334 = vmatprep.subr.mxu1 %v25032_v0  ;;  %23324 = vmatpush3.msra.mxu0 %v20363_v3  ;;  %v20401_v3 = vld [vmem:[%s25074_s18 + $0x11d8] sm:$0xff] }
 0x212   : > { %23335 = vmatpush3.msra.mxu1 %v20367_v4  ;;  %23325 = vmatprep.subr.mxu0 %v25032_v0  ;;  %v20396_v4 = vld [vmem:[%s25074_s18 + $0x1170] sm:$0xff] }
 0x213   : > { %23336 = vmatprep.subr.mxu1 %v25032_v0  ;;  %23326 = vmatpush3.msra.mxu0 %v20362_v5 }
 0x214   : > { %23327 = vmatprep.mubr.msk.f32.mxu0 %vm25033_vm0, %v25032_v0  ;;  %23337 = vmatpush3.msra.mxu1 %v20366_v6 }
 0x215   : > { %23338 = vmatprep.mubr.msk.f32.mxu1 %vm25033_vm0, %v25032_v0  ;;  %23328 = vmatmul.mubr.msk.f32.vlgmr.msra.gmra.mxu0 %vm539_vm1, %v26094_v21  ;;  %v20371_v21 = vld [vmem:[%s25074_s18 + $0xf28] sm:$0xff] }
 0x216   : > { %23339 = vmatmul.mubr.msk.f32.vlgmr.msra.gmra.mxu1 %vm539_vm1, %v26096_v22  ;;  %23341 = vmatprep.subr.mxu0 %v25032_v0  ;;  %v20375_v22 = vld [vmem:[%s25074_s18 + $0xf88] sm:$0xff] }
 0x217   : > { %23352 = vmatprep.subr.mxu1 %v25032_v0  ;;  %23342 = vmatpush3.msra.mxu0 %v20373_v17  ;;  %v26458_v54 = vpop.f32.mrf.mxu0 }
 0x218   : > { %23353 = vmatpush3.msra.mxu1 %v20377_v18  ;;  %v26460_v12 = vpop.f32.mrf.mxu1  ;;  %23343 = vmatprep.subr.mxu0 %v25032_v0  ;;  %v20394_v18 = vld [vmem:[%s25074_s18 + $0x1160] sm:$0xff] }
 0x219   : > { %23354 = vmatprep.subr.mxu1 %v25032_v0  ;;  %23344 = vmatpush3.msra.mxu0 %v20372_v19  ;;  %v22911_v13 = vpop.f32.mrf.mxu0  ;;  %v20398_v19 = vld [vmem:[%s25074_s18 + $0x11c0] sm:$0xff] }
 0x21a   : > { %23355 = vmatpush3.msra.mxu1 %v20376_v10  ;;  %v22922_v61 = vpop.f32.mrf.mxu1  ;;  %23345 = vmatprep.subr.mxu0 %v25032_v0  ;;  %v20405_v10 = vld [vmem:[%s25074_s18 + $0x1238] sm:$0xff]  ;;  %v20408_v13 = vld [vmem:[%s25074_s18 + $0x1290] sm:$0xff] }
 0x21b   : > { %23356 = vmatprep.subr.mxu1 %v25032_v0  ;;  %23346 = vmatpush3.msra.mxu0 %v20371_v21  ;;  %v20409_v21 = vld [vmem:[%s25074_s18 + $0x1298] sm:$0xff] }
 0x21c   : > { %23357 = vmatpush3.msra.mxu1 %v20375_v22  ;;  %23347 = vmatprep.subr.mxu0 %v25032_v0  ;;  %v20404_v22 = vld [vmem:[%s25074_s18 + $0x1230] sm:$0xff] }
 0x21d   : > { %23358 = vmatprep.subr.mxu1 %v25032_v0  ;;  %23348 = vmatpush3.msra.mxu0 %v20370_v27 }
 0x21e   : > { %23349 = vmatprep.mubr.msk.f32.mxu0 %vm25033_vm0, %v25032_v0  ;;  %23359 = vmatpush3.msra.mxu1 %v20374_v28 }
 0x21f   : > { %23360 = vmatprep.mubr.msk.f32.mxu1 %vm25033_vm0, %v25032_v0  ;;  %23350 = vmatmul.mubr.msk.f32.vlgmr.msra.gmra.mxu0 %vm539_vm1, %v26122_v39  ;;  %v20379_v39 = vld [vmem:[%s25074_s18 + $0xfe8] sm:$0xff] }
 0x220   : > { %23361 = vmatmul.mubr.msk.f32.vlgmr.msra.gmra.mxu1 %vm539_vm1, %v26124_v40  ;;  %23363 = vmatprep.subr.mxu0 %v25032_v0  ;;  %v20383_v40 = vld [vmem:[%s25074_s18 + $0x1048] sm:$0xff] }
 0x221   : > { %23374 = vmatprep.subr.mxu1 %v25032_v0  ;;  %23364 = vmatpush3.msra.mxu0 %v20381_v31  ;;  %v26486_v7 = vpop.f32.mrf.mxu0 }
 0x222   : > { %23375 = vmatpush3.msra.mxu1 %v20385_v36  ;;  %v26488_v32 = vpop.f32.mrf.mxu1  ;;  %23365 = vmatprep.subr.mxu0 %v25032_v0  ;;  %v20402_v36 = vld [vmem:[%s25074_s18 + $0x1220] sm:$0xff] }
 0x223   : > { %23376 = vmatprep.subr.mxu1 %v25032_v0  ;;  %23366 = vmatpush3.msra.mxu0 %v20380_v37  ;;  %v22933_v33 = vpop.f32.mrf.mxu0  ;;  %v20406_v37 = vld [vmem:[%s25074_s18 + $0x1280] sm:$0xff] }
 0x224   : > { %23377 = vmatpush3.msra.mxu1 %v20384_v26  ;;  %v22944_v14 = vpop.f32.mrf.mxu1  ;;  %23367 = vmatprep.subr.mxu0 %v25032_v0  ;;  %v20413_v26 = vld [vmem:[%s25074_s18 + $0x12f8] sm:$0xff]  ;;  %v20416_v33 = vld [vmem:[%s25074_s18 + $0x1350] sm:$0xff] }
 0x225   : > { %23378 = vmatprep.subr.mxu1 %v25032_v0  ;;  %23368 = vmatpush3.msra.mxu0 %v20379_v39  ;;  %v20417_v39 = vld [vmem:[%s25074_s18 + $0x1358] sm:$0xff] }
 0x226   : > { %23379 = vmatpush3.msra.mxu1 %v20383_v40  ;;  %23369 = vmatprep.subr.mxu0 %v25032_v0  ;;  %v20412_v40 = vld [vmem:[%s25074_s18 + $0x12f0] sm:$0xff] }
 0x227   : > { %23380 = vmatprep.subr.mxu1 %v25032_v0  ;;  %23370 = vmatpush3.msra.mxu0 %v20378_v47 }
 0x228   : > { %23371 = vmatprep.mubr.msk.f32.mxu0 %vm25033_vm0, %v25032_v0  ;;  %23381 = vmatpush3.msra.mxu1 %v20382_v48 }
 0x229   : > { %23382 = vmatprep.mubr.msk.f32.mxu1 %vm25033_vm0, %v25032_v0  ;;  %23372 = vmatmul.mubr.msk.f32.vlgmr.msra.gmra.mxu0 %vm539_vm1, %v26150_v55  ;;  %v20387_v55 = vld [vmem:[%s25074_s18 + $0x10a8] sm:$0xff] }
 0x22a   : > { %23383 = vmatmul.mubr.msk.f32.vlgmr.msra.gmra.mxu1 %vm539_vm1, %v26152_v56  ;;  %23385 = vmatprep.subr.mxu0 %v25032_v0  ;;  %v20391_v56 = vld [vmem:[%s25074_s18 + $0x1108] sm:$0xff] }
 0x22b   : > { %23396 = vmatprep.subr.mxu1 %v25032_v0  ;;  %23386 = vmatpush3.msra.mxu0 %v20389_v45  ;;  %v26514_v23 = vpop.f32.mrf.mxu0 }
 0x22c   : > { %23397 = vmatpush3.msra.mxu1 %v20393_v52  ;;  %v26516_v50 = vpop.f32.mrf.mxu1  ;;  %23387 = vmatprep.subr.mxu0 %v25032_v0  ;;  %v20410_v52 = vld [vmem:[%s25074_s18 + $0x12e0] sm:$0xff] }
 0x22d   : > { %23398 = vmatprep.subr.mxu1 %v25032_v0  ;;  %23388 = vmatpush3.msra.mxu0 %v20388_v53  ;;  %v22955_v51 = vpop.f32.mrf.mxu0  ;;  %v20414_v53 = vld [vmem:[%s25074_s18 + $0x1340] sm:$0xff] }
 0x22e   : > { %23399 = vmatpush3.msra.mxu1 %v20392_v42  ;;  %v22966_v34 = vpop.f32.mrf.mxu1  ;;  %23389 = vmatprep.subr.mxu0 %v25032_v0  ;;  %v20421_v42 = vld [vmem:[%s25074_s18 + $0x13b8] sm:$0xff]  ;;  %v20424_v51 = vld [vmem:[%s25074_s18 + $0x1410] sm:$0xff] }
 0x22f   : > { %23400 = vmatprep.subr.mxu1 %v25032_v0  ;;  %23390 = vmatpush3.msra.mxu0 %v20387_v55  ;;  %v20425_v55 = vld [vmem:[%s25074_s18 + $0x1418] sm:$0xff] }
 0x230   : > { %23401 = vmatpush3.msra.mxu1 %v20391_v56  ;;  %23391 = vmatprep.subr.mxu0 %v25032_v0  ;;  %v20420_v56 = vld [vmem:[%s25074_s18 + $0x13b0] sm:$0xff] }
 0x231   : > { %23402 = vmatprep.subr.mxu1 %v25032_v0  ;;  %23392 = vmatpush3.msra.mxu0 %v20386_v63 }
 0x232   : > { %23393 = vmatprep.mubr.msk.f32.mxu0 %vm25033_vm0, %v25032_v0  ;;  %23403 = vmatpush3.msra.mxu1 %v20390_v1 }
 0x233   : > { %23404 = vmatprep.mubr.msk.f32.mxu1 %vm25033_vm0, %v25032_v0  ;;  %23394 = vmatmul.mubr.msk.f32.vlgmr.msra.gmra.mxu0 %vm539_vm1, %v26178_v8  ;;  %v20395_v8 = vld [vmem:[%s25074_s18 + $0x1168] sm:$0xff] }
 0x234   : > { %23405 = vmatmul.mubr.msk.f32.vlgmr.msra.gmra.mxu1 %vm539_vm1, %v26180_v11  ;;  %23407 = vmatprep.subr.mxu0 %v25032_v0  ;;  %v20399_v11 = vld [vmem:[%s25074_s18 + $0x11c8] sm:$0xff] }
 0x235   : > { %23418 = vmatprep.subr.mxu1 %v25032_v0  ;;  %23408 = vmatpush3.msra.mxu0 %v20397_v59  ;;  %v26542_v43 = vpop.f32.mrf.mxu0 }
 0x236   : > { %23419 = vmatpush3.msra.mxu1 %v20401_v3  ;;  %v26544_v5 = vpop.f32.mrf.mxu1  ;;  %23409 = vmatprep.subr.mxu0 %v25032_v0  ;;  %v20418_v3 = vld [vmem:[%s25074_s18 + $0x13a0] sm:$0xff] }
 0x237   : > { %23420 = vmatprep.subr.mxu1 %v25032_v0  ;;  %23410 = vmatpush3.msra.mxu0 %v20396_v4  ;;  %v22977_v6 = vpop.f32.mrf.mxu0  ;;  %v20422_v4 = vld [vmem:[%s25074_s18 + $0x1400] sm:$0xff] }
 0x238   : > { %23421 = vmatpush3.msra.mxu1 %v20400_v60  ;;  %v22988_v17 = vpop.f32.mrf.mxu1  ;;  %23411 = vmatprep.subr.mxu0 %v25032_v0  ;;  %v20429_v60 = vld [vmem:[%s25074_s18 + $0x1478] sm:$0xff]  ;;  %v20432_v6 = vld [vmem:[%s25074_s18 + $0x14d0] sm:$0xff] }
 0x239   : > { %23422 = vmatprep.subr.mxu1 %v25032_v0  ;;  %23412 = vmatpush3.msra.mxu0 %v20395_v8  ;;  %v20433_v8 = vld [vmem:[%s25074_s18 + $0x14d8] sm:$0xff] }
 0x23a   : > { %23423 = vmatpush3.msra.mxu1 %v20399_v11  ;;  %23413 = vmatprep.subr.mxu0 %v25032_v0  ;;  %v20428_v11 = vld [vmem:[%s25074_s18 + $0x1470] sm:$0xff] }
 0x23b   : > { %23424 = vmatprep.subr.mxu1 %v25032_v0  ;;  %23414 = vmatpush3.msra.mxu0 %v20394_v18 }
 0x23c   : > { %23415 = vmatprep.mubr.msk.f32.mxu0 %vm25033_vm0, %v25032_v0  ;;  %23425 = vmatpush3.msra.mxu1 %v20398_v19 }
 0x23d   : > { %23426 = vmatprep.mubr.msk.f32.mxu1 %vm25033_vm0, %v25032_v0  ;;  %23416 = vmatmul.mubr.msk.f32.vlgmr.msra.gmra.mxu0 %vm539_vm1, %v26206_v24  ;;  %v20403_v24 = vld [vmem:[%s25074_s18 + $0x1228] sm:$0xff] }
 0x23e   : > { %23427 = vmatmul.mubr.msk.f32.vlgmr.msra.gmra.mxu1 %vm539_vm1, %v26208_v29  ;;  %23429 = vmatprep.subr.mxu0 %v25032_v0  ;;  %v20407_v29 = vld [vmem:[%s25074_s18 + $0x1288] sm:$0xff] }
 0x23f   : > { %23440 = vmatprep.subr.mxu1 %v25032_v0  ;;  %23430 = vmatpush3.msra.mxu0 %v20405_v10  ;;  %v26570_v61 = vpop.f32.mrf.mxu0 }
 0x240   : > { %23441 = vmatpush3.msra.mxu1 %v20409_v21  ;;  %v26572_v27 = vpop.f32.mrf.mxu1  ;;  %23431 = vmatprep.subr.mxu0 %v25032_v0  ;;  %v20426_v21 = vld [vmem:[%s25074_s18 + $0x1460] sm:$0xff] }
 0x241   : > { %23442 = vmatprep.subr.mxu1 %v25032_v0  ;;  %23432 = vmatpush3.msra.mxu0 %v20404_v22  ;;  %v22999_v28 = vpop.f32.mrf.mxu0  ;;  %v20430_v22 = vld [vmem:[%s25074_s18 + $0x14c0] sm:$0xff] }
 0x242   : > { %23443 = vmatpush3.msra.mxu1 %v20408_v13  ;;  %v23010_v31 = vpop.f32.mrf.mxu1  ;;  %23433 = vmatprep.subr.mxu0 %v25032_v0  ;;  %v20437_v13 = vld [vmem:[%s25074_s18 + $0x1538] sm:$0xff]  ;;  %v20440_v28 = vld [vmem:[%s25074_s18 + $0x1590] sm:$0xff] }
 0x243   : > { %23444 = vmatprep.subr.mxu1 %v25032_v0  ;;  %23434 = vmatpush3.msra.mxu0 %v20403_v24  ;;  %v20441_v24 = vld [vmem:[%s25074_s18 + $0x1598] sm:$0xff] }
 0x244   : > { %23445 = vmatpush3.msra.mxu1 %v20407_v29  ;;  %23435 = vmatprep.subr.mxu0 %v25032_v0  ;;  %v20436_v29 = vld [vmem:[%s25074_s18 + $0x1530] sm:$0xff] }
 0x245   : > { %23446 = vmatprep.subr.mxu1 %v25032_v0  ;;  %23436 = vmatpush3.msra.mxu0 %v20402_v36 }
 0x246   : > { %23437 = vmatprep.mubr.msk.f32.mxu0 %vm25033_vm0, %v25032_v0  ;;  %23447 = vmatpush3.msra.mxu1 %v20406_v37 }
 0x247   : > { %23448 = vmatprep.mubr.msk.f32.mxu1 %vm25033_vm0, %v25032_v0  ;;  %23438 = vmatmul.mubr.msk.f32.vlgmr.msra.gmra.mxu0 %vm539_vm1, %v26234_v46  ;;  %v20411_v46 = vld [vmem:[%s25074_s18 + $0x12e8] sm:$0xff] }
 0x248   : > { %23449 = vmatmul.mubr.msk.f32.vlgmr.msra.gmra.mxu1 %vm539_vm1, %v26236_v16  ;;  %23451 = vmatprep.subr.mxu0 %v25032_v0  ;;  %v20415_v16 = vld [vmem:[%s25074_s18 + $0x1348] sm:$0xff] }
 0x249   : > { %23462 = vmatprep.subr.mxu1 %v25032_v0  ;;  %23452 = vmatpush3.msra.mxu0 %v20413_v26  ;;  %v26598_v14 = vpop.f32.mrf.mxu0 }
 0x24a   : > { %23463 = vmatpush3.msra.mxu1 %v20417_v39  ;;  %v26600_v47 = vpop.f32.mrf.mxu1  ;;  %23453 = vmatprep.subr.mxu0 %v25032_v0  ;;  %v20434_v39 = vld [vmem:[%s25074_s18 + $0x1520] sm:$0xff] }
 0x24b   : > { %23464 = vmatprep.subr.mxu1 %v25032_v0  ;;  %23454 = vmatpush3.msra.mxu0 %v20412_v40  ;;  %v23021_v48 = vpop.f32.mrf.mxu0  ;;  %v20438_v40 = vld [vmem:[%s25074_s18 + $0x1580] sm:$0xff] }
 0x24c   : > { %23465 = vmatpush3.msra.mxu1 %v20416_v33  ;;  %v23032_v45 = vpop.f32.mrf.mxu1  ;;  %23455 = vmatprep.subr.mxu0 %v25032_v0  ;;  %v20445_v33 = vld [vmem:[%s25074_s18 + $0x15f8] sm:$0xff]  ;;  %v20448_v48 = vld [vmem:[%s25074_s18 + $0x1650] sm:$0xff] }
 0x24d   : > { %23466 = vmatprep.subr.mxu1 %v25032_v0  ;;  %23456 = vmatpush3.msra.mxu0 %v20411_v46  ;;  %v20449_v46 = vld [vmem:[%s25074_s18 + $0x1658] sm:$0xff] }
 0x24e   : > { %23467 = vmatpush3.msra.mxu1 %v20415_v16  ;;  %23457 = vmatprep.subr.mxu0 %v25032_v0  ;;  %v20444_v16 = vld [vmem:[%s25074_s18 + $0x15f0] sm:$0xff] }
 0x24f   : > { %23468 = vmatprep.subr.mxu1 %v25032_v0  ;;  %23458 = vmatpush3.msra.mxu0 %v20410_v52 }
 0x250   : > { %23459 = vmatprep.mubr.msk.f32.mxu0 %vm25033_vm0, %v25032_v0  ;;  %23469 = vmatpush3.msra.mxu1 %v20414_v53 }
 0x251   : > { %23470 = vmatprep.mubr.msk.f32.mxu1 %vm25033_vm0, %v25032_v0  ;;  %23460 = vmatmul.mubr.msk.f32.vlgmr.msra.gmra.mxu0 %vm539_vm1, %v26262_v62  ;;  %v20419_v62 = vld [vmem:[%s25074_s18 + $0x13a8] sm:$0xff] }
 0x252   : > { %23471 = vmatmul.mubr.msk.f32.vlgmr.msra.gmra.mxu1 %vm539_vm1, %v26264_v30  ;;  %23473 = vmatprep.subr.mxu0 %v25032_v0  ;;  %v20423_v30 = vld [vmem:[%s25074_s18 + $0x1408] sm:$0xff] }
 0x253   : > { %23484 = vmatprep.subr.mxu1 %v25032_v0  ;;  %23474 = vmatpush3.msra.mxu0 %v20421_v42  ;;  %v26626_v34 = vpop.f32.mrf.mxu0 }
 0x254   : > { %23485 = vmatpush3.msra.mxu1 %v20425_v55  ;;  %v26628_v63 = vpop.f32.mrf.mxu1  ;;  %23475 = vmatprep.subr.mxu0 %v25032_v0  ;;  %v20442_v55 = vld [vmem:[%s25074_s18 + $0x15e0] sm:$0xff] }
 0x255   : > { %23486 = vmatprep.subr.mxu1 %v25032_v0  ;;  %23476 = vmatpush3.msra.mxu0 %v20420_v56  ;;  %v23043_v1 = vpop.f32.mrf.mxu0  ;;  %v20446_v56 = vld [vmem:[%s25074_s18 + $0x1640] sm:$0xff] }
 0x256   : > { %23487 = vmatpush3.msra.mxu1 %v20424_v51  ;;  %v23054_v59 = vpop.f32.mrf.mxu1  ;;  %23477 = vmatprep.subr.mxu0 %v25032_v0  ;;  %v20453_v51 = vld [vmem:[%s25074_s18 + $0x16b8] sm:$0xff]  ;;  %v20456_v1 = vld [vmem:[%s25074_s18 + $0x1710] sm:$0xff] }
 0x257   : > { %23488 = vmatprep.subr.mxu1 %v25032_v0  ;;  %23478 = vmatpush3.msra.mxu0 %v20419_v62  ;;  %v20457_v62 = vld [vmem:[%s25074_s18 + $0x1718] sm:$0xff] }
 0x258   : > { %23489 = vmatpush3.msra.mxu1 %v20423_v30  ;;  %23479 = vmatprep.subr.mxu0 %v25032_v0  ;;  %v20452_v30 = vld [vmem:[%s25074_s18 + $0x16b0] sm:$0xff] }
 0x259   : > { %23490 = vmatprep.subr.mxu1 %v25032_v0  ;;  %23480 = vmatpush3.msra.mxu0 %v20418_v3 }
 0x25a   : > { %23481 = vmatprep.mubr.msk.f32.mxu0 %vm25033_vm0, %v25032_v0  ;;  %23491 = vmatpush3.msra.mxu1 %v20422_v4 }
 0x25b   : > { %23492 = vmatprep.mubr.msk.f32.mxu1 %vm25033_vm0, %v25032_v0  ;;  %23482 = vmatmul.mubr.msk.f32.vlgmr.msra.gmra.mxu0 %vm539_vm1, %v26290_v15  ;;  %v20427_v15 = vld [vmem:[%s25074_s18 + $0x1468] sm:$0xff] }
 0x25c   : > { %23493 = vmatmul.mubr.msk.f32.vlgmr.msra.gmra.mxu1 %vm539_vm1, %v26292_v44  ;;  %23495 = vmatprep.subr.mxu0 %v25032_v0  ;;  %v20431_v44 = vld [vmem:[%s25074_s18 + $0x14c8] sm:$0xff] }
 0x25d   : > { %23506 = vmatprep.subr.mxu1 %v25032_v0  ;;  %23496 = vmatpush3.msra.mxu0 %v20429_v60  ;;  %v26654_v17 = vpop.f32.mrf.mxu0 }
 0x25e   : > { %23507 = vmatpush3.msra.mxu1 %v20433_v8  ;;  %v26656_v18 = vpop.f32.mrf.mxu1  ;;  %23497 = vmatprep.subr.mxu0 %v25032_v0  ;;  %v20450_v8 = vld [vmem:[%s25074_s18 + $0x16a0] sm:$0xff] }
 0x25f   : > { %23508 = vmatprep.subr.mxu1 %v25032_v0  ;;  %23498 = vmatpush3.msra.mxu0 %v20428_v11  ;;  %v23065_v19 = vpop.f32.mrf.mxu0  ;;  %v20454_v11 = vld [vmem:[%s25074_s18 + $0x1700] sm:$0xff] }
 0x260   : > { %23509 = vmatpush3.msra.mxu1 %v20432_v6  ;;  %v23076_v10 = vpop.f32.mrf.mxu1  ;;  %23499 = vmatprep.subr.mxu0 %v25032_v0  ;;  %v20461_v6 = vld [vmem:[%s25074_s18 + $0x1778] sm:$0xff]  ;;  %v20464_v19 = vld [vmem:[%s25074_s18 + $0x17d0] sm:$0xff] }
 0x261   : > { %23510 = vmatprep.subr.mxu1 %v25032_v0  ;;  %23500 = vmatpush3.msra.mxu0 %v20427_v15  ;;  %v20465_v15 = vld [vmem:[%s25074_s18 + $0x17d8] sm:$0xff] }
 0x262   : > { %23511 = vmatpush3.msra.mxu1 %v20431_v44  ;;  %23501 = vmatprep.subr.mxu0 %v25032_v0  ;;  %v20460_v44 = vld [vmem:[%s25074_s18 + $0x1770] sm:$0xff] }
 0x263   : > { %23512 = vmatprep.subr.mxu1 %v25032_v0  ;;  %23502 = vmatpush3.msra.mxu0 %v20426_v21 }
 0x264   : > { %23503 = vmatprep.mubr.msk.f32.mxu0 %vm25033_vm0, %v25032_v0  ;;  %23513 = vmatpush3.msra.mxu1 %v20430_v22 }
 0x265   : > { %23514 = vmatprep.mubr.msk.f32.mxu1 %vm25033_vm0, %v25032_v0  ;;  %23504 = vmatmul.mubr.msk.f32.vlgmr.msra.gmra.mxu0 %vm539_vm1, %v26318_v35  ;;  %v20435_v35 = vld [vmem:[%s25074_s18 + $0x1528] sm:$0xff] }
 0x266   : > { %23515 = vmatmul.mubr.msk.f32.vlgmr.msra.gmra.mxu1 %vm539_vm1, %v26320_v58  ;;  %23517 = vmatprep.subr.mxu0 %v25032_v0  ;;  %v20439_v58 = vld [vmem:[%s25074_s18 + $0x1588] sm:$0xff] }
 0x267   : > { %23528 = vmatprep.subr.mxu1 %v25032_v0  ;;  %23518 = vmatpush3.msra.mxu0 %v20437_v13  ;;  %v26682_v31 = vpop.f32.mrf.mxu0 }
 0x268   : > { %23529 = vmatpush3.msra.mxu1 %v20441_v24  ;;  %v26684_v36 = vpop.f32.mrf.mxu1  ;;  %23519 = vmatprep.subr.mxu0 %v25032_v0  ;;  %v20458_v24 = vld [vmem:[%s25074_s18 + $0x1760] sm:$0xff] }
 0x269   : > { %23530 = vmatprep.subr.mxu1 %v25032_v0  ;;  %23520 = vmatpush3.msra.mxu0 %v20436_v29  ;;  %v23087_v37 = vpop.f32.mrf.mxu0  ;;  %v20462_v29 = vld [vmem:[%s25074_s18 + $0x17c0] sm:$0xff] }
 0x26a   : > { %23531 = vmatpush3.msra.mxu1 %v20440_v28  ;;  %v23098_v26 = vpop.f32.mrf.mxu1  ;;  %23521 = vmatprep.subr.mxu0 %v25032_v0  ;;  %v20533_v28 = vld [vmem:[%s25074_s18 + $0x58] sm:$0xff]  ;;  %v20536_v37 = vld [vmem:[%s25074_s18 + $0xb0] sm:$0xff] }
 0x26b   : > { %23532 = vmatprep.subr.mxu1 %v25032_v0  ;;  %23522 = vmatpush3.msra.mxu0 %v20435_v35  ;;  %v20537_v35 = vld [vmem:[%s25074_s18 + $0xb8] sm:$0xff] }
 0x26c   : > { %23533 = vmatpush3.msra.mxu1 %v20439_v58  ;;  %23523 = vmatprep.subr.mxu0 %v25032_v0  ;;  %v20532_v58 = vld [vmem:[%s25074_s18 + $0x50] sm:$0xff] }
 0x26d   : > { %23534 = vmatprep.subr.mxu1 %v25032_v0  ;;  %23524 = vmatpush3.msra.mxu0 %v20434_v39 }
 0x26e   : > { %23525 = vmatprep.mubr.msk.f32.mxu0 %vm25033_vm0, %v25032_v0  ;;  %23535 = vmatpush3.msra.mxu1 %v20438_v40 }
 0x26f   : > { %23536 = vmatprep.mubr.msk.f32.mxu1 %vm25033_vm0, %v25032_v0  ;;  %23526 = vmatmul.mubr.msk.f32.vlgmr.msra.gmra.mxu0 %vm539_vm1, %v26346_v49  ;;  %v20443_v49 = vld [vmem:[%s25074_s18 + $0x15e8] sm:$0xff] }
 0x270   : > { %23537 = vmatmul.mubr.msk.f32.vlgmr.msra.gmra.mxu1 %vm539_vm1, %v26348_v9  ;;  %23539 = vmatprep.subr.mxu0 %v25032_v0  ;;  %v20447_v9 = vld [vmem:[%s25074_s18 + $0x1648] sm:$0xff] }
 0x271   : > { %23550 = vmatprep.subr.mxu1 %v25032_v0  ;;  %23540 = vmatpush3.msra.mxu0 %v20445_v33  ;;  %v26710_v45 = vpop.f32.mrf.mxu0 }
 0x272   : > { %23551 = vmatpush3.msra.mxu1 %v20449_v46  ;;  %v26712_v52 = vpop.f32.mrf.mxu1  ;;  %23541 = vmatprep.subr.mxu0 %v25032_v0  ;;  %v20530_v46 = vld [vmem:[%s25074_s18 + $0x40] sm:$0xff] }
 0x273   : > { %23552 = vmatprep.subr.mxu1 %v25032_v0  ;;  %23542 = vmatpush3.msra.mxu0 %v20444_v16  ;;  %v23109_v53 = vpop.f32.mrf.mxu0  ;;  %v20534_v16 = vld [vmem:[%s25074_s18 + $0xa0] sm:$0xff] }
 0x274   : > { %23553 = vmatpush3.msra.mxu1 %v20448_v48  ;;  %v23120_v42 = vpop.f32.mrf.mxu1  ;;  %23543 = vmatprep.subr.mxu0 %v25032_v0  ;;  %v20541_v48 = vld [vmem:[%s25074_s18 + $0x118] sm:$0xff]  ;;  %v20544_v53 = vld [vmem:[%s25074_s18 + $0x170] sm:$0xff] }
 0x275   : > { %23554 = vmatprep.subr.mxu1 %v25032_v0  ;;  %23544 = vmatpush3.msra.mxu0 %v20443_v49  ;;  %v20545_v49 = vld [vmem:[%s25074_s18 + $0x178] sm:$0xff] }
 0x276   : > { %23555 = vmatpush3.msra.mxu1 %v20447_v9  ;;  %23545 = vmatprep.subr.mxu0 %v25032_v0  ;;  %v20540_v9 = vld [vmem:[%s25074_s18 + $0x110] sm:$0xff] }
 0x277   : > { %23556 = vmatprep.subr.mxu1 %v25032_v0  ;;  %23546 = vmatpush3.msra.mxu0 %v20442_v55 }
 0x278   : > { %23547 = vmatprep.mubr.msk.f32.mxu0 %vm25033_vm0, %v25032_v0  ;;  %23557 = vmatpush3.msra.mxu1 %v20446_v56 }
 0x279   : > { %23558 = vmatprep.mubr.msk.f32.mxu1 %vm25033_vm0, %v25032_v0  ;;  %23548 = vmatmul.mubr.msk.f32.vlgmr.msra.gmra.mxu0 %vm539_vm1, %v26374_v2  ;;  %v20451_v2 = vld [vmem:[%s25074_s18 + $0x16a8] sm:$0xff] }
 0x27a   : > { %23559 = vmatmul.mubr.msk.f32.vlgmr.msra.gmra.mxu1 %vm539_vm1, %v26376_v25  ;;  %23561 = vmatprep.subr.mxu0 %v25032_v0  ;;  %v20455_v25 = vld [vmem:[%s25074_s18 + $0x1708] sm:$0xff] }
 0x27b   : > { %23572 = vmatprep.subr.mxu1 %v25032_v0  ;;  %23562 = vmatpush3.msra.mxu0 %v20453_v51  ;;  %v26738_v59 = vpop.f32.mrf.mxu0 }
 0x27c   : > { %23573 = vmatpush3.msra.mxu1 %v20457_v62  ;;  %v26740_v3 = vpop.f32.mrf.mxu1  ;;  %23563 = vmatprep.subr.mxu0 %v25032_v0  ;;  %v20538_v62 = vld [vmem:[%s25074_s18 + $0x100] sm:$0xff] }
 0x27d   : > { %23574 = vmatprep.subr.mxu1 %v25032_v0  ;;  %23564 = vmatpush3.msra.mxu0 %v20452_v30  ;;  %v23131_v4 = vpop.f32.mrf.mxu0  ;;  %v20542_v30 = vld [vmem:[%s25074_s18 + $0x160] sm:$0xff] }
 0x27e   : > { %23575 = vmatpush3.msra.mxu1 %v20456_v1  ;;  %v23142_v60 = vpop.f32.mrf.mxu1  ;;  %23565 = vmatprep.subr.mxu0 %v25032_v0  ;;  %v20549_v1 = vld [vmem:[%s25074_s18 + $0x1d8] sm:$0xff]  ;;  %v20552_v4 = vld [vmem:[%s25074_s18 + $0x230] sm:$0xff] }
 0x27f   : > { %23576 = vmatprep.subr.mxu1 %v25032_v0  ;;  %23566 = vmatpush3.msra.mxu0 %v20451_v2  ;;  %v20553_v2 = vld [vmem:[%s25074_s18 + $0x238] sm:$0xff] }
 0x280   : > { %23577 = vmatpush3.msra.mxu1 %v20455_v25  ;;  %23567 = vmatprep.subr.mxu0 %v25032_v0  ;;  %v20548_v25 = vld [vmem:[%s25074_s18 + $0x1d0] sm:$0xff] }
 0x281   : > { %23578 = vmatprep.subr.mxu1 %v25032_v0  ;;  %23568 = vmatpush3.msra.mxu0 %v20450_v8 }
 0x282   : > { %23569 = vmatprep.mubr.msk.f32.mxu0 %vm25033_vm0, %v25032_v0  ;;  %23579 = vmatpush3.msra.mxu1 %v20454_v11 }
 0x283   : > { %23580 = vmatprep.mubr.msk.f32.mxu1 %vm25033_vm0, %v25032_v0  ;;  %23570 = vmatmul.mubr.msk.f32.vlgmr.msra.gmra.mxu0 %vm539_vm1, %v26402_v20  ;;  %v20459_v20 = vld [vmem:[%s25074_s18 + $0x1768] sm:$0xff] }
 0x284   : > { %23581 = vmatmul.mubr.msk.f32.vlgmr.msra.gmra.mxu1 %vm539_vm1, %v26404_v41  ;;  %23583 = vmatprep.subr.mxu0 %v25032_v0  ;;  %v20463_v41 = vld [vmem:[%s25074_s18 + $0x17c8] sm:$0xff] }
 0x285   : > { %23594 = vmatprep.subr.mxu1 %v25032_v0  ;;  %23584 = vmatpush3.msra.mxu0 %v20461_v6  ;;  %v26766_v10 = vpop.f32.mrf.mxu0 }
 0x286   : > { %23595 = vmatpush3.msra.mxu1 %v20465_v15  ;;  %v26768_v21 = vpop.f32.mrf.mxu1  ;;  %23585 = vmatprep.subr.mxu0 %v25032_v0  ;;  %v20546_v15 = vld [vmem:[%s25074_s18 + $0x1c0] sm:$0xff] }
 0x287   : > { %23596 = vmatprep.subr.mxu1 %v25032_v0  ;;  %23586 = vmatpush3.msra.mxu0 %v20460_v44  ;;  %v23153_v22 = vpop.f32.mrf.mxu0  ;;  %v20550_v44 = vld [vmem:[%s25074_s18 + $0x220] sm:$0xff] }
 0x288   : > { %23597 = vmatpush3.msra.mxu1 %v20464_v19  ;;  %v23164_v13 = vpop.f32.mrf.mxu1  ;;  %23587 = vmatprep.subr.mxu0 %v25032_v0  ;;  %v20557_v19 = vld [vmem:[%s25074_s18 + $0x298] sm:$0xff]  ;;  %v20560_v22 = vld [vmem:[%s25074_s18 + $0x2f0] sm:$0xff] }
 0x289   : > { %23598 = vmatprep.subr.mxu1 %v25032_v0  ;;  %23588 = vmatpush3.msra.mxu0 %v20459_v20  ;;  %v20561_v20 = vld [vmem:[%s25074_s18 + $0x2f8] sm:$0xff] }
 0x28a   : > { %23599 = vmatpush3.msra.mxu1 %v20463_v41  ;;  %23589 = vmatprep.subr.mxu0 %v25032_v0  ;;  %v20556_v41 = vld [vmem:[%s25074_s18 + $0x290] sm:$0xff] }
 0x28b   : > { %23600 = vmatprep.subr.mxu1 %v25032_v0  ;;  %23590 = vmatpush3.msra.mxu0 %v20458_v24 }
 0x28c   : > { %23591 = vmatprep.mubr.msk.f32.mxu0 %vm25033_vm0, %v25032_v0  ;;  %23601 = vmatpush3.msra.mxu1 %v20462_v29 }
 0x28d   : > { %23602 = vmatprep.mubr.msk.f32.mxu1 %vm25033_vm0, %v25032_v0  ;;  %23592 = vmatmul.mubr.msk.f32.vlgmr.msra.gmra.mxu0 %vm539_vm1, %v26430_v38  ;;  %v20531_v38 = vld [vmem:[%s25074_s18 + $0x48] sm:$0xff] }
 0x28e   : > { %23603 = vmatmul.mubr.msk.f32.vlgmr.msra.gmra.mxu1 %vm539_vm1, %v26432_v57  ;;  %23605 = vmatprep.subr.mxu0 %v25032_v0  ;;  %v20535_v57 = vld [vmem:[%s25074_s18 + $0xa8] sm:$0xff] }
 0x28f   : > { %23616 = vmatprep.subr.mxu1 %v25032_v0  ;;  %23606 = vmatpush3.msra.mxu0 %v20533_v28  ;;  %v26794_v26 = vpop.f32.mrf.mxu0 }
 0x290   : > { %23617 = vmatpush3.msra.mxu1 %v20537_v35  ;;  %v26796_v39 = vpop.f32.mrf.mxu1  ;;  %23607 = vmatprep.subr.mxu0 %v25032_v0  ;;  %v20554_v35 = vld [vmem:[%s25074_s18 + $0x280] sm:$0xff] }
 0x291   : > { %23618 = vmatprep.subr.mxu1 %v25032_v0  ;;  %23608 = vmatpush3.msra.mxu0 %v20532_v58  ;;  %v23175_v40 = vpop.f32.mrf.mxu0  ;;  %v20558_v58 = vld [vmem:[%s25074_s18 + $0x2e0] sm:$0xff] }
 0x292   : > { %23619 = vmatpush3.msra.mxu1 %v20536_v37  ;;  %v23186_v33 = vpop.f32.mrf.mxu1  ;;  %23609 = vmatprep.subr.mxu0 %v25032_v0  ;;  %v20565_v37 = vld [vmem:[%s25074_s18 + $0x358] sm:$0xff]  ;;  %v20568_v40 = vld [vmem:[%s25074_s18 + $0x3b0] sm:$0xff] }
 0x293   : > { %23620 = vmatprep.subr.mxu1 %v25032_v0  ;;  %23610 = vmatpush3.msra.mxu0 %v20531_v38  ;;  %v20569_v38 = vld [vmem:[%s25074_s18 + $0x3b8] sm:$0xff] }
 0x294   : > { %23621 = vmatpush3.msra.mxu1 %v20535_v57  ;;  %23611 = vmatprep.subr.mxu0 %v25032_v0  ;;  %v20564_v57 = vld [vmem:[%s25074_s18 + $0x350] sm:$0xff] }
 0x295   : > { %23622 = vmatprep.subr.mxu1 %v25032_v0  ;;  %23612 = vmatpush3.msra.mxu0 %v20530_v46 }
 0x296   : > { %23613 = vmatprep.mubr.msk.f32.mxu0 %vm25033_vm0, %v25032_v0  ;;  %23623 = vmatpush3.msra.mxu1 %v20534_v16 }
 0x297   : > { %23624 = vmatprep.mubr.msk.f32.mxu1 %vm25033_vm0, %v25032_v0  ;;  %23614 = vmatmul.mubr.msk.f32.vlgmr.msra.gmra.mxu0 %vm539_vm1, %v26458_v54  ;;  %v20539_v54 = vld [vmem:[%s25074_s18 + $0x108] sm:$0xff] }
 0x298   : > { %23625 = vmatmul.mubr.msk.f32.vlgmr.msra.gmra.mxu1 %vm539_vm1, %v26460_v12  ;;  %23627 = vmatprep.subr.mxu0 %v25032_v0  ;;  %v20543_v12 = vld [vmem:[%s25074_s18 + $0x168] sm:$0xff] }
 0x299   : > { %23638 = vmatprep.subr.mxu1 %v25032_v0  ;;  %23628 = vmatpush3.msra.mxu0 %v20541_v48  ;;  %v26822_v42 = vpop.f32.mrf.mxu0 }
 0x29a   : > { %23639 = vmatpush3.msra.mxu1 %v20545_v49  ;;  %v26824_v55 = vpop.f32.mrf.mxu1  ;;  %23629 = vmatprep.subr.mxu0 %v25032_v0  ;;  %v20562_v49 = vld [vmem:[%s25074_s18 + $0x340] sm:$0xff] }
 0x29b   : > { %23640 = vmatprep.subr.mxu1 %v25032_v0  ;;  %23630 = vmatpush3.msra.mxu0 %v20540_v9  ;;  %v23197_v56 = vpop.f32.mrf.mxu0  ;;  %v20566_v9 = vld [vmem:[%s25074_s18 + $0x3a0] sm:$0xff] }
 0x29c   : > { %23641 = vmatpush3.msra.mxu1 %v20544_v53  ;;  %v23208_v51 = vpop.f32.mrf.mxu1  ;;  %23631 = vmatprep.subr.mxu0 %v25032_v0  ;;  %v20573_v53 = vld [vmem:[%s25074_s18 + $0x418] sm:$0xff]  ;;  %v20576_v56 = vld [vmem:[%s25074_s18 + $0x470] sm:$0xff] }
 0x29d   : > { %23642 = vmatprep.subr.mxu1 %v25032_v0  ;;  %23632 = vmatpush3.msra.mxu0 %v20539_v54  ;;  %v20577_v54 = vld [vmem:[%s25074_s18 + $0x478] sm:$0xff] }
 0x29e   : > { %23643 = vmatpush3.msra.mxu1 %v20543_v12  ;;  %23633 = vmatprep.subr.mxu0 %v25032_v0  ;;  %v20572_v12 = vld [vmem:[%s25074_s18 + $0x410] sm:$0xff] }
 0x29f   : > { %23644 = vmatprep.subr.mxu1 %v25032_v0  ;;  %23634 = vmatpush3.msra.mxu0 %v20538_v62 }
 0x2a0   : > { %23635 = vmatprep.mubr.msk.f32.mxu0 %vm25033_vm0, %v25032_v0  ;;  %23645 = vmatpush3.msra.mxu1 %v20542_v30 }
 0x2a1   : > { %23646 = vmatprep.mubr.msk.f32.mxu1 %vm25033_vm0, %v25032_v0  ;;  %23636 = vmatmul.mubr.msk.f32.vlgmr.msra.gmra.mxu0 %vm539_vm1, %v26486_v7  ;;  %v20547_v7 = vld [vmem:[%s25074_s18 + $0x1c8] sm:$0xff] }
 0x2a2   : > { %23647 = vmatmul.mubr.msk.f32.vlgmr.msra.gmra.mxu1 %vm539_vm1, %v26488_v32  ;;  %23649 = vmatprep.subr.mxu0 %v25032_v0  ;;  %v20551_v32 = vld [vmem:[%s25074_s18 + $0x228] sm:$0xff] }
 0x2a3   : > { %23660 = vmatprep.subr.mxu1 %v25032_v0  ;;  %23650 = vmatpush3.msra.mxu0 %v20549_v1  ;;  %v26850_v60 = vpop.f32.mrf.mxu0 }
 0x2a4   : > { %23661 = vmatpush3.msra.mxu1 %v20553_v2  ;;  %v26852_v8 = vpop.f32.mrf.mxu1  ;;  %23651 = vmatprep.subr.mxu0 %v25032_v0  ;;  %v20570_v2 = vld [vmem:[%s25074_s18 + $0x400] sm:$0xff] }
 0x2a5   : > { %23662 = vmatprep.subr.mxu1 %v25032_v0  ;;  %23652 = vmatpush3.msra.mxu0 %v20548_v25  ;;  %v23219_v11 = vpop.f32.mrf.mxu0  ;;  %v20574_v25 = vld [vmem:[%s25074_s18 + $0x460] sm:$0xff] }
 0x2a6   : > { %23663 = vmatpush3.msra.mxu1 %v20552_v4  ;;  %v23230_v6 = vpop.f32.mrf.mxu1  ;;  %23653 = vmatprep.subr.mxu0 %v25032_v0  ;;  %v20581_v4 = vld [vmem:[%s25074_s18 + $0x4d8] sm:$0xff]  ;;  %v20584_v11 = vld [vmem:[%s25074_s18 + $0x530] sm:$0xff] }
 0x2a7   : > { %23664 = vmatprep.subr.mxu1 %v25032_v0  ;;  %23654 = vmatpush3.msra.mxu0 %v20547_v7  ;;  %v20585_v7 = vld [vmem:[%s25074_s18 + $0x538] sm:$0xff] }
 0x2a8   : > { %23665 = vmatpush3.msra.mxu1 %v20551_v32  ;;  %23655 = vmatprep.subr.mxu0 %v25032_v0  ;;  %v20580_v32 = vld [vmem:[%s25074_s18 + $0x4d0] sm:$0xff] }
 0x2a9   : > { %23666 = vmatprep.subr.mxu1 %v25032_v0  ;;  %23656 = vmatpush3.msra.mxu0 %v20546_v15 }
 0x2aa   : > { %23657 = vmatprep.mubr.msk.f32.mxu0 %vm25033_vm0, %v25032_v0  ;;  %23667 = vmatpush3.msra.mxu1 %v20550_v44 }
 0x2ab   : > { %23668 = vmatprep.mubr.msk.f32.mxu1 %vm25033_vm0, %v25032_v0  ;;  %23658 = vmatmul.mubr.msk.f32.vlgmr.msra.gmra.mxu0 %vm539_vm1, %v26514_v23  ;;  %v20555_v23 = vld [vmem:[%s25074_s18 + $0x288] sm:$0xff] }
 0x2ac   : > { %23669 = vmatmul.mubr.msk.f32.vlgmr.msra.gmra.mxu1 %vm539_vm1, %v26516_v50  ;;  %23671 = vmatprep.subr.mxu0 %v25032_v0  ;;  %v20559_v50 = vld [vmem:[%s25074_s18 + $0x2e8] sm:$0xff] }
 0x2ad   : > { %23682 = vmatprep.subr.mxu1 %v25032_v0  ;;  %23672 = vmatpush3.msra.mxu0 %v20557_v19  ;;  %v26878_v13 = vpop.f32.mrf.mxu0 }
 0x2ae   : > { %23683 = vmatpush3.msra.mxu1 %v20561_v20  ;;  %v26880_v24 = vpop.f32.mrf.mxu1  ;;  %23673 = vmatprep.subr.mxu0 %v25032_v0  ;;  %v20578_v20 = vld [vmem:[%s25074_s18 + $0x4c0] sm:$0xff] }
 0x2af   : > { %23684 = vmatprep.subr.mxu1 %v25032_v0  ;;  %23674 = vmatpush3.msra.mxu0 %v20556_v41  ;;  %v23241_v29 = vpop.f32.mrf.mxu0  ;;  %v20582_v41 = vld [vmem:[%s25074_s18 + $0x520] sm:$0xff] }
 0x2b0   : > { %23685 = vmatpush3.msra.mxu1 %v20560_v22  ;;  %v23252_v28 = vpop.f32.mrf.mxu1  ;;  %23675 = vmatprep.subr.mxu0 %v25032_v0  ;;  %v20589_v22 = vld [vmem:[%s25074_s18 + $0x598] sm:$0xff]  ;;  %v20592_v29 = vld [vmem:[%s25074_s18 + $0x5f0] sm:$0xff] }
 0x2b1   : > { %23686 = vmatprep.subr.mxu1 %v25032_v0  ;;  %23676 = vmatpush3.msra.mxu0 %v20555_v23  ;;  %v20593_v23 = vld [vmem:[%s25074_s18 + $0x5f8] sm:$0xff] }
 0x2b2   : > { %23687 = vmatpush3.msra.mxu1 %v20559_v50  ;;  %23677 = vmatprep.subr.mxu0 %v25032_v0  ;;  %v20588_v50 = vld [vmem:[%s25074_s18 + $0x590] sm:$0xff] }
 0x2b3   : > { %23688 = vmatprep.subr.mxu1 %v25032_v0  ;;  %23678 = vmatpush3.msra.mxu0 %v20554_v35 }
 0x2b4   : > { %23679 = vmatprep.mubr.msk.f32.mxu0 %vm25033_vm0, %v25032_v0  ;;  %23689 = vmatpush3.msra.mxu1 %v20558_v58 }
 0x2b5   : > { %23690 = vmatprep.mubr.msk.f32.mxu1 %vm25033_vm0, %v25032_v0  ;;  %23680 = vmatmul.mubr.msk.f32.vlgmr.msra.gmra.mxu0 %vm539_vm1, %v26542_v43  ;;  %v20563_v43 = vld [vmem:[%s25074_s18 + $0x348] sm:$0xff] }
 0x2b6   : > { %23691 = vmatmul.mubr.msk.f32.vlgmr.msra.gmra.mxu1 %vm539_vm1, %v26544_v5  ;;  %23693 = vmatprep.subr.mxu0 %v25032_v0  ;;  %v20567_v5 = vld [vmem:[%s25074_s18 + $0x3a8] sm:$0xff] }
 0x2b7   : > { %23704 = vmatprep.subr.mxu1 %v25032_v0  ;;  %23694 = vmatpush3.msra.mxu0 %v20565_v37  ;;  %v26906_v33 = vpop.f32.mrf.mxu0 }
 0x2b8   : > { %23705 = vmatpush3.msra.mxu1 %v20569_v38  ;;  %v26908_v46 = vpop.f32.mrf.mxu1  ;;  %23695 = vmatprep.subr.mxu0 %v25032_v0  ;;  %v20586_v38 = vld [vmem:[%s25074_s18 + $0x580] sm:$0xff] }
 0x2b9   : > { %23706 = vmatprep.subr.mxu1 %v25032_v0  ;;  %23696 = vmatpush3.msra.mxu0 %v20564_v57  ;;  %v23263_v16 = vpop.f32.mrf.mxu0  ;;  %v20590_v57 = vld [vmem:[%s25074_s18 + $0x5e0] sm:$0xff] }
 0x2ba   : > { %23707 = vmatpush3.msra.mxu1 %v20568_v40  ;;  %v23274_v48 = vpop.f32.mrf.mxu1  ;;  %23697 = vmatprep.subr.mxu0 %v25032_v0  ;;  %v20597_v40 = vld [vmem:[%s25074_s18 + $0x658] sm:$0xff]  ;;  %v20600_v16 = vld [vmem:[%s25074_s18 + $0x6b0] sm:$0xff] }
 0x2bb   : > { %23708 = vmatprep.subr.mxu1 %v25032_v0  ;;  %23698 = vmatpush3.msra.mxu0 %v20563_v43  ;;  %v20601_v43 = vld [vmem:[%s25074_s18 + $0x6b8] sm:$0xff] }
 0x2bc   : > { %23709 = vmatpush3.msra.mxu1 %v20567_v5  ;;  %23699 = vmatprep.subr.mxu0 %v25032_v0  ;;  %v20596_v5 = vld [vmem:[%s25074_s18 + $0x650] sm:$0xff] }
 0x2bd   : > { %23710 = vmatprep.subr.mxu1 %v25032_v0  ;;  %23700 = vmatpush3.msra.mxu0 %v20562_v49 }
 0x2be   : > { %23701 = vmatprep.mubr.msk.f32.mxu0 %vm25033_vm0, %v25032_v0  ;;  %23711 = vmatpush3.msra.mxu1 %v20566_v9 }
 0x2bf   : > { %23712 = vmatprep.mubr.msk.f32.mxu1 %vm25033_vm0, %v25032_v0  ;;  %23702 = vmatmul.mubr.msk.f32.vlgmr.msra.gmra.mxu0 %vm539_vm1, %v26570_v61  ;;  %v20571_v61 = vld [vmem:[%s25074_s18 + $0x408] sm:$0xff] }
 0x2c0   : > { %23713 = vmatmul.mubr.msk.f32.vlgmr.msra.gmra.mxu1 %vm539_vm1, %v26572_v27  ;;  %23715 = vmatprep.subr.mxu0 %v25032_v0  ;;  %v20575_v27 = vld [vmem:[%s25074_s18 + $0x468] sm:$0xff] }
 0x2c1   : > { %23726 = vmatprep.subr.mxu1 %v25032_v0  ;;  %23716 = vmatpush3.msra.mxu0 %v20573_v53  ;;  %v26934_v51 = vpop.f32.mrf.mxu0 }
 0x2c2   : > { %23727 = vmatpush3.msra.mxu1 %v20577_v54  ;;  %v26936_v62 = vpop.f32.mrf.mxu1  ;;  %23717 = vmatprep.subr.mxu0 %v25032_v0  ;;  %v20594_v54 = vld [vmem:[%s25074_s18 + $0x640] sm:$0xff] }
 0x2c3   : > { %23728 = vmatprep.subr.mxu1 %v25032_v0  ;;  %23718 = vmatpush3.msra.mxu0 %v20572_v12  ;;  %v23285_v30 = vpop.f32.mrf.mxu0  ;;  %v20598_v12 = vld [vmem:[%s25074_s18 + $0x6a0] sm:$0xff] }
 0x2c4   : > { %23729 = vmatpush3.msra.mxu1 %v20576_v56  ;;  %v23296_v1 = vpop.f32.mrf.mxu1  ;;  %23719 = vmatprep.subr.mxu0 %v25032_v0  ;;  %v20605_v56 = vld [vmem:[%s25074_s18 + $0x718] sm:$0xff]  ;;  %v20608_v30 = vld [vmem:[%s25074_s18 + $0x770] sm:$0xff] }
 0x2c5   : > { %23730 = vmatprep.subr.mxu1 %v25032_v0  ;;  %23720 = vmatpush3.msra.mxu0 %v20571_v61  ;;  %v20609_v61 = vld [vmem:[%s25074_s18 + $0x778] sm:$0xff] }
 0x2c6   : > { %23731 = vmatpush3.msra.mxu1 %v20575_v27  ;;  %23721 = vmatprep.subr.mxu0 %v25032_v0  ;;  %v20604_v27 = vld [vmem:[%s25074_s18 + $0x710] sm:$0xff] }
 0x2c7   : > { %23732 = vmatprep.subr.mxu1 %v25032_v0  ;;  %23722 = vmatpush3.msra.mxu0 %v20570_v2 }
 0x2c8   : > { %23723 = vmatprep.mubr.msk.f32.mxu0 %vm25033_vm0, %v25032_v0  ;;  %23733 = vmatpush3.msra.mxu1 %v20574_v25 }
 0x2c9   : > { %23734 = vmatprep.mubr.msk.f32.mxu1 %vm25033_vm0, %v25032_v0  ;;  %23724 = vmatmul.mubr.msk.f32.vlgmr.msra.gmra.mxu0 %vm539_vm1, %v26598_v14  ;;  %v20579_v14 = vld [vmem:[%s25074_s18 + $0x4c8] sm:$0xff] }
 0x2ca   : > { %23735 = vmatmul.mubr.msk.f32.vlgmr.msra.gmra.mxu1 %vm539_vm1, %v26600_v47  ;;  %23737 = vmatprep.subr.mxu0 %v25032_v0  ;;  %v20583_v47 = vld [vmem:[%s25074_s18 + $0x528] sm:$0xff] }
 0x2cb   : > { %23748 = vmatprep.subr.mxu1 %v25032_v0  ;;  %23738 = vmatpush3.msra.mxu0 %v20581_v4  ;;  %v26962_v6 = vpop.f32.mrf.mxu0 }
 0x2cc   : > { %23749 = vmatpush3.msra.mxu1 %v20585_v7  ;;  %v26964_v15 = vpop.f32.mrf.mxu1  ;;  %23739 = vmatprep.subr.mxu0 %v25032_v0  ;;  %v20602_v7 = vld [vmem:[%s25074_s18 + $0x700] sm:$0xff] }
 0x2cd   : > { %23750 = vmatprep.subr.mxu1 %v25032_v0  ;;  %23740 = vmatpush3.msra.mxu0 %v20580_v32  ;;  %v23307_v44 = vpop.f32.mrf.mxu0  ;;  %v20606_v32 = vld [vmem:[%s25074_s18 + $0x760] sm:$0xff] }
 0x2ce   : > { %23751 = vmatpush3.msra.mxu1 %v20584_v11  ;;  %v23318_v19 = vpop.f32.mrf.mxu1  ;;  %23741 = vmatprep.subr.mxu0 %v25032_v0  ;;  %v20613_v11 = vld [vmem:[%s25074_s18 + $0x7d8] sm:$0xff]  ;;  %v20616_v44 = vld [vmem:[%s25074_s18 + $0x830] sm:$0xff] }
 0x2cf   : > { %23752 = vmatprep.subr.mxu1 %v25032_v0  ;;  %23742 = vmatpush3.msra.mxu0 %v20579_v14  ;;  %v20617_v14 = vld [vmem:[%s25074_s18 + $0x838] sm:$0xff] }
 0x2d0   : > { %23753 = vmatpush3.msra.mxu1 %v20583_v47  ;;  %23743 = vmatprep.subr.mxu0 %v25032_v0  ;;  %v20612_v47 = vld [vmem:[%s25074_s18 + $0x7d0] sm:$0xff] }
 0x2d1   : > { %23754 = vmatprep.subr.mxu1 %v25032_v0  ;;  %23744 = vmatpush3.msra.mxu0 %v20578_v20 }
 0x2d2   : > { %23745 = vmatprep.mubr.msk.f32.mxu0 %vm25033_vm0, %v25032_v0  ;;  %23755 = vmatpush3.msra.mxu1 %v20582_v41 }
 0x2d3   : > { %23756 = vmatprep.mubr.msk.f32.mxu1 %vm25033_vm0, %v25032_v0  ;;  %23746 = vmatmul.mubr.msk.f32.vlgmr.msra.gmra.mxu0 %vm539_vm1, %v26626_v34  ;;  %v20587_v34 = vld [vmem:[%s25074_s18 + $0x588] sm:$0xff] }
 0x2d4   : > { %23757 = vmatmul.mubr.msk.f32.vlgmr.msra.gmra.mxu1 %vm539_vm1, %v26628_v63  ;;  %23759 = vmatprep.subr.mxu0 %v25032_v0  ;;  %v20591_v63 = vld [vmem:[%s25074_s18 + $0x5e8] sm:$0xff] }
 0x2d5   : > { %23770 = vmatprep.subr.mxu1 %v25032_v0  ;;  %23760 = vmatpush3.msra.mxu0 %v20589_v22  ;;  %v26990_v28 = vpop.f32.mrf.mxu0 }
 0x2d6   : > { %23771 = vmatpush3.msra.mxu1 %v20593_v23  ;;  %v26992_v35 = vpop.f32.mrf.mxu1  ;;  %23761 = vmatprep.subr.mxu0 %v25032_v0  ;;  %v20610_v23 = vld [vmem:[%s25074_s18 + $0x7c0] sm:$0xff] }
 0x2d7   : > { %23772 = vmatprep.subr.mxu1 %v25032_v0  ;;  %23762 = vmatpush3.msra.mxu0 %v20588_v50  ;;  %v23329_v58 = vpop.f32.mrf.mxu0  ;;  %v20614_v50 = vld [vmem:[%s25074_s18 + $0x820] sm:$0xff] }
 0x2d8   : > { %23773 = vmatpush3.msra.mxu1 %v20592_v29  ;;  %v23340_v37 = vpop.f32.mrf.mxu1  ;;  %23763 = vmatprep.subr.mxu0 %v25032_v0  ;;  %v20621_v29 = vld [vmem:[%s25074_s18 + $0x898] sm:$0xff]  ;;  %v20624_v58 = vld [vmem:[%s25074_s18 + $0x8f0] sm:$0xff] }
 0x2d9   : > { %23774 = vmatprep.subr.mxu1 %v25032_v0  ;;  %23764 = vmatpush3.msra.mxu0 %v20587_v34  ;;  %v20625_v34 = vld [vmem:[%s25074_s18 + $0x8f8] sm:$0xff] }
 0x2da   : > { %23775 = vmatpush3.msra.mxu1 %v20591_v63  ;;  %23765 = vmatprep.subr.mxu0 %v25032_v0  ;;  %v20620_v63 = vld [vmem:[%s25074_s18 + $0x890] sm:$0xff] }
 0x2db   : > { %23776 = vmatprep.subr.mxu1 %v25032_v0  ;;  %23766 = vmatpush3.msra.mxu0 %v20586_v38 }
 0x2dc   : > { %23767 = vmatprep.mubr.msk.f32.mxu0 %vm25033_vm0, %v25032_v0  ;;  %23777 = vmatpush3.msra.mxu1 %v20590_v57 }
 0x2dd   : > { %23778 = vmatprep.mubr.msk.f32.mxu1 %vm25033_vm0, %v25032_v0  ;;  %23768 = vmatmul.mubr.msk.f32.vlgmr.msra.gmra.mxu0 %vm539_vm1, %v26654_v17  ;;  %v20595_v17 = vld [vmem:[%s25074_s18 + $0x648] sm:$0xff] }
 0x2de   : > { %23779 = vmatmul.mubr.msk.f32.vlgmr.msra.gmra.mxu1 %vm539_vm1, %v26656_v18  ;;  %23781 = vmatprep.subr.mxu0 %v25032_v0  ;;  %v20599_v18 = vld [vmem:[%s25074_s18 + $0x6a8] sm:$0xff] }
 0x2df   : > { %23792 = vmatprep.subr.mxu1 %v25032_v0  ;;  %23782 = vmatpush3.msra.mxu0 %v20597_v40  ;;  %v27018_v48 = vpop.f32.mrf.mxu0 }
 0x2e0   : > { %23793 = vmatpush3.msra.mxu1 %v20601_v43  ;;  %v27020_v49 = vpop.f32.mrf.mxu1  ;;  %23783 = vmatprep.subr.mxu0 %v25032_v0  ;;  %v20618_v43 = vld [vmem:[%s25074_s18 + $0x880] sm:$0xff] }
 0x2e1   : > { %23794 = vmatprep.subr.mxu1 %v25032_v0  ;;  %23784 = vmatpush3.msra.mxu0 %v20596_v5  ;;  %v23351_v9 = vpop.f32.mrf.mxu0  ;;  %v20622_v5 = vld [vmem:[%s25074_s18 + $0x8e0] sm:$0xff] }
 0x2e2   : > { %23795 = vmatpush3.msra.mxu1 %v20600_v16  ;;  %v23362_v53 = vpop.f32.mrf.mxu1  ;;  %23785 = vmatprep.subr.mxu0 %v25032_v0  ;;  %v20629_v16 = vld [vmem:[%s25074_s18 + $0x958] sm:$0xff]  ;;  %v20632_v9 = vld [vmem:[%s25074_s18 + $0x9b0] sm:$0xff] }
 0x2e3   : > { %23796 = vmatprep.subr.mxu1 %v25032_v0  ;;  %23786 = vmatpush3.msra.mxu0 %v20595_v17  ;;  %v20633_v17 = vld [vmem:[%s25074_s18 + $0x9b8] sm:$0xff] }
 0x2e4   : > { %23797 = vmatpush3.msra.mxu1 %v20599_v18  ;;  %23787 = vmatprep.subr.mxu0 %v25032_v0  ;;  %v20628_v18 = vld [vmem:[%s25074_s18 + $0x950] sm:$0xff] }
 0x2e5   : > { %23798 = vmatprep.subr.mxu1 %v25032_v0  ;;  %23788 = vmatpush3.msra.mxu0 %v20594_v54 }
 0x2e6   : > { %23789 = vmatprep.mubr.msk.f32.mxu0 %vm25033_vm0, %v25032_v0  ;;  %23799 = vmatpush3.msra.mxu1 %v20598_v12 }
 0x2e7   : > { %23800 = vmatprep.mubr.msk.f32.mxu1 %vm25033_vm0, %v25032_v0  ;;  %23790 = vmatmul.mubr.msk.f32.vlgmr.msra.gmra.mxu0 %vm539_vm1, %v26682_v31  ;;  %v20603_v31 = vld [vmem:[%s25074_s18 + $0x708] sm:$0xff] }
 0x2e8   : > { %23801 = vmatmul.mubr.msk.f32.vlgmr.msra.gmra.mxu1 %vm539_vm1, %v26684_v36  ;;  %23803 = vmatprep.subr.mxu0 %v25032_v0  ;;  %v20607_v36 = vld [vmem:[%s25074_s18 + $0x768] sm:$0xff] }
 0x2e9   : > { %23814 = vmatprep.subr.mxu1 %v25032_v0  ;;  %23804 = vmatpush3.msra.mxu0 %v20605_v56  ;;  %v27046_v1 = vpop.f32.mrf.mxu0 }
 0x2ea   : > { %23815 = vmatpush3.msra.mxu1 %v20609_v61  ;;  %v27048_v2 = vpop.f32.mrf.mxu1  ;;  %23805 = vmatprep.subr.mxu0 %v25032_v0  ;;  %v20626_v61 = vld [vmem:[%s25074_s18 + $0x940] sm:$0xff] }
 0x2eb   : > { %23816 = vmatprep.subr.mxu1 %v25032_v0  ;;  %23806 = vmatpush3.msra.mxu0 %v20604_v27  ;;  %v23373_v25 = vpop.f32.mrf.mxu0  ;;  %v20630_v27 = vld [vmem:[%s25074_s18 + $0x9a0] sm:$0xff] }
 0x2ec   : > { %23817 = vmatpush3.msra.mxu1 %v20608_v30  ;;  %v23384_v4 = vpop.f32.mrf.mxu1  ;;  %23807 = vmatprep.subr.mxu0 %v25032_v0  ;;  %v20637_v30 = vld [vmem:[%s25074_s18 + $0xa18] sm:$0xff]  ;;  %v20640_v25 = vld [vmem:[%s25074_s18 + $0xa70] sm:$0xff] }
 0x2ed   : > { %23818 = vmatprep.subr.mxu1 %v25032_v0  ;;  %23808 = vmatpush3.msra.mxu0 %v20603_v31  ;;  %v20641_v31 = vld [vmem:[%s25074_s18 + $0xa78] sm:$0xff] }
 0x2ee   : > { %23819 = vmatpush3.msra.mxu1 %v20607_v36  ;;  %23809 = vmatprep.subr.mxu0 %v25032_v0  ;;  %v20636_v36 = vld [vmem:[%s25074_s18 + $0xa10] sm:$0xff] }
 0x2ef   : > { %23820 = vmatprep.subr.mxu1 %v25032_v0  ;;  %23810 = vmatpush3.msra.mxu0 %v20602_v7 }
 0x2f0   : > { %23811 = vmatprep.mubr.msk.f32.mxu0 %vm25033_vm0, %v25032_v0  ;;  %23821 = vmatpush3.msra.mxu1 %v20606_v32 }
 0x2f1   : > { %23822 = vmatprep.mubr.msk.f32.mxu1 %vm25033_vm0, %v25032_v0  ;;  %23812 = vmatmul.mubr.msk.f32.vlgmr.msra.gmra.mxu0 %vm539_vm1, %v26710_v45  ;;  %v20611_v45 = vld [vmem:[%s25074_s18 + $0x7c8] sm:$0xff] }
 0x2f2   : > { %23823 = vmatmul.mubr.msk.f32.vlgmr.msra.gmra.mxu1 %vm539_vm1, %v26712_v52  ;;  %23825 = vmatprep.subr.mxu0 %v25032_v0  ;;  %v20615_v52 = vld [vmem:[%s25074_s18 + $0x828] sm:$0xff] }
 0x2f3   : > { %23836 = vmatprep.subr.mxu1 %v25032_v0  ;;  %23826 = vmatpush3.msra.mxu0 %v20613_v11  ;;  %v27074_v19 = vpop.f32.mrf.mxu0 }
 0x2f4   : > { %23837 = vmatpush3.msra.mxu1 %v20617_v14  ;;  %v27076_v20 = vpop.f32.mrf.mxu1  ;;  %23827 = vmatprep.subr.mxu0 %v25032_v0  ;;  %v20634_v14 = vld [vmem:[%s25074_s18 + $0xa00] sm:$0xff] }
 0x2f5   : > { %23838 = vmatprep.subr.mxu1 %v25032_v0  ;;  %23828 = vmatpush3.msra.mxu0 %v20612_v47  ;;  %v23395_v41 = vpop.f32.mrf.mxu0  ;;  %v20638_v47 = vld [vmem:[%s25074_s18 + $0xa60] sm:$0xff] }
 0x2f6   : > { %23839 = vmatpush3.msra.mxu1 %v20616_v44  ;;  %v23406_v22 = vpop.f32.mrf.mxu1  ;;  %23829 = vmatprep.subr.mxu0 %v25032_v0  ;;  %v20645_v44 = vld [vmem:[%s25074_s18 + $0xad8] sm:$0xff]  ;;  %v20648_v41 = vld [vmem:[%s25074_s18 + $0xb30] sm:$0xff] }
 0x2f7   : > { %23840 = vmatprep.subr.mxu1 %v25032_v0  ;;  %23830 = vmatpush3.msra.mxu0 %v20611_v45  ;;  %v20649_v45 = vld [vmem:[%s25074_s18 + $0xb38] sm:$0xff] }
 0x2f8   : > { %23841 = vmatpush3.msra.mxu1 %v20615_v52  ;;  %23831 = vmatprep.subr.mxu0 %v25032_v0  ;;  %v20644_v52 = vld [vmem:[%s25074_s18 + $0xad0] sm:$0xff] }
 0x2f9   : > { %23842 = vmatprep.subr.mxu1 %v25032_v0  ;;  %23832 = vmatpush3.msra.mxu0 %v20610_v23 }
 0x2fa   : > { %23833 = vmatprep.mubr.msk.f32.mxu0 %vm25033_vm0, %v25032_v0  ;;  %23843 = vmatpush3.msra.mxu1 %v20614_v50 }
 0x2fb   : > { %23844 = vmatprep.mubr.msk.f32.mxu1 %vm25033_vm0, %v25032_v0  ;;  %23834 = vmatmul.mubr.msk.f32.vlgmr.msra.gmra.mxu0 %vm539_vm1, %v26738_v59  ;;  %v20619_v59 = vld [vmem:[%s25074_s18 + $0x888] sm:$0xff] }
 0x2fc   : > { %23845 = vmatmul.mubr.msk.f32.vlgmr.msra.gmra.mxu1 %vm539_vm1, %v26740_v3  ;;  %23847 = vmatprep.subr.mxu0 %v25032_v0  ;;  %v20623_v3 = vld [vmem:[%s25074_s18 + $0x8e8] sm:$0xff] }
 0x2fd   : > { %23858 = vmatprep.subr.mxu1 %v25032_v0  ;;  %23848 = vmatpush3.msra.mxu0 %v20621_v29  ;;  %v27102_v37 = vpop.f32.mrf.mxu0 }
 0x2fe   : > { %23859 = vmatpush3.msra.mxu1 %v20625_v34  ;;  %v27104_v38 = vpop.f32.mrf.mxu1  ;;  %23849 = vmatprep.subr.mxu0 %v25032_v0  ;;  %v20642_v34 = vld [vmem:[%s25074_s18 + $0xac0] sm:$0xff] }
 0x2ff   : > { %23860 = vmatprep.subr.mxu1 %v25032_v0  ;;  %23850 = vmatpush3.msra.mxu0 %v20620_v63  ;;  %v23417_v57 = vpop.f32.mrf.mxu0  ;;  %v20646_v63 = vld [vmem:[%s25074_s18 + $0xb20] sm:$0xff] }
 0x300   : > { %23861 = vmatpush3.msra.mxu1 %v20624_v58  ;;  %v23428_v40 = vpop.f32.mrf.mxu1  ;;  %23851 = vmatprep.subr.mxu0 %v25032_v0  ;;  %v20653_v58 = vld [vmem:[%s25074_s18 + $0xb98] sm:$0xff]  ;;  %v20656_v57 = vld [vmem:[%s25074_s18 + $0xbf0] sm:$0xff] }
 0x301   : > { %23862 = vmatprep.subr.mxu1 %v25032_v0  ;;  %23852 = vmatpush3.msra.mxu0 %v20619_v59  ;;  %v20657_v59 = vld [vmem:[%s25074_s18 + $0xbf8] sm:$0xff] }
 0x302   : > { %23863 = vmatpush3.msra.mxu1 %v20623_v3  ;;  %23853 = vmatprep.subr.mxu0 %v25032_v0  ;;  %v20652_v3 = vld [vmem:[%s25074_s18 + $0xb90] sm:$0xff] }
 0x303   : > { %23864 = vmatprep.subr.mxu1 %v25032_v0  ;;  %23854 = vmatpush3.msra.mxu0 %v20618_v43 }
 0x304   : > { %23855 = vmatprep.mubr.msk.f32.mxu0 %vm25033_vm0, %v25032_v0  ;;  %23865 = vmatpush3.msra.mxu1 %v20622_v5 }
 0x305   : > { %23866 = vmatprep.mubr.msk.f32.mxu1 %vm25033_vm0, %v25032_v0  ;;  %23856 = vmatmul.mubr.msk.f32.vlgmr.msra.gmra.mxu0 %vm539_vm1, %v26766_v10  ;;  %v20627_v10 = vld [vmem:[%s25074_s18 + $0x948] sm:$0xff] }
 0x306   : > { %23867 = vmatmul.mubr.msk.f32.vlgmr.msra.gmra.mxu1 %vm539_vm1, %v26768_v21  ;;  %23869 = vmatprep.subr.mxu0 %v25032_v0  ;;  %v20631_v21 = vld [vmem:[%s25074_s18 + $0x9a8] sm:$0xff] }
 0x307   : > { %23880 = vmatprep.subr.mxu1 %v25032_v0  ;;  %23870 = vmatpush3.msra.mxu0 %v20629_v16  ;;  %v27130_v53 = vpop.f32.mrf.mxu0 }
 0x308   : > { %23881 = vmatpush3.msra.mxu1 %v20633_v17  ;;  %v27132_v54 = vpop.f32.mrf.mxu1  ;;  %23871 = vmatprep.subr.mxu0 %v25032_v0  ;;  %v20650_v17 = vld [vmem:[%s25074_s18 + $0xb80] sm:$0xff] }
 0x309   : > { %23882 = vmatprep.subr.mxu1 %v25032_v0  ;;  %23872 = vmatpush3.msra.mxu0 %v20628_v18  ;;  %v23439_v12 = vpop.f32.mrf.mxu0  ;;  %v20654_v18 = vld [vmem:[%s25074_s18 + $0xbe0] sm:$0xff] }
 0x30a   : > { %23883 = vmatpush3.msra.mxu1 %v20632_v9  ;;  %v23450_v56 = vpop.f32.mrf.mxu1  ;;  %23873 = vmatprep.subr.mxu0 %v25032_v0  ;;  %v20661_v9 = vld [vmem:[%s25074_s18 + $0xc58] sm:$0xff]  ;;  %v20664_v12 = vld [vmem:[%s25074_s18 + $0xcb0] sm:$0xff] }
 0x30b   : > { %23884 = vmatprep.subr.mxu1 %v25032_v0  ;;  %23874 = vmatpush3.msra.mxu0 %v20627_v10  ;;  %v20665_v10 = vld [vmem:[%s25074_s18 + $0xcb8] sm:$0xff] }
 0x30c   : > { %23885 = vmatpush3.msra.mxu1 %v20631_v21  ;;  %23875 = vmatprep.subr.mxu0 %v25032_v0  ;;  %v20660_v21 = vld [vmem:[%s25074_s18 + $0xc50] sm:$0xff] }
 0x30d   : > { %23886 = vmatprep.subr.mxu1 %v25032_v0  ;;  %23876 = vmatpush3.msra.mxu0 %v20626_v61 }
 0x30e   : > { %23877 = vmatprep.mubr.msk.f32.mxu0 %vm25033_vm0, %v25032_v0  ;;  %23887 = vmatpush3.msra.mxu1 %v20630_v27 }
 0x30f   : > { %23888 = vmatprep.mubr.msk.f32.mxu1 %vm25033_vm0, %v25032_v0  ;;  %23878 = vmatmul.mubr.msk.f32.vlgmr.msra.gmra.mxu0 %vm539_vm1, %v26794_v26  ;;  %v20635_v26 = vld [vmem:[%s25074_s18 + $0xa08] sm:$0xff] }
 0x310   : > { %23889 = vmatmul.mubr.msk.f32.vlgmr.msra.gmra.mxu1 %vm539_vm1, %v26796_v39  ;;  %23891 = vmatprep.subr.mxu0 %v25032_v0  ;;  %v20639_v39 = vld [vmem:[%s25074_s18 + $0xa68] sm:$0xff] }
 0x311   : > { %23902 = vmatprep.subr.mxu1 %v25032_v0  ;;  %23892 = vmatpush3.msra.mxu0 %v20637_v30  ;;  %v27158_v4 = vpop.f32.mrf.mxu0 }
 0x312   : > { %23903 = vmatpush3.msra.mxu1 %v20641_v31  ;;  %v27160_v7 = vpop.f32.mrf.mxu1  ;;  %23893 = vmatprep.subr.mxu0 %v25032_v0  ;;  %v20658_v31 = vld [vmem:[%s25074_s18 + $0xc40] sm:$0xff] }
 0x313   : > { %23904 = vmatprep.subr.mxu1 %v25032_v0  ;;  %23894 = vmatpush3.msra.mxu0 %v20636_v36  ;;  %v23461_v32 = vpop.f32.mrf.mxu0  ;;  %v20662_v36 = vld [vmem:[%s25074_s18 + $0xca0] sm:$0xff] }
 0x314   : > { %23905 = vmatpush3.msra.mxu1 %v20640_v25  ;;  %v23472_v11 = vpop.f32.mrf.mxu1  ;;  %23895 = vmatprep.subr.mxu0 %v25032_v0  ;;  %v20669_v25 = vld [vmem:[%s25074_s18 + $0xd18] sm:$0xff]  ;;  %v20672_v32 = vld [vmem:[%s25074_s18 + $0xd70] sm:$0xff] }
 0x315   : > { %23906 = vmatprep.subr.mxu1 %v25032_v0  ;;  %23896 = vmatpush3.msra.mxu0 %v20635_v26  ;;  %v20673_v26 = vld [vmem:[%s25074_s18 + $0xd78] sm:$0xff] }
 0x316   : > { %23907 = vmatpush3.msra.mxu1 %v20639_v39  ;;  %23897 = vmatprep.subr.mxu0 %v25032_v0  ;;  %v20668_v39 = vld [vmem:[%s25074_s18 + $0xd10] sm:$0xff] }
 0x317   : > { %23908 = vmatprep.subr.mxu1 %v25032_v0  ;;  %23898 = vmatpush3.msra.mxu0 %v20634_v14 }
 0x318   : > { %23899 = vmatprep.mubr.msk.f32.mxu0 %vm25033_vm0, %v25032_v0  ;;  %23909 = vmatpush3.msra.mxu1 %v20638_v47 }
 0x319   : > { %23910 = vmatprep.mubr.msk.f32.mxu1 %vm25033_vm0, %v25032_v0  ;;  %23900 = vmatmul.mubr.msk.f32.vlgmr.msra.gmra.mxu0 %vm539_vm1, %v26822_v42  ;;  %v20643_v42 = vld [vmem:[%s25074_s18 + $0xac8] sm:$0xff] }
 0x31a   : > { %23911 = vmatmul.mubr.msk.f32.vlgmr.msra.gmra.mxu1 %vm539_vm1, %v26824_v55  ;;  %23913 = vmatprep.subr.mxu0 %v25032_v0  ;;  %v20647_v55 = vld [vmem:[%s25074_s18 + $0xb28] sm:$0xff] }
 0x31b   : > { %23924 = vmatprep.subr.mxu1 %v25032_v0  ;;  %23914 = vmatpush3.msra.mxu0 %v20645_v44  ;;  %v27186_v22 = vpop.f32.mrf.mxu0 }
 0x31c   : > { %23925 = vmatpush3.msra.mxu1 %v20649_v45  ;;  %v27188_v23 = vpop.f32.mrf.mxu1  ;;  %23915 = vmatprep.subr.mxu0 %v25032_v0  ;;  %v20666_v45 = vld [vmem:[%s25074_s18 + $0xd00] sm:$0xff] }
 0x31d   : > { %23926 = vmatprep.subr.mxu1 %v25032_v0  ;;  %23916 = vmatpush3.msra.mxu0 %v20644_v52  ;;  %v23483_v50 = vpop.f32.mrf.mxu0  ;;  %v20670_v52 = vld [vmem:[%s25074_s18 + $0xd60] sm:$0xff] }
 0x31e   : > { %23927 = vmatpush3.msra.mxu1 %v20648_v41  ;;  %v23494_v29 = vpop.f32.mrf.mxu1  ;;  %23917 = vmatprep.subr.mxu0 %v25032_v0  ;;  %v20677_v41 = vld [vmem:[%s25074_s18 + $0xdd8] sm:$0xff]  ;;  %v20680_v50 = vld [vmem:[%s25074_s18 + $0xe30] sm:$0xff] }
 0x31f   : > { %23928 = vmatprep.subr.mxu1 %v25032_v0  ;;  %23918 = vmatpush3.msra.mxu0 %v20643_v42  ;;  %v20681_v42 = vld [vmem:[%s25074_s18 + $0xe38] sm:$0xff] }
 0x320   : > { %23929 = vmatpush3.msra.mxu1 %v20647_v55  ;;  %23919 = vmatprep.subr.mxu0 %v25032_v0  ;;  %v20676_v55 = vld [vmem:[%s25074_s18 + $0xdd0] sm:$0xff] }
 0x321   : > { %23930 = vmatprep.subr.mxu1 %v25032_v0  ;;  %23920 = vmatpush3.msra.mxu0 %v20642_v34 }
 0x322   : > { %23921 = vmatprep.mubr.msk.f32.mxu0 %vm25033_vm0, %v25032_v0  ;;  %23931 = vmatpush3.msra.mxu1 %v20646_v63 }
 0x323   : > { %23932 = vmatprep.mubr.msk.f32.mxu1 %vm25033_vm0, %v25032_v0  ;;  %23922 = vmatmul.mubr.msk.f32.vlgmr.msra.gmra.mxu0 %vm539_vm1, %v26850_v60  ;;  %v20651_v60 = vld [vmem:[%s25074_s18 + $0xb88] sm:$0xff] }
 0x324   : > { %23933 = vmatmul.mubr.msk.f32.vlgmr.msra.gmra.mxu1 %vm539_vm1, %v26852_v8  ;;  %23935 = vmatprep.subr.mxu0 %v25032_v0  ;;  %v20655_v8 = vld [vmem:[%s25074_s18 + $0xbe8] sm:$0xff] }
 0x325   : > { %23946 = vmatprep.subr.mxu1 %v25032_v0  ;;  %23936 = vmatpush3.msra.mxu0 %v20653_v58  ;;  %v27214_v40 = vpop.f32.mrf.mxu0 }
 0x326   : > { %23947 = vmatpush3.msra.mxu1 %v20657_v59  ;;  %v27216_v43 = vpop.f32.mrf.mxu1  ;;  %23937 = vmatprep.subr.mxu0 %v25032_v0  ;;  %v20674_v59 = vld [vmem:[%s25074_s18 + $0xdc0] sm:$0xff] }
 0x327   : > { %23948 = vmatprep.subr.mxu1 %v25032_v0  ;;  %23938 = vmatpush3.msra.mxu0 %v20652_v3  ;;  %v23505_v5 = vpop.f32.mrf.mxu0  ;;  %v20678_v3 = vld [vmem:[%s25074_s18 + $0xe20] sm:$0xff] }
 0x328   : > { %23949 = vmatpush3.msra.mxu1 %v20656_v57  ;;  %v23516_v16 = vpop.f32.mrf.mxu1  ;;  %23939 = vmatprep.subr.mxu0 %v25032_v0  ;;  %v20685_v57 = vld [vmem:[%s25074_s18 + $0xe98] sm:$0xff]  ;;  %v20688_v5 = vld [vmem:[%s25074_s18 + $0xef0] sm:$0xff] }
 0x329   : > { %23950 = vmatprep.subr.mxu1 %v25032_v0  ;;  %23940 = vmatpush3.msra.mxu0 %v20651_v60  ;;  %v20689_v60 = vld [vmem:[%s25074_s18 + $0xef8] sm:$0xff] }
 0x32a   : > { %23951 = vmatpush3.msra.mxu1 %v20655_v8  ;;  %23941 = vmatprep.subr.mxu0 %v25032_v0  ;;  %v20684_v8 = vld [vmem:[%s25074_s18 + $0xe90] sm:$0xff] }
 0x32b   : > { %23952 = vmatprep.subr.mxu1 %v25032_v0  ;;  %23942 = vmatpush3.msra.mxu0 %v20650_v17 }
 0x32c   : > { %23943 = vmatprep.mubr.msk.f32.mxu0 %vm25033_vm0, %v25032_v0  ;;  %23953 = vmatpush3.msra.mxu1 %v20654_v18 }
 0x32d   : > { %23954 = vmatprep.mubr.msk.f32.mxu1 %vm25033_vm0, %v25032_v0  ;;  %23944 = vmatmul.mubr.msk.f32.vlgmr.msra.gmra.mxu0 %vm539_vm1, %v26878_v13  ;;  %v20659_v13 = vld [vmem:[%s25074_s18 + $0xc48] sm:$0xff] }
 0x32e   : > { %23955 = vmatmul.mubr.msk.f32.vlgmr.msra.gmra.mxu1 %vm539_vm1, %v26880_v24  ;;  %23957 = vmatprep.subr.mxu0 %v25032_v0  ;;  %v20663_v24 = vld [vmem:[%s25074_s18 + $0xca8] sm:$0xff] }
 0x32f   : > { %23968 = vmatprep.subr.mxu1 %v25032_v0  ;;  %23958 = vmatpush3.msra.mxu0 %v20661_v9  ;;  %v27242_v56 = vpop.f32.mrf.mxu0 }
 0x330   : > { %23969 = vmatpush3.msra.mxu1 %v20665_v10  ;;  %v27244_v61 = vpop.f32.mrf.mxu1  ;;  %23959 = vmatprep.subr.mxu0 %v25032_v0  ;;  %v20682_v10 = vld [vmem:[%s25074_s18 + $0xe80] sm:$0xff] }
 0x331   : > { %23970 = vmatprep.subr.mxu1 %v25032_v0  ;;  %23960 = vmatpush3.msra.mxu0 %v20660_v21  ;;  %v23527_v27 = vpop.f32.mrf.mxu0  ;;  %v20686_v21 = vld [vmem:[%s25074_s18 + $0xee0] sm:$0xff] }
 0x332   : > { %23971 = vmatpush3.msra.mxu1 %v20664_v12  ;;  %v23538_v30 = vpop.f32.mrf.mxu1  ;;  %23961 = vmatprep.subr.mxu0 %v25032_v0  ;;  %v20693_v12 = vld [vmem:[%s25074_s18 + $0xf58] sm:$0xff]  ;;  %v20696_v27 = vld [vmem:[%s25074_s18 + $0xfb0] sm:$0xff] }
 0x333   : > { %23972 = vmatprep.subr.mxu1 %v25032_v0  ;;  %23962 = vmatpush3.msra.mxu0 %v20659_v13  ;;  %v20697_v13 = vld [vmem:[%s25074_s18 + $0xfb8] sm:$0xff] }
 0x334   : > { %23973 = vmatpush3.msra.mxu1 %v20663_v24  ;;  %23963 = vmatprep.subr.mxu0 %v25032_v0  ;;  %v20692_v24 = vld [vmem:[%s25074_s18 + $0xf50] sm:$0xff] }
 0x335   : > { %23974 = vmatprep.subr.mxu1 %v25032_v0  ;;  %23964 = vmatpush3.msra.mxu0 %v20658_v31 }
 0x336   : > { %23965 = vmatprep.mubr.msk.f32.mxu0 %vm25033_vm0, %v25032_v0  ;;  %23975 = vmatpush3.msra.mxu1 %v20662_v36 }
 0x337   : > { %23976 = vmatprep.mubr.msk.f32.mxu1 %vm25033_vm0, %v25032_v0  ;;  %23966 = vmatmul.mubr.msk.f32.vlgmr.msra.gmra.mxu0 %vm539_vm1, %v26906_v33  ;;  %v20667_v33 = vld [vmem:[%s25074_s18 + $0xd08] sm:$0xff] }
 0x338   : > { %23977 = vmatmul.mubr.msk.f32.vlgmr.msra.gmra.mxu1 %vm539_vm1, %v26908_v46  ;;  %23979 = vmatprep.subr.mxu0 %v25032_v0  ;;  %v20671_v46 = vld [vmem:[%s25074_s18 + $0xd68] sm:$0xff] }
 0x339   : > { %23990 = vmatprep.subr.mxu1 %v25032_v0  ;;  %23980 = vmatpush3.msra.mxu0 %v20669_v25  ;;  %v27270_v11 = vpop.f32.mrf.mxu0 }
 0x33a   : > { %23991 = vmatpush3.msra.mxu1 %v20673_v26  ;;  %v27272_v14 = vpop.f32.mrf.mxu1  ;;  %23981 = vmatprep.subr.mxu0 %v25032_v0  ;;  %v20690_v26 = vld [vmem:[%s25074_s18 + $0xf40] sm:$0xff] }
 0x33b   : > { %23992 = vmatprep.subr.mxu1 %v25032_v0  ;;  %23982 = vmatpush3.msra.mxu0 %v20668_v39  ;;  %v23549_v47 = vpop.f32.mrf.mxu0  ;;  %v20694_v39 = vld [vmem:[%s25074_s18 + $0xfa0] sm:$0xff] }
 0x33c   : > { %23993 = vmatpush3.msra.mxu1 %v20672_v32  ;;  %v23560_v44 = vpop.f32.mrf.mxu1  ;;  %23983 = vmatprep.subr.mxu0 %v25032_v0  ;;  %v20701_v32 = vld [vmem:[%s25074_s18 + $0x1018] sm:$0xff]  ;;  %v20704_v47 = vld [vmem:[%s25074_s18 + $0x1070] sm:$0xff] }
 0x33d   : > { %23994 = vmatprep.subr.mxu1 %v25032_v0  ;;  %23984 = vmatpush3.msra.mxu0 %v20667_v33  ;;  %v20705_v33 = vld [vmem:[%s25074_s18 + $0x1078] sm:$0xff] }
 0x33e   : > { %23995 = vmatpush3.msra.mxu1 %v20671_v46  ;;  %23985 = vmatprep.subr.mxu0 %v25032_v0  ;;  %v20700_v46 = vld [vmem:[%s25074_s18 + $0x1010] sm:$0xff] }
 0x33f   : > { %23996 = vmatprep.subr.mxu1 %v25032_v0  ;;  %23986 = vmatpush3.msra.mxu0 %v20666_v45 }
 0x340   : > { %23987 = vmatprep.mubr.msk.f32.mxu0 %vm25033_vm0, %v25032_v0  ;;  %23997 = vmatpush3.msra.mxu1 %v20670_v52 }
 0x341   : > { %23998 = vmatprep.mubr.msk.f32.mxu1 %vm25033_vm0, %v25032_v0  ;;  %23988 = vmatmul.mubr.msk.f32.vlgmr.msra.gmra.mxu0 %vm539_vm1, %v26934_v51  ;;  %v20675_v51 = vld [vmem:[%s25074_s18 + $0xdc8] sm:$0xff] }
 0x342   : > { %23999 = vmatmul.mubr.msk.f32.vlgmr.msra.gmra.mxu1 %vm539_vm1, %v26936_v62  ;;  %24001 = vmatprep.subr.mxu0 %v25032_v0  ;;  %v20679_v62 = vld [vmem:[%s25074_s18 + $0xe28] sm:$0xff] }
 0x343   : > { %24012 = vmatprep.subr.mxu1 %v25032_v0  ;;  %24002 = vmatpush3.msra.mxu0 %v20677_v41  ;;  %v27298_v29 = vpop.f32.mrf.mxu0 }
 0x344   : > { %24013 = vmatpush3.msra.mxu1 %v20681_v42  ;;  %v27300_v34 = vpop.f32.mrf.mxu1  ;;  %24003 = vmatprep.subr.mxu0 %v25032_v0  ;;  %v20698_v42 = vld [vmem:[%s25074_s18 + $0x1000] sm:$0xff] }
 0x345   : > { %24014 = vmatprep.subr.mxu1 %v25032_v0  ;;  %24004 = vmatpush3.msra.mxu0 %v20676_v55  ;;  %v23571_v63 = vpop.f32.mrf.mxu0  ;;  %v20702_v55 = vld [vmem:[%s25074_s18 + $0x1060] sm:$0xff] }
 0x346   : > { %24015 = vmatpush3.msra.mxu1 %v20680_v50  ;;  %v23582_v58 = vpop.f32.mrf.mxu1  ;;  %24005 = vmatprep.subr.mxu0 %v25032_v0  ;;  %v20709_v50 = vld [vmem:[%s25074_s18 + $0x10d8] sm:$0xff]  ;;  %v20712_v63 = vld [vmem:[%s25074_s18 + $0x1130] sm:$0xff] }
 0x347   : > { %24016 = vmatprep.subr.mxu1 %v25032_v0  ;;  %24006 = vmatpush3.msra.mxu0 %v20675_v51  ;;  %v20713_v51 = vld [vmem:[%s25074_s18 + $0x1138] sm:$0xff] }
 0x348   : > { %24017 = vmatpush3.msra.mxu1 %v20679_v62  ;;  %24007 = vmatprep.subr.mxu0 %v25032_v0  ;;  %v20708_v62 = vld [vmem:[%s25074_s18 + $0x10d0] sm:$0xff] }
 0x349   : > { %24018 = vmatprep.subr.mxu1 %v25032_v0  ;;  %24008 = vmatpush3.msra.mxu0 %v20674_v59 }
 0x34a   : > { %24009 = vmatprep.mubr.msk.f32.mxu0 %vm25033_vm0, %v25032_v0  ;;  %24019 = vmatpush3.msra.mxu1 %v20678_v3 }
 0x34b   : > { %24020 = vmatprep.mubr.msk.f32.mxu1 %vm25033_vm0, %v25032_v0  ;;  %24010 = vmatmul.mubr.msk.f32.vlgmr.msra.gmra.mxu0 %vm539_vm1, %v26962_v6  ;;  %v20683_v6 = vld [vmem:[%s25074_s18 + $0xe88] sm:$0xff] }
 0x34c   : > { %24021 = vmatmul.mubr.msk.f32.vlgmr.msra.gmra.mxu1 %vm539_vm1, %v26964_v15  ;;  %24023 = vmatprep.subr.mxu0 %v25032_v0  ;;  %v20687_v15 = vld [vmem:[%s25074_s18 + $0xee8] sm:$0xff] }
 0x34d   : > { %24034 = vmatprep.subr.mxu1 %v25032_v0  ;;  %24024 = vmatpush3.msra.mxu0 %v20685_v57  ;;  %v27326_v16 = vpop.f32.mrf.mxu0 }
 0x34e   : > { %24035 = vmatpush3.msra.mxu1 %v20689_v60  ;;  %v27328_v17 = vpop.f32.mrf.mxu1  ;;  %24025 = vmatprep.subr.mxu0 %v25032_v0  ;;  %v20706_v60 = vld [vmem:[%s25074_s18 + $0x10c0] sm:$0xff] }
 0x34f   : > { %24036 = vmatprep.subr.mxu1 %v25032_v0  ;;  %24026 = vmatpush3.msra.mxu0 %v20684_v8  ;;  %v23593_v18 = vpop.f32.mrf.mxu0  ;;  %v20710_v8 = vld [vmem:[%s25074_s18 + $0x1120] sm:$0xff] }
 0x350   : > { %24037 = vmatpush3.msra.mxu1 %v20688_v5  ;;  %v23604_v9 = vpop.f32.mrf.mxu1  ;;  %24027 = vmatprep.subr.mxu0 %v25032_v0  ;;  %v20717_v5 = vld [vmem:[%s25074_s18 + $0x1198] sm:$0xff]  ;;  %v20720_v18 = vld [vmem:[%s25074_s18 + $0x11f0] sm:$0xff] }
 0x351   : > { %24038 = vmatprep.subr.mxu1 %v25032_v0  ;;  %24028 = vmatpush3.msra.mxu0 %v20683_v6  ;;  %v20721_v6 = vld [vmem:[%s25074_s18 + $0x11f8] sm:$0xff] }
 0x352   : > { %24039 = vmatpush3.msra.mxu1 %v20687_v15  ;;  %24029 = vmatprep.subr.mxu0 %v25032_v0  ;;  %v20716_v15 = vld [vmem:[%s25074_s18 + $0x1190] sm:$0xff] }
 0x353   : > { %24040 = vmatprep.subr.mxu1 %v25032_v0  ;;  %24030 = vmatpush3.msra.mxu0 %v20682_v10 }
 0x354   : > { %24031 = vmatprep.mubr.msk.f32.mxu0 %vm25033_vm0, %v25032_v0  ;;  %24041 = vmatpush3.msra.mxu1 %v20686_v21 }
 0x355   : > { %24042 = vmatprep.mubr.msk.f32.mxu1 %vm25033_vm0, %v25032_v0  ;;  %24032 = vmatmul.mubr.msk.f32.vlgmr.msra.gmra.mxu0 %vm539_vm1, %v26990_v28  ;;  %v20691_v28 = vld [vmem:[%s25074_s18 + $0xf48] sm:$0xff] }
 0x356   : > { %24043 = vmatmul.mubr.msk.f32.vlgmr.msra.gmra.mxu1 %vm539_vm1, %v26992_v35  ;;  %24045 = vmatprep.subr.mxu0 %v25032_v0  ;;  %v20695_v35 = vld [vmem:[%s25074_s18 + $0xfa8] sm:$0xff] }
 0x357   : > { %24056 = vmatprep.subr.mxu1 %v25032_v0  ;;  %24046 = vmatpush3.msra.mxu0 %v20693_v12  ;;  %v27354_v30 = vpop.f32.mrf.mxu0 }
 0x358   : > { %24057 = vmatpush3.msra.mxu1 %v20697_v13  ;;  %v27356_v31 = vpop.f32.mrf.mxu1  ;;  %24047 = vmatprep.subr.mxu0 %v25032_v0  ;;  %v20714_v13 = vld [vmem:[%s25074_s18 + $0x1180] sm:$0xff] }
 0x359   : > { %24058 = vmatprep.subr.mxu1 %v25032_v0  ;;  %24048 = vmatpush3.msra.mxu0 %v20692_v24  ;;  %v23615_v36 = vpop.f32.mrf.mxu0  ;;  %v20718_v24 = vld [vmem:[%s25074_s18 + $0x11e0] sm:$0xff] }
 0x35a   : > { %24059 = vmatpush3.msra.mxu1 %v20696_v27  ;;  %v23626_v25 = vpop.f32.mrf.mxu1  ;;  %24049 = vmatprep.subr.mxu0 %v25032_v0  ;;  %v20725_v27 = vld [vmem:[%s25074_s18 + $0x1258] sm:$0xff]  ;;  %v20728_v36 = vld [vmem:[%s25074_s18 + $0x12b0] sm:$0xff] }
 0x35b   : > { %24060 = vmatprep.subr.mxu1 %v25032_v0  ;;  %24050 = vmatpush3.msra.mxu0 %v20691_v28  ;;  %v20729_v28 = vld [vmem:[%s25074_s18 + $0x12b8] sm:$0xff] }
 0x35c   : > { %24061 = vmatpush3.msra.mxu1 %v20695_v35  ;;  %24051 = vmatprep.subr.mxu0 %v25032_v0  ;;  %v20724_v35 = vld [vmem:[%s25074_s18 + $0x1250] sm:$0xff] }
 0x35d   : > { %24062 = vmatprep.subr.mxu1 %v25032_v0  ;;  %24052 = vmatpush3.msra.mxu0 %v20690_v26 }
 0x35e   : > { %24053 = vmatprep.mubr.msk.f32.mxu0 %vm25033_vm0, %v25032_v0  ;;  %24063 = vmatpush3.msra.mxu1 %v20694_v39 }
 0x35f   : > { %24064 = vmatprep.mubr.msk.f32.mxu1 %vm25033_vm0, %v25032_v0  ;;  %24054 = vmatmul.mubr.msk.f32.vlgmr.msra.gmra.mxu0 %vm539_vm1, %v27018_v48  ;;  %v20699_v48 = vld [vmem:[%s25074_s18 + $0x1008] sm:$0xff] }
 0x360   : > { %24065 = vmatmul.mubr.msk.f32.vlgmr.msra.gmra.mxu1 %vm539_vm1, %v27020_v49  ;;  %24067 = vmatprep.subr.mxu0 %v25032_v0  ;;  %v20703_v49 = vld [vmem:[%s25074_s18 + $0x1068] sm:$0xff] }
 0x361   : > { %24078 = vmatprep.subr.mxu1 %v25032_v0  ;;  %24068 = vmatpush3.msra.mxu0 %v20701_v32  ;;  %v27382_v44 = vpop.f32.mrf.mxu0 }
 0x362   : > { %24079 = vmatpush3.msra.mxu1 %v20705_v33  ;;  %v27384_v45 = vpop.f32.mrf.mxu1  ;;  %24069 = vmatprep.subr.mxu0 %v25032_v0  ;;  %v20722_v33 = vld [vmem:[%s25074_s18 + $0x1240] sm:$0xff] }
 0x363   : > { %24080 = vmatprep.subr.mxu1 %v25032_v0  ;;  %24070 = vmatpush3.msra.mxu0 %v20700_v46  ;;  %v23637_v52 = vpop.f32.mrf.mxu0  ;;  %v20726_v46 = vld [vmem:[%s25074_s18 + $0x12a0] sm:$0xff] }
 0x364   : > { %24081 = vmatpush3.msra.mxu1 %v20704_v47  ;;  %v23648_v41 = vpop.f32.mrf.mxu1  ;;  %24071 = vmatprep.subr.mxu0 %v25032_v0  ;;  %v20733_v47 = vld [vmem:[%s25074_s18 + $0x1318] sm:$0xff]  ;;  %v20736_v52 = vld [vmem:[%s25074_s18 + $0x1370] sm:$0xff] }
 0x365   : > { %24082 = vmatprep.subr.mxu1 %v25032_v0  ;;  %24072 = vmatpush3.msra.mxu0 %v20699_v48  ;;  %v20737_v48 = vld [vmem:[%s25074_s18 + $0x1378] sm:$0xff] }
 0x366   : > { %24083 = vmatpush3.msra.mxu1 %v20703_v49  ;;  %24073 = vmatprep.subr.mxu0 %v25032_v0  ;;  %v20732_v49 = vld [vmem:[%s25074_s18 + $0x1310] sm:$0xff] }
 0x367   : > { %24084 = vmatprep.subr.mxu1 %v25032_v0  ;;  %24074 = vmatpush3.msra.mxu0 %v20698_v42 }
 0x368   : > { %24075 = vmatprep.mubr.msk.f32.mxu0 %vm25033_vm0, %v25032_v0  ;;  %24085 = vmatpush3.msra.mxu1 %v20702_v55 }
 0x369   : > { %24086 = vmatprep.mubr.msk.f32.mxu1 %vm25033_vm0, %v25032_v0  ;;  %24076 = vmatmul.mubr.msk.f32.vlgmr.msra.gmra.mxu0 %vm539_vm1, %v27046_v1  ;;  %v20707_v1 = vld [vmem:[%s25074_s18 + $0x10c8] sm:$0xff] }
 0x36a   : > { %24087 = vmatmul.mubr.msk.f32.vlgmr.msra.gmra.mxu1 %vm539_vm1, %v27048_v2  ;;  %24089 = vmatprep.subr.mxu0 %v25032_v0  ;;  %v20711_v2 = vld [vmem:[%s25074_s18 + $0x1128] sm:$0xff] }
 0x36b   : > { %24100 = vmatprep.subr.mxu1 %v25032_v0  ;;  %24090 = vmatpush3.msra.mxu0 %v20709_v50  ;;  %v27410_v58 = vpop.f32.mrf.mxu0 }
 0x36c   : > { %24101 = vmatpush3.msra.mxu1 %v20713_v51  ;;  %v27412_v59 = vpop.f32.mrf.mxu1  ;;  %24091 = vmatprep.subr.mxu0 %v25032_v0  ;;  %v20730_v51 = vld [vmem:[%s25074_s18 + $0x1300] sm:$0xff] }
 0x36d   : > { %24102 = vmatprep.subr.mxu1 %v25032_v0  ;;  %24092 = vmatpush3.msra.mxu0 %v20708_v62  ;;  %v23659_v3 = vpop.f32.mrf.mxu0  ;;  %v20734_v62 = vld [vmem:[%s25074_s18 + $0x1360] sm:$0xff] }
 0x36e   : > { %24103 = vmatpush3.msra.mxu1 %v20712_v63  ;;  %v23670_v57 = vpop.f32.mrf.mxu1  ;;  %24093 = vmatprep.subr.mxu0 %v25032_v0  ;;  %v20741_v63 = vld [vmem:[%s25074_s18 + $0x13d8] sm:$0xff]  ;;  %v20744_v3 = vld [vmem:[%s25074_s18 + $0x1430] sm:$0xff] }
 0x36f   : > { %24104 = vmatprep.subr.mxu1 %v25032_v0  ;;  %24094 = vmatpush3.msra.mxu0 %v20707_v1  ;;  %v20745_v1 = vld [vmem:[%s25074_s18 + $0x1438] sm:$0xff] }
 0x370   : > { %24105 = vmatpush3.msra.mxu1 %v20711_v2  ;;  %24095 = vmatprep.subr.mxu0 %v25032_v0  ;;  %v20740_v2 = vld [vmem:[%s25074_s18 + $0x13d0] sm:$0xff] }
 0x371   : > { %24106 = vmatprep.subr.mxu1 %v25032_v0  ;;  %24096 = vmatpush3.msra.mxu0 %v20706_v60 }
 0x372   : > { %24097 = vmatprep.mubr.msk.f32.mxu0 %vm25033_vm0, %v25032_v0  ;;  %24107 = vmatpush3.msra.mxu1 %v20710_v8 }
 0x373   : > { %24108 = vmatprep.mubr.msk.f32.mxu1 %vm25033_vm0, %v25032_v0  ;;  %24098 = vmatmul.mubr.msk.f32.vlgmr.msra.gmra.mxu0 %vm539_vm1, %v27074_v19  ;;  %v20715_v19 = vld [vmem:[%s25074_s18 + $0x1188] sm:$0xff] }
 0x374   : > { %24109 = vmatmul.mubr.msk.f32.vlgmr.msra.gmra.mxu1 %vm539_vm1, %v27076_v20  ;;  %24111 = vmatprep.subr.mxu0 %v25032_v0  ;;  %v20719_v20 = vld [vmem:[%s25074_s18 + $0x11e8] sm:$0xff] }
 0x375   : > { %24122 = vmatprep.subr.mxu1 %v25032_v0  ;;  %24112 = vmatpush3.msra.mxu0 %v20717_v5  ;;  %v27438_v9 = vpop.f32.mrf.mxu0 }
 0x376   : > { %24123 = vmatpush3.msra.mxu1 %v20721_v6  ;;  %v27440_v10 = vpop.f32.mrf.mxu1  ;;  %24113 = vmatprep.subr.mxu0 %v25032_v0  ;;  %v20738_v6 = vld [vmem:[%s25074_s18 + $0x13c0] sm:$0xff] }
 0x377   : > { %24124 = vmatprep.subr.mxu1 %v25032_v0  ;;  %24114 = vmatpush3.msra.mxu0 %v20716_v15  ;;  %v23681_v21 = vpop.f32.mrf.mxu0  ;;  %v20742_v15 = vld [vmem:[%s25074_s18 + $0x1420] sm:$0xff] }
 0x378   : > { %24125 = vmatpush3.msra.mxu1 %v20720_v18  ;;  %v23692_v12 = vpop.f32.mrf.mxu1  ;;  %24115 = vmatprep.subr.mxu0 %v25032_v0  ;;  %v20749_v18 = vld [vmem:[%s25074_s18 + $0x1498] sm:$0xff]  ;;  %v20752_v21 = vld [vmem:[%s25074_s18 + $0x14f0] sm:$0xff] }
 0x379   : > { %24126 = vmatprep.subr.mxu1 %v25032_v0  ;;  %24116 = vmatpush3.msra.mxu0 %v20715_v19  ;;  %v20753_v19 = vld [vmem:[%s25074_s18 + $0x14f8] sm:$0xff] }
 0x37a   : > { %24127 = vmatpush3.msra.mxu1 %v20719_v20  ;;  %24117 = vmatprep.subr.mxu0 %v25032_v0  ;;  %v20748_v20 = vld [vmem:[%s25074_s18 + $0x1490] sm:$0xff] }
 0x37b   : > { %24128 = vmatprep.subr.mxu1 %v25032_v0  ;;  %24118 = vmatpush3.msra.mxu0 %v20714_v13 }
 0x37c   : > { %24119 = vmatprep.mubr.msk.f32.mxu0 %vm25033_vm0, %v25032_v0  ;;  %24129 = vmatpush3.msra.mxu1 %v20718_v24 }
 0x37d   : > { %24130 = vmatprep.mubr.msk.f32.mxu1 %vm25033_vm0, %v25032_v0  ;;  %24120 = vmatmul.mubr.msk.f32.vlgmr.msra.gmra.mxu0 %vm539_vm1, %v27102_v37  ;;  %v20723_v37 = vld [vmem:[%s25074_s18 + $0x1248] sm:$0xff] }
 0x37e   : > { %24131 = vmatmul.mubr.msk.f32.vlgmr.msra.gmra.mxu1 %vm539_vm1, %v27104_v38  ;;  %24133 = vmatprep.subr.mxu0 %v25032_v0  ;;  %v20727_v38 = vld [vmem:[%s25074_s18 + $0x12a8] sm:$0xff] }
 0x37f   : > { %24144 = vmatprep.subr.mxu1 %v25032_v0  ;;  %24134 = vmatpush3.msra.mxu0 %v20725_v27  ;;  %v27466_v25 = vpop.f32.mrf.mxu0 }
 0x380   : > { %24145 = vmatpush3.msra.mxu1 %v20729_v28  ;;  %v27468_v26 = vpop.f32.mrf.mxu1  ;;  %24135 = vmatprep.subr.mxu0 %v25032_v0  ;;  %v20746_v28 = vld [vmem:[%s25074_s18 + $0x1480] sm:$0xff] }
 0x381   : > { %24146 = vmatprep.subr.mxu1 %v25032_v0  ;;  %24136 = vmatpush3.msra.mxu0 %v20724_v35  ;;  %v23703_v39 = vpop.f32.mrf.mxu0  ;;  %v20750_v35 = vld [vmem:[%s25074_s18 + $0x14e0] sm:$0xff] }
 0x382   : > { %24147 = vmatpush3.msra.mxu1 %v20728_v36  ;;  %v23714_v32 = vpop.f32.mrf.mxu1  ;;  %24137 = vmatprep.subr.mxu0 %v25032_v0  ;;  %v20757_v36 = vld [vmem:[%s25074_s18 + $0x1558] sm:$0xff]  ;;  %v20760_v39 = vld [vmem:[%s25074_s18 + $0x15b0] sm:$0xff] }
 0x383   : > { %24148 = vmatprep.subr.mxu1 %v25032_v0  ;;  %24138 = vmatpush3.msra.mxu0 %v20723_v37  ;;  %v20761_v37 = vld [vmem:[%s25074_s18 + $0x15b8] sm:$0xff] }
 0x384   : > { %24149 = vmatpush3.msra.mxu1 %v20727_v38  ;;  %24139 = vmatprep.subr.mxu0 %v25032_v0  ;;  %v20756_v38 = vld [vmem:[%s25074_s18 + $0x1550] sm:$0xff] }
 0x385   : > { %24150 = vmatprep.subr.mxu1 %v25032_v0  ;;  %24140 = vmatpush3.msra.mxu0 %v20722_v33 }
 0x386   : > { %24141 = vmatprep.mubr.msk.f32.mxu0 %vm25033_vm0, %v25032_v0  ;;  %24151 = vmatpush3.msra.mxu1 %v20726_v46 }
 0x387   : > { %24152 = vmatprep.mubr.msk.f32.mxu1 %vm25033_vm0, %v25032_v0  ;;  %24142 = vmatmul.mubr.msk.f32.vlgmr.msra.gmra.mxu0 %vm539_vm1, %v27130_v53  ;;  %v20731_v53 = vld [vmem:[%s25074_s18 + $0x1308] sm:$0xff] }
 0x388   : > { %24153 = vmatmul.mubr.msk.f32.vlgmr.msra.gmra.mxu1 %vm539_vm1, %v27132_v54  ;;  %24155 = vmatprep.subr.mxu0 %v25032_v0  ;;  %v20735_v54 = vld [vmem:[%s25074_s18 + $0x1368] sm:$0xff] }
 0x389   : > { %24166 = vmatprep.subr.mxu1 %v25032_v0  ;;  %24156 = vmatpush3.msra.mxu0 %v20733_v47  ;;  %v27494_v41 = vpop.f32.mrf.mxu0 }
 0x38a   : > { %24167 = vmatpush3.msra.mxu1 %v20737_v48  ;;  %v27496_v42 = vpop.f32.mrf.mxu1  ;;  %24157 = vmatprep.subr.mxu0 %v25032_v0  ;;  %v20754_v48 = vld [vmem:[%s25074_s18 + $0x1540] sm:$0xff] }
 0x38b   : > { %24168 = vmatprep.subr.mxu1 %v25032_v0  ;;  %24158 = vmatpush3.msra.mxu0 %v20732_v49  ;;  %v23725_v55 = vpop.f32.mrf.mxu0  ;;  %v20758_v49 = vld [vmem:[%s25074_s18 + $0x15a0] sm:$0xff] }
 0x38c   : > { %24169 = vmatpush3.msra.mxu1 %v20736_v52  ;;  %v23736_v50 = vpop.f32.mrf.mxu1  ;;  %24159 = vmatprep.subr.mxu0 %v25032_v0  ;;  %v20765_v52 = vld [vmem:[%s25074_s18 + $0x1618] sm:$0xff]  ;;  %v20768_v55 = vld [vmem:[%s25074_s18 + $0x1670] sm:$0xff] }
 0x38d   : > { %24170 = vmatprep.subr.mxu1 %v25032_v0  ;;  %24160 = vmatpush3.msra.mxu0 %v20731_v53  ;;  %v20769_v53 = vld [vmem:[%s25074_s18 + $0x1678] sm:$0xff] }
 0x38e   : > { %24171 = vmatpush3.msra.mxu1 %v20735_v54  ;;  %24161 = vmatprep.subr.mxu0 %v25032_v0  ;;  %v20764_v54 = vld [vmem:[%s25074_s18 + $0x1610] sm:$0xff] }
 0x38f   : > { %24172 = vmatprep.subr.mxu1 %v25032_v0  ;;  %24162 = vmatpush3.msra.mxu0 %v20730_v51 }
 0x390   : > { %24163 = vmatprep.mubr.msk.f32.mxu0 %vm25033_vm0, %v25032_v0  ;;  %24173 = vmatpush3.msra.mxu1 %v20734_v62 }
 0x391   : > { %24174 = vmatprep.mubr.msk.f32.mxu1 %vm25033_vm0, %v25032_v0  ;;  %24164 = vmatmul.mubr.msk.f32.vlgmr.msra.gmra.mxu0 %vm539_vm1, %v27158_v4  ;;  %v20739_v4 = vld [vmem:[%s25074_s18 + $0x13c8] sm:$0xff] }
 0x392   : > { %24175 = vmatmul.mubr.msk.f32.vlgmr.msra.gmra.mxu1 %vm539_vm1, %v27160_v7  ;;  %24177 = vmatprep.subr.mxu0 %v25032_v0  ;;  %v20743_v7 = vld [vmem:[%s25074_s18 + $0x1428] sm:$0xff] }
 0x393   : > { %24188 = vmatprep.subr.mxu1 %v25032_v0  ;;  %24178 = vmatpush3.msra.mxu0 %v20741_v63  ;;  %v27522_v57 = vpop.f32.mrf.mxu0 }
 0x394   : > { %24189 = vmatpush3.msra.mxu1 %v20745_v1  ;;  %v27524_v60 = vpop.f32.mrf.mxu1  ;;  %24179 = vmatprep.subr.mxu0 %v25032_v0  ;;  %v20762_v1 = vld [vmem:[%s25074_s18 + $0x1600] sm:$0xff] }
 0x395   : > { %24190 = vmatprep.subr.mxu1 %v25032_v0  ;;  %24180 = vmatpush3.msra.mxu0 %v20740_v2  ;;  %v23747_v8 = vpop.f32.mrf.mxu0  ;;  %v20766_v2 = vld [vmem:[%s25074_s18 + $0x1660] sm:$0xff] }
 0x396   : > { %24191 = vmatpush3.msra.mxu1 %v20744_v3  ;;  %v23758_v5 = vpop.f32.mrf.mxu1  ;;  %24181 = vmatprep.subr.mxu0 %v25032_v0  ;;  %v20773_v3 = vld [vmem:[%s25074_s18 + $0x16d8] sm:$0xff]  ;;  %v20776_v8 = vld [vmem:[%s25074_s18 + $0x1730] sm:$0xff] }
 0x397   : > { %24192 = vmatprep.subr.mxu1 %v25032_v0  ;;  %24182 = vmatpush3.msra.mxu0 %v20739_v4  ;;  %v20777_v4 = vld [vmem:[%s25074_s18 + $0x1738] sm:$0xff] }
 0x398   : > { %24193 = vmatpush3.msra.mxu1 %v20743_v7  ;;  %24183 = vmatprep.subr.mxu0 %v25032_v0  ;;  %v20772_v7 = vld [vmem:[%s25074_s18 + $0x16d0] sm:$0xff] }
 0x399   : > { %24194 = vmatprep.subr.mxu1 %v25032_v0  ;;  %24184 = vmatpush3.msra.mxu0 %v20738_v6 }
 0x39a   : > { %24185 = vmatprep.mubr.msk.f32.mxu0 %vm25033_vm0, %v25032_v0  ;;  %24195 = vmatpush3.msra.mxu1 %v20742_v15 }
 0x39b   : > { %24196 = vmatprep.mubr.msk.f32.mxu1 %vm25033_vm0, %v25032_v0  ;;  %24186 = vmatmul.mubr.msk.f32.vlgmr.msra.gmra.mxu0 %vm539_vm1, %v27186_v22  ;;  %v20747_v22 = vld [vmem:[%s25074_s18 + $0x1488] sm:$0xff] }
 0x39c   : > { %24197 = vmatmul.mubr.msk.f32.vlgmr.msra.gmra.mxu1 %vm539_vm1, %v27188_v23  ;;  %24199 = vmatprep.subr.mxu0 %v25032_v0  ;;  %v20751_v23 = vld [vmem:[%s25074_s18 + $0x14e8] sm:$0xff] }
 0x39d   : > { %24210 = vmatprep.subr.mxu1 %v25032_v0  ;;  %24200 = vmatpush3.msra.mxu0 %v20749_v18  ;;  %v27550_v12 = vpop.f32.mrf.mxu0 }
 0x39e   : > { %24211 = vmatpush3.msra.mxu1 %v20753_v19  ;;  %v27552_v13 = vpop.f32.mrf.mxu1  ;;  %24201 = vmatprep.subr.mxu0 %v25032_v0  ;;  %v20770_v19 = vld [vmem:[%s25074_s18 + $0x16c0] sm:$0xff] }
 0x39f   : > { %24212 = vmatprep.subr.mxu1 %v25032_v0  ;;  %24202 = vmatpush3.msra.mxu0 %v20748_v20  ;;  %v23769_v24 = vpop.f32.mrf.mxu0  ;;  %v20774_v20 = vld [vmem:[%s25074_s18 + $0x1720] sm:$0xff] }
 0x3a0   : > { %24213 = vmatpush3.msra.mxu1 %v20752_v21  ;;  %v23780_v27 = vpop.f32.mrf.mxu1  ;;  %24203 = vmatprep.subr.mxu0 %v25032_v0  ;;  %v20781_v21 = vld [vmem:[%s25074_s18 + $0x1798] sm:$0xff]  ;;  %v20784_v24 = vld [vmem:[%s25074_s18 + $0x17f0] sm:$0xff] }
 0x3a1   : > { %24214 = vmatprep.subr.mxu1 %v25032_v0  ;;  %24204 = vmatpush3.msra.mxu0 %v20747_v22  ;;  %v20785_v22 = vld [vmem:[%s25074_s18 + $0x17f8] sm:$0xff] }
 0x3a2   : > { %24215 = vmatpush3.msra.mxu1 %v20751_v23  ;;  %24205 = vmatprep.subr.mxu0 %v25032_v0  ;;  %v20780_v23 = vld [vmem:[%s25074_s18 + $0x1790] sm:$0xff] }
 0x3a3   : > { %24216 = vmatprep.subr.mxu1 %v25032_v0  ;;  %24206 = vmatpush3.msra.mxu0 %v20746_v28 }
 0x3a4   : > { %24207 = vmatprep.mubr.msk.f32.mxu0 %vm25033_vm0, %v25032_v0  ;;  %24217 = vmatpush3.msra.mxu1 %v20750_v35 }
 0x3a5   : > { %24218 = vmatprep.mubr.msk.f32.mxu1 %vm25033_vm0, %v25032_v0  ;;  %24208 = vmatmul.mubr.msk.f32.vlgmr.msra.gmra.mxu0 %vm539_vm1, %v27214_v40  ;;  %v20755_v40 = vld [vmem:[%s25074_s18 + $0x1548] sm:$0xff] }
 0x3a6   : > { %24219 = vmatmul.mubr.msk.f32.vlgmr.msra.gmra.mxu1 %vm539_vm1, %v27216_v43  ;;  %24221 = vmatprep.subr.mxu0 %v25032_v0  ;;  %v20759_v43 = vld [vmem:[%s25074_s18 + $0x15a8] sm:$0xff] }
 0x3a7   : > { %24232 = vmatprep.subr.mxu1 %v25032_v0  ;;  %24222 = vmatpush3.msra.mxu0 %v20757_v36  ;;  %v27578_v32 = vpop.f32.mrf.mxu0 }
 0x3a8   : > { %24233 = vmatpush3.msra.mxu1 %v20761_v37  ;;  %v27580_v33 = vpop.f32.mrf.mxu1  ;;  %24223 = vmatprep.subr.mxu0 %v25032_v0  ;;  %v20778_v37 = vld [vmem:[%s25074_s18 + $0x1780] sm:$0xff] }
 0x3a9   : > { %24234 = vmatprep.subr.mxu1 %v25032_v0  ;;  %24224 = vmatpush3.msra.mxu0 %v20756_v38  ;;  %v23791_v46 = vpop.f32.mrf.mxu0  ;;  %v20782_v38 = vld [vmem:[%s25074_s18 + $0x17e0] sm:$0xff] }
 0x3aa   : > { %24235 = vmatpush3.msra.mxu1 %v20760_v39  ;;  %v23802_v47 = vpop.f32.mrf.mxu1  ;;  %24225 = vmatprep.subr.mxu0 %v25032_v0  ;;  %v15073_v39 = vld [vmem:[%s27678_s25 + $0x18] sm:$0xff]  ;;  %v15076_v46 = vld [vmem:[%s27678_s25 + $0x30] sm:$0xff] }
 0x3ab   : > { %24236 = vmatprep.subr.mxu1 %v25032_v0  ;;  %24226 = vmatpush3.msra.mxu0 %v20755_v40  ;;  %v15077_v40 = vld [vmem:[%s27678_s25 + $0x38] sm:$0xff] }
 0x3ac   : > { %24237 = vmatpush3.msra.mxu1 %v20759_v43  ;;  %24227 = vmatprep.subr.mxu0 %v25032_v0  ;;  %v15072_v43 = vld [vmem:[%s27678_s25 + $0x10] sm:$0xff] }
 0x3ad   : > { %24238 = vmatprep.subr.mxu1 %v25032_v0  ;;  %24228 = vmatpush3.msra.mxu0 %v20754_v48 }
 0x3ae   : > { %24229 = vmatprep.mubr.msk.f32.mxu0 %vm25033_vm0, %v25032_v0  ;;  %24239 = vmatpush3.msra.mxu1 %v20758_v49 }
 0x3af   : > { %24240 = vmatprep.mubr.msk.f32.mxu1 %vm25033_vm0, %v25032_v0  ;;  %24230 = vmatmul.mubr.msk.f32.vlgmr.msra.gmra.mxu0 %vm539_vm1, %v27242_v56  ;;  %v20763_v56 = vld [vmem:[%s25074_s18 + $0x1608] sm:$0xff] }
 0x3b0   : > { %24241 = vmatmul.mubr.msk.f32.vlgmr.msra.gmra.mxu1 %vm539_vm1, %v27244_v61  ;;  %24243 = vmatprep.subr.mxu0 %v25032_v0  ;;  %v20767_v61 = vld [vmem:[%s25074_s18 + $0x1668] sm:$0xff] }
 0x3b1   : > { %24254 = vmatprep.subr.mxu1 %v25032_v0  ;;  %24244 = vmatpush3.msra.mxu0 %v20765_v52  ;;  %v27606_v50 = vpop.f32.mrf.mxu0 }
 0x3b2   : > { %24255 = vmatpush3.msra.mxu1 %v20769_v53  ;;  %v27608_v51 = vpop.f32.mrf.mxu1  ;;  %24245 = vmatprep.subr.mxu0 %v25032_v0  ;;  %v15070_v53 = vld [vmem:[%s27678_s25] sm:$0xff] }
 0x3b3   : > { %24256 = vmatprep.subr.mxu1 %v25032_v0  ;;  %24246 = vmatpush3.msra.mxu0 %v20764_v54  ;;  %v23813_v62 = vpop.f32.mrf.mxu0  ;;  %v15074_v54 = vld [vmem:[%s27678_s25 + $0x20] sm:$0xff] }
 0x3b4   : > { %24257 = vmatpush3.msra.mxu1 %v20768_v55  ;;  %v23824_v63 = vpop.f32.mrf.mxu1  ;;  %24247 = vmatprep.subr.mxu0 %v25032_v0  ;;  %v15081_v55 = vld [vmem:[%s27678_s25 + $0x58] sm:$0xff]  ;;  %v15084_v62 = vld [vmem:[%s27678_s25 + $0x70] sm:$0xff] }
 0x3b5   : > { %24258 = vmatprep.subr.mxu1 %v25032_v0  ;;  %24248 = vmatpush3.msra.mxu0 %v20763_v56  ;;  %v15085_v56 = vld [vmem:[%s27678_s25 + $0x78] sm:$0xff] }
 0x3b6   : > { %24259 = vmatpush3.msra.mxu1 %v20767_v61  ;;  %24249 = vmatprep.subr.mxu0 %v25032_v0  ;;  %v15080_v61 = vld [vmem:[%s27678_s25 + $0x50] sm:$0xff] }
 0x3b7   : > { %24260 = vmatprep.subr.mxu1 %v25032_v0  ;;  %24250 = vmatpush3.msra.mxu0 %v20762_v1 }
 0x3b8   : > { %24251 = vmatprep.mubr.msk.f32.mxu0 %vm25033_vm0, %v25032_v0  ;;  %24261 = vmatpush3.msra.mxu1 %v20766_v2 }
 0x3b9   : > { %24262 = vmatprep.mubr.msk.f32.mxu1 %vm25033_vm0, %v25032_v0  ;;  %24252 = vmatmul.mubr.msk.f32.vlgmr.msra.gmra.mxu0 %vm539_vm1, %v27270_v11  ;;  %v20771_v11 = vld [vmem:[%s25074_s18 + $0x16c8] sm:$0xff] }
 0x3ba   : > { %24263 = vmatmul.mubr.msk.f32.vlgmr.msra.gmra.mxu1 %vm539_vm1, %v27272_v14  ;;  %24265 = vmatprep.subr.mxu0 %v25032_v0  ;;  %v20775_v14 = vld [vmem:[%s25074_s18 + $0x1728] sm:$0xff] }
 0x3bb   : > { %24276 = vmatprep.subr.mxu1 %v25032_v0  ;;  %24266 = vmatpush3.msra.mxu0 %v20773_v3  ;;  %v27634_v5 = vpop.f32.mrf.mxu0 }
 0x3bc   : > { %24277 = vmatpush3.msra.mxu1 %v20777_v4  ;;  %v27636_v6 = vpop.f32.mrf.mxu1  ;;  %24267 = vmatprep.subr.mxu0 %v25032_v0  ;;  %v15078_v4 = vld [vmem:[%s27678_s25 + $0x40] sm:$0xff] }
 0x3bd   : > { %24278 = vmatprep.subr.mxu1 %v25032_v0  ;;  %24268 = vmatpush3.msra.mxu0 %v20772_v7  ;;  %v23835_v15 = vpop.f32.mrf.mxu0  ;;  %v15082_v7 = vld [vmem:[%s27678_s25 + $0x60] sm:$0xff] }
 0x3be   : > { %24279 = vmatpush3.msra.mxu1 %v20776_v8  ;;  %v23846_v18 = vpop.f32.mrf.mxu1  ;;  %24269 = vmatprep.subr.mxu0 %v25032_v0  ;;  %v15089_v8 = vld [vmem:[%s27678_s25 + $0x98] sm:$0xff]  ;;  %v15092_v15 = vld [vmem:[%s27678_s25 + $0xb0] sm:$0xff] }
 0x3bf   : > { %24280 = vmatprep.subr.mxu1 %v25032_v0  ;;  %24270 = vmatpush3.msra.mxu0 %v20771_v11  ;;  %v15093_v11 = vld [vmem:[%s27678_s25 + $0xb8] sm:$0xff] }
 0x3c0   : > { %24281 = vmatpush3.msra.mxu1 %v20775_v14  ;;  %24271 = vmatprep.subr.mxu0 %v25032_v0  ;;  %v15088_v14 = vld [vmem:[%s27678_s25 + $0x90] sm:$0xff] }
 0x3c1   : > { %24282 = vmatprep.subr.mxu1 %v25032_v0  ;;  %24272 = vmatpush3.msra.mxu0 %v20770_v19 }
 0x3c2   : > { %24273 = vmatprep.mubr.msk.f32.mxu0 %vm25033_vm0, %v25032_v0  ;;  %24283 = vmatpush3.msra.mxu1 %v20774_v20 }
 0x3c3   : > { %24284 = vmatprep.mubr.msk.f32.mxu1 %vm25033_vm0, %v25032_v0  ;;  %24274 = vmatmul.mubr.msk.f32.vlgmr.msra.gmra.mxu0 %vm539_vm1, %v27298_v29  ;;  %v20779_v29 = vld [vmem:[%s25074_s18 + $0x1788] sm:$0xff] }
 0x3c4   : > { %24285 = vmatmul.mubr.msk.f32.vlgmr.msra.gmra.mxu1 %vm539_vm1, %v27300_v34  ;;  %24287 = vmatprep.subr.mxu0 %v25032_v0  ;;  %v20783_v34 = vld [vmem:[%s25074_s18 + $0x17e8] sm:$0xff] }
 0x3c5   : > { %24298 = vmatprep.subr.mxu1 %v25032_v0  ;;  %24288 = vmatpush3.msra.mxu0 %v20781_v21  ;;  %v27662_v27 = vpop.f32.mrf.mxu0 }
 0x3c6   : > { %24299 = vmatpush3.msra.mxu1 %v20785_v22  ;;  %v27664_v28 = vpop.f32.mrf.mxu1  ;;  %24289 = vmatprep.subr.mxu0 %v25032_v0  ;;  %v15086_v22 = vld [vmem:[%s27678_s25 + $0x80] sm:$0xff] }
 0x3c7   : > { %24300 = vmatprep.subr.mxu1 %v25032_v0  ;;  %24290 = vmatpush3.msra.mxu0 %v20780_v23  ;;  %v23857_v35 = vpop.f32.mrf.mxu0  ;;  %v15090_v23 = vld [vmem:[%s27678_s25 + $0xa0] sm:$0xff] }
 0x3c8   : > { %24301 = vmatpush3.msra.mxu1 %v20784_v24  ;;  %v23868_v36 = vpop.f32.mrf.mxu1  ;;  %24291 = vmatprep.subr.mxu0 %v25032_v0  ;;  %v15097_v24 = vld [vmem:[%s27678_s25 + $0xd8] sm:$0xff]  ;;  %v15100_v35 = vld [vmem:[%s27678_s25 + $0xf0] sm:$0xff] }
 0x3c9   : > { %24302 = vmatprep.subr.mxu1 %v25032_v0  ;;  %24292 = vmatpush3.msra.mxu0 %v20779_v29  ;;  %v15101_v29 = vld [vmem:[%s27678_s25 + $0xf8] sm:$0xff] }
 0x3ca   : > { %24303 = vmatpush3.msra.mxu1 %v20783_v34  ;;  %24293 = vmatprep.subr.mxu0 %v25032_v0  ;;  %v15096_v34 = vld [vmem:[%s27678_s25 + $0xd0] sm:$0xff] }
 0x3cb   : > { %24304 = vmatprep.subr.mxu1 %v25032_v0  ;;  %24294 = vmatpush3.msra.mxu0 %v20778_v37 }
 0x3cc   : > { %24295 = vmatprep.mubr.msk.f32.mxu0 %vm25033_vm0, %v25032_v0  ;;  %24305 = vmatpush3.msra.mxu1 %v20782_v38 }
 0x3cd   : > { %24306 = vmatprep.mubr.msk.f32.mxu1 %vm25033_vm0, %v25032_v0  ;;  %24296 = vmatmul.mubr.msk.f32.vlgmr.msra.gmra.mxu0 %vm539_vm1, %v27326_v16  ;;  %v15071_v16 = vld [vmem:[%s27678_s25 + $0x8] sm:$0xff] }
 0x3ce   : > { %24307 = vmatmul.mubr.msk.f32.vlgmr.msra.gmra.mxu1 %vm539_vm1, %v27328_v17  ;;  %24309 = vmatprep.subr.mxu0 %v25032_v0  ;;  %v15075_v17 = vld [vmem:[%s27678_s25 + $0x28] sm:$0xff] }
 0x3cf   : > { %24320 = vmatprep.subr.mxu1 %v25032_v0  ;;  %24310 = vmatpush3.msra.mxu0 %v15073_v39  ;;  %v27696_v47 = vpop.f32.mrf.mxu0 }
 0x3d0   : > { %24321 = vmatpush3.msra.mxu1 %v15077_v40  ;;  %v27698_v48 = vpop.f32.mrf.mxu1  ;;  %24311 = vmatprep.subr.mxu0 %v25032_v0  ;;  %v15094_v40 = vld [vmem:[%s27678_s25 + $0xc0] sm:$0xff] }
 0x3d1   : > { %24322 = vmatprep.subr.mxu1 %v25032_v0  ;;  %24312 = vmatpush3.msra.mxu0 %v15072_v43  ;;  %v23879_v49 = vpop.f32.mrf.mxu0  ;;  %v15098_v43 = vld [vmem:[%s27678_s25 + $0xe0] sm:$0xff] }
 0x3d2   : > { %24323 = vmatpush3.msra.mxu1 %v15076_v46  ;;  %v23890_v52 = vpop.f32.mrf.mxu1  ;;  %24313 = vmatprep.subr.mxu0 %v25032_v0  ;;  %v15105_v46 = vld [vmem:[%s27678_s25 + $0x118] sm:$0xff]  ;;  %v15108_v49 = vld [vmem:[%s27678_s25 + $0x130] sm:$0xff] }
 0x3d3   : > { %24324 = vmatprep.subr.mxu1 %v25032_v0  ;;  %24314 = vmatpush3.msra.mxu0 %v15071_v16  ;;  %v15109_v16 = vld [vmem:[%s27678_s25 + $0x138] sm:$0xff] }
 0x3d4   : > { %24325 = vmatpush3.msra.mxu1 %v15075_v17  ;;  %24315 = vmatprep.subr.mxu0 %v25032_v0  ;;  %v15104_v17 = vld [vmem:[%s27678_s25 + $0x110] sm:$0xff] }
 0x3d5   : > { %24326 = vmatprep.subr.mxu1 %v25032_v0  ;;  %24316 = vmatpush3.msra.mxu0 %v15070_v53 }
 0x3d6   : > { %24317 = vmatprep.mubr.msk.f32.mxu0 %vm25033_vm0, %v25032_v0  ;;  %24327 = vmatpush3.msra.mxu1 %v15074_v54 }
 0x3d7   : > { %24328 = vmatprep.mubr.msk.f32.mxu1 %vm25033_vm0, %v25032_v0  ;;  %24318 = vmatmul.mubr.msk.f32.vlgmr.msra.gmra.mxu0 %vm539_vm1, %v27354_v30  ;;  %v15079_v30 = vld [vmem:[%s27678_s25 + $0x48] sm:$0xff] }
 0x3d8   : > { %24329 = vmatmul.mubr.msk.f32.vlgmr.msra.gmra.mxu1 %vm539_vm1, %v27356_v31  ;;  %24331 = vmatprep.subr.mxu0 %v25032_v0  ;;  %v15083_v31 = vld [vmem:[%s27678_s25 + $0x68] sm:$0xff] }
 0x3d9   : > { %24342 = vmatprep.subr.mxu1 %v25032_v0  ;;  %24332 = vmatpush3.msra.mxu0 %v15081_v55  ;;  %v27724_v63 = vpop.f32.mrf.mxu0 }
 0x3da   : > { %24343 = vmatpush3.msra.mxu1 %v15085_v56  ;;  %v27726_v1 = vpop.f32.mrf.mxu1  ;;  %24333 = vmatprep.subr.mxu0 %v25032_v0  ;;  %v15102_v56 = vld [vmem:[%s27678_s25 + $0x100] sm:$0xff] }
 0x3db   : > { %24344 = vmatprep.subr.mxu1 %v25032_v0  ;;  %24334 = vmatpush3.msra.mxu0 %v15080_v61  ;;  %v23901_v2 = vpop.f32.mrf.mxu0  ;;  %v15106_v61 = vld [vmem:[%s27678_s25 + $0x120] sm:$0xff] }
 0x3dc   : > { %24345 = vmatpush3.msra.mxu1 %v15084_v62  ;;  %v23912_v3 = vpop.f32.mrf.mxu1  ;;  %24335 = vmatprep.subr.mxu0 %v25032_v0  ;;  %v15113_v62 = vld [vmem:[%s27678_s25 + $0x158] sm:$0xff]  ;;  %v15116_v2 = vld [vmem:[%s27678_s25 + $0x170] sm:$0xff] }
 0x3dd   : > { %24346 = vmatprep.subr.mxu1 %v25032_v0  ;;  %24336 = vmatpush3.msra.mxu0 %v15079_v30  ;;  %v15117_v30 = vld [vmem:[%s27678_s25 + $0x178] sm:$0xff] }
 0x3de   : > { %24347 = vmatpush3.msra.mxu1 %v15083_v31  ;;  %24337 = vmatprep.subr.mxu0 %v25032_v0  ;;  %v15112_v31 = vld [vmem:[%s27678_s25 + $0x150] sm:$0xff] }
 0x3df   : > { %24348 = vmatprep.subr.mxu1 %v25032_v0  ;;  %24338 = vmatpush3.msra.mxu0 %v15078_v4 }
 0x3e0   : > { %24339 = vmatprep.mubr.msk.f32.mxu0 %vm25033_vm0, %v25032_v0  ;;  %24349 = vmatpush3.msra.mxu1 %v15082_v7 }
 0x3e1   : > { %24350 = vmatprep.mubr.msk.f32.mxu1 %vm25033_vm0, %v25032_v0  ;;  %24340 = vmatmul.mubr.msk.f32.vlgmr.msra.gmra.mxu0 %vm539_vm1, %v27382_v44  ;;  %v15087_v44 = vld [vmem:[%s27678_s25 + $0x88] sm:$0xff] }
 0x3e2   : > { %24351 = vmatmul.mubr.msk.f32.vlgmr.msra.gmra.mxu1 %vm539_vm1, %v27384_v45  ;;  %24353 = vmatprep.subr.mxu0 %v25032_v0  ;;  %v15091_v45 = vld [vmem:[%s27678_s25 + $0xa8] sm:$0xff] }
 0x3e3   : > { %24364 = vmatprep.subr.mxu1 %v25032_v0  ;;  %24354 = vmatpush3.msra.mxu0 %v15089_v8  ;;  %v27752_v18 = vpop.f32.mrf.mxu0 }
 0x3e4   : > { %24365 = vmatpush3.msra.mxu1 %v15093_v11  ;;  %v27754_v19 = vpop.f32.mrf.mxu1  ;;  %24355 = vmatprep.subr.mxu0 %v25032_v0  ;;  %v15110_v11 = vld [vmem:[%s27678_s25 + $0x140] sm:$0xff] }
 0x3e5   : > { %24366 = vmatprep.subr.mxu1 %v25032_v0  ;;  %24356 = vmatpush3.msra.mxu0 %v15088_v14  ;;  %v23923_v20 = vpop.f32.mrf.mxu0  ;;  %v15114_v14 = vld [vmem:[%s27678_s25 + $0x160] sm:$0xff] }
 0x3e6   : > { %24367 = vmatpush3.msra.mxu1 %v15092_v15  ;;  %v23934_v21 = vpop.f32.mrf.mxu1  ;;  %24357 = vmatprep.subr.mxu0 %v25032_v0  ;;  %v15121_v15 = vld [vmem:[%s27678_s25 + $0x198] sm:$0xff]  ;;  %v15124_v20 = vld [vmem:[%s27678_s25 + $0x1b0] sm:$0xff] }
 0x3e7   : > { %24368 = vmatprep.subr.mxu1 %v25032_v0  ;;  %24358 = vmatpush3.msra.mxu0 %v15087_v44  ;;  %v15125_v44 = vld [vmem:[%s27678_s25 + $0x1b8] sm:$0xff] }
 0x3e8   : > { %24369 = vmatpush3.msra.mxu1 %v15091_v45  ;;  %24359 = vmatprep.subr.mxu0 %v25032_v0  ;;  %v15120_v45 = vld [vmem:[%s27678_s25 + $0x190] sm:$0xff] }
 0x3e9   : > { %24370 = vmatprep.subr.mxu1 %v25032_v0  ;;  %24360 = vmatpush3.msra.mxu0 %v15086_v22 }
 0x3ea   : > { %24361 = vmatprep.mubr.msk.f32.mxu0 %vm25033_vm0, %v25032_v0  ;;  %24371 = vmatpush3.msra.mxu1 %v15090_v23 }
 0x3eb   : > { %24372 = vmatprep.mubr.msk.f32.mxu1 %vm25033_vm0, %v25032_v0  ;;  %24362 = vmatmul.mubr.msk.f32.vlgmr.msra.gmra.mxu0 %vm539_vm1, %v27410_v58  ;;  %v15095_v58 = vld [vmem:[%s27678_s25 + $0xc8] sm:$0xff] }
 0x3ec   : > { %24373 = vmatmul.mubr.msk.f32.vlgmr.msra.gmra.mxu1 %vm539_vm1, %v27412_v59  ;;  %24375 = vmatprep.subr.mxu0 %v25032_v0  ;;  %v15099_v59 = vld [vmem:[%s27678_s25 + $0xe8] sm:$0xff] }
 0x3ed   : > { %24386 = vmatprep.subr.mxu1 %v25032_v0  ;;  %24376 = vmatpush3.msra.mxu0 %v15097_v24  ;;  %v27780_v36 = vpop.f32.mrf.mxu0 }
 0x3ee   : > { %24387 = vmatpush3.msra.mxu1 %v15101_v29  ;;  %v27782_v37 = vpop.f32.mrf.mxu1  ;;  %24377 = vmatprep.subr.mxu0 %v25032_v0  ;;  %v15118_v29 = vld [vmem:[%s27678_s25 + $0x180] sm:$0xff] }
 0x3ef   : > { %24388 = vmatprep.subr.mxu1 %v25032_v0  ;;  %24378 = vmatpush3.msra.mxu0 %v15096_v34  ;;  %v23945_v38 = vpop.f32.mrf.mxu0  ;;  %v15122_v34 = vld [vmem:[%s27678_s25 + $0x1a0] sm:$0xff] }
 0x3f0   : > { %24389 = vmatpush3.msra.mxu1 %v15100_v35  ;;  %v23956_v39 = vpop.f32.mrf.mxu1  ;;  %24379 = vmatprep.subr.mxu0 %v25032_v0  ;;  %v15129_v35 = vld [vmem:[%s27678_s25 + $0x1d8] sm:$0xff]  ;;  %v15132_v38 = vld [vmem:[%s27678_s25 + $0x1f0] sm:$0xff] }
 0x3f1   : > { %24390 = vmatprep.subr.mxu1 %v25032_v0  ;;  %24380 = vmatpush3.msra.mxu0 %v15095_v58  ;;  %v15133_v58 = vld [vmem:[%s27678_s25 + $0x1f8] sm:$0xff] }
 0x3f2   : > { %24391 = vmatpush3.msra.mxu1 %v15099_v59  ;;  %24381 = vmatprep.subr.mxu0 %v25032_v0  ;;  %v15128_v59 = vld [vmem:[%s27678_s25 + $0x1d0] sm:$0xff] }
 0x3f3   : > { %24392 = vmatprep.subr.mxu1 %v25032_v0  ;;  %24382 = vmatpush3.msra.mxu0 %v15094_v40 }
 0x3f4   : > { %24383 = vmatprep.mubr.msk.f32.mxu0 %vm25033_vm0, %v25032_v0  ;;  %24393 = vmatpush3.msra.mxu1 %v15098_v43 }
 0x3f5   : > { %24394 = vmatprep.mubr.msk.f32.mxu1 %vm25033_vm0, %v25032_v0  ;;  %24384 = vmatmul.mubr.msk.f32.vlgmr.msra.gmra.mxu0 %vm539_vm1, %v27438_v9  ;;  %v15103_v9 = vld [vmem:[%s27678_s25 + $0x108] sm:$0xff] }
 0x3f6   : > { %24395 = vmatmul.mubr.msk.f32.vlgmr.msra.gmra.mxu1 %vm539_vm1, %v27440_v10  ;;  %24397 = vmatprep.subr.mxu0 %v25032_v0  ;;  %v15107_v10 = vld [vmem:[%s27678_s25 + $0x128] sm:$0xff] }
 0x3f7   : > { %24408 = vmatprep.subr.mxu1 %v25032_v0  ;;  %24398 = vmatpush3.msra.mxu0 %v15105_v46  ;;  %v27808_v52 = vpop.f32.mrf.mxu0 }
 0x3f8   : > { %24409 = vmatpush3.msra.mxu1 %v15109_v16  ;;  %v27810_v53 = vpop.f32.mrf.mxu1  ;;  %24399 = vmatprep.subr.mxu0 %v25032_v0  ;;  %v15126_v16 = vld [vmem:[%s27678_s25 + $0x1c0] sm:$0xff] }
 0x3f9   : > { %24410 = vmatprep.subr.mxu1 %v25032_v0  ;;  %24400 = vmatpush3.msra.mxu0 %v15104_v17  ;;  %v23967_v54 = vpop.f32.mrf.mxu0  ;;  %v15130_v17 = vld [vmem:[%s27678_s25 + $0x1e0] sm:$0xff] }
 0x3fa   : > { %24411 = vmatpush3.msra.mxu1 %v15108_v49  ;;  %v23978_v55 = vpop.f32.mrf.mxu1  ;;  %24401 = vmatprep.subr.mxu0 %v25032_v0  ;;  %v15137_v49 = vld [vmem:[%s27678_s25 + $0x218] sm:$0xff]  ;;  %v15140_v54 = vld [vmem:[%s27678_s25 + $0x230] sm:$0xff] }
 0x3fb   : > { %24412 = vmatprep.subr.mxu1 %v25032_v0  ;;  %24402 = vmatpush3.msra.mxu0 %v15103_v9  ;;  %v15141_v9 = vld [vmem:[%s27678_s25 + $0x238] sm:$0xff] }
 0x3fc   : > { %24413 = vmatpush3.msra.mxu1 %v15107_v10  ;;  %24403 = vmatprep.subr.mxu0 %v25032_v0  ;;  %v15136_v10 = vld [vmem:[%s27678_s25 + $0x210] sm:$0xff] }
 0x3fd   : > { %24414 = vmatprep.subr.mxu1 %v25032_v0  ;;  %24404 = vmatpush3.msra.mxu0 %v15102_v56 }
 0x3fe   : > { %24405 = vmatprep.mubr.msk.f32.mxu0 %vm25033_vm0, %v25032_v0  ;;  %24415 = vmatpush3.msra.mxu1 %v15106_v61 }
 0x3ff   : > { %24416 = vmatprep.mubr.msk.f32.mxu1 %vm25033_vm0, %v25032_v0  ;;  %24406 = vmatmul.mubr.msk.f32.vlgmr.msra.gmra.mxu0 %vm539_vm1, %v27466_v25  ;;  %v15111_v25 = vld [vmem:[%s27678_s25 + $0x148] sm:$0xff] }
 0x400   : > { %24417 = vmatmul.mubr.msk.f32.vlgmr.msra.gmra.mxu1 %vm539_vm1, %v27468_v26  ;;  %24419 = vmatprep.subr.mxu0 %v25032_v0  ;;  %v15115_v26 = vld [vmem:[%s27678_s25 + $0x168] sm:$0xff] }
 0x401   : > { %24430 = vmatprep.subr.mxu1 %v25032_v0  ;;  %24420 = vmatpush3.msra.mxu0 %v15113_v62  ;;  %v27836_v3 = vpop.f32.mrf.mxu0 }
 0x402   : > { %24431 = vmatpush3.msra.mxu1 %v15117_v30  ;;  %v27838_v4 = vpop.f32.mrf.mxu1  ;;  %24421 = vmatprep.subr.mxu0 %v25032_v0  ;;  %v15134_v30 = vld [vmem:[%s27678_s25 + $0x200] sm:$0xff] }
 0x403   : > { %24432 = vmatprep.subr.mxu1 %v25032_v0  ;;  %24422 = vmatpush3.msra.mxu0 %v15112_v31  ;;  %v23989_v7 = vpop.f32.mrf.mxu0  ;;  %v15138_v31 = vld [vmem:[%s27678_s25 + $0x220] sm:$0xff] }
 0x404   : > { %24433 = vmatpush3.msra.mxu1 %v15116_v2  ;;  %v24000_v8 = vpop.f32.mrf.mxu1  ;;  %24423 = vmatprep.subr.mxu0 %v25032_v0  ;;  %v15145_v2 = vld [vmem:[%s27678_s25 + $0x258] sm:$0xff]  ;;  %v15148_v7 = vld [vmem:[%s27678_s25 + $0x270] sm:$0xff] }
 0x405   : > { %24434 = vmatprep.subr.mxu1 %v25032_v0  ;;  %24424 = vmatpush3.msra.mxu0 %v15111_v25  ;;  %v15149_v25 = vld [vmem:[%s27678_s25 + $0x278] sm:$0xff] }
 0x406   : > { %24435 = vmatpush3.msra.mxu1 %v15115_v26  ;;  %24425 = vmatprep.subr.mxu0 %v25032_v0  ;;  %v15144_v26 = vld [vmem:[%s27678_s25 + $0x250] sm:$0xff] }
 0x407   : > { %24436 = vmatprep.subr.mxu1 %v25032_v0  ;;  %24426 = vmatpush3.msra.mxu0 %v15110_v11 }
 0x408   : > { %24427 = vmatprep.mubr.msk.f32.mxu0 %vm25033_vm0, %v25032_v0  ;;  %24437 = vmatpush3.msra.mxu1 %v15114_v14 }
 0x409   : > { %24438 = vmatprep.mubr.msk.f32.mxu1 %vm25033_vm0, %v25032_v0  ;;  %24428 = vmatmul.mubr.msk.f32.vlgmr.msra.gmra.mxu0 %vm539_vm1, %v27494_v41  ;;  %v15119_v41 = vld [vmem:[%s27678_s25 + $0x188] sm:$0xff] }
 0x40a   : > { %24439 = vmatmul.mubr.msk.f32.vlgmr.msra.gmra.mxu1 %vm539_vm1, %v27496_v42  ;;  %24441 = vmatprep.subr.mxu0 %v25032_v0  ;;  %v15123_v42 = vld [vmem:[%s27678_s25 + $0x1a8] sm:$0xff] }
 0x40b   : > { %24452 = vmatprep.subr.mxu1 %v25032_v0  ;;  %24442 = vmatpush3.msra.mxu0 %v15121_v15  ;;  %v27864_v21 = vpop.f32.mrf.mxu0 }
 0x40c   : > { %24453 = vmatpush3.msra.mxu1 %v15125_v44  ;;  %v27866_v22 = vpop.f32.mrf.mxu1  ;;  %24443 = vmatprep.subr.mxu0 %v25032_v0  ;;  %v15142_v44 = vld [vmem:[%s27678_s25 + $0x240] sm:$0xff] }
 0x40d   : > { %24454 = vmatprep.subr.mxu1 %v25032_v0  ;;  %24444 = vmatpush3.msra.mxu0 %v15120_v45  ;;  %v24011_v23 = vpop.f32.mrf.mxu0  ;;  %v15146_v45 = vld [vmem:[%s27678_s25 + $0x260] sm:$0xff] }
 0x40e   : > { %24455 = vmatpush3.msra.mxu1 %v15124_v20  ;;  %v24022_v24 = vpop.f32.mrf.mxu1  ;;  %24445 = vmatprep.subr.mxu0 %v25032_v0  ;;  %v15153_v20 = vld [vmem:[%s27678_s25 + $0x298] sm:$0xff]  ;;  %v15156_v23 = vld [vmem:[%s27678_s25 + $0x2b0] sm:$0xff] }
 0x40f   : > { %24456 = vmatprep.subr.mxu1 %v25032_v0  ;;  %24446 = vmatpush3.msra.mxu0 %v15119_v41  ;;  %v15157_v41 = vld [vmem:[%s27678_s25 + $0x2b8] sm:$0xff] }
 0x410   : > { %24457 = vmatpush3.msra.mxu1 %v15123_v42  ;;  %24447 = vmatprep.subr.mxu0 %v25032_v0  ;;  %v15152_v42 = vld [vmem:[%s27678_s25 + $0x290] sm:$0xff] }
 0x411   : > { %24458 = vmatprep.subr.mxu1 %v25032_v0  ;;  %24448 = vmatpush3.msra.mxu0 %v15118_v29 }
 0x412   : > { %24449 = vmatprep.mubr.msk.f32.mxu0 %vm25033_vm0, %v25032_v0  ;;  %24459 = vmatpush3.msra.mxu1 %v15122_v34 }
 0x413   : > { %24460 = vmatprep.mubr.msk.f32.mxu1 %vm25033_vm0, %v25032_v0  ;;  %24450 = vmatmul.mubr.msk.f32.vlgmr.msra.gmra.mxu0 %vm539_vm1, %v27522_v57  ;;  %v15127_v57 = vld [vmem:[%s27678_s25 + $0x1c8] sm:$0xff] }
 0x414   : > { %24461 = vmatmul.mubr.msk.f32.vlgmr.msra.gmra.mxu1 %vm539_vm1, %v27524_v60  ;;  %24463 = vmatprep.subr.mxu0 %v25032_v0  ;;  %v15131_v60 = vld [vmem:[%s27678_s25 + $0x1e8] sm:$0xff] }
 0x415   : > { %24474 = vmatprep.subr.mxu1 %v25032_v0  ;;  %24464 = vmatpush3.msra.mxu0 %v15129_v35  ;;  %v27892_v39 = vpop.f32.mrf.mxu0 }
 0x416   : > { %24475 = vmatpush3.msra.mxu1 %v15133_v58  ;;  %v27894_v40 = vpop.f32.mrf.mxu1  ;;  %24465 = vmatprep.subr.mxu0 %v25032_v0  ;;  %v15150_v58 = vld [vmem:[%s27678_s25 + $0x280] sm:$0xff] }
 0x417   : > { %24476 = vmatprep.subr.mxu1 %v25032_v0  ;;  %24466 = vmatpush3.msra.mxu0 %v15128_v59  ;;  %v24033_v43 = vpop.f32.mrf.mxu0  ;;  %v15154_v59 = vld [vmem:[%s27678_s25 + $0x2a0] sm:$0xff] }
 0x418   : > { %24477 = vmatpush3.msra.mxu1 %v15132_v38  ;;  %v24044_v46 = vpop.f32.mrf.mxu1  ;;  %24467 = vmatprep.subr.mxu0 %v25032_v0  ;;  %v15161_v38 = vld [vmem:[%s27678_s25 + $0x2d8] sm:$0xff]  ;;  %v15164_v43 = vld [vmem:[%s27678_s25 + $0x2f0] sm:$0xff] }
 0x419   : > { %24478 = vmatprep.subr.mxu1 %v25032_v0  ;;  %24468 = vmatpush3.msra.mxu0 %v15127_v57  ;;  %v15165_v57 = vld [vmem:[%s27678_s25 + $0x2f8] sm:$0xff] }
 0x41a   : > { %24479 = vmatpush3.msra.mxu1 %v15131_v60  ;;  %24469 = vmatprep.subr.mxu0 %v25032_v0  ;;  %v15160_v60 = vld [vmem:[%s27678_s25 + $0x2d0] sm:$0xff] }
 0x41b   : > { %24480 = vmatprep.subr.mxu1 %v25032_v0  ;;  %24470 = vmatpush3.msra.mxu0 %v15126_v16 }
 0x41c   : > { %24471 = vmatprep.mubr.msk.f32.mxu0 %vm25033_vm0, %v25032_v0  ;;  %24481 = vmatpush3.msra.mxu1 %v15130_v17 }
 0x41d   : > { %24482 = vmatprep.mubr.msk.f32.mxu1 %vm25033_vm0, %v25032_v0  ;;  %24472 = vmatmul.mubr.msk.f32.vlgmr.msra.gmra.mxu0 %vm539_vm1, %v27550_v12  ;;  %v15135_v12 = vld [vmem:[%s27678_s25 + $0x208] sm:$0xff] }
 0x41e   : > { %24483 = vmatmul.mubr.msk.f32.vlgmr.msra.gmra.mxu1 %vm539_vm1, %v27552_v13  ;;  %24485 = vmatprep.subr.mxu0 %v25032_v0  ;;  %v15139_v13 = vld [vmem:[%s27678_s25 + $0x228] sm:$0xff] }
 0x41f   : > { %24496 = vmatprep.subr.mxu1 %v25032_v0  ;;  %24486 = vmatpush3.msra.mxu0 %v15137_v49  ;;  %v27920_v55 = vpop.f32.mrf.mxu0 }
 0x420   : > { %24497 = vmatpush3.msra.mxu1 %v15141_v9  ;;  %v27922_v56 = vpop.f32.mrf.mxu1  ;;  %24487 = vmatprep.subr.mxu0 %v25032_v0  ;;  %v15158_v9 = vld [vmem:[%s27678_s25 + $0x2c0] sm:$0xff] }
 0x421   : > { %24498 = vmatprep.subr.mxu1 %v25032_v0  ;;  %24488 = vmatpush3.msra.mxu0 %v15136_v10  ;;  %v24055_v61 = vpop.f32.mrf.mxu0  ;;  %v15162_v10 = vld [vmem:[%s27678_s25 + $0x2e0] sm:$0xff] }
 0x422   : > { %24499 = vmatpush3.msra.mxu1 %v15140_v54  ;;  %v24066_v62 = vpop.f32.mrf.mxu1  ;;  %24489 = vmatprep.subr.mxu0 %v25032_v0  ;;  %v15169_v54 = vld [vmem:[%s27678_s25 + $0x318] sm:$0xff]  ;;  %v15172_v61 = vld [vmem:[%s27678_s25 + $0x330] sm:$0xff] }
 0x423   : > { %24500 = vmatprep.subr.mxu1 %v25032_v0  ;;  %24490 = vmatpush3.msra.mxu0 %v15135_v12  ;;  %v15173_v12 = vld [vmem:[%s27678_s25 + $0x338] sm:$0xff] }
 0x424   : > { %24501 = vmatpush3.msra.mxu1 %v15139_v13  ;;  %24491 = vmatprep.subr.mxu0 %v25032_v0  ;;  %v15168_v13 = vld [vmem:[%s27678_s25 + $0x310] sm:$0xff] }
 0x425   : > { %24502 = vmatprep.subr.mxu1 %v25032_v0  ;;  %24492 = vmatpush3.msra.mxu0 %v15134_v30 }
 0x426   : > { %24493 = vmatprep.mubr.msk.f32.mxu0 %vm25033_vm0, %v25032_v0  ;;  %24503 = vmatpush3.msra.mxu1 %v15138_v31 }
 0x427   : > { %24504 = vmatprep.mubr.msk.f32.mxu1 %vm25033_vm0, %v25032_v0  ;;  %24494 = vmatmul.mubr.msk.f32.vlgmr.msra.gmra.mxu0 %vm539_vm1, %v27578_v32  ;;  %v15143_v32 = vld [vmem:[%s27678_s25 + $0x248] sm:$0xff] }
 0x428   : > { %24505 = vmatmul.mubr.msk.f32.vlgmr.msra.gmra.mxu1 %vm539_vm1, %v27580_v33  ;;  %24507 = vmatprep.subr.mxu0 %v25032_v0  ;;  %v15147_v33 = vld [vmem:[%s27678_s25 + $0x268] sm:$0xff] }
 0x429   : > { %24518 = vmatprep.subr.mxu1 %v25032_v0  ;;  %24508 = vmatpush3.msra.mxu0 %v15145_v2  ;;  %v27948_v8 = vpop.f32.mrf.mxu0 }
 0x42a   : > { %24519 = vmatpush3.msra.mxu1 %v15149_v25  ;;  %v27950_v11 = vpop.f32.mrf.mxu1  ;;  %24509 = vmatprep.subr.mxu0 %v25032_v0  ;;  %v15166_v25 = vld [vmem:[%s27678_s25 + $0x300] sm:$0xff] }
 0x42b   : > { %24520 = vmatprep.subr.mxu1 %v25032_v0  ;;  %24510 = vmatpush3.msra.mxu0 %v15144_v26  ;;  %v24077_v14 = vpop.f32.mrf.mxu0  ;;  %v15170_v26 = vld [vmem:[%s27678_s25 + $0x320] sm:$0xff] }
 0x42c   : > { %24521 = vmatpush3.msra.mxu1 %v15148_v7  ;;  %v24088_v15 = vpop.f32.mrf.mxu1  ;;  %24511 = vmatprep.subr.mxu0 %v25032_v0  ;;  %v15177_v7 = vld [vmem:[%s27678_s25 + $0x358] sm:$0xff]  ;;  %v15180_v14 = vld [vmem:[%s27678_s25 + $0x370] sm:$0xff] }
 0x42d   : > { %24522 = vmatprep.subr.mxu1 %v25032_v0  ;;  %24512 = vmatpush3.msra.mxu0 %v15143_v32  ;;  %v15181_v32 = vld [vmem:[%s27678_s25 + $0x378] sm:$0xff] }
 0x42e   : > { %24523 = vmatpush3.msra.mxu1 %v15147_v33  ;;  %24513 = vmatprep.subr.mxu0 %v25032_v0  ;;  %v15176_v33 = vld [vmem:[%s27678_s25 + $0x350] sm:$0xff] }
 0x42f   : > { %24524 = vmatprep.subr.mxu1 %v25032_v0  ;;  %24514 = vmatpush3.msra.mxu0 %v15142_v44 }
 0x430   : > { %24515 = vmatprep.mubr.msk.f32.mxu0 %vm25033_vm0, %v25032_v0  ;;  %24525 = vmatpush3.msra.mxu1 %v15146_v45 }
 0x431   : > { %24526 = vmatprep.mubr.msk.f32.mxu1 %vm25033_vm0, %v25032_v0  ;;  %24516 = vmatmul.mubr.msk.f32.vlgmr.msra.gmra.mxu0 %vm539_vm1, %v27606_v50  ;;  %v15151_v50 = vld [vmem:[%s27678_s25 + $0x288] sm:$0xff] }
 0x432   : > { %24527 = vmatmul.mubr.msk.f32.vlgmr.msra.gmra.mxu1 %vm539_vm1, %v27608_v51  ;;  %24529 = vmatprep.subr.mxu0 %v25032_v0  ;;  %v15155_v51 = vld [vmem:[%s27678_s25 + $0x2a8] sm:$0xff] }
 0x433   : > { %24540 = vmatprep.subr.mxu1 %v25032_v0  ;;  %24530 = vmatpush3.msra.mxu0 %v15153_v20  ;;  %v27976_v24 = vpop.f32.mrf.mxu0 }
 0x434   : > { %24541 = vmatpush3.msra.mxu1 %v15157_v41  ;;  %v27978_v29 = vpop.f32.mrf.mxu1  ;;  %24531 = vmatprep.subr.mxu0 %v25032_v0  ;;  %v15174_v41 = vld [vmem:[%s27678_s25 + $0x340] sm:$0xff] }
 0x435   : > { %24542 = vmatprep.subr.mxu1 %v25032_v0  ;;  %24532 = vmatpush3.msra.mxu0 %v15152_v42  ;;  %v24099_v34 = vpop.f32.mrf.mxu0  ;;  %v15178_v42 = vld [vmem:[%s27678_s25 + $0x360] sm:$0xff] }
 0x436   : > { %24543 = vmatpush3.msra.mxu1 %v15156_v23  ;;  %v24110_v35 = vpop.f32.mrf.mxu1  ;;  %24533 = vmatprep.subr.mxu0 %v25032_v0  ;;  %v15185_v23 = vld [vmem:[%s27678_s25 + $0x398] sm:$0xff]  ;;  %v15188_v34 = vld [vmem:[%s27678_s25 + $0x3b0] sm:$0xff] }
 0x437   : > { %24544 = vmatprep.subr.mxu1 %v25032_v0  ;;  %24534 = vmatpush3.msra.mxu0 %v15151_v50  ;;  %v15189_v50 = vld [vmem:[%s27678_s25 + $0x3b8] sm:$0xff] }
 0x438   : > { %24545 = vmatpush3.msra.mxu1 %v15155_v51  ;;  %24535 = vmatprep.subr.mxu0 %v25032_v0  ;;  %v15184_v51 = vld [vmem:[%s27678_s25 + $0x390] sm:$0xff] }
 0x439   : > { %24546 = vmatprep.subr.mxu1 %v25032_v0  ;;  %24536 = vmatpush3.msra.mxu0 %v15150_v58 }
 0x43a   : > { %24537 = vmatprep.mubr.msk.f32.mxu0 %vm25033_vm0, %v25032_v0  ;;  %24547 = vmatpush3.msra.mxu1 %v15154_v59 }
 0x43b   : > { %24548 = vmatprep.mubr.msk.f32.mxu1 %vm25033_vm0, %v25032_v0  ;;  %24538 = vmatmul.mubr.msk.f32.vlgmr.msra.gmra.mxu0 %vm539_vm1, %v27634_v5  ;;  %v15159_v5 = vld [vmem:[%s27678_s25 + $0x2c8] sm:$0xff] }
 0x43c   : > { %24549 = vmatmul.mubr.msk.f32.vlgmr.msra.gmra.mxu1 %vm539_vm1, %v27636_v6  ;;  %24551 = vmatprep.subr.mxu0 %v25032_v0  ;;  %v15163_v6 = vld [vmem:[%s27678_s25 + $0x2e8] sm:$0xff] }
 0x43d   : > { %24562 = vmatprep.subr.mxu1 %v25032_v0  ;;  %24552 = vmatpush3.msra.mxu0 %v15161_v38  ;;  %v28004_v46 = vpop.f32.mrf.mxu0 }
 0x43e   : > { %24563 = vmatpush3.msra.mxu1 %v15165_v57  ;;  %v28006_v16 = vpop.f32.mrf.mxu1  ;;  %24553 = vmatprep.subr.mxu0 %v25032_v0  ;;  %v15182_v57 = vld [vmem:[%s27678_s25 + $0x380] sm:$0xff] }
 0x43f   : > { %24564 = vmatprep.subr.mxu1 %v25032_v0  ;;  %24554 = vmatpush3.msra.mxu0 %v15160_v60  ;;  %v24121_v17 = vpop.f32.mrf.mxu0  ;;  %v15186_v60 = vld [vmem:[%s27678_s25 + $0x3a0] sm:$0xff] }
 0x440   : > { %24565 = vmatpush3.msra.mxu1 %v15164_v43  ;;  %v24132_v49 = vpop.f32.mrf.mxu1  ;;  %24555 = vmatprep.subr.mxu0 %v25032_v0  ;;  %v15193_v43 = vld [vmem:[%s27678_s25 + $0x3d8] sm:$0xff]  ;;  %v15196_v17 = vld [vmem:[%s27678_s25 + $0x3f0] sm:$0xff] }
 0x441   : > { %24566 = vmatprep.subr.mxu1 %v25032_v0  ;;  %24556 = vmatpush3.msra.mxu0 %v15159_v5  ;;  %v15197_v5 = vld [vmem:[%s27678_s25 + $0x3f8] sm:$0xff] }
 0x442   : > { %24567 = vmatpush3.msra.mxu1 %v15163_v6  ;;  %24557 = vmatprep.subr.mxu0 %v25032_v0  ;;  %v15192_v6 = vld [vmem:[%s27678_s25 + $0x3d0] sm:$0xff] }
 0x443   : > { %24568 = vmatprep.subr.mxu1 %v25032_v0  ;;  %24558 = vmatpush3.msra.mxu0 %v15158_v9 }
 0x444   : > { %24559 = vmatprep.mubr.msk.f32.mxu0 %vm25033_vm0, %v25032_v0  ;;  %24569 = vmatpush3.msra.mxu1 %v15162_v10 }
 0x445   : > { %24570 = vmatprep.mubr.msk.f32.mxu1 %vm25033_vm0, %v25032_v0  ;;  %24560 = vmatmul.mubr.msk.f32.vlgmr.msra.gmra.mxu0 %vm539_vm1, %v27662_v27  ;;  %v15167_v27 = vld [vmem:[%s27678_s25 + $0x308] sm:$0xff] }
 0x446   : > { %24571 = vmatmul.mubr.msk.f32.vlgmr.msra.gmra.mxu1 %vm539_vm1, %v27664_v28  ;;  %24573 = vmatprep.subr.mxu0 %v25032_v0  ;;  %v15171_v28 = vld [vmem:[%s27678_s25 + $0x328] sm:$0xff] }
 0x447   : > { %24584 = vmatprep.subr.mxu1 %v25032_v0  ;;  %24574 = vmatpush3.msra.mxu0 %v15169_v54  ;;  %v28032_v62 = vpop.f32.mrf.mxu0 }
 0x448   : > { %24585 = vmatpush3.msra.mxu1 %v15173_v12  ;;  %v28034_v30 = vpop.f32.mrf.mxu1  ;;  %24575 = vmatprep.subr.mxu0 %v25032_v0  ;;  %v15190_v12 = vld [vmem:[%s27678_s25 + $0x3c0] sm:$0xff] }
 0x449   : > { %24586 = vmatprep.subr.mxu1 %v25032_v0  ;;  %24576 = vmatpush3.msra.mxu0 %v15168_v13  ;;  %v24143_v31 = vpop.f32.mrf.mxu0  ;;  %v15194_v13 = vld [vmem:[%s27678_s25 + $0x3e0] sm:$0xff] }
 0x44a   : > { %24587 = vmatpush3.msra.mxu1 %v15172_v61  ;;  %v24154_v2 = vpop.f32.mrf.mxu1  ;;  %24577 = vmatprep.subr.mxu0 %v25032_v0  ;;  %v15201_v61 = vld [vmem:[%s27678_s25 + $0x418] sm:$0xff]  ;;  %v15204_v31 = vld [vmem:[%s27678_s25 + $0x430] sm:$0xff] }
 0x44b   : > { %24588 = vmatprep.subr.mxu1 %v25032_v0  ;;  %24578 = vmatpush3.msra.mxu0 %v15167_v27  ;;  %v15205_v27 = vld [vmem:[%s27678_s25 + $0x438] sm:$0xff] }
 0x44c   : > { %24589 = vmatpush3.msra.mxu1 %v15171_v28  ;;  %24579 = vmatprep.subr.mxu0 %v25032_v0  ;;  %v15200_v28 = vld [vmem:[%s27678_s25 + $0x410] sm:$0xff] }
 0x44d   : > { %24590 = vmatprep.subr.mxu1 %v25032_v0  ;;  %24580 = vmatpush3.msra.mxu0 %v15166_v25 }
 0x44e   : > { %24581 = vmatprep.mubr.msk.f32.mxu0 %vm25033_vm0, %v25032_v0  ;;  %24591 = vmatpush3.msra.mxu1 %v15170_v26 }
 0x44f   : > { %24592 = vmatprep.mubr.msk.f32.mxu1 %vm25033_vm0, %v25032_v0  ;;  %24582 = vmatmul.mubr.msk.f32.vlgmr.msra.gmra.mxu0 %vm539_vm1, %v27696_v47  ;;  %v15175_v47 = vld [vmem:[%s27678_s25 + $0x348] sm:$0xff] }
 0x450   : > { %24593 = vmatmul.mubr.msk.f32.vlgmr.msra.gmra.mxu1 %vm539_vm1, %v27698_v48  ;;  %24595 = vmatprep.subr.mxu0 %v25032_v0  ;;  %v15179_v48 = vld [vmem:[%s27678_s25 + $0x368] sm:$0xff] }
 0x451   : > { %24606 = vmatprep.subr.mxu1 %v25032_v0  ;;  %24596 = vmatpush3.msra.mxu0 %v15177_v7  ;;  %v28060_v15 = vpop.f32.mrf.mxu0 }
 0x452   : > { %24607 = vmatpush3.msra.mxu1 %v15181_v32  ;;  %v28062_v44 = vpop.f32.mrf.mxu1  ;;  %24597 = vmatprep.subr.mxu0 %v25032_v0  ;;  %v15198_v32 = vld [vmem:[%s27678_s25 + $0x400] sm:$0xff] }
 0x453   : > { %24608 = vmatprep.subr.mxu1 %v25032_v0  ;;  %24598 = vmatpush3.msra.mxu0 %v15176_v33  ;;  %v24165_v45 = vpop.f32.mrf.mxu0  ;;  %v15202_v33 = vld [vmem:[%s27678_s25 + $0x420] sm:$0xff] }
 0x454   : > { %24609 = vmatpush3.msra.mxu1 %v15180_v14  ;;  %v24176_v20 = vpop.f32.mrf.mxu1  ;;  %24599 = vmatprep.subr.mxu0 %v25032_v0  ;;  %v15209_v14 = vld [vmem:[%s27678_s25 + $0x458] sm:$0xff]  ;;  %v15212_v45 = vld [vmem:[%s27678_s25 + $0x470] sm:$0xff] }
 0x455   : > { %24610 = vmatprep.subr.mxu1 %v25032_v0  ;;  %24600 = vmatpush3.msra.mxu0 %v15175_v47  ;;  %v15213_v47 = vld [vmem:[%s27678_s25 + $0x478] sm:$0xff] }
 0x456   : > { %24611 = vmatpush3.msra.mxu1 %v15179_v48  ;;  %24601 = vmatprep.subr.mxu0 %v25032_v0  ;;  %v15208_v48 = vld [vmem:[%s27678_s25 + $0x450] sm:$0xff] }
 0x457   : > { %24612 = vmatprep.subr.mxu1 %v25032_v0  ;;  %24602 = vmatpush3.msra.mxu0 %v15174_v41 }
 0x458   : > { %24603 = vmatprep.mubr.msk.f32.mxu0 %vm25033_vm0, %v25032_v0  ;;  %24613 = vmatpush3.msra.mxu1 %v15178_v42 }
 0x459   : > { %24614 = vmatprep.mubr.msk.f32.mxu1 %vm25033_vm0, %v25032_v0  ;;  %24604 = vmatmul.mubr.msk.f32.vlgmr.msra.gmra.mxu0 %vm539_vm1, %v27724_v63  ;;  %v15183_v63 = vld [vmem:[%s27678_s25 + $0x388] sm:$0xff] }
 0x45a   : > { %24615 = vmatmul.mubr.msk.f32.vlgmr.msra.gmra.mxu1 %vm539_vm1, %v27726_v1  ;;  %24617 = vmatprep.subr.mxu0 %v25032_v0  ;;  %v15187_v1 = vld [vmem:[%s27678_s25 + $0x3a8] sm:$0xff] }
 0x45b   : > { %24628 = vmatprep.subr.mxu1 %v25032_v0  ;;  %24618 = vmatpush3.msra.mxu0 %v15185_v23  ;;  %v28088_v35 = vpop.f32.mrf.mxu0 }
 0x45c   : > { %24629 = vmatpush3.msra.mxu1 %v15189_v50  ;;  %v28090_v58 = vpop.f32.mrf.mxu1  ;;  %24619 = vmatprep.subr.mxu0 %v25032_v0  ;;  %v15206_v50 = vld [vmem:[%s27678_s25 + $0x440] sm:$0xff] }
 0x45d   : > { %24630 = vmatprep.subr.mxu1 %v25032_v0  ;;  %24620 = vmatpush3.msra.mxu0 %v15184_v51  ;;  %v24187_v59 = vpop.f32.mrf.mxu0  ;;  %v15210_v51 = vld [vmem:[%s27678_s25 + $0x460] sm:$0xff] }
 0x45e   : > { %24631 = vmatpush3.msra.mxu1 %v15188_v34  ;;  %v24198_v38 = vpop.f32.mrf.mxu1  ;;  %24621 = vmatprep.subr.mxu0 %v25032_v0  ;;  %v15217_v34 = vld [vmem:[%s27678_s25 + $0x498] sm:$0xff]  ;;  %v15220_v59 = vld [vmem:[%s27678_s25 + $0x4b0] sm:$0xff] }
 0x45f   : > { %24632 = vmatprep.subr.mxu1 %v25032_v0  ;;  %24622 = vmatpush3.msra.mxu0 %v15183_v63  ;;  %v15221_v63 = vld [vmem:[%s27678_s25 + $0x4b8] sm:$0xff] }
 0x460   : > { %24633 = vmatpush3.msra.mxu1 %v15187_v1  ;;  %24623 = vmatprep.subr.mxu0 %v25032_v0  ;;  %v15216_v1 = vld [vmem:[%s27678_s25 + $0x490] sm:$0xff] }
 0x461   : > { %24634 = vmatprep.subr.mxu1 %v25032_v0  ;;  %24624 = vmatpush3.msra.mxu0 %v15182_v57 }
 0x462   : > { %24625 = vmatprep.mubr.msk.f32.mxu0 %vm25033_vm0, %v25032_v0  ;;  %24635 = vmatpush3.msra.mxu1 %v15186_v60 }
 0x463   : > { %24636 = vmatprep.mubr.msk.f32.mxu1 %vm25033_vm0, %v25032_v0  ;;  %24626 = vmatmul.mubr.msk.f32.vlgmr.msra.gmra.mxu0 %vm539_vm1, %v27752_v18  ;;  %v15191_v18 = vld [vmem:[%s27678_s25 + $0x3c8] sm:$0xff] }
 0x464   : > { %24637 = vmatmul.mubr.msk.f32.vlgmr.msra.gmra.mxu1 %vm539_vm1, %v27754_v19  ;;  %24639 = vmatprep.subr.mxu0 %v25032_v0  ;;  %v15195_v19 = vld [vmem:[%s27678_s25 + $0x3e8] sm:$0xff] }
 0x465   : > { %24650 = vmatprep.subr.mxu1 %v25032_v0  ;;  %24640 = vmatpush3.msra.mxu0 %v15193_v43  ;;  %v28116_v49 = vpop.f32.mrf.mxu0 }
 0x466   : > { %24651 = vmatpush3.msra.mxu1 %v15197_v5  ;;  %v28118_v9 = vpop.f32.mrf.mxu1  ;;  %24641 = vmatprep.subr.mxu0 %v25032_v0  ;;  %v15214_v5 = vld [vmem:[%s27678_s25 + $0x480] sm:$0xff] }
 0x467   : > { %24652 = vmatprep.subr.mxu1 %v25032_v0  ;;  %24642 = vmatpush3.msra.mxu0 %v15192_v6  ;;  %v24209_v10 = vpop.f32.mrf.mxu0  ;;  %v15218_v6 = vld [vmem:[%s27678_s25 + $0x4a0] sm:$0xff] }
 0x468   : > { %24653 = vmatpush3.msra.mxu1 %v15196_v17  ;;  %v24220_v54 = vpop.f32.mrf.mxu1  ;;  %24643 = vmatprep.subr.mxu0 %v25032_v0  ;;  %v15225_v17 = vld [vmem:[%s27678_s25 + $0x4d8] sm:$0xff]  ;;  %v15228_v10 = vld [vmem:[%s27678_s25 + $0x4f0] sm:$0xff] }
 0x469   : > { %24654 = vmatprep.subr.mxu1 %v25032_v0  ;;  %24644 = vmatpush3.msra.mxu0 %v15191_v18  ;;  %v15229_v18 = vld [vmem:[%s27678_s25 + $0x4f8] sm:$0xff] }
 0x46a   : > { %24655 = vmatpush3.msra.mxu1 %v15195_v19  ;;  %24645 = vmatprep.subr.mxu0 %v25032_v0  ;;  %v15224_v19 = vld [vmem:[%s27678_s25 + $0x4d0] sm:$0xff] }
 0x46b   : > { %24656 = vmatprep.subr.mxu1 %v25032_v0  ;;  %24646 = vmatpush3.msra.mxu0 %v15190_v12 }
 0x46c   : > { %24647 = vmatprep.mubr.msk.f32.mxu0 %vm25033_vm0, %v25032_v0  ;;  %24657 = vmatpush3.msra.mxu1 %v15194_v13 }
 0x46d   : > { %24658 = vmatprep.mubr.msk.f32.mxu1 %vm25033_vm0, %v25032_v0  ;;  %24648 = vmatmul.mubr.msk.f32.vlgmr.msra.gmra.mxu0 %vm539_vm1, %v27780_v36  ;;  %v15199_v36 = vld [vmem:[%s27678_s25 + $0x408] sm:$0xff] }
 0x46e   : > { %24659 = vmatmul.mubr.msk.f32.vlgmr.msra.gmra.mxu1 %vm539_vm1, %v27782_v37  ;;  %24661 = vmatprep.subr.mxu0 %v25032_v0  ;;  %v15203_v37 = vld [vmem:[%s27678_s25 + $0x428] sm:$0xff] }
 0x46f   : > { %24672 = vmatprep.subr.mxu1 %v25032_v0  ;;  %24662 = vmatpush3.msra.mxu0 %v15201_v61  ;;  %v28144_v2 = vpop.f32.mrf.mxu0 }
 0x470   : > { %24673 = vmatpush3.msra.mxu1 %v15205_v27  ;;  %v28146_v25 = vpop.f32.mrf.mxu1  ;;  %24663 = vmatprep.subr.mxu0 %v25032_v0  ;;  %v15222_v27 = vld [vmem:[%s27678_s25 + $0x4c0] sm:$0xff] }
 0x471   : > { %24674 = vmatprep.subr.mxu1 %v25032_v0  ;;  %24664 = vmatpush3.msra.mxu0 %v15200_v28  ;;  %v24231_v26 = vpop.f32.mrf.mxu0  ;;  %v15226_v28 = vld [vmem:[%s27678_s25 + $0x4e0] sm:$0xff] }
 0x472   : > { %24675 = vmatpush3.msra.mxu1 %v15204_v31  ;;  %v24242_v7 = vpop.f32.mrf.mxu1  ;;  %24665 = vmatprep.subr.mxu0 %v25032_v0  ;;  %v15233_v31 = vld [vmem:[%s27678_s25 + $0x518] sm:$0xff]  ;;  %v15236_v26 = vld [vmem:[%s27678_s25 + $0x530] sm:$0xff] }
 0x473   : > { %24676 = vmatprep.subr.mxu1 %v25032_v0  ;;  %24666 = vmatpush3.msra.mxu0 %v15199_v36  ;;  %v15237_v36 = vld [vmem:[%s27678_s25 + $0x538] sm:$0xff] }
 0x474   : > { %24677 = vmatpush3.msra.mxu1 %v15203_v37  ;;  %24667 = vmatprep.subr.mxu0 %v25032_v0  ;;  %v15232_v37 = vld [vmem:[%s27678_s25 + $0x510] sm:$0xff] }
 0x475   : > { %24678 = vmatprep.subr.mxu1 %v25032_v0  ;;  %24668 = vmatpush3.msra.mxu0 %v15198_v32  ;;  %v15235_v32 = vld [vmem:[%s27678_s25 + $0x528] sm:$0xff] }
 0x476   : > { %24669 = vmatprep.mubr.msk.f32.mxu0 %vm25033_vm0, %v25032_v0  ;;  %24679 = vmatpush3.msra.mxu1 %v15202_v33 }
 0x477   : > { %24680 = vmatprep.mubr.msk.f32.mxu1 %vm25033_vm0, %v25032_v0  ;;  %24670 = vmatmul.mubr.msk.f32.vlgmr.msra.gmra.mxu0 %vm539_vm1, %v27808_v52  ;;  %v15207_v52 = vld [vmem:[%s27678_s25 + $0x448] sm:$0xff] }
 0x478   : > { %24681 = vmatmul.mubr.msk.f32.vlgmr.msra.gmra.mxu1 %vm539_vm1, %v27810_v53  ;;  %24683 = vmatprep.subr.mxu0 %v25032_v0  ;;  %v15211_v53 = vld [vmem:[%s27678_s25 + $0x468] sm:$0xff] }
 0x479   : > { %24694 = vmatprep.subr.mxu1 %v25032_v0  ;;  %24684 = vmatpush3.msra.mxu0 %v15209_v14  ;;  %v28172_v20 = vpop.f32.mrf.mxu0 }
 0x47a   : > { %24695 = vmatpush3.msra.mxu1 %v15213_v47  ;;  %v28174_v41 = vpop.f32.mrf.mxu1  ;;  %24685 = vmatprep.subr.mxu0 %v25032_v0  ;;  %v15230_v47 = vld [vmem:[%s27678_s25 + $0x500] sm:$0xff] }
 0x47b   : > { %24696 = vmatprep.subr.mxu1 %v25032_v0  ;;  %24686 = vmatpush3.msra.mxu0 %v15208_v48  ;;  %v24253_v42 = vpop.f32.mrf.mxu0  ;;  %v15234_v48 = vld [vmem:[%s27678_s25 + $0x520] sm:$0xff] }
 0x47c   : > { %24697 = vmatpush3.msra.mxu1 %v15212_v45  ;;  %v24264_v23 = vpop.f32.mrf.mxu1  ;;  %24687 = vmatprep.subr.mxu0 %v25032_v0  ;;  %v15241_v45 = vld [vmem:[%s27678_s25 + $0x558] sm:$0xff]  ;;  %v15244_v42 = vld [vmem:[%s27678_s25 + $0x570] sm:$0xff] }
 0x47d   : > { %24698 = vmatprep.subr.mxu1 %v25032_v0  ;;  %24688 = vmatpush3.msra.mxu0 %v15207_v52  ;;  %v15245_v52 = vld [vmem:[%s27678_s25 + $0x578] sm:$0xff] }
 0x47e   : > { %24699 = vmatpush3.msra.mxu1 %v15211_v53  ;;  %24689 = vmatprep.subr.mxu0 %v25032_v0  ;;  %v15240_v53 = vld [vmem:[%s27678_s25 + $0x550] sm:$0xff] }
 0x47f   : > { %24700 = vmatprep.subr.mxu1 %v25032_v0  ;;  %24690 = vmatpush3.msra.mxu0 %v15206_v50 }
 0x480   : > { %24691 = vmatprep.mubr.msk.f32.mxu0 %vm25033_vm0, %v25032_v0  ;;  %24701 = vmatpush3.msra.mxu1 %v15210_v51  ;;  %v15243_v51 = vld [vmem:[%s27678_s25 + $0x568] sm:$0xff] }
 0x481   : > { %24702 = vmatprep.mubr.msk.f32.mxu1 %vm25033_vm0, %v25032_v0  ;;  %24692 = vmatmul.mubr.msk.f32.vlgmr.msra.gmra.mxu0 %vm539_vm1, %v27836_v3  ;;  %v15215_v3 = vld [vmem:[%s27678_s25 + $0x488] sm:$0xff] }
 0x482   : > { %24703 = vmatmul.mubr.msk.f32.vlgmr.msra.gmra.mxu1 %vm539_vm1, %v27838_v4  ;;  %24705 = vmatprep.subr.mxu0 %v25032_v0  ;;  %v15219_v4 = vld [vmem:[%s27678_s25 + $0x4a8] sm:$0xff] }
 0x483   : > { %24716 = vmatprep.subr.mxu1 %v25032_v0  ;;  %24706 = vmatpush3.msra.mxu0 %v15217_v34  ;;  %v28200_v38 = vpop.f32.mrf.mxu0 }
 0x484   : > { %24717 = vmatpush3.msra.mxu1 %v15221_v63  ;;  %v28202_v57 = vpop.f32.mrf.mxu1  ;;  %24707 = vmatprep.subr.mxu0 %v25032_v0  ;;  %v15238_v63 = vld [vmem:[%s27678_s25 + $0x540] sm:$0xff] }
 0x485   : > { %24718 = vmatprep.subr.mxu1 %v25032_v0  ;;  %24708 = vmatpush3.msra.mxu0 %v15216_v1  ;;  %v24275_v60 = vpop.f32.mrf.mxu0  ;;  %v15242_v1 = vld [vmem:[%s27678_s25 + $0x560] sm:$0xff] }
 0x486   : > { %24719 = vmatpush3.msra.mxu1 %v15220_v59  ;;  %v24286_v43 = vpop.f32.mrf.mxu1  ;;  %24709 = vmatprep.subr.mxu0 %v25032_v0  ;;  %v15249_v59 = vld [vmem:[%s27678_s25 + $0x598] sm:$0xff]  ;;  %v15252_v60 = vld [vmem:[%s27678_s25 + $0x5b0] sm:$0xff] }
 0x487   : > { %24720 = vmatprep.subr.mxu1 %v25032_v0  ;;  %24710 = vmatpush3.msra.mxu0 %v15215_v3  ;;  %v15253_v3 = vld [vmem:[%s27678_s25 + $0x5b8] sm:$0xff] }
 0x488   : > { %24721 = vmatpush3.msra.mxu1 %v15219_v4  ;;  %24711 = vmatprep.subr.mxu0 %v25032_v0  ;;  %v15248_v4 = vld [vmem:[%s27678_s25 + $0x590] sm:$0xff] }
 0x489   : > { %24722 = vmatprep.subr.mxu1 %v25032_v0  ;;  %24712 = vmatpush3.msra.mxu0 %v15214_v5 }
 0x48a   : > { %24713 = vmatprep.mubr.msk.f32.mxu0 %vm25033_vm0, %v25032_v0  ;;  %24723 = vmatpush3.msra.mxu1 %v15218_v6  ;;  %v15251_v6 = vld [vmem:[%s27678_s25 + $0x5a8] sm:$0xff] }
 0x48b   : > { %24724 = vmatprep.mubr.msk.f32.mxu1 %vm25033_vm0, %v25032_v0  ;;  %24714 = vmatmul.mubr.msk.f32.vlgmr.msra.gmra.mxu0 %vm539_vm1, %v27864_v21  ;;  %v15223_v21 = vld [vmem:[%s27678_s25 + $0x4c8] sm:$0xff] }
 0x48c   : > { %24725 = vmatmul.mubr.msk.f32.vlgmr.msra.gmra.mxu1 %vm539_vm1, %v27866_v22  ;;  %24727 = vmatprep.subr.mxu0 %v25032_v0  ;;  %v15227_v22 = vld [vmem:[%s27678_s25 + $0x4e8] sm:$0xff] }
 0x48d   : > { %24738 = vmatprep.subr.mxu1 %v25032_v0  ;;  %24728 = vmatpush3.msra.mxu0 %v15225_v17  ;;  %v28228_v54 = vpop.f32.mrf.mxu0 }
 0x48e   : > { %24739 = vmatpush3.msra.mxu1 %v15229_v18  ;;  %v28230_v12 = vpop.f32.mrf.mxu1  ;;  %24729 = vmatprep.subr.mxu0 %v25032_v0  ;;  %v15246_v18 = vld [vmem:[%s27678_s25 + $0x580] sm:$0xff] }
 0x48f   : > { %24740 = vmatprep.subr.mxu1 %v25032_v0  ;;  %24730 = vmatpush3.msra.mxu0 %v15224_v19  ;;  %v24297_v13 = vpop.f32.mrf.mxu0  ;;  %v15250_v19 = vld [vmem:[%s27678_s25 + $0x5a0] sm:$0xff] }
 0x490   : > { %24741 = vmatpush3.msra.mxu1 %v15228_v10  ;;  %v24308_v61 = vpop.f32.mrf.mxu1  ;;  %24731 = vmatprep.subr.mxu0 %v25032_v0  ;;  %v15257_v10 = vld [vmem:[%s27678_s25 + $0x5d8] sm:$0xff]  ;;  %v15260_v13 = vld [vmem:[%s27678_s25 + $0x5f0] sm:$0xff] }
 0x491   : > { %24742 = vmatprep.subr.mxu1 %v25032_v0  ;;  %24732 = vmatpush3.msra.mxu0 %v15223_v21  ;;  %v15261_v21 = vld [vmem:[%s27678_s25 + $0x5f8] sm:$0xff] }
 0x492   : > { %24743 = vmatpush3.msra.mxu1 %v15227_v22  ;;  %24733 = vmatprep.subr.mxu0 %v25032_v0  ;;  %v15256_v22 = vld [vmem:[%s27678_s25 + $0x5d0] sm:$0xff] }
 0x493   : > { %24744 = vmatprep.subr.mxu1 %v25032_v0  ;;  %24734 = vmatpush3.msra.mxu0 %v15222_v27 }
 0x494   : > { %24735 = vmatprep.mubr.msk.f32.mxu0 %vm25033_vm0, %v25032_v0  ;;  %24745 = vmatpush3.msra.mxu1 %v15226_v28  ;;  %v15259_v28 = vld [vmem:[%s27678_s25 + $0x5e8] sm:$0xff] }
 0x495   : > { %24746 = vmatprep.mubr.msk.f32.mxu1 %vm25033_vm0, %v25032_v0  ;;  %24736 = vmatmul.mubr.msk.f32.vlgmr.msra.gmra.mxu0 %vm539_vm1, %v27892_v39 }
 0x496   : > { %24747 = vmatmul.mubr.msk.f32.vlgmr.msra.gmra.mxu1 %vm539_vm1, %v27894_v40  ;;  %24749 = vmatprep.subr.mxu0 %v25032_v0  ;;  %v15231_v40 = vld [vmem:[%s27678_s25 + $0x508] sm:$0xff] }
 0x497   : > { %24760 = vmatprep.subr.mxu1 %v25032_v0  ;;  %24750 = vmatpush3.msra.mxu0 %v15233_v31  ;;  %v15395_v39 = vpop.f32.mrf.mxu0 }
 0x498   : > { %24761 = vmatpush3.msra.mxu1 %v15237_v36  ;;  %v15468_v7 = vpop.f32.mrf.mxu1  ;;  %24751 = vmatprep.subr.mxu0 %v25032_v0  ;;  %19999 = vst.msk [vmem:[%s28256_s28] sm:$0x1] %vm19998_vm2, %v15395_v39  ;;  %v15254_v36 = vld [vmem:[%s27678_s25 + $0x5c0] sm:$0xff]  ;;  %v15269_v39 = vld [vmem:[%s27678_s25 + $0x638] sm:$0xff] }
 0x499   : > { %24762 = vmatprep.subr.mxu1 %v25032_v0  ;;  %20000 = vst.msk [vmem:[%s28256_s28 + $0x1] sm:$0x1] %vm19998_vm2, %v15468_v7  ;;  %24752 = vmatpush3.msra.mxu0 %v15232_v37  ;;  %v24319_v33 = vpop.f32.mrf.mxu0  ;;  %v15258_v37 = vld [vmem:[%s27678_s25 + $0x5e0] sm:$0xff]  ;;  %v15264_v7 = vld [vmem:[%s27678_s25 + $0x610] sm:$0xff] }
 0x49a   : > { %24763 = vmatpush3.msra.mxu1 %v15236_v26  ;;  %v24330_v14 = vpop.f32.mrf.mxu1  ;;  %24753 = vmatprep.subr.mxu0 %v25032_v0  ;;  %v15265_v26 = vld [vmem:[%s27678_s25 + $0x618] sm:$0xff] }
 0x49b   : > { %24764 = vmatprep.subr.mxu1 %v25032_v0  ;;  %24754 = vmatpush3.msra.mxu0 %v15231_v40  ;;  %v15268_v40 = vld [vmem:[%s27678_s25 + $0x630] sm:$0xff]  ;;  %v15267_v14 = vld [vmem:[%s27678_s25 + $0x628] sm:$0xff] }
 0x49c   : > { %24765 = vmatpush3.msra.mxu1 %v15235_v32  ;;  %24755 = vmatprep.subr.mxu0 %v25032_v0 }
 0x49d   : > { %24766 = vmatprep.subr.mxu1 %v25032_v0  ;;  %24756 = vmatpush3.msra.mxu0 %v15230_v47 }
 0x49e   : > { %24757 = vmatprep.mubr.msk.f32.mxu0 %vm25033_vm0, %v25032_v0  ;;  %24767 = vmatpush3.msra.mxu1 %v15234_v48  ;;  %v15262_v48 = vld [vmem:[%s27678_s25 + $0x600] sm:$0xff] }
 0x49f   : > { %24768 = vmatprep.mubr.msk.f32.mxu1 %vm25033_vm0, %v25032_v0  ;;  %24758 = vmatmul.mubr.msk.f32.vlgmr.msra.gmra.mxu0 %vm539_vm1, %v27920_v55  ;;  %v15239_v55 = vld [vmem:[%s27678_s25 + $0x548] sm:$0xff] }
 0x4a0   : > { %24769 = vmatmul.mubr.msk.f32.vlgmr.msra.gmra.mxu1 %vm539_vm1, %v27922_v56  ;;  %24771 = vmatprep.subr.mxu0 %v25032_v0 }
 0x4a1   : > { %24782 = vmatprep.subr.mxu1 %v25032_v0  ;;  %24772 = vmatpush3.msra.mxu0 %v15241_v45  ;;  %v15541_v23 = vpop.f32.mrf.mxu0  ;;  %v15266_v45 = vld [vmem:[%s27678_s25 + $0x620] sm:$0xff] }
 0x4a2   : > { %24783 = vmatpush3.msra.mxu1 %v15245_v52  ;;  %v15614_v50 = vpop.f32.mrf.mxu1  ;;  %24773 = vmatprep.subr.mxu0 %v25032_v0  ;;  %20001 = vst.msk [vmem:[%s28256_s28 + $0x2] sm:$0x1] %vm19998_vm2, %v15541_v23  ;;  %v15273_v52 = vld [vmem:[%s27678_s25 + $0x658] sm:$0xff]  ;;  %v15276_v23 = vld [vmem:[%s27678_s25 + $0x670] sm:$0xff] }
 0x4a3   : > { %24784 = vmatprep.subr.mxu1 %v25032_v0  ;;  %20002 = vst.msk [vmem:[%s28256_s28 + $0x3] sm:$0x1] %vm19998_vm2, %v15614_v50  ;;  %24774 = vmatpush3.msra.mxu0 %v15240_v53  ;;  %v24341_v56 = vpop.f32.mrf.mxu0  ;;  %v15277_v53 = vld [vmem:[%s27678_s25 + $0x678] sm:$0xff] }
 0x4a4   : > { %24785 = vmatpush3.msra.mxu1 %v15244_v42  ;;  %v24352_v34 = vpop.f32.mrf.mxu1  ;;  %24775 = vmatprep.subr.mxu0 %v25032_v0  ;;  %v15272_v42 = vld [vmem:[%s27678_s25 + $0x650] sm:$0xff] }
 0x4a5   : > { %24786 = vmatprep.subr.mxu1 %v25032_v0  ;;  %24776 = vmatpush3.msra.mxu0 %v15239_v55  ;;  %v15270_v34 = vld [vmem:[%s27678_s25 + $0x640] sm:$0xff] }
 0x4a6   : > { %24787 = vmatpush3.msra.mxu1 %v15243_v51  ;;  %24777 = vmatprep.subr.mxu0 %v25032_v0  ;;  %v15275_v51 = vld [vmem:[%s27678_s25 + $0x668] sm:$0xff] }
 0x4a7   : > { %24788 = vmatprep.subr.mxu1 %v25032_v0  ;;  %24778 = vmatpush3.msra.mxu0 %v15238_v63  ;;  %v15274_v63 = vld [vmem:[%s27678_s25 + $0x660] sm:$0xff] }
 0x4a8   : > { %24779 = vmatprep.mubr.msk.f32.mxu0 %vm25033_vm0, %v25032_v0  ;;  %24789 = vmatpush3.msra.mxu1 %v15242_v1  ;;  %v15281_v1 = vld [vmem:[%s27678_s25 + $0x698] sm:$0xff] }
 0x4a9   : > { %24790 = vmatprep.mubr.msk.f32.mxu1 %vm25033_vm0, %v25032_v0  ;;  %24780 = vmatmul.mubr.msk.f32.vlgmr.msra.gmra.mxu0 %vm539_vm1, %v27948_v8  ;;  %v15247_v8 = vld [vmem:[%s27678_s25 + $0x588] sm:$0xff] }
 0x4aa   : > { %24791 = vmatmul.mubr.msk.f32.vlgmr.msra.gmra.mxu1 %vm539_vm1, %v27950_v11  ;;  %24793 = vmatprep.subr.mxu0 %v25032_v0 }
 0x4ab   : > { %24804 = vmatprep.subr.mxu1 %v25032_v0  ;;  %24794 = vmatpush3.msra.mxu0 %v15249_v59  ;;  %v15687_v43 = vpop.f32.mrf.mxu0  ;;  %v15285_v59 = vld [vmem:[%s27678_s25 + $0x6b8] sm:$0xff] }
 0x4ac   : > { %24805 = vmatpush3.msra.mxu1 %v15253_v3  ;;  %v15760_v5 = vpop.f32.mrf.mxu1  ;;  %24795 = vmatprep.subr.mxu0 %v25032_v0  ;;  %20003 = vst.msk [vmem:[%s28256_s28 + $0x4] sm:$0x1] %vm19998_vm2, %v15687_v43  ;;  %v15280_v3 = vld [vmem:[%s27678_s25 + $0x690] sm:$0xff] }
 0x4ad   : > { %24806 = vmatprep.subr.mxu1 %v25032_v0  ;;  %20004 = vst.msk [vmem:[%s28256_s28 + $0x5] sm:$0x1] %vm19998_vm2, %v15760_v5  ;;  %24796 = vmatpush3.msra.mxu0 %v15248_v4  ;;  %v24363_v11 = vpop.f32.mrf.mxu0  ;;  %v15284_v4 = vld [vmem:[%s27678_s25 + $0x6b0] sm:$0xff]  ;;  %v15283_v5 = vld [vmem:[%s27678_s25 + $0x6a8] sm:$0xff] }
 0x4ae   : > { %24807 = vmatpush3.msra.mxu1 %v15252_v60  ;;  %v24374_v17 = vpop.f32.mrf.mxu1  ;;  %24797 = vmatprep.subr.mxu0 %v25032_v0  ;;  %v15282_v11 = vld [vmem:[%s27678_s25 + $0x6a0] sm:$0xff] }
 0x4af   : > { %24808 = vmatprep.subr.mxu1 %v25032_v0  ;;  %24798 = vmatpush3.msra.mxu0 %v15247_v8  ;;  %v15289_v17 = vld [vmem:[%s27678_s25 + $0x6d8] sm:$0xff] }
 0x4b0   : > { %24809 = vmatpush3.msra.mxu1 %v15251_v6  ;;  %24799 = vmatprep.subr.mxu0 %v25032_v0  ;;  %v15278_v6 = vld [vmem:[%s27678_s25 + $0x680] sm:$0xff] }
 0x4b1   : > { %24810 = vmatprep.subr.mxu1 %v25032_v0  ;;  %24800 = vmatpush3.msra.mxu0 %v15246_v18  ;;  %v15293_v18 = vld [vmem:[%s27678_s25 + $0x6f8] sm:$0xff] }
 0x4b2   : > { %24801 = vmatprep.mubr.msk.f32.mxu0 %vm25033_vm0, %v25032_v0  ;;  %24811 = vmatpush3.msra.mxu1 %v15250_v19  ;;  %v15288_v19 = vld [vmem:[%s27678_s25 + $0x6d0] sm:$0xff] }
 0x4b3   : > { %24812 = vmatprep.mubr.msk.f32.mxu1 %vm25033_vm0, %v25032_v0  ;;  %24802 = vmatmul.mubr.msk.f32.vlgmr.msra.gmra.mxu0 %vm539_vm1, %v27976_v24  ;;  %v15255_v24 = vld [vmem:[%s27678_s25 + $0x5c8] sm:$0xff] }
 0x4b4   : > { %24813 = vmatmul.mubr.msk.f32.vlgmr.msra.gmra.mxu1 %vm539_vm1, %v27978_v29  ;;  %24815 = vmatprep.subr.mxu0 %v25032_v0 }
 0x4b5   : > { %24826 = vmatprep.subr.mxu1 %v25032_v0  ;;  %24816 = vmatpush3.msra.mxu0 %v15257_v10  ;;  %v15833_v61 = vpop.f32.mrf.mxu0  ;;  %v15292_v10 = vld [vmem:[%s27678_s25 + $0x6f0] sm:$0xff] }
 0x4b6   : > { %24827 = vmatpush3.msra.mxu1 %v15261_v21  ;;  %v15906_v27 = vpop.f32.mrf.mxu1  ;;  %24817 = vmatprep.subr.mxu0 %v25032_v0  ;;  %20005 = vst.msk [vmem:[%s28256_s28 + $0x6] sm:$0x1] %vm19998_vm2, %v15833_v61 }
 0x4b7   : > { %24828 = vmatprep.subr.mxu1 %v25032_v0  ;;  %20006 = vst.msk [vmem:[%s28256_s28 + $0x7] sm:$0x1] %vm19998_vm2, %v15906_v27  ;;  %24818 = vmatpush3.msra.mxu0 %v15256_v22  ;;  %v24385_v29 = vpop.f32.mrf.mxu0  ;;  %v15286_v27 = vld [vmem:[%s27678_s25 + $0x6c0] sm:$0xff] }
 0x4b8   : > { %24829 = vmatpush3.msra.mxu1 %v15260_v13  ;;  %v24396_v31 = vpop.f32.mrf.mxu1  ;;  %24819 = vmatprep.subr.mxu0 %v25032_v0  ;;  %v15291_v13 = vld [vmem:[%s27678_s25 + $0x6e8] sm:$0xff]  ;;  %v15301_v29 = vld [vmem:[%s27678_s25 + $0x738] sm:$0xff] }
 0x4b9   : > { %24830 = vmatprep.subr.mxu1 %v25032_v0  ;;  %24820 = vmatpush3.msra.mxu0 %v15255_v24  ;;  %v15290_v24 = vld [vmem:[%s27678_s25 + $0x6e0] sm:$0xff]  ;;  %v15296_v31 = vld [vmem:[%s27678_s25 + $0x710] sm:$0xff] }
 0x4ba   : > { %24831 = vmatpush3.msra.mxu1 %v15259_v28  ;;  %24821 = vmatprep.subr.mxu0 %v25032_v0  ;;  %v15297_v28 = vld [vmem:[%s27678_s25 + $0x718] sm:$0xff] }
 0x4bb   : > { %24832 = vmatprep.subr.mxu1 %v25032_v0  ;;  %24822 = vmatpush3.msra.mxu0 %v15254_v36  ;;  %v15300_v36 = vld [vmem:[%s27678_s25 + $0x730] sm:$0xff] }
 0x4bc   : > { %24823 = vmatprep.mubr.msk.f32.mxu0 %vm25033_vm0, %v25032_v0  ;;  %24833 = vmatpush3.msra.mxu1 %v15258_v37 }
 0x4bd   : > { %24834 = vmatprep.mubr.msk.f32.mxu1 %vm25033_vm0, %v25032_v0  ;;  %24824 = vmatmul.mubr.msk.f32.vlgmr.msra.gmra.mxu0 %vm539_vm1, %v28004_v46  ;;  %v15263_v46 = vld [vmem:[%s27678_s25 + $0x608] sm:$0xff] }
 0x4be   : > { %24835 = vmatmul.mubr.msk.f32.vlgmr.msra.gmra.mxu1 %vm539_vm1, %v28006_v16  ;;  %24837 = vmatprep.subr.mxu0 %v25032_v0 }
 0x4bf   : > { %24848 = vmatprep.subr.mxu1 %v25032_v0  ;;  %24838 = vmatpush3.msra.mxu0 %v15265_v26  ;;  %v15979_v32 = vpop.f32.mrf.mxu0 }
 0x4c0   : > { %24849 = vmatpush3.msra.mxu1 %v15269_v39  ;;  %v16052_v33 = vpop.f32.mrf.mxu1  ;;  %24839 = vmatprep.subr.mxu0 %v25032_v0  ;;  %20007 = vst.msk [vmem:[%s28256_s28 + $0x8] sm:$0x1] %vm19998_vm2, %v15979_v32  ;;  %v15299_v39 = vld [vmem:[%s27678_s25 + $0x728] sm:$0xff]  ;;  %v15298_v32 = vld [vmem:[%s27678_s25 + $0x720] sm:$0xff] }
 0x4c1   : > { %24850 = vmatprep.subr.mxu1 %v25032_v0  ;;  %20008 = vst.msk [vmem:[%s28256_s28 + $0x9] sm:$0x1] %vm19998_vm2, %v16052_v33  ;;  %24840 = vmatpush3.msra.mxu0 %v15264_v7  ;;  %v24407_v16 = vpop.f32.mrf.mxu0  ;;  %v15305_v33 = vld [vmem:[%s27678_s25 + $0x758] sm:$0xff] }
 0x4c2   : > { %24851 = vmatpush3.msra.mxu1 %v15268_v40  ;;  %v24418_v47 = vpop.f32.mrf.mxu1  ;;  %24841 = vmatprep.subr.mxu0 %v25032_v0  ;;  %v15294_v40 = vld [vmem:[%s27678_s25 + $0x700] sm:$0xff]  ;;  %v15308_v16 = vld [vmem:[%s27678_s25 + $0x770] sm:$0xff] }
 0x4c3   : > { %24852 = vmatprep.subr.mxu1 %v25032_v0  ;;  %24842 = vmatpush3.msra.mxu0 %v15263_v46  ;;  %v15309_v46 = vld [vmem:[%s27678_s25 + $0x778] sm:$0xff] }
 0x4c4   : > { %24853 = vmatpush3.msra.mxu1 %v15267_v14  ;;  %24843 = vmatprep.subr.mxu0 %v25032_v0  ;;  %v15304_v14 = vld [vmem:[%s27678_s25 + $0x750] sm:$0xff] }
 0x4c5   : > { %24854 = vmatprep.subr.mxu1 %v25032_v0  ;;  %24844 = vmatpush3.msra.mxu0 %v15262_v48 }
 0x4c6   : > { %24845 = vmatprep.mubr.msk.f32.mxu0 %vm25033_vm0, %v25032_v0  ;;  %24855 = vmatpush3.msra.mxu1 %v15266_v45  ;;  %v15307_v45 = vld [vmem:[%s27678_s25 + $0x768] sm:$0xff] }
 0x4c7   : > { %24856 = vmatprep.mubr.msk.f32.mxu1 %vm25033_vm0, %v25032_v0  ;;  %24846 = vmatmul.mubr.msk.f32.vlgmr.msra.gmra.mxu0 %vm539_vm1, %v28032_v62  ;;  %v15271_v62 = vld [vmem:[%s27678_s25 + $0x648] sm:$0xff] }
 0x4c8   : > { %24857 = vmatmul.mubr.msk.f32.vlgmr.msra.gmra.mxu1 %vm539_vm1, %v28034_v30  ;;  %24859 = vmatprep.subr.mxu0 %v25032_v0 }
 0x4c9   : > { %24870 = vmatprep.subr.mxu1 %v25032_v0  ;;  %24860 = vmatpush3.msra.mxu0 %v15273_v52  ;;  %v16125_v50 = vpop.f32.mrf.mxu0 }
 0x4ca   : > { %24871 = vmatpush3.msra.mxu1 %v15277_v53  ;;  %v16198_v55 = vpop.f32.mrf.mxu1  ;;  %24861 = vmatprep.subr.mxu0 %v25032_v0  ;;  %20009 = vst.msk [vmem:[%s28256_s28 + $0xa] sm:$0x1] %vm19998_vm2, %v16125_v50  ;;  %v15302_v53 = vld [vmem:[%s27678_s25 + $0x740] sm:$0xff]  ;;  %v15317_v50 = vld [vmem:[%s27678_s25 + $0x7b8] sm:$0xff] }
 0x4cb   : > { %24872 = vmatprep.subr.mxu1 %v25032_v0  ;;  %20010 = vst.msk [vmem:[%s28256_s28 + $0xb] sm:$0x1] %vm19998_vm2, %v16198_v55  ;;  %24862 = vmatpush3.msra.mxu0 %v15272_v42  ;;  %v24429_v30 = vpop.f32.mrf.mxu0  ;;  %v15306_v42 = vld [vmem:[%s27678_s25 + $0x760] sm:$0xff]  ;;  %v15312_v55 = vld [vmem:[%s27678_s25 + $0x790] sm:$0xff] }
 0x4cc   : > { %24873 = vmatpush3.msra.mxu1 %v15276_v23  ;;  %v24440_v56 = vpop.f32.mrf.mxu1  ;;  %24863 = vmatprep.subr.mxu0 %v25032_v0  ;;  %v15313_v23 = vld [vmem:[%s27678_s25 + $0x798] sm:$0xff] }
 0x4cd   : > { %24874 = vmatprep.subr.mxu1 %v25032_v0  ;;  %24864 = vmatpush3.msra.mxu0 %v15271_v62  ;;  %v15316_v62 = vld [vmem:[%s27678_s25 + $0x7b0] sm:$0xff]  ;;  %v15315_v56 = vld [vmem:[%s27678_s25 + $0x7a8] sm:$0xff] }
 0x4ce   : > { %24875 = vmatpush3.msra.mxu1 %v15275_v51  ;;  %24865 = vmatprep.subr.mxu0 %v25032_v0 }
 0x4cf   : > { %24876 = vmatprep.subr.mxu1 %v25032_v0  ;;  %24866 = vmatpush3.msra.mxu0 %v15270_v34 }
 0x4d0   : > { %24867 = vmatprep.mubr.msk.f32.mxu0 %vm25033_vm0, %v25032_v0  ;;  %24877 = vmatpush3.msra.mxu1 %v15274_v63  ;;  %v15310_v63 = vld [vmem:[%s27678_s25 + $0x780] sm:$0xff] }
 0x4d1   : > { %24878 = vmatprep.mubr.msk.f32.mxu1 %vm25033_vm0, %v25032_v0  ;;  %24868 = vmatmul.mubr.msk.f32.vlgmr.msra.gmra.mxu0 %vm539_vm1, %v28060_v15  ;;  %v15279_v15 = vld [vmem:[%s27678_s25 + $0x688] sm:$0xff] }
 0x4d2   : > { %24879 = vmatmul.mubr.msk.f32.vlgmr.msra.gmra.mxu1 %vm539_vm1, %v28062_v44  ;;  %24881 = vmatprep.subr.mxu0 %v25032_v0 }
 0x4d3   : > { %24892 = vmatprep.subr.mxu1 %v25032_v0  ;;  %24882 = vmatpush3.msra.mxu0 %v15281_v1  ;;  %v16271_v60 = vpop.f32.mrf.mxu0  ;;  %v15314_v1 = vld [vmem:[%s27678_s25 + $0x7a0] sm:$0xff] }
 0x4d4   : > { %24893 = vmatpush3.msra.mxu1 %v15285_v59  ;;  %v16344_v43 = vpop.f32.mrf.mxu1  ;;  %24883 = vmatprep.subr.mxu0 %v25032_v0  ;;  %20011 = vst.msk [vmem:[%s28256_s28 + $0xc] sm:$0x1] %vm19998_vm2, %v16271_v60  ;;  %v15321_v59 = vld [vmem:[%s27678_s25 + $0x7d8] sm:$0xff]  ;;  %v15324_v60 = vld [vmem:[%s27678_s25 + $0x7f0] sm:$0xff] }
 0x4d5   : > { %24894 = vmatprep.subr.mxu1 %v25032_v0  ;;  %20012 = vst.msk [vmem:[%s28256_s28 + $0xd] sm:$0x1] %vm19998_vm2, %v16344_v43  ;;  %24884 = vmatpush3.msra.mxu0 %v15280_v3  ;;  %v24451_v44 = vpop.f32.mrf.mxu0  ;;  %v15325_v3 = vld [vmem:[%s27678_s25 + $0x7f8] sm:$0xff] }
 0x4d6   : > { %24895 = vmatpush3.msra.mxu1 %v15284_v4  ;;  %v24462_v8 = vpop.f32.mrf.mxu1  ;;  %24885 = vmatprep.subr.mxu0 %v25032_v0  ;;  %v15320_v4 = vld [vmem:[%s27678_s25 + $0x7d0] sm:$0xff] }
 0x4d7   : > { %24896 = vmatprep.subr.mxu1 %v25032_v0  ;;  %24886 = vmatpush3.msra.mxu0 %v15279_v15  ;;  %v15318_v8 = vld [vmem:[%s27678_s25 + $0x7c0] sm:$0xff] }
 0x4d8   : > { %24897 = vmatpush3.msra.mxu1 %v15283_v5  ;;  %24887 = vmatprep.subr.mxu0 %v25032_v0  ;;  %v15323_v5 = vld [vmem:[%s27678_s25 + $0x7e8] sm:$0xff] }
 0x4d9   : > { %24898 = vmatprep.subr.mxu1 %v25032_v0  ;;  %24888 = vmatpush3.msra.mxu0 %v15278_v6  ;;  %v15322_v6 = vld [vmem:[%s27678_s25 + $0x7e0] sm:$0xff] }
 0x4da   : > { %24889 = vmatprep.mubr.msk.f32.mxu0 %vm25033_vm0, %v25032_v0  ;;  %24899 = vmatpush3.msra.mxu1 %v15282_v11 }
 0x4db   : > { %24900 = vmatprep.mubr.msk.f32.mxu1 %vm25033_vm0, %v25032_v0  ;;  %24890 = vmatmul.mubr.msk.f32.vlgmr.msra.gmra.mxu0 %vm539_vm1, %v28088_v35  ;;  %v15287_v35 = vld [vmem:[%s27678_s25 + $0x6c8] sm:$0xff] }
 0x4dc   : > { %24901 = vmatmul.mubr.msk.f32.vlgmr.msra.gmra.mxu1 %vm539_vm1, %v28090_v58  ;;  %24903 = vmatprep.subr.mxu0 %v25032_v0 }
 0x4dd   : > { %24914 = vmatprep.subr.mxu1 %v25032_v0  ;;  %24904 = vmatpush3.msra.mxu0 %v15289_v17  ;;  %v16417_v21 = vpop.f32.mrf.mxu0 }
 0x4de   : > { %24915 = vmatpush3.msra.mxu1 %v15293_v18  ;;  %v16490_v22 = vpop.f32.mrf.mxu1  ;;  %24905 = vmatprep.subr.mxu0 %v25032_v0  ;;  %20013 = vst.msk [vmem:[%s28256_s28 + $0xe] sm:$0x1] %vm19998_vm2, %v16417_v21 }
 0x4df   : > { %24916 = vmatprep.subr.mxu1 %v25032_v0  ;;  %20014 = vst.msk [vmem:[%s28256_s28 + $0xf] sm:$0x1] %vm19998_vm2, %v16490_v22  ;;  %24906 = vmatpush3.msra.mxu0 %v15288_v19  ;;  %v24473_v58 = vpop.f32.mrf.mxu0 }
 0x4e0   : > { %24917 = vmatpush3.msra.mxu1 %v15292_v10  ;;  %v24484_v61 = vpop.f32.mrf.mxu1  ;;  %24907 = vmatprep.subr.mxu0 %v25032_v0 }
 0x4e1   : > { %24918 = vmatprep.subr.mxu1 %v25032_v0  ;;  %24908 = vmatpush3.msra.mxu0 %v15287_v35 }
 0x4e2   : > { %24919 = vmatpush3.msra.mxu1 %v15291_v13  ;;  %24909 = vmatprep.subr.mxu0 %v25032_v0 }
 0x4e3   : > { %24920 = vmatprep.subr.mxu1 %v25032_v0  ;;  %24910 = vmatpush3.msra.mxu0 %v15286_v27 }
 0x4e4   : > { %24911 = vmatprep.mubr.msk.f32.mxu0 %vm25033_vm0, %v25032_v0  ;;  %24921 = vmatpush3.msra.mxu1 %v15290_v24 }
 0x4e5   : > { %24922 = vmatprep.mubr.msk.f32.mxu1 %vm25033_vm0, %v25032_v0  ;;  %24912 = vmatmul.mubr.msk.f32.vlgmr.msra.gmra.mxu0 %vm539_vm1, %v28116_v49  ;;  %v15295_v49 = vld [vmem:[%s27678_s25 + $0x708] sm:$0xff] }
 0x4e6   : > { %24923 = vmatmul.mubr.msk.f32.vlgmr.msra.gmra.mxu1 %vm539_vm1, %v28118_v9  ;;  %24925 = vmatprep.subr.mxu0 %v25032_v0 }
 0x4e7   : > { %24936 = vmatprep.subr.mxu1 %v25032_v0  ;;  %24926 = vmatpush3.msra.mxu0 %v15297_v28  ;;  %v16563_v37 = vpop.f32.mrf.mxu0 }
 0x4e8   : > { %24937 = vmatpush3.msra.mxu1 %v15301_v29  ;;  %v16636_v26 = vpop.f32.mrf.mxu1  ;;  %24927 = vmatprep.subr.mxu0 %v25032_v0  ;;  %20015 = vst.msk [vmem:[%s28256_s28 + $0x10] sm:$0x1] %vm19998_vm2, %v16563_v37 }
 0x4e9   : > { %24938 = vmatprep.subr.mxu1 %v25032_v0  ;;  %20016 = vst.msk [vmem:[%s28256_s28 + $0x11] sm:$0x1] %vm19998_vm2, %v16636_v26  ;;  %24928 = vmatpush3.msra.mxu0 %v15296_v31  ;;  %v24495_v9 = vpop.f32.mrf.mxu0 }
 0x4ea   : > { %24939 = vmatpush3.msra.mxu1 %v15300_v36  ;;  %v24506_v7 = vpop.f32.mrf.mxu1  ;;  %24929 = vmatprep.subr.mxu0 %v25032_v0 }
 0x4eb   : > { %24940 = vmatprep.subr.mxu1 %v25032_v0  ;;  %24930 = vmatpush3.msra.mxu0 %v15295_v49 }
 0x4ec   : > { %24941 = vmatpush3.msra.mxu1 %v15299_v39  ;;  %24931 = vmatprep.subr.mxu0 %v25032_v0 }
 0x4ed   : > { %24942 = vmatprep.subr.mxu1 %v25032_v0  ;;  %24932 = vmatpush3.msra.mxu0 %v15294_v40 }
 0x4ee   : > { %24933 = vmatprep.mubr.msk.f32.mxu0 %vm25033_vm0, %v25032_v0  ;;  %24943 = vmatpush3.msra.mxu1 %v15298_v32 }
 0x4ef   : > { %24944 = vmatprep.mubr.msk.f32.mxu1 %vm25033_vm0, %v25032_v0  ;;  %24934 = vmatmul.mubr.msk.f32.vlgmr.msra.gmra.mxu0 %vm539_vm1, %v28144_v2  ;;  %v15303_v2 = vld [vmem:[%s27678_s25 + $0x748] sm:$0xff] }
 0x4f0   : > { %24945 = vmatmul.mubr.msk.f32.vlgmr.msra.gmra.mxu1 %vm539_vm1, %v28146_v25  ;;  %24947 = vmatprep.subr.mxu0 %v25032_v0 }
 0x4f1   : > { %24958 = vmatprep.subr.mxu1 %v25032_v0  ;;  %24948 = vmatpush3.msra.mxu0 %v15305_v33  ;;  %v16709_v47 = vpop.f32.mrf.mxu0 }
 0x4f2   : > { %24959 = vmatpush3.msra.mxu1 %v15309_v46  ;;  %v16782_v48 = vpop.f32.mrf.mxu1  ;;  %24949 = vmatprep.subr.mxu0 %v25032_v0  ;;  %20017 = vst.msk [vmem:[%s28256_s28 + $0x12] sm:$0x1] %vm19998_vm2, %v16709_v47 }
 0x4f3   : > { %24960 = vmatprep.subr.mxu1 %v25032_v0  ;;  %20018 = vst.msk [vmem:[%s28256_s28 + $0x13] sm:$0x1] %vm19998_vm2, %v16782_v48  ;;  %24950 = vmatpush3.msra.mxu0 %v15304_v14  ;;  %v24517_v25 = vpop.f32.mrf.mxu0 }
 0x4f4   : > { %24961 = vmatpush3.msra.mxu1 %v15308_v16  ;;  %v24528_v52 = vpop.f32.mrf.mxu1  ;;  %24951 = vmatprep.subr.mxu0 %v25032_v0 }
 0x4f5   : > { %24962 = vmatprep.subr.mxu1 %v25032_v0  ;;  %24952 = vmatpush3.msra.mxu0 %v15303_v2 }
 0x4f6   : > { %24963 = vmatpush3.msra.mxu1 %v15307_v45  ;;  %24953 = vmatprep.subr.mxu0 %v25032_v0 }
 0x4f7   : > { %24964 = vmatprep.subr.mxu1 %v25032_v0  ;;  %24954 = vmatpush3.msra.mxu0 %v15302_v53 }
 0x4f8   : > { %24955 = vmatprep.mubr.msk.f32.mxu0 %vm25033_vm0, %v25032_v0  ;;  %24965 = vmatpush3.msra.mxu1 %v15306_v42 }
 0x4f9   : > { %24966 = vmatprep.mubr.msk.f32.mxu1 %vm25033_vm0, %v25032_v0  ;;  %24956 = vmatmul.mubr.msk.f32.vlgmr.msra.gmra.mxu0 %vm539_vm1, %v28172_v20  ;;  %v15311_v20 = vld [vmem:[%s27678_s25 + $0x788] sm:$0xff] }
 0x4fa   : > { %24967 = vmatmul.mubr.msk.f32.vlgmr.msra.gmra.mxu1 %vm539_vm1, %v28174_v41  ;;  %24969 = vmatprep.subr.mxu0 %v25032_v0 }
 0x4fb   : > { %24980 = vmatprep.subr.mxu1 %v25032_v0  ;;  %24970 = vmatpush3.msra.mxu0 %v15313_v23  ;;  %v16855_v51 = vpop.f32.mrf.mxu0 }
 0x4fc   : > { %24981 = vmatpush3.msra.mxu1 %v15317_v50  ;;  %v16928_v30 = vpop.f32.mrf.mxu1  ;;  %24971 = vmatprep.subr.mxu0 %v25032_v0  ;;  %20019 = vst.msk [vmem:[%s28256_s28 + $0x14] sm:$0x1] %vm19998_vm2, %v16855_v51 }
 0x4fd   : > { %24982 = vmatprep.subr.mxu1 %v25032_v0  ;;  %20020 = vst.msk [vmem:[%s28256_s28 + $0x15] sm:$0x1] %vm19998_vm2, %v16928_v30  ;;  %24972 = vmatpush3.msra.mxu0 %v15312_v55  ;;  %v24539_v41 = vpop.f32.mrf.mxu0 }
 0x4fe   : > { %24983 = vmatpush3.msra.mxu1 %v15316_v62  ;;  %v24550_v34 = vpop.f32.mrf.mxu1  ;;  %24973 = vmatprep.subr.mxu0 %v25032_v0 }
 0x4ff   : > { %24984 = vmatprep.subr.mxu1 %v25032_v0  ;;  %24974 = vmatpush3.msra.mxu0 %v15311_v20 }
 0x500   : > { %24985 = vmatpush3.msra.mxu1 %v15315_v56  ;;  %24975 = vmatprep.subr.mxu0 %v25032_v0 }
 0x501   : > { %24986 = vmatprep.subr.mxu1 %v25032_v0  ;;  %24976 = vmatpush3.msra.mxu0 %v15310_v63 }
 0x502   : > { %24977 = vmatprep.mubr.msk.f32.mxu0 %vm25033_vm0, %v25032_v0  ;;  %24987 = vmatpush3.msra.mxu1 %v15314_v1 }
 0x503   : > { %24988 = vmatprep.mubr.msk.f32.mxu1 %vm25033_vm0, %v25032_v0  ;;  %24978 = vmatmul.mubr.msk.f32.vlgmr.msra.gmra.mxu0 %vm539_vm1, %v28200_v38  ;;  %v15319_v38 = vld [vmem:[%s27678_s25 + $0x7c8] sm:$0xff] }
 0x504   : > { %24989 = vmatmul.mubr.msk.f32.vlgmr.msra.gmra.mxu1 %vm539_vm1, %v28202_v57  ;;  %24991 = vmatprep.subr.mxu0 %v25032_v0 }
 0x505   : > { %25002 = vmatprep.subr.mxu1 %v25032_v0  ;;  %24992 = vmatpush3.msra.mxu0 %v15321_v59  ;;  %v17001_v43 = vpop.f32.mrf.mxu0 }
 0x506   : > { %25003 = vmatpush3.msra.mxu1 %v15325_v3  ;;  %v17074_v15 = vpop.f32.mrf.mxu1  ;;  %24993 = vmatprep.subr.mxu0 %v25032_v0  ;;  %20021 = vst.msk [vmem:[%s28256_s28 + $0x16] sm:$0x1] %vm19998_vm2, %v17001_v43 }
 0x507   : > { %25004 = vmatprep.subr.mxu1 %v25032_v0  ;;  %20022 = vst.msk [vmem:[%s28256_s28 + $0x17] sm:$0x1] %vm19998_vm2, %v17074_v15  ;;  %24994 = vmatpush3.msra.mxu0 %v15320_v4  ;;  %v24561_v57 = vpop.f32.mrf.mxu0 }
 0x508   : > { %25005 = vmatpush3.msra.mxu1 %v15324_v60  ;;  %v24572_v44 = vpop.f32.mrf.mxu1  ;;  %24995 = vmatprep.subr.mxu0 %v25032_v0 }
 0x509   : > { %25006 = vmatprep.subr.mxu1 %v25032_v0  ;;  %24996 = vmatpush3.msra.mxu0 %v15319_v38 }
 0x50a   : > { %25007 = vmatpush3.msra.mxu1 %v15323_v5  ;;  %24997 = vmatprep.subr.mxu0 %v25032_v0 }
 0x50b   : > { %25008 = vmatprep.subr.mxu1 %v25032_v0  ;;  %24998 = vmatpush3.msra.mxu0 %v15318_v8 }
 0x50c   : > { %24999 = vmatprep.mubr.msk.f32.mxu0 %vm25033_vm0, %v25032_v0  ;;  %25009 = vmatpush3.msra.mxu1 %v15322_v6 }
 0x50d   : > { %25010 = vmatprep.mubr.msk.f32.mxu1 %vm25033_vm0, %v25032_v0  ;;  %25000 = vmatmul.mubr.msk.f32.vlgmr.msra.gmra.mxu0 %vm539_vm1, %v28228_v54 }
 0x50e   : > { %25011 = vmatmul.mubr.msk.f32.vlgmr.msra.gmra.mxu1 %vm539_vm1, %v28230_v12 }
 0x50f   : > { %v17147_v11 = vpop.f32.mrf.mxu0 }
 0x510   : > { %v17220_v17 = vpop.f32.mrf.mxu1  ;;  %20023 = vst.msk [vmem:[%s28256_s28 + $0x18] sm:$0x1] %vm19998_vm2, %v17147_v11 }
 0x511   : > { %20024 = vst.msk [vmem:[%s28256_s28 + $0x19] sm:$0x1] %vm19998_vm2, %v17220_v17  ;;  %v24583_v18 = vpop.f32.mrf.mxu0 }
 0x512   : > { %v24594_v19 = vpop.f32.mrf.mxu1 }
 0x519   : > { %v17293_v10 = vpop.f32.mrf.mxu0 }
 0x51a   : > { %v17366_v0 = vpop.f32.mrf.mxu1  ;;  %20025 = vst.msk [vmem:[%s28256_s28 + $0x1a] sm:$0x1] %vm19998_vm2, %v17293_v10 }
 0x51b   : > { %20026 = vst.msk [vmem:[%s28256_s28 + $0x1b] sm:$0x1] %vm19998_vm2, %v17366_v0  ;;  %v24605_v54 = vpop.f32.mrf.mxu0 }
 0x51c   : > { %v24616_v12 = vpop.f32.mrf.mxu1 }
 0x523   : > { %v17439_v21 = vpop.f32.mrf.mxu0 }
 0x524   : > { %v17512_v22 = vpop.f32.mrf.mxu1  ;;  %20027 = vst.msk [vmem:[%s28256_s28 + $0x1c] sm:$0x1] %vm19998_vm2, %v17439_v21 }
 0x525   : > { %20028 = vst.msk [vmem:[%s28256_s28 + $0x1d] sm:$0x1] %vm19998_vm2, %v17512_v22  ;;  %v24627_v35 = vpop.f32.mrf.mxu0 }
 0x526   : > { %v24638_v13 = vpop.f32.mrf.mxu1 }
 0x52d   : > { %v17585_v58 = vpop.f32.mrf.mxu0 }
 0x52e   : > { %v17658_v61 = vpop.f32.mrf.mxu1  ;;  %20029 = vst.msk [vmem:[%s28256_s28 + $0x1e] sm:$0x1] %vm19998_vm2, %v17585_v58 }
 0x52f   : > { %20030 = vst.msk [vmem:[%s28256_s28 + $0x1f] sm:$0x1] %vm19998_vm2, %v17658_v61  ;;  %v24649_v27 = vpop.f32.mrf.mxu0 }
 0x530   : > { %v24660_v24 = vpop.f32.mrf.mxu1 }
 0x537   : > { %v17731_v28 = vpop.f32.mrf.mxu0 }
 0x538   : > { %v17804_v29 = vpop.f32.mrf.mxu1  ;;  %20031 = vst.msk [vmem:[%s28256_s28 + $0x20] sm:$0x1] %vm19998_vm2, %v17731_v28 }
 0x539   : > { %20032 = vst.msk [vmem:[%s28256_s28 + $0x21] sm:$0x1] %vm19998_vm2, %v17804_v29  ;;  %v24671_v31 = vpop.f32.mrf.mxu0 }
 0x53a   : > { %v24682_v36 = vpop.f32.mrf.mxu1 }
 0x541   : > { %v17877_v37 = vpop.f32.mrf.mxu0 }
 0x542   : > { %v17950_v26 = vpop.f32.mrf.mxu1  ;;  %20033 = vst.msk [vmem:[%s28256_s28 + $0x22] sm:$0x1] %vm19998_vm2, %v17877_v37 }
 0x543   : > { %20034 = vst.msk [vmem:[%s28256_s28 + $0x23] sm:$0x1] %vm19998_vm2, %v17950_v26  ;;  %v24693_v49 = vpop.f32.mrf.mxu0 }
 0x544   : > { %v24704_v39 = vpop.f32.mrf.mxu1 }
 0x54b   : > { %v18023_v9 = vpop.f32.mrf.mxu0 }
 0x54c   : > { %v18096_v7 = vpop.f32.mrf.mxu1  ;;  %20035 = vst.msk [vmem:[%s28256_s28 + $0x24] sm:$0x1] %vm19998_vm2, %v18023_v9 }
 0x54d   : > { %20036 = vst.msk [vmem:[%s28256_s28 + $0x25] sm:$0x1] %vm19998_vm2, %v18096_v7  ;;  %v24715_v40 = vpop.f32.mrf.mxu0 }
 0x54e   : > { %v24726_v32 = vpop.f32.mrf.mxu1 }
 0x555   : > { %v18169_v33 = vpop.f32.mrf.mxu0 }
 0x556   : > { %v18242_v46 = vpop.f32.mrf.mxu1  ;;  %20037 = vst.msk [vmem:[%s28256_s28 + $0x26] sm:$0x1] %vm19998_vm2, %v18169_v33 }
 0x557   : > { %20038 = vst.msk [vmem:[%s28256_s28 + $0x27] sm:$0x1] %vm19998_vm2, %v18242_v46  ;;  %v24737_v14 = vpop.f32.mrf.mxu0 }
 0x558   : > { %v24748_v16 = vpop.f32.mrf.mxu1 }
 0x55f   : > { %v18315_v47 = vpop.f32.mrf.mxu0 }
 0x560   : > { %v18388_v48 = vpop.f32.mrf.mxu1  ;;  %20039 = vst.msk [vmem:[%s28256_s28 + $0x28] sm:$0x1] %vm19998_vm2, %v18315_v47 }
 0x561   : > { %20040 = vst.msk [vmem:[%s28256_s28 + $0x29] sm:$0x1] %vm19998_vm2, %v18388_v48  ;;  %v24759_v2 = vpop.f32.mrf.mxu0 }
 0x562   : > { %v24770_v45 = vpop.f32.mrf.mxu1 }
 0x569   : > { %v18461_v25 = vpop.f32.mrf.mxu0 }
 0x56a   : > { %v18534_v52 = vpop.f32.mrf.mxu1  ;;  %20041 = vst.msk [vmem:[%s28256_s28 + $0x2a] sm:$0x1] %vm19998_vm2, %v18461_v25 }
 0x56b   : > { %20042 = vst.msk [vmem:[%s28256_s28 + $0x2b] sm:$0x1] %vm19998_vm2, %v18534_v52  ;;  %v24781_v53 = vpop.f32.mrf.mxu0 }
 0x56c   : > { %v24792_v42 = vpop.f32.mrf.mxu1 }
 0x573   : > { %v18607_v23 = vpop.f32.mrf.mxu0 }
 0x574   : > { %v18680_v50 = vpop.f32.mrf.mxu1  ;;  %20043 = vst.msk [vmem:[%s28256_s28 + $0x2c] sm:$0x1] %vm19998_vm2, %v18607_v23 }
 0x575   : > { %20044 = vst.msk [vmem:[%s28256_s28 + $0x2d] sm:$0x1] %vm19998_vm2, %v18680_v50  ;;  %v24803_v55 = vpop.f32.mrf.mxu0 }
 0x576   : > { %v24814_v62 = vpop.f32.mrf.mxu1 }
 0x57d   : > { %v18753_v51 = vpop.f32.mrf.mxu0 }
 0x57e   : > { %v18826_v30 = vpop.f32.mrf.mxu1  ;;  %20045 = vst.msk [vmem:[%s28256_s28 + $0x2e] sm:$0x1] %vm19998_vm2, %v18753_v51 }
 0x57f   : > { %20046 = vst.msk [vmem:[%s28256_s28 + $0x2f] sm:$0x1] %vm19998_vm2, %v18826_v30  ;;  %v24825_v20 = vpop.f32.mrf.mxu0 }
 0x580   : > { %v24836_v56 = vpop.f32.mrf.mxu1 }
 0x587   : > { %v18899_v41 = vpop.f32.mrf.mxu0 }
 0x588   : > { %v18972_v34 = vpop.f32.mrf.mxu1  ;;  %20047 = vst.msk [vmem:[%s28256_s28 + $0x30] sm:$0x1] %vm19998_vm2, %v18899_v41 }
 0x589   : > { %20048 = vst.msk [vmem:[%s28256_s28 + $0x31] sm:$0x1] %vm19998_vm2, %v18972_v34  ;;  %v24847_v63 = vpop.f32.mrf.mxu0 }
 0x58a   : > { %v24858_v1 = vpop.f32.mrf.mxu1 }
 0x591   : > { %v19045_v59 = vpop.f32.mrf.mxu0 }
 0x592   : > { %v19118_v3 = vpop.f32.mrf.mxu1  ;;  %20049 = vst.msk [vmem:[%s28256_s28 + $0x32] sm:$0x1] %vm19998_vm2, %v19045_v59 }
 0x593   : > { %20050 = vst.msk [vmem:[%s28256_s28 + $0x33] sm:$0x1] %vm19998_vm2, %v19118_v3  ;;  %v24869_v4 = vpop.f32.mrf.mxu0 }
 0x594   : > { %v24880_v60 = vpop.f32.mrf.mxu1 }
 0x59b   : > { %v19191_v43 = vpop.f32.mrf.mxu0 }
 0x59c   : > { %v19264_v15 = vpop.f32.mrf.mxu1  ;;  %20051 = vst.msk [vmem:[%s28256_s28 + $0x34] sm:$0x1] %vm19998_vm2, %v19191_v43 }
 0x59d   : > { %20052 = vst.msk [vmem:[%s28256_s28 + $0x35] sm:$0x1] %vm19998_vm2, %v19264_v15  ;;  %v24891_v38 = vpop.f32.mrf.mxu0 }
 0x59e   : > { %v24902_v5 = vpop.f32.mrf.mxu1 }
 0x5a5   : > { %v19337_v57 = vpop.f32.mrf.mxu0 }
 0x5a6   : > { %v19410_v44 = vpop.f32.mrf.mxu1  ;;  %20053 = vst.msk [vmem:[%s28256_s28 + $0x36] sm:$0x1] %vm19998_vm2, %v19337_v57 }
 0x5a7   : > { %20054 = vst.msk [vmem:[%s28256_s28 + $0x37] sm:$0x1] %vm19998_vm2, %v19410_v44  ;;  %v24913_v8 = vpop.f32.mrf.mxu0 }
 0x5a8   : > { %v24924_v6 = vpop.f32.mrf.mxu1 }
 0x5af   : > { %v19483_v11 = vpop.f32.mrf.mxu0 }
 0x5b0   : > { %v19556_v17 = vpop.f32.mrf.mxu1  ;;  %20055 = vst.msk [vmem:[%s28256_s28 + $0x38] sm:$0x1] %vm19998_vm2, %v19483_v11 }
 0x5b1   : > { %20056 = vst.msk [vmem:[%s28256_s28 + $0x39] sm:$0x1] %vm19998_vm2, %v19556_v17  ;;  %v24935_v18 = vpop.f32.mrf.mxu0 }
 0x5b2   : > { %v24946_v19 = vpop.f32.mrf.mxu1 }
 0x5b9   : > { %v19629_v10 = vpop.f32.mrf.mxu0 }
 0x5ba   : > { %v19702_v0 = vpop.f32.mrf.mxu1  ;;  %20057 = vst.msk [vmem:[%s28256_s28 + $0x3a] sm:$0x1] %vm19998_vm2, %v19629_v10 }
 0x5bb   : > { %20058 = vst.msk [vmem:[%s28256_s28 + $0x3b] sm:$0x1] %vm19998_vm2, %v19702_v0  ;;  %v24957_v54 = vpop.f32.mrf.mxu0 }
 0x5bc   : > { %v24968_v12 = vpop.f32.mrf.mxu1 }
 0x5c3   : > { %v19775_v21 = vpop.f32.mrf.mxu0 }
 0x5c4   : > { %v19848_v22 = vpop.f32.mrf.mxu1  ;;  %20059 = vst.msk [vmem:[%s28256_s28 + $0x3c] sm:$0x1] %vm19998_vm2, %v19775_v21 }
 0x5c5   : > { %20060 = vst.msk [vmem:[%s28256_s28 + $0x3d] sm:$0x1] %vm19998_vm2, %v19848_v22  ;;  %v24979_v35 = vpop.f32.mrf.mxu0 }
 0x5c6   : > { %v24990_v13 = vpop.f32.mrf.mxu1 }
 0x5cd   : > { %v19921_v58 = vpop.f32.mrf.mxu0 }
 0x5ce   : > { %v19994_v61 = vpop.f32.mrf.mxu1  ;;  %20061 = vst.msk [vmem:[%s28256_s28 + $0x3e] sm:$0x1] %vm19998_vm2, %v19921_v58 }
 0x5cf   : > { %20062 = vst.msk [vmem:[%s28256_s28 + $0x3f] sm:$0x1] %vm19998_vm2, %v19994_v61  ;;  %v25001_v27 = vpop.f32.mrf.mxu0 }
 0x5d0   : > { %v25012_v24 = vpop.f32.mrf.mxu1 }
 0x5d1 PF: > { %s13_s12 = sadd.s32 1, %s25030_s12  }
 0x5d2   : > { %p10_p4 = scmp.ge.s32.totalorder %s13_s12, 4  }
 0x5d4   :  { %12 = sbr.rel (!%p10_p4) target bundleno = 1 (0x1), region = 70 }

</bundles_post_ra>
